<compile_context>
chip_gen: v7x
topology: tpu7x:2x2x1
jax: 0.10.0
libtpu: 0.0.40
codegen_flags: <defaults>
</compile_context>

<pallas_src>
import numpy as np
import jax
import jax.numpy as jnp
from jax.experimental import pallas as pl
from jax.experimental.pallas import tpu as pltpu

F32 = jnp.float32
N_ATOM = 3          # backbone atoms per residue in xyz (Ca is index 1)
TILE_M = 512        # rows per Pallas grid step
_LN_EPS = 1e-5

_COMPILER_PARAMS = pltpu.CompilerParams(
    dimension_semantics=("parallel",),     # shard the M grid across TensorCores (v7x)
    vmem_limit_bytes=48 * 1024 * 1024,     # sized for v7x's 64 MiB physical VMEM
)


# ----------------------------------------------------------------------------
# Pallas kernels — tiled over the flattened row dim M; weights / biases / LN
# params are broadcast to every grid step (index_map -> (0, 0)).
# ----------------------------------------------------------------------------
def _linear_kernel(x_ref, w_ref, b_ref, o_ref):
    acc = jnp.dot(x_ref[...], w_ref[...], preferred_element_type=jnp.float32)
    o_ref[...] = (acc + b_ref[...]).astype(o_ref.dtype)


def _linear_nobias_kernel(x_ref, w_ref, o_ref):
    o_ref[...] = jnp.dot(x_ref[...], w_ref[...],
                         preferred_element_type=jnp.float32).astype(o_ref.dtype)


def _ln_linear_kernel(x_ref, g_ref, bln_ref, w_ref, b_ref, o_ref):
    x = x_ref[...].astype(jnp.float32)
    mu = jnp.mean(x, axis=-1, keepdims=True)
    var = jnp.mean(jnp.square(x - mu), axis=-1, keepdims=True)
    xn = (x - mu) * jax.lax.rsqrt(var + _LN_EPS) * g_ref[...] + bln_ref[...]
    acc = jnp.dot(xn, w_ref[...], preferred_element_type=jnp.float32)
    o_ref[...] = (acc + b_ref[...]).astype(o_ref.dtype)


def _ln_linear_nobias_kernel(x_ref, g_ref, bln_ref, w_ref, o_ref):
    x = x_ref[...].astype(jnp.float32)
    mu = jnp.mean(x, axis=-1, keepdims=True)
    var = jnp.mean(jnp.square(x - mu), axis=-1, keepdims=True)
    xn = (x - mu) * jax.lax.rsqrt(var + _LN_EPS) * g_ref[...] + bln_ref[...]
    o_ref[...] = jnp.dot(xn, w_ref[...],
                         preferred_element_type=jnp.float32).astype(o_ref.dtype)


def _layernorm_kernel(x_ref, g_ref, b_ref, o_ref):
    x = x_ref[...].astype(jnp.float32)
    mu = jnp.mean(x, axis=-1, keepdims=True)
    var = jnp.mean(jnp.square(x - mu), axis=-1, keepdims=True)
    o_ref[...] = ((x - mu) * jax.lax.rsqrt(var + _LN_EPS) * g_ref[...]
                  + b_ref[...]).astype(o_ref.dtype)


# ----------------------------------------------------------------------------
# Wrappers
# ----------------------------------------------------------------------------
def _flatten_rows(x):
    *lead, K = x.shape
    M = int(np.prod(lead)) if lead else 1
    return x.reshape(M, K), lead, M, K


def _row_tile(M):
    # Full-array block when small (legal regardless of (8,128) divisibility),
    # TILE_M (multiple of 8) otherwise so the grid pipelines.
    return M if M <= TILE_M else TILE_M


def pallas_linear(x, w, b=None):
    """y = x @ w (+ b); x (..., K), w (K, N), b (1, N) or None."""
    x2, lead, M, K = _flatten_rows(x)
    N = w.shape[1]
    tm = _row_tile(M)
    grid = (pl.cdiv(M, tm),)
    x_spec = pl.BlockSpec((tm, K), lambda i: (i, 0))
    w_spec = pl.BlockSpec((K, N), lambda i: (0, 0))
    o_spec = pl.BlockSpec((tm, N), lambda i: (i, 0))
    out_shape = jax.ShapeDtypeStruct((M, N), F32)
    if b is None:
        out = pl.pallas_call(_linear_nobias_kernel, out_shape=out_shape, grid=grid,
                             in_specs=[x_spec, w_spec], out_specs=o_spec,
                             compiler_params=_COMPILER_PARAMS)(x2, w)
    else:
        out = pl.pallas_call(_linear_kernel, out_shape=out_shape, grid=grid,
                             in_specs=[x_spec, w_spec,
                                       pl.BlockSpec((1, N), lambda i: (0, 0))],
                             out_specs=o_spec,
                             compiler_params=_COMPILER_PARAMS)(x2, w, b)
    return out.reshape(*lead, N)


def pallas_ln_linear(x, g, bln, w, b=None):
    """y = LayerNorm(x) @ w (+ b) fused in one kernel (single HBM read of x)."""
    x2, lead, M, K = _flatten_rows(x)
    N = w.shape[1]
    tm = _row_tile(M)
    grid = (pl.cdiv(M, tm),)
    x_spec = pl.BlockSpec((tm, K), lambda i: (i, 0))
    v_spec = pl.BlockSpec((1, K), lambda i: (0, 0))
    w_spec = pl.BlockSpec((K, N), lambda i: (0, 0))
    o_spec = pl.BlockSpec((tm, N), lambda i: (i, 0))
    out_shape = jax.ShapeDtypeStruct((M, N), F32)
    if b is None:
        out = pl.pallas_call(_ln_linear_nobias_kernel, out_shape=out_shape, grid=grid,
                             in_specs=[x_spec, v_spec, v_spec, w_spec],
                             out_specs=o_spec,
                             compiler_params=_COMPILER_PARAMS)(x2, g, bln, w)
    else:
        out = pl.pallas_call(_ln_linear_kernel, out_shape=out_shape, grid=grid,
                             in_specs=[x_spec, v_spec, v_spec, w_spec,
                                       pl.BlockSpec((1, N), lambda i: (0, 0))],
                             out_specs=o_spec,
                             compiler_params=_COMPILER_PARAMS)(x2, g, bln, w, b)
    return out.reshape(*lead, N)


def pallas_layernorm(x, g, b):
    x2, lead, M, D = _flatten_rows(x)
    tm = _row_tile(M)
    out = pl.pallas_call(
        _layernorm_kernel, out_shape=jax.ShapeDtypeStruct((M, D), F32),
        grid=(pl.cdiv(M, tm),),
        in_specs=[pl.BlockSpec((tm, D), lambda i: (i, 0)),
                  pl.BlockSpec((1, D), lambda i: (0, 0)),
                  pl.BlockSpec((1, D), lambda i: (0, 0))],
        out_specs=pl.BlockSpec((tm, D), lambda i: (i, 0)),
        compiler_params=_COMPILER_PARAMS)(x2, g, b)
    return out.reshape(*lead, D)


def LIN(p, x):
    return pallas_linear(x, p['w'], p['b'])


def LNLIN(lnp, linp, x):
    return pallas_ln_linear(x, lnp['g'], lnp['b'], linp['w'], linp['b'])


def LN(p, x):
    return pallas_layernorm(x, p['g'], p['b'])


# ----------------------------------------------------------------------------
# Deterministic parameter construction
# ----------------------------------------------------------------------------
class PRNG:
    def __init__(self, seed):
        self._key = jax.random.PRNGKey(seed)

    def __call__(self):
        self._key, sub = jax.random.split(self._key)
        return sub


def lin(pg, d_in, d_out, bias=True):
    w = jax.random.normal(pg(), (d_in, d_out), F32) * (1.0 / np.sqrt(d_in))
    return {'w': w, 'b': jnp.zeros((1, d_out), F32) if bias else None}


def ln(d):
    return {'g': jnp.ones((1, d), F32), 'b': jnp.zeros((1, d), F32)}


def fuse_lins(*ps):
    """Concatenate linear layers along the output dim (lane-dense fused projection)."""
    w = jnp.concatenate([q['w'] for q in ps], axis=1)
    if all(q['b'] is None for q in ps):
        return {'w': w, 'b': None}
    bs = [q['b'] if q['b'] is not None else jnp.zeros((1, q['w'].shape[1]), F32)
          for q in ps]
    return {'w': w, 'b': jnp.concatenate(bs, axis=1)}


# ----------------------------------------------------------------------------
# Utility functions (rbf / cdist / seqsep)
# ----------------------------------------------------------------------------
D_MIN, D_MAX, D_COUNT = 2.0, 22.0, 36


def rbf(D):
    mu = jnp.linspace(D_MIN, D_MAX, D_COUNT).astype(F32)
    sigma = (D_MAX - D_MIN) / D_COUNT
    return jnp.exp(-jnp.square((D[..., None] - mu) / sigma))


def cdist(a, b):
    d2 = jnp.sum(jnp.square(a[:, :, None, :] - b[:, None, :, :]), axis=-1)
    return jnp.sqrt(jnp.maximum(d2, 0.0))


def get_seqsep(idx):
    # TODO(synk): cyclic_reses handling omitted (only the cyclic_reses=None path).
    seqsep = (idx[:, None, :] - idx[:, :, None]).astype(F32)
    sign = jnp.sign(seqsep)
    neigh = jnp.abs(seqsep)
    neigh = jnp.where(neigh > 1, 0.0, neigh)
    return (sign * neigh)[..., None]


# ----------------------------------------------------------------------------
# Attention sub-modules (LN fused into the QKVG projection; Q|K|V|G fused)
# ----------------------------------------------------------------------------
def make_row_attn(pg, d_msa, d_pair, n_head, d_hidden):
    hd = n_head * d_hidden
    sw_q = lin(pg, d_msa, hd)                     # SequenceWeight.to_query
    sw_k = lin(pg, d_msa, hd)                     # SequenceWeight.to_key
    to_q = lin(pg, d_msa, hd, bias=False)
    to_k = lin(pg, d_msa, hd, bias=False)
    to_v = lin(pg, d_msa, hd, bias=False)
    to_g = lin(pg, d_msa, hd)
    return {'norm_msa': ln(d_msa), 'norm_pair': ln(d_pair),
            'msa_proj': fuse_lins(to_q, to_k, to_v, to_g, sw_k),   # (d_msa, 5*hd)
            'sw_q': sw_q,
            'to_b': lin(pg, d_pair, n_head, bias=False),
            'to_out': lin(pg, hd, d_msa),
            'h': n_head, 'd': d_hidden}


def row_attn_fwd(p, msa, pair):
    # TODO(synk): score/softmax/context kept in XLA; flash-style Pallas fusion is future work.
    B, N, L, _ = msa.shape
    h, d = p['h'], p['d']
    hd = h * d
    nm = p['norm_msa']
    proj = pallas_ln_linear(msa, nm['g'], nm['b'],
                            p['msa_proj']['w'], p['msa_proj']['b'])     # (B,N,L,5hd)
    q = proj[..., 0 * hd:1 * hd].reshape(B, N, L, h, d)
    k = proj[..., 1 * hd:2 * hd].reshape(B, N, L, h, d)
    v = proj[..., 2 * hd:3 * hd].reshape(B, N, L, h, d)
    gate = jax.nn.sigmoid(proj[..., 3 * hd:4 * hd])
    swk = proj[..., 4 * hd:5 * hd].reshape(B, N, L, h, d)
    # sequence-weight query from the first MSA row only
    swq = pallas_ln_linear(msa[:, 0], nm['g'], nm['b'],
                           p['sw_q']['w'], p['sw_q']['b']).reshape(B, 1, L, h, d)
    swq = swq * (1.0 / np.sqrt(d))
    sw = jax.nn.softmax(jnp.einsum('bqihd,bkihd->bkihq', swq, swk), axis=1)  # (B,N,L,h,1)
    bias = pallas_ln_linear(pair, p['norm_pair']['g'], p['norm_pair']['b'],
                            p['to_b']['w'], None)                            # (B,L,L,h)
    q = q * sw
    k = k * (1.0 / np.sqrt(d))
    attn = jnp.einsum('bsqhd,bskhd->bqkh', q, k) + bias
    attn = jax.nn.softmax(attn, axis=-2)
    out = jnp.einsum('bqkh,bskhd->bsqhd', attn, v).reshape(B, N, L, hd)
    out = gate * out
    return LIN(p['to_out'], out)


def make_col_attn(pg, d_msa, n_head, d_hidden):
    hd = n_head * d_hidden
    to_q = lin(pg, d_msa, hd, bias=False)
    to_k = lin(pg, d_msa, hd, bias=False)
    to_v = lin(pg, d_msa, hd, bias=False)
    to_g = lin(pg, d_msa, hd)
    return {'norm_msa': ln(d_msa), 'proj': fuse_lins(to_q, to_k, to_v, to_g),
            'to_out': lin(pg, hd, d_msa), 'h': n_head, 'd': d_hidden}


def col_attn_fwd(p, msa):
    B, N, L, _ = msa.shape
    h, d = p['h'], p['d']
    hd = h * d
    nm = p['norm_msa']
    proj = pallas_ln_linear(msa, nm['g'], nm['b'], p['proj']['w'], p['proj']['b'])
    q = proj[..., :hd].reshape(B, N, L, h, d) * (1.0 / np.sqrt(d))
    k = proj[..., hd:2 * hd].reshape(B, N, L, h, d)
    v = proj[..., 2 * hd:3 * hd].reshape(B, N, L, h, d)
    gate = jax.nn.sigmoid(proj[..., 3 * hd:])
    attn = jax.nn.softmax(jnp.einsum('bqihd,bkihd->bihqk', q, k), axis=-1)
    out = jnp.einsum('bihqk,bkihd->bqihd', attn, v).reshape(B, N, L, hd)
    return LIN(p['to_out'], gate * out)


def make_col_global_attn(pg, d_msa, n_head, d_hidden):
    hd = n_head * d_hidden
    to_q = lin(pg, d_msa, hd, bias=False)
    to_k = lin(pg, d_msa, d_hidden, bias=False)
    to_v = lin(pg, d_msa, d_hidden, bias=False)
    to_g = lin(pg, d_msa, hd)
    return {'norm_msa': ln(d_msa), 'proj': fuse_lins(to_q, to_k, to_v, to_g),
            'to_out': lin(pg, hd, d_msa), 'h': n_head, 'd': d_hidden}


def col_global_attn_fwd(p, msa):
    B, N, L, _ = msa.shape
    h, d = p['h'], p['d']
    hd = h * d
    nm = p['norm_msa']
    proj = pallas_ln_linear(msa, nm['g'], nm['b'], p['proj']['w'], p['proj']['b'])
    q = proj[..., :hd].reshape(B, N, L, h, d).mean(axis=1) * (1.0 / np.sqrt(d))
    k = proj[..., hd:hd + d]                         # (B,N,L,d)
    v = proj[..., hd + d:hd + 2 * d]                 # (B,N,L,d)
    gate = jax.nn.sigmoid(proj[..., hd + 2 * d:])    # (B,N,L,hd)
    attn = jax.nn.softmax(jnp.einsum('bihd,bkid->bihk', q, k), axis=-1)
    out = jnp.einsum('bihk,bkid->bihd', attn, v).reshape(B, 1, L, hd)
    return LIN(p['to_out'], gate * out)


def make_biased_axial(pg, d_pair, d_bias, n_head, d_hidden, is_row):
    hd = n_head * d_hidden
    to_q = lin(pg, d_pair, hd, bias=False)
    to_k = lin(pg, d_pair, hd, bias=False)
    to_v = lin(pg, d_pair, hd, bias=False)
    to_g = lin(pg, d_pair, hd)
    return {'norm_pair': ln(d_pair), 'norm_bias': ln(d_bias),
            'proj': fuse_lins(to_q, to_k, to_v, to_g),
            'to_b': lin(pg, d_bias, n_head, bias=False),
            'to_out': lin(pg, hd, d_pair),
            'h': n_head, 'd': d_hidden, 'is_row': is_row}


def biased_axial_fwd(p, pair, bias):
    B, L = pair.shape[:2]
    h, d = p['h'], p['d']
    hd = h * d
    if p['is_row']:
        pair = jnp.transpose(pair, (0, 2, 1, 3))
        bias = jnp.transpose(bias, (0, 2, 1, 3))
    proj = pallas_ln_linear(pair, p['norm_pair']['g'], p['norm_pair']['b'],
                            p['proj']['w'], p['proj']['b'])
    q = proj[..., :hd].reshape(B, L, L, h, d) * (1.0 / np.sqrt(d))
    k = proj[..., hd:2 * hd].reshape(B, L, L, h, d) / float(L)   # tied attention
    v = proj[..., 2 * hd:3 * hd].reshape(B, L, L, h, d)
    g = jax.nn.sigmoid(proj[..., 3 * hd:])
    b = pallas_ln_linear(bias, p['norm_bias']['g'], p['norm_bias']['b'],
                         p['to_b']['w'], None)                   # (B,L,L,h)
    attn = jnp.einsum('bnihk,bnjhk->bijh', q, k) + b
    attn = jax.nn.softmax(attn, axis=-2)
    out = jnp.einsum('bijh,bnjhd->bnihd', attn, v).reshape(B, L, L, hd)
    out = LIN(p['to_out'], g * out)
    if p['is_row']:
        out = jnp.transpose(out, (0, 2, 1, 3))
    return out


def make_ff(pg, d_model, r_ff):
    return {'norm': ln(d_model),
            'l1': lin(pg, d_model, d_model * r_ff),
            'l2': lin(pg, d_model * r_ff, d_model)}


def ff_fwd(p, x):
    h = jax.nn.relu(LNLIN(p['norm'], p['l1'], x))
    return LIN(p['l2'], h)          # dropout = identity (eval)


# ----------------------------------------------------------------------------
# MSAPairStr2MSA / MSA2Pair / PairStr2Pair
# ----------------------------------------------------------------------------
def make_msa2msa(pg, d_msa, d_pair, n_head, d_state, d_hidden, use_global_attn):
    proj_pair = lin(pg, d_pair + 36, d_pair)
    return {'norm_pair': ln(d_pair),
            'pp_w_pair': proj_pair['w'][:d_pair, :],   # concat split: pair chunk
            'pp_w_rbf': proj_pair['w'][d_pair:, :],    # concat split: rbf chunk
            'pp_b': proj_pair['b'],
            'norm_state': ln(d_state),
            'proj_state': lin(pg, d_state, d_msa),
            'row_attn': make_row_attn(pg, d_msa, d_pair, n_head, d_hidden),
            'col_attn': (make_col_global_attn(pg, d_msa, n_head, d_hidden)
                         if use_global_attn else
                         make_col_attn(pg, d_msa, n_head, d_hidden)),
            'use_global': use_global_attn,
            'ff': make_ff(pg, d_msa, 4)}


def msa2msa_fwd(p, msa, pair, rbf_feat, state):
    B, N, L, _ = msa.shape
    # proj_pair(cat(LN(pair), rbf)) == LN(pair)@W_pair + rbf@W_rbf + b  (no concat in HBM)
    pair = (pallas_ln_linear(pair, p['norm_pair']['g'], p['norm_pair']['b'],
                             p['pp_w_pair'], p['pp_b'])
            + pallas_linear(rbf_feat, p['pp_w_rbf'], None))
    st = LNLIN(p['norm_state'], p['proj_state'], state).reshape(B, 1, L, -1)
    msa = msa.at[:, 0].add(st[:, 0])                    # index_add on dim 1, index 0
    msa = msa + row_attn_fwd(p['row_attn'], msa, pair)  # drop_row = identity (eval)
    if p['use_global']:
        msa = msa + col_global_attn_fwd(p['col_attn'], msa)
    else:
        msa = msa + col_attn_fwd(p['col_attn'], msa)
    msa = msa + ff_fwd(p['ff'], msa)
    return msa


def make_msa2pair(pg, d_msa, d_pair, d_hidden):
    p_left = lin(pg, d_msa, d_hidden)
    p_right = lin(pg, d_msa, d_hidden)
    return {'norm': ln(d_msa),
            'proj_lr': fuse_lins(p_left, p_right),      # (d_msa, 2*d_hidden)
            'proj_out': lin(pg, d_hidden * d_hidden, d_pair),
            'dh': d_hidden}


def msa2pair_fwd(p, msa, pair):
    B, N, L, _ = msa.shape
    dh = p['dh']
    lr = LNLIN(p['norm'], p['proj_lr'], msa)            # fused LN + left|right proj
    left = lr[..., :dh]
    right = lr[..., dh:] / float(N)
    out = jnp.einsum('bsli,bsmj->blmij', left, right).reshape(B, L, L, -1)
    out = LIN(p['proj_out'], out)
    return pair + out


def make_pair2pair(pg, d_pair, n_head, d_hidden, d_rbf=36):
    return {'emb_rbf': lin(pg, d_rbf, d_hidden),
            'proj_rbf': lin(pg, d_hidden, d_pair),
            'row_attn': make_biased_axial(pg, d_pair, d_pair, n_head, d_hidden, True),
            'col_attn': make_biased_axial(pg, d_pair, d_pair, n_head, d_hidden, False),
            'ff': make_ff(pg, d_pair, 2)}


def pair2pair_fwd(p, pair, rbf_feat):
    rb = LIN(p['proj_rbf'], jax.nn.relu(LIN(p['emb_rbf'], rbf_feat)))
    pair = pair + biased_axial_fwd(p['row_attn'], pair, rb)   # drop_row identity
    pair = pair + biased_axial_fwd(p['col_attn'], pair, rb)   # drop_col identity
    pair = pair + ff_fwd(p['ff'], pair)
    return pair


# ----------------------------------------------------------------------------
# SCPred / Str2Str (with SE3 stand-in)
# ----------------------------------------------------------------------------
def make_scpred(pg, d_msa, d_state, d_hidden=128):
    return {'norm_s0': ln(d_msa), 'norm_si': ln(d_state),
            'linear_s0': lin(pg, d_msa, d_hidden), 'linear_si': lin(pg, d_state, d_hidden),
            'linear_1': lin(pg, d_hidden, d_hidden), 'linear_2': lin(pg, d_hidden, d_hidden),
            'linear_3': lin(pg, d_hidden, d_hidden), 'linear_4': lin(pg, d_hidden, d_hidden),
            'linear_out': lin(pg, d_hidden, 20)}


def scpred_fwd(p, seq, state):
    B, L = seq.shape[:2]
    si = (LNLIN(p['norm_s0'], p['linear_s0'], seq)
          + LNLIN(p['norm_si'], p['linear_si'], state))
    si = si + LIN(p['linear_2'], jax.nn.relu(LIN(p['linear_1'], jax.nn.relu(si))))
    si = si + LIN(p['linear_4'], jax.nn.relu(LIN(p['linear_3'], jax.nn.relu(si))))
    si = LIN(p['linear_out'], jax.nn.relu(si))
    return si.reshape(B, L, 10, 2)


def make_se3_stub(pg, l0_in, l0_out, d_edge, n_atom):
    # TODO(synk): SE3TransformerWrapper (DGL-based equivariant graph attention) and
    # make_topk_graph/make_full_graph have no clean Pallas equivalent; this is a minimal
    # SE(3)-equivariant linear message-passing stand-in with identical I/O shapes.
    node_out = lin(pg, l0_in + d_edge, l0_out)
    l1_gate = lin(pg, l0_in + d_edge, 2 * n_atom)
    return {'proj': fuse_lins(node_out, l1_gate),   # fused node_out | l1_gate
            'l0_out': l0_out, 'n_atom': n_atom}


def se3_stub_fwd(p, node, edge, l1_feats):
    # node (B,L,l0_in), edge (B,L,L,d_edge), l1_feats (B,L,A,3)
    msg = jnp.mean(edge, axis=2)                                   # full-graph aggregation
    feat = jnp.concatenate([node, msg], axis=-1)
    out = LIN(p['proj'], feat)
    state = out[..., :p['l0_out']]                                 # (B,L,l0_out)
    B, L, A, _ = l1_feats.shape
    gates = out[..., p['l0_out']:].reshape(B, L, 2, A)
    offset = jnp.einsum('blka,blad->blkd', gates, l1_feats)        # (B,L,2,3) equivariant
    return state, offset


def make_str2str(pg, d_msa, d_pair, d_state, se3_param, n_atom=N_ATOM):
    l0_in = se3_param['l0_in_features']
    l0_out = se3_param['l0_out_features']
    de = se3_param['num_edge_features']
    embed_x = lin(pg, d_msa + d_state, l0_in)
    embed_e2 = lin(pg, de + 36 + 1, de)
    return {'norm_msa': ln(d_msa), 'norm_pair': ln(d_pair), 'norm_state': ln(d_state),
            'ex_w_msa': embed_x['w'][:d_msa, :],       # embed_x split (no concat in HBM)
            'ex_w_state': embed_x['w'][d_msa:, :],
            'ex_b': embed_x['b'],
            'embed_e1': lin(pg, d_pair, de),
            'e2_w_edge': embed_e2['w'][:de, :],        # embed_e2 split
            'e2_w_rbf': embed_e2['w'][de:de + 36, :],
            'e2_w_seqsep': embed_e2['w'][de + 36, :],  # (de,)
            'e2_b': embed_e2['b'],
            'norm_node': ln(l0_in), 'norm_edge1': ln(de), 'norm_edge2': ln(de),
            'se3': make_se3_stub(pg, l0_in, l0_out, de, n_atom),
            'sc': make_scpred(pg, d_msa, l0_out)}


def str2str_fwd(p, msa, pair, R_in, T_in, xyz, state, idx, motif_mask,
                rbf_feat=None, top_k=64):
    # TODO(synk): top_k graph construction unused (full-graph SE3 stub), per stub above.
    B, N, L = msa.shape[:3]
    # node = norm_node(embed_x(cat(norm_msa(msa[:,0]), norm_state(state))))
    node = (pallas_ln_linear(msa[:, 0], p['norm_msa']['g'], p['norm_msa']['b'],
                             p['ex_w_msa'], p['ex_b'])
            + pallas_ln_linear(state, p['norm_state']['g'], p['norm_state']['b'],
                               p['ex_w_state'], None))
    node = LN(p['norm_node'], node)
    # edge path
    e1 = LNLIN(p['norm_pair'], p['embed_e1'], pair)
    if rbf_feat is None:
        rbf_feat = rbf(cdist(xyz[:, :, 1], xyz[:, :, 1]))
    neighbor = get_seqsep(idx)                                     # (B,L,L,1)
    # embed_e2(cat(norm_edge1(e1), rbf, seqsep)) split into three pieces
    e2 = (pallas_ln_linear(e1, p['norm_edge1']['g'], p['norm_edge1']['b'],
                           p['e2_w_edge'], p['e2_b'])
          + pallas_linear(rbf_feat, p['e2_w_rbf'], None)
          + neighbor * p['e2_w_seqsep'])
    pair_e = LN(p['norm_edge2'], e2)

    l1_feats = xyz - xyz[:, :, 1:2, :]
    new_state, offset = se3_stub_fwd(p['se3'], node, pair_e, l1_feats)

    keep = (1.0 - motif_mask.astype(F32))[None, :, None, None]
    offset = offset * keep                                         # offset[:, motif_mask] = 0

    delTi = offset[:, :, 0, :] / 10.0
    Rv = offset[:, :, 1, :] / 100.0
    Qnorm = jnp.sqrt(1.0 + jnp.sum(Rv * Rv, axis=-1))
    qA = 1.0 / Qnorm
    qB = Rv[:, :, 0] / Qnorm
    qC = Rv[:, :, 1] / Qnorm
    qD = Rv[:, :, 2] / Qnorm
    row0 = jnp.stack([qA * qA + qB * qB - qC * qC - qD * qD,
                      2 * qB * qC - 2 * qA * qD,
                      2 * qB * qD + 2 * qA * qC], axis=-1)
    row1 = jnp.stack([2 * qB * qC + 2 * qA * qD,
                      qA * qA - qB * qB + qC * qC - qD * qD,
                      2 * qC * qD - 2 * qA * qB], axis=-1)
    row2 = jnp.stack([2 * qB * qD - 2 * qA * qC,
                      2 * qC * qD + 2 * qA * qB,
                      qA * qA - qB * qB - qC * qC + qD * qD], axis=-1)
    delRi = jnp.stack([row0, row1, row2], axis=-2)                 # (B,L,3,3)

    Ri = jnp.einsum('bnij,bnjk->bnik', delRi, R_in)
    Ti = delTi + T_in
    alpha = scpred_fwd(p['sc'], msa[:, 0], new_state)
    return Ri, Ti, new_state, alpha


# ----------------------------------------------------------------------------
# IterBlock / IterativeSimulator
# ----------------------------------------------------------------------------
def make_iterblock(pg, d_msa, d_pair, n_head_msa, n_head_pair, use_global_attn,
                   d_hidden, d_hidden_msa, se3_param):
    if d_hidden_msa is None:
        d_hidden_msa = d_hidden
    return {'msa2msa': make_msa2msa(pg, d_msa, d_pair, n_head_msa,
                                    se3_param['l0_out_features'], d_hidden_msa,
                                    use_global_attn),
            'msa2pair': make_msa2pair(pg, d_msa, d_pair, d_hidden // 2),
            'pair2pair': make_pair2pair(pg, d_pair, n_head_pair, d_hidden),
            'str2str': make_str2str(pg, d_msa, d_pair, se3_param['l0_out_features'], se3_param)}


def iterblock_fwd(p, msa, pair, R_in, T_in, xyz, state, idx, motif_mask):
    rbf_feat = rbf(cdist(xyz[:, :, 1, :], xyz[:, :, 1, :]))   # computed once, shared
    msa = msa2msa_fwd(p['msa2msa'], msa, pair, rbf_feat, state)
    pair = msa2pair_fwd(p['msa2pair'], msa, pair)
    pair = pair2pair_fwd(p['pair2pair'], pair, rbf_feat)
    R, T, state, alpha = str2str_fwd(p['str2str'], msa, pair, R_in, T_in, xyz,
                                     state, idx, motif_mask, rbf_feat=rbf_feat, top_k=0)
    return msa, pair, R, T, state, alpha


def make_simulator(pg, n_extra_block, n_main_block, n_ref_block,
                   d_msa, d_msa_full, d_pair, d_hidden,
                   n_head_msa, n_head_pair, se3_full, se3_topk):
    return {'n_ref': n_ref_block,
            'proj_state': lin(pg, se3_topk['l0_out_features'], se3_full['l0_out_features']),
            'extra': [make_iterblock(pg, d_msa_full, d_pair, n_head_msa, n_head_pair,
                                     True, d_hidden, 8, se3_full)
                      for _ in range(n_extra_block)],
            'main': [make_iterblock(pg, d_msa, d_pair, n_head_msa, n_head_pair,
                                    False, d_hidden, None, se3_full)
                     for _ in range(n_main_block)],
            'proj_state2': lin(pg, se3_full['l0_out_features'], se3_topk['l0_out_features']),
            'str_refiner': make_str2str(pg, d_msa, d_pair,
                                        se3_topk['l0_out_features'], se3_topk)}


def simulator_fwd(p, seq, msa, msa_full, pair, xyz_in, state, idx, motif_mask=None):
    B, L = pair.shape[:2]
    if motif_mask is None:
        motif_mask = jnp.zeros((L,), bool)
    R_in = jnp.broadcast_to(jnp.eye(3, dtype=F32).reshape(1, 1, 3, 3), (B, L, 3, 3))
    T_in = xyz_in[:, :, 1]
    xyz_in = xyz_in - T_in[:, :, None, :]
    state = LIN(p['proj_state'], state)

    R_s, T_s, alpha_s = [], [], []
    for blk in p['extra']:
        xyz = jnp.einsum('bnij,bnaj->bnai', R_in, xyz_in) + T_in[:, :, None, :]
        msa_full, pair, R_in, T_in, state, alpha = iterblock_fwd(
            blk, msa_full, pair, R_in, T_in, xyz, state, idx, motif_mask)
        R_s.append(R_in); T_s.append(T_in); alpha_s.append(alpha)

    for blk in p['main']:
        xyz = jnp.einsum('bnij,bnaj->bnai', R_in, xyz_in) + T_in[:, :, None, :]
        msa, pair, R_in, T_in, state, alpha = iterblock_fwd(
            blk, msa, pair, R_in, T_in, xyz, state, idx, motif_mask)
        R_s.append(R_in); T_s.append(T_in); alpha_s.append(alpha)

    state = LIN(p['proj_state2'], state)
    for _ in range(p['n_ref']):
        xyz = jnp.einsum('bnij,bnaj->bnai', R_in, xyz_in) + T_in[:, :, None, :]
        R_in, T_in, state, alpha = str2str_fwd(
            p['str_refiner'], msa, pair, R_in, T_in, xyz, state, idx, motif_mask,
            rbf_feat=None, top_k=64)
        R_s.append(R_in); T_s.append(T_in); alpha_s.append(alpha)

    return (msa, pair, jnp.stack(R_s, 0), jnp.stack(T_s, 0),
            jnp.stack(alpha_s, 0), state)


# ----------------------------------------------------------------------------
# Main
# ----------------------------------------------------------------------------
if __name__ == "__main__":
    # Small, module-consistent shapes.
    B, N_SEED, N_FULL, L, A = 1, 4, 4, 8, N_ATOM
    d_msa, d_msa_full, d_pair, d_hidden = 32, 16, 32, 8
    n_head_msa, n_head_pair = 4, 2
    se3_full = {'l0_in_features': 16, 'l0_out_features': 8, 'num_edge_features': 16}
    se3_topk = {'l0_in_features': 16, 'l0_out_features': 8, 'num_edge_features': 16}
    d_state_in = se3_topk['l0_out_features']

    pg = PRNG(1)
    params = make_simulator(pg, n_extra_block=1, n_main_block=1, n_ref_block=1,
                            d_msa=d_msa, d_msa_full=d_msa_full, d_pair=d_pair,
                            d_hidden=d_hidden, n_head_msa=n_head_msa,
                            n_head_pair=n_head_pair,
                            se3_full=se3_full, se3_topk=se3_topk)

    ks = jax.random.split(jax.random.PRNGKey(0), 8)
    seq = jax.random.randint(ks[0], (B, L), 0, 20)
    msa = jax.random.normal(ks[1], (B, N_SEED, L, d_msa), F32)
    msa_full = jax.random.normal(ks[2], (B, N_FULL, L, d_msa_full), F32)
    pair = jax.random.normal(ks[3], (B, L, L, d_pair), F32)
    xyz_in = jax.random.normal(ks[4], (B, L, A, 3), F32) * 3.0
    state = jax.random.normal(ks[5], (B, L, d_state_in), F32)
    idx = jnp.broadcast_to(jnp.arange(L, dtype=jnp.int32), (B, L))

    # jit with params closed over: removes per-op dispatch overhead and lets XLA fuse
    # the non-Pallas glue; Python ints/bools in params stay static.
    fwd = jax.jit(lambda sq, m, mf, pr, xz, st, ix:
                  simulator_fwd(params, sq, m, mf, pr, xz, st, ix))
    out = fwd(seq, msa, msa_full, pair, xyz_in, state, idx)
    jax.block_until_ready(out)

    msa_o, pair_o, R_s, T_s, alpha_s, state_o = out
    assert msa_o.shape == (B, N_SEED, L, d_msa)
    assert pair_o.shape == (B, L, L, d_pair)
    assert R_s.shape == (3, B, L, 3, 3)
    assert T_s.shape == (3, B, L, 3)
    assert alpha_s.shape == (3, B, L, 10, 2)
    assert state_o.shape == (B, L, se3_topk['l0_out_features'])
    assert bool(jnp.all(jnp.isfinite(R_s))) and bool(jnp.all(jnp.isfinite(alpha_s)))
    print("KERNEL_OK")
</pallas_src>

<mosaic_0001>
module attributes {stable_mosaic.version = 11 : i64} {
  func.func @_linear_kernel(%arg0: i32, %arg1: memref<8x8xf32, #tpu.memory_space<vmem>>, %arg2: memref<8x8xf32, #tpu.memory_space<vmem>>, %arg3: memref<1x8xf32, #tpu.memory_space<vmem>>, %arg4: memref<8x8xf32, #tpu.memory_space<vmem>>) attributes {dimension_semantics = [#tpu.dimension_semantics<parallel>], iteration_bounds = array<i64: 1>, scalar_prefetch = 0 : i64, scratch_operands = 0 : i64, tpu.core_type = #tpu.core_type<tc>, window_params = [{transform_indices = @transform_0, window_bounds = array<i64: 8, 8>}, {pipeline_mode = #tpu.pipeline_mode<synchronous>, transform_indices = @transform_1, window_bounds = array<i64: 8, 8>}, {pipeline_mode = #tpu.pipeline_mode<synchronous>, transform_indices = @transform_2, window_bounds = array<i64: 1, 8>}, {transform_indices = @transform_3, window_bounds = array<i64: 8, 8>}]} {
    %c0 = arith.constant 0 : index
    %c0_0 = arith.constant 0 : index
    %0 = vector.load %arg1[%c0, %c0_0] : memref<8x8xf32, #tpu.memory_space<vmem>>, vector<8x8xf32>
    %c0_1 = arith.constant 0 : index
    %c0_2 = arith.constant 0 : index
    %1 = vector.load %arg2[%c0_1, %c0_2] : memref<8x8xf32, #tpu.memory_space<vmem>>, vector<8x8xf32>
    %cst = arith.constant dense<0.000000e+00> : vector<8x8xf32>
    %2 = tpu.matmul %0, %1, %cst {dimension_numbers = #tpu.dot_dimension_numbers<[1], [0], [0], [1], [0, 0, 1, 1], [], []>} : vector<8x8xf32>, vector<8x8xf32>, vector<8x8xf32> -> vector<8x8xf32>
    %c0_3 = arith.constant 0 : index
    %c0_4 = arith.constant 0 : index
    %3 = vector.load %arg3[%c0_3, %c0_4] : memref<1x8xf32, #tpu.memory_space<vmem>>, vector<1x8xf32>
    %4 = vector.broadcast %3 : vector<1x8xf32> to vector<8x8xf32>
    %5 = arith.addf %2, %4 : vector<8x8xf32>
    %c0_5 = arith.constant 0 : index
    %c0_6 = arith.constant 0 : index
    %6 = vector.load %arg4[%c0_5, %c0_6] : memref<8x8xf32, #tpu.memory_space<vmem>>, vector<8x8xf32>
    tpu.vector_store %arg4[%c0_5, %c0_6], %5 {strides = array<i32>} : memref<8x8xf32, #tpu.memory_space<vmem>>, vector<8x8xf32>,
    return
  }
  func.func @transform_0(%arg0: i32) -> (i32, i32) {
    %c0_i32 = arith.constant 0 : i32
    %c0_i32_0 = arith.constant 0 : i32
    return %arg0, %c0_i32 : i32, i32
  }
  func.func @transform_1(%arg0: i32) -> (i32, i32) {
    %c0_i32 = arith.constant 0 : i32
    %c0_i32_0 = arith.constant 0 : i32
    %c0_i32_1 = arith.constant 0 : i32
    return %c0_i32, %c0_i32_0 : i32, i32
  }
  func.func @transform_2(%arg0: i32) -> (i32, i32) {
    %c0_i32 = arith.constant 0 : i32
    %c0_i32_0 = arith.constant 0 : i32
    %c0_i32_1 = arith.constant 0 : i32
    return %c0_i32, %c0_i32_0 : i32, i32
  }
  func.func @transform_3(%arg0: i32) -> (i32, i32) {
    %c0_i32 = arith.constant 0 : i32
    %c0_i32_0 = arith.constant 0 : i32
    return %arg0, %c0_i32 : i32, i32
  }
}

module attributes {stable_mosaic.version = 11 : i64} {
  func.func @_ln_linear_kernel(%arg0: i32, %arg1: memref<8x8xf32, #tpu.memory_space<vmem>>, %arg2: memref<1x8xf32, #tpu.memory_space<vmem>>, %arg3: memref<1x8xf32, #tpu.memory_space<vmem>>, %arg4: memref<8x16xf32, #tpu.memory_space<vmem>>, %arg5: memref<1x16xf32, #tpu.memory_space<vmem>>, %arg6: memref<8x16xf32, #tpu.memory_space<vmem>>) attributes {dimension_semantics = [#tpu.dimension_semantics<parallel>], iteration_bounds = array<i64: 1>, scalar_prefetch = 0 : i64, scratch_operands = 0 : i64, tpu.core_type = #tpu.core_type<tc>, window_params = [{transform_indices = @transform_0, window_bounds = array<i64: 8, 8>}, {pipeline_mode = #tpu.pipeline_mode<synchronous>, transform_indices = @transform_1, window_bounds = array<i64: 1, 8>}, {pipeline_mode = #tpu.pipeline_mode<synchronous>, transform_indices = @transform_2, window_bounds = array<i64: 1, 8>}, {pipeline_mode = #tpu.pipeline_mode<synchronous>, transform_indices = @transform_3, window_bounds = array<i64: 8, 16>}, {pipeline_mode = #tpu.pipeline_mode<synchronous>, transform_indices = @transform_4, window_bounds = array<i64: 1, 16>}, {transform_indices = @transform_5, window_bounds = array<i64: 8, 16>}]} {
    %c0 = arith.constant 0 : index
    %c0_0 = arith.constant 0 : index
    %0 = vector.load %arg1[%c0, %c0_0] : memref<8x8xf32, #tpu.memory_space<vmem>>, vector<8x8xf32>
    %cst = arith.constant dense<0.000000e+00> : vector<8xf32>
    %1 = vector.multi_reduction <add>, %0, %cst [1] : vector<8x8xf32> to vector<8xf32>
    %2 = vector.shape_cast %1 : vector<8xf32> to vector<8x1xf32>
    %cst_1 = arith.constant 8.000000e+00 : f32
    %3 = vector.broadcast %cst_1 : f32 to vector<8x1xf32>
    %4 = arith.divf %2, %3 : vector<8x1xf32>
    %5 = vector.broadcast %4 : vector<8x1xf32> to vector<8x8xf32>
    %6 = arith.subf %0, %5 : vector<8x8xf32>
    %7 = arith.mulf %6, %6 : vector<8x8xf32>
    %cst_2 = arith.constant dense<0.000000e+00> : vector<8xf32>
    %8 = vector.multi_reduction <add>, %7, %cst_2 [1] : vector<8x8xf32> to vector<8xf32>
    %9 = vector.shape_cast %8 : vector<8xf32> to vector<8x1xf32>
    %cst_3 = arith.constant 8.000000e+00 : f32
    %10 = vector.broadcast %cst_3 : f32 to vector<8x1xf32>
    %11 = arith.divf %9, %10 : vector<8x1xf32>
    %12 = vector.broadcast %4 : vector<8x1xf32> to vector<8x8xf32>
    %13 = arith.subf %0, %12 : vector<8x8xf32>
    %cst_4 = arith.constant 9.99999974E-6 : f32
    %14 = vector.broadcast %cst_4 : f32 to vector<8x1xf32>
    %15 = arith.addf %11, %14 : vector<8x1xf32>
    %16 = math.rsqrt %15 : vector<8x1xf32>
    %17 = vector.broadcast %16 : vector<8x1xf32> to vector<8x8xf32>
    %18 = arith.mulf %13, %17 : vector<8x8xf32>
    %c0_5 = arith.constant 0 : index
    %c0_6 = arith.constant 0 : index
    %19 = vector.load %arg2[%c0_5, %c0_6] : memref<1x8xf32, #tpu.memory_space<vmem>>, vector<1x8xf32>
    %20 = vector.broadcast %19 : vector<1x8xf32> to vector<8x8xf32>
    %21 = arith.mulf %18, %20 : vector<8x8xf32>
    %c0_7 = arith.constant 0 : index
    %c0_8 = arith.constant 0 : index
    %22 = vector.load %arg3[%c0_7, %c0_8] : memref<1x8xf32, #tpu.memory_space<vmem>>, vector<1x8xf32>
    %23 = vector.broadcast %22 : vector<1x8xf32> to vector<8x8xf32>
    %24 = arith.addf %21, %23 : vector<8x8xf32>
    %c0_9 = arith.constant 0 : index
    %c0_10 = arith.constant 0 : index
    %25 = vector.load %arg4[%c0_9, %c0_10] : memref<8x16xf32, #tpu.memory_space<vmem>>, vector<8x16xf32>
    %cst_11 = arith.constant dense<0.000000e+00> : vector<8x16xf32>
    %26 = tpu.matmul %24, %25, %cst_11 {dimension_numbers = #tpu.dot_dimension_numbers<[1], [0], [0], [1], [0, 0, 1, 1], [], []>} : vector<8x8xf32>, vector<8x16xf32>, vector<8x16xf32> -> vector<8x16xf32>
    %c0_12 = arith.constant 0 : index
    %c0_13 = arith.constant 0 : index
    %27 = vector.load %arg5[%c0_12, %c0_13] : memref<1x16xf32, #tpu.memory_space<vmem>>, vector<1x16xf32>
    %28 = vector.broadcast %27 : vector<1x16xf32> to vector<8x16xf32>
    %29 = arith.addf %26, %28 : vector<8x16xf32>
    %c0_14 = arith.constant 0 : index
    %c0_15 = arith.constant 0 : index
    %30 = vector.load %arg6[%c0_14, %c0_15] : memref<8x16xf32, #tpu.memory_space<vmem>>, vector<8x16xf32>
    tpu.vector_store %arg6[%c0_14, %c0_15], %29 {strides = array<i32>} : memref<8x16xf32, #tpu.memory_space<vmem>>, vector<8x16xf32>,
    return
  }
  func.func @transform_0(%arg0: i32) -> (i32, i32) {
    %c0_i32 = arith.constant 0 : i32
    %c0_i32_0 = arith.constant 0 : i32
    return %arg0, %c0_i32 : i32, i32
  }
  func.func @transform_1(%arg0: i32) -> (i32, i32) {
    %c0_i32 = arith.constant 0 : i32
    %c0_i32_0 = arith.constant 0 : i32
    %c0_i32_1 = arith.constant 0 : i32
    return %c0_i32, %c0_i32_0 : i32, i32
  }
  func.func @transform_2(%arg0: i32) -> (i32, i32) {
    %c0_i32 = arith.constant 0 : i32
    %c0_i32_0 = arith.constant 0 : i32
    %c0_i32_1 = arith.constant 0 : i32
    return %c0_i32, %c0_i32_0 : i32, i32
  }
  func.func @transform_3(%arg0: i32) -> (i32, i32) {
    %c0_i32 = arith.constant 0 : i32
    %c0_i32_0 = arith.constant 0 : i32
    %c0_i32_1 = arith.constant 0 : i32
    return %c0_i32, %c0_i32_0 : i32, i32
  }
  func.func @transform_4(%arg0: i32) -> (i32, i32) {
    %c0_i32 = arith.constant 0 : i32
    %c0_i32_0 = arith.constant 0 : i32
    %c0_i32_1 = arith.constant 0 : i32
    return %c0_i32, %c0_i32_0 : i32, i32
  }
  func.func @transform_5(%arg0: i32) -> (i32, i32) {
    %c0_i32 = arith.constant 0 : i32
    %c0_i32_0 = arith.constant 0 : i32
    return %arg0, %c0_i32 : i32, i32
  }
}

module attributes {stable_mosaic.version = 11 : i64} {
  func.func @_ln_linear_kernel(%arg0: i32, %arg1: memref<32x16xf32, #tpu.memory_space<vmem>>, %arg2: memref<1x16xf32, #tpu.memory_space<vmem>>, %arg3: memref<1x16xf32, #tpu.memory_space<vmem>>, %arg4: memref<16x160xf32, #tpu.memory_space<vmem>>, %arg5: memref<1x160xf32, #tpu.memory_space<vmem>>, %arg6: memref<32x160xf32, #tpu.memory_space<vmem>>) attributes {dimension_semantics = [#tpu.dimension_semantics<parallel>], iteration_bounds = array<i64: 1>, scalar_prefetch = 0 : i64, scratch_operands = 0 : i64, tpu.core_type = #tpu.core_type<tc>, window_params = [{transform_indices = @transform_0, window_bounds = array<i64: 32, 16>}, {pipeline_mode = #tpu.pipeline_mode<synchronous>, transform_indices = @transform_1, window_bounds = array<i64: 1, 16>}, {pipeline_mode = #tpu.pipeline_mode<synchronous>, transform_indices = @transform_2, window_bounds = array<i64: 1, 16>}, {pipeline_mode = #tpu.pipeline_mode<synchronous>, transform_indices = @transform_3, window_bounds = array<i64: 16, 160>}, {pipeline_mode = #tpu.pipeline_mode<synchronous>, transform_indices = @transform_4, window_bounds = array<i64: 1, 160>}, {transform_indices = @transform_5, window_bounds = array<i64: 32, 160>}]} {
    %c0 = arith.constant 0 : index
    %c0_0 = arith.constant 0 : index
    %0 = vector.load %arg1[%c0, %c0_0] : memref<32x16xf32, #tpu.memory_space<vmem>>, vector<32x16xf32>
    %cst = arith.constant dense<0.000000e+00> : vector<32xf32>
    %1 = vector.multi_reduction <add>, %0, %cst [1] : vector<32x16xf32> to vector<32xf32>
    %2 = vector.shape_cast %1 : vector<32xf32> to vector<32x1xf32>
    %cst_1 = arith.constant 1.600000e+01 : f32
    %3 = vector.broadcast %cst_1 : f32 to vector<32x1xf32>
    %4 = arith.divf %2, %3 : vector<32x1xf32>
    %5 = vector.broadcast %4 : vector<32x1xf32> to vector<32x16xf32>
    %6 = arith.subf %0, %5 : vector<32x16xf32>
    %7 = arith.mulf %6, %6 : vector<32x16xf32>
    %cst_2 = arith.constant dense<0.000000e+00> : vector<32xf32>
    %8 = vector.multi_reduction <add>, %7, %cst_2 [1] : vector<32x16xf32> to vector<32xf32>
    %9 = vector.shape_cast %8 : vector<32xf32> to vector<32x1xf32>
    %cst_3 = arith.constant 1.600000e+01 : f32
    %10 = vector.broadcast %cst_3 : f32 to vector<32x1xf32>
    %11 = arith.divf %9, %10 : vector<32x1xf32>
    %12 = vector.broadcast %4 : vector<32x1xf32> to vector<32x16xf32>
    %13 = arith.subf %0, %12 : vector<32x16xf32>
    %cst_4 = arith.constant 9.99999974E-6 : f32
    %14 = vector.broadcast %cst_4 : f32 to vector<32x1xf32>
    %15 = arith.addf %11, %14 : vector<32x1xf32>
    %16 = math.rsqrt %15 : vector<32x1xf32>
    %17 = vector.broadcast %16 : vector<32x1xf32> to vector<32x16xf32>
    %18 = arith.mulf %13, %17 : vector<32x16xf32>
    %c0_5 = arith.constant 0 : index
    %c0_6 = arith.constant 0 : index
    %19 = vector.load %arg2[%c0_5, %c0_6] : memref<1x16xf32, #tpu.memory_space<vmem>>, vector<1x16xf32>
    %20 = vector.broadcast %19 : vector<1x16xf32> to vector<32x16xf32>
    %21 = arith.mulf %18, %20 : vector<32x16xf32>
    %c0_7 = arith.constant 0 : index
    %c0_8 = arith.constant 0 : index
    %22 = vector.load %arg3[%c0_7, %c0_8] : memref<1x16xf32, #tpu.memory_space<vmem>>, vector<1x16xf32>
    %23 = vector.broadcast %22 : vector<1x16xf32> to vector<32x16xf32>
    %24 = arith.addf %21, %23 : vector<32x16xf32>
    %c0_9 = arith.constant 0 : index
    %c0_10 = arith.constant 0 : index
    %25 = vector.load %arg4[%c0_9, %c0_10] : memref<16x160xf32, #tpu.memory_space<vmem>>, vector<16x160xf32>
    %cst_11 = arith.constant dense<0.000000e+00> : vector<32x160xf32>
    %26 = tpu.matmul %24, %25, %cst_11 {dimension_numbers = #tpu.dot_dimension_numbers<[1], [0], [0], [1], [0, 0, 1, 1], [], []>} : vector<32x16xf32>, vector<16x160xf32>, vector<32x160xf32> -> vector<32x160xf32>
    %c0_12 = arith.constant 0 : index
    %c0_13 = arith.constant 0 : index
    %27 = vector.load %arg5[%c0_12, %c0_13] : memref<1x160xf32, #tpu.memory_space<vmem>>, vector<1x160xf32>
    %28 = vector.broadcast %27 : vector<1x160xf32> to vector<32x160xf32>
    %29 = arith.addf %26, %28 : vector<32x160xf32>
    %c0_14 = arith.constant 0 : index
    %c0_15 = arith.constant 0 : index
    %30 = vector.load %arg6[%c0_14, %c0_15] : memref<32x160xf32, #tpu.memory_space<vmem>>, vector<32x160xf32>
    tpu.vector_store %arg6[%c0_14, %c0_15], %29 {strides = array<i32>} : memref<32x160xf32, #tpu.memory_space<vmem>>, vector<32x160xf32>,
    return
  }
  func.func @transform_0(%arg0: i32) -> (i32, i32) {
    %c0_i32 = arith.constant 0 : i32
    %c0_i32_0 = arith.constant 0 : i32
    return %arg0, %c0_i32 : i32, i32
  }
  func.func @transform_1(%arg0: i32) -> (i32, i32) {
    %c0_i32 = arith.constant 0 : i32
    %c0_i32_0 = arith.constant 0 : i32
    %c0_i32_1 = arith.constant 0 : i32
    return %c0_i32, %c0_i32_0 : i32, i32
  }
  func.func @transform_2(%arg0: i32) -> (i32, i32) {
    %c0_i32 = arith.constant 0 : i32
    %c0_i32_0 = arith.constant 0 : i32
    %c0_i32_1 = arith.constant 0 : i32
    return %c0_i32, %c0_i32_0 : i32, i32
  }
  func.func @transform_3(%arg0: i32) -> (i32, i32) {
    %c0_i32 = arith.constant 0 : i32
    %c0_i32_0 = arith.constant 0 : i32
    %c0_i32_1 = arith.constant 0 : i32
    return %c0_i32, %c0_i32_0 : i32, i32
  }
  func.func @transform_4(%arg0: i32) -> (i32, i32) {
    %c0_i32 = arith.constant 0 : i32
    %c0_i32_0 = arith.constant 0 : i32
    %c0_i32_1 = arith.constant 0 : i32
    return %c0_i32, %c0_i32_0 : i32, i32
  }
  func.func @transform_5(%arg0: i32) -> (i32, i32) {
    %c0_i32 = arith.constant 0 : i32
    %c0_i32_0 = arith.constant 0 : i32
    return %arg0, %c0_i32 : i32, i32
  }
}

module attributes {stable_mosaic.version = 11 : i64} {
  func.func @_ln_linear_kernel(%arg0: i32, %arg1: memref<64x32xf32, #tpu.memory_space<vmem>>, %arg2: memref<1x32xf32, #tpu.memory_space<vmem>>, %arg3: memref<1x32xf32, #tpu.memory_space<vmem>>, %arg4: memref<32x32xf32, #tpu.memory_space<vmem>>, %arg5: memref<1x32xf32, #tpu.memory_space<vmem>>, %arg6: memref<64x32xf32, #tpu.memory_space<vmem>>) attributes {dimension_semantics = [#tpu.dimension_semantics<parallel>], iteration_bounds = array<i64: 1>, scalar_prefetch = 0 : i64, scratch_operands = 0 : i64, tpu.core_type = #tpu.core_type<tc>, window_params = [{transform_indices = @transform_0, window_bounds = array<i64: 64, 32>}, {pipeline_mode = #tpu.pipeline_mode<synchronous>, transform_indices = @transform_1, window_bounds = array<i64: 1, 32>}, {pipeline_mode = #tpu.pipeline_mode<synchronous>, transform_indices = @transform_2, window_bounds = array<i64: 1, 32>}, {pipeline_mode = #tpu.pipeline_mode<synchronous>, transform_indices = @transform_3, window_bounds = array<i64: 32, 32>}, {pipeline_mode = #tpu.pipeline_mode<synchronous>, transform_indices = @transform_4, window_bounds = array<i64: 1, 32>}, {transform_indices = @transform_5, window_bounds = array<i64: 64, 32>}]} {
    %c0 = arith.constant 0 : index
    %c0_0 = arith.constant 0 : index
    %0 = vector.load %arg1[%c0, %c0_0] : memref<64x32xf32, #tpu.memory_space<vmem>>, vector<64x32xf32>
    %cst = arith.constant dense<0.000000e+00> : vector<64xf32>
    %1 = vector.multi_reduction <add>, %0, %cst [1] : vector<64x32xf32> to vector<64xf32>
    %2 = vector.shape_cast %1 : vector<64xf32> to vector<64x1xf32>
    %cst_1 = arith.constant 3.200000e+01 : f32
    %3 = vector.broadcast %cst_1 : f32 to vector<64x1xf32>
    %4 = arith.divf %2, %3 : vector<64x1xf32>
    %5 = vector.broadcast %4 : vector<64x1xf32> to vector<64x32xf32>
    %6 = arith.subf %0, %5 : vector<64x32xf32>
    %7 = arith.mulf %6, %6 : vector<64x32xf32>
    %cst_2 = arith.constant dense<0.000000e+00> : vector<64xf32>
    %8 = vector.multi_reduction <add>, %7, %cst_2 [1] : vector<64x32xf32> to vector<64xf32>
    %9 = vector.shape_cast %8 : vector<64xf32> to vector<64x1xf32>
    %cst_3 = arith.constant 3.200000e+01 : f32
    %10 = vector.broadcast %cst_3 : f32 to vector<64x1xf32>
    %11 = arith.divf %9, %10 : vector<64x1xf32>
    %12 = vector.broadcast %4 : vector<64x1xf32> to vector<64x32xf32>
    %13 = arith.subf %0, %12 : vector<64x32xf32>
    %cst_4 = arith.constant 9.99999974E-6 : f32
    %14 = vector.broadcast %cst_4 : f32 to vector<64x1xf32>
    %15 = arith.addf %11, %14 : vector<64x1xf32>
    %16 = math.rsqrt %15 : vector<64x1xf32>
    %17 = vector.broadcast %16 : vector<64x1xf32> to vector<64x32xf32>
    %18 = arith.mulf %13, %17 : vector<64x32xf32>
    %c0_5 = arith.constant 0 : index
    %c0_6 = arith.constant 0 : index
    %19 = vector.load %arg2[%c0_5, %c0_6] : memref<1x32xf32, #tpu.memory_space<vmem>>, vector<1x32xf32>
    %20 = vector.broadcast %19 : vector<1x32xf32> to vector<64x32xf32>
    %21 = arith.mulf %18, %20 : vector<64x32xf32>
    %c0_7 = arith.constant 0 : index
    %c0_8 = arith.constant 0 : index
    %22 = vector.load %arg3[%c0_7, %c0_8] : memref<1x32xf32, #tpu.memory_space<vmem>>, vector<1x32xf32>
    %23 = vector.broadcast %22 : vector<1x32xf32> to vector<64x32xf32>
    %24 = arith.addf %21, %23 : vector<64x32xf32>
    %c0_9 = arith.constant 0 : index
    %c0_10 = arith.constant 0 : index
    %25 = vector.load %arg4[%c0_9, %c0_10] : memref<32x32xf32, #tpu.memory_space<vmem>>, vector<32x32xf32>
    %cst_11 = arith.constant dense<0.000000e+00> : vector<64x32xf32>
    %26 = tpu.matmul %24, %25, %cst_11 {dimension_numbers = #tpu.dot_dimension_numbers<[1], [0], [0], [1], [0, 0, 1, 1], [], []>} : vector<64x32xf32>, vector<32x32xf32>, vector<64x32xf32> -> vector<64x32xf32>
    %c0_12 = arith.constant 0 : index
    %c0_13 = arith.constant 0 : index
    %27 = vector.load %arg5[%c0_12, %c0_13] : memref<1x32xf32, #tpu.memory_space<vmem>>, vector<1x32xf32>
    %28 = vector.broadcast %27 : vector<1x32xf32> to vector<64x32xf32>
    %29 = arith.addf %26, %28 : vector<64x32xf32>
    %c0_14 = arith.constant 0 : index
    %c0_15 = arith.constant 0 : index
    %30 = vector.load %arg6[%c0_14, %c0_15] : memref<64x32xf32, #tpu.memory_space<vmem>>, vector<64x32xf32>
    tpu.vector_store %arg6[%c0_14, %c0_15], %29 {strides = array<i32>} : memref<64x32xf32, #tpu.memory_space<vmem>>, vector<64x32xf32>,
    return
  }
  func.func @transform_0(%arg0: i32) -> (i32, i32) {
    %c0_i32 = arith.constant 0 : i32
    %c0_i32_0 = arith.constant 0 : i32
    return %arg0, %c0_i32 : i32, i32
  }
  func.func @transform_1(%arg0: i32) -> (i32, i32) {
    %c0_i32 = arith.constant 0 : i32
    %c0_i32_0 = arith.constant 0 : i32
    %c0_i32_1 = arith.constant 0 : i32
    return %c0_i32, %c0_i32_0 : i32, i32
  }
  func.func @transform_2(%arg0: i32) -> (i32, i32) {
    %c0_i32 = arith.constant 0 : i32
    %c0_i32_0 = arith.constant 0 : i32
    %c0_i32_1 = arith.constant 0 : i32
    return %c0_i32, %c0_i32_0 : i32, i32
  }
  func.func @transform_3(%arg0: i32) -> (i32, i32) {
    %c0_i32 = arith.constant 0 : i32
    %c0_i32_0 = arith.constant 0 : i32
    %c0_i32_1 = arith.constant 0 : i32
    return %c0_i32, %c0_i32_0 : i32, i32
  }
  func.func @transform_4(%arg0: i32) -> (i32, i32) {
    %c0_i32 = arith.constant 0 : i32
    %c0_i32_0 = arith.constant 0 : i32
    %c0_i32_1 = arith.constant 0 : i32
    return %c0_i32, %c0_i32_0 : i32, i32
  }
  func.func @transform_5(%arg0: i32) -> (i32, i32) {
    %c0_i32 = arith.constant 0 : i32
    %c0_i32_0 = arith.constant 0 : i32
    return %arg0, %c0_i32 : i32, i32
  }
}

module attributes {stable_mosaic.version = 11 : i64} {
  func.func @_linear_nobias_kernel(%arg0: i32, %arg1: memref<64x36xf32, #tpu.memory_space<vmem>>, %arg2: memref<36x32xf32, #tpu.memory_space<vmem>>, %arg3: memref<64x32xf32, #tpu.memory_space<vmem>>) attributes {dimension_semantics = [#tpu.dimension_semantics<parallel>], iteration_bounds = array<i64: 1>, scalar_prefetch = 0 : i64, scratch_operands = 0 : i64, tpu.core_type = #tpu.core_type<tc>, window_params = [{transform_indices = @transform_0, window_bounds = array<i64: 64, 36>}, {pipeline_mode = #tpu.pipeline_mode<synchronous>, transform_indices = @transform_1, window_bounds = array<i64: 36, 32>}, {transform_indices = @transform_2, window_bounds = array<i64: 64, 32>}]} {
    %c0 = arith.constant 0 : index
    %c0_0 = arith.constant 0 : index
    %0 = vector.load %arg1[%c0, %c0_0] : memref<64x36xf32, #tpu.memory_space<vmem>>, vector<64x36xf32>
    %c0_1 = arith.constant 0 : index
    %c0_2 = arith.constant 0 : index
    %1 = vector.load %arg2[%c0_1, %c0_2] : memref<36x32xf32, #tpu.memory_space<vmem>>, vector<36x32xf32>
    %cst = arith.constant dense<0.000000e+00> : vector<64x32xf32>
    %2 = tpu.matmul %0, %1, %cst {dimension_numbers = #tpu.dot_dimension_numbers<[1], [0], [0], [1], [0, 0, 1, 1], [], []>} : vector<64x36xf32>, vector<36x32xf32>, vector<64x32xf32> -> vector<64x32xf32>
    %c0_3 = arith.constant 0 : index
    %c0_4 = arith.constant 0 : index
    %3 = vector.load %arg3[%c0_3, %c0_4] : memref<64x32xf32, #tpu.memory_space<vmem>>, vector<64x32xf32>
    tpu.vector_store %arg3[%c0_3, %c0_4], %2 {strides = array<i32>} : memref<64x32xf32, #tpu.memory_space<vmem>>, vector<64x32xf32>,
    return
  }
  func.func @transform_0(%arg0: i32) -> (i32, i32) {
    %c0_i32 = arith.constant 0 : i32
    %c0_i32_0 = arith.constant 0 : i32
    return %arg0, %c0_i32 : i32, i32
  }
  func.func @transform_1(%arg0: i32) -> (i32, i32) {
    %c0_i32 = arith.constant 0 : i32
    %c0_i32_0 = arith.constant 0 : i32
    %c0_i32_1 = arith.constant 0 : i32
    return %c0_i32, %c0_i32_0 : i32, i32
  }
  func.func @transform_2(%arg0: i32) -> (i32, i32) {
    %c0_i32 = arith.constant 0 : i32
    %c0_i32_0 = arith.constant 0 : i32
    return %arg0, %c0_i32 : i32, i32
  }
}

module attributes {stable_mosaic.version = 11 : i64} {
  func.func @_ln_linear_nobias_kernel(%arg0: i32, %arg1: memref<64x32xf32, #tpu.memory_space<vmem>>, %arg2: memref<1x32xf32, #tpu.memory_space<vmem>>, %arg3: memref<1x32xf32, #tpu.memory_space<vmem>>, %arg4: memref<32x4xf32, #tpu.memory_space<vmem>>, %arg5: memref<64x4xf32, #tpu.memory_space<vmem>>) attributes {dimension_semantics = [#tpu.dimension_semantics<parallel>], iteration_bounds = array<i64: 1>, scalar_prefetch = 0 : i64, scratch_operands = 0 : i64, tpu.core_type = #tpu.core_type<tc>, window_params = [{transform_indices = @transform_0, window_bounds = array<i64: 64, 32>}, {pipeline_mode = #tpu.pipeline_mode<synchronous>, transform_indices = @transform_1, window_bounds = array<i64: 1, 32>}, {pipeline_mode = #tpu.pipeline_mode<synchronous>, transform_indices = @transform_2, window_bounds = array<i64: 1, 32>}, {pipeline_mode = #tpu.pipeline_mode<synchronous>, transform_indices = @transform_3, window_bounds = array<i64: 32, 4>}, {transform_indices = @transform_4, window_bounds = array<i64: 64, 4>}]} {
    %c0 = arith.constant 0 : index
    %c0_0 = arith.constant 0 : index
    %0 = vector.load %arg1[%c0, %c0_0] : memref<64x32xf32, #tpu.memory_space<vmem>>, vector<64x32xf32>
    %cst = arith.constant dense<0.000000e+00> : vector<64xf32>
    %1 = vector.multi_reduction <add>, %0, %cst [1] : vector<64x32xf32> to vector<64xf32>
    %2 = vector.shape_cast %1 : vector<64xf32> to vector<64x1xf32>
    %cst_1 = arith.constant 3.200000e+01 : f32
    %3 = vector.broadcast %cst_1 : f32 to vector<64x1xf32>
    %4 = arith.divf %2, %3 : vector<64x1xf32>
    %5 = vector.broadcast %4 : vector<64x1xf32> to vector<64x32xf32>
    %6 = arith.subf %0, %5 : vector<64x32xf32>
    %7 = arith.mulf %6, %6 : vector<64x32xf32>
    %cst_2 = arith.constant dense<0.000000e+00> : vector<64xf32>
    %8 = vector.multi_reduction <add>, %7, %cst_2 [1] : vector<64x32xf32> to vector<64xf32>
    %9 = vector.shape_cast %8 : vector<64xf32> to vector<64x1xf32>
    %cst_3 = arith.constant 3.200000e+01 : f32
    %10 = vector.broadcast %cst_3 : f32 to vector<64x1xf32>
    %11 = arith.divf %9, %10 : vector<64x1xf32>
    %12 = vector.broadcast %4 : vector<64x1xf32> to vector<64x32xf32>
    %13 = arith.subf %0, %12 : vector<64x32xf32>
    %cst_4 = arith.constant 9.99999974E-6 : f32
    %14 = vector.broadcast %cst_4 : f32 to vector<64x1xf32>
    %15 = arith.addf %11, %14 : vector<64x1xf32>
    %16 = math.rsqrt %15 : vector<64x1xf32>
    %17 = vector.broadcast %16 : vector<64x1xf32> to vector<64x32xf32>
    %18 = arith.mulf %13, %17 : vector<64x32xf32>
    %c0_5 = arith.constant 0 : index
    %c0_6 = arith.constant 0 : index
    %19 = vector.load %arg2[%c0_5, %c0_6] : memref<1x32xf32, #tpu.memory_space<vmem>>, vector<1x32xf32>
    %20 = vector.broadcast %19 : vector<1x32xf32> to vector<64x32xf32>
    %21 = arith.mulf %18, %20 : vector<64x32xf32>
    %c0_7 = arith.constant 0 : index
    %c0_8 = arith.constant 0 : index
    %22 = vector.load %arg3[%c0_7, %c0_8] : memref<1x32xf32, #tpu.memory_space<vmem>>, vector<1x32xf32>
    %23 = vector.broadcast %22 : vector<1x32xf32> to vector<64x32xf32>
    %24 = arith.addf %21, %23 : vector<64x32xf32>
    %c0_9 = arith.constant 0 : index
    %c0_10 = arith.constant 0 : index
    %25 = vector.load %arg4[%c0_9, %c0_10] : memref<32x4xf32, #tpu.memory_space<vmem>>, vector<32x4xf32>
    %cst_11 = arith.constant dense<0.000000e+00> : vector<64x4xf32>
    %26 = tpu.matmul %24, %25, %cst_11 {dimension_numbers = #tpu.dot_dimension_numbers<[1], [0], [0], [1], [0, 0, 1, 1], [], []>} : vector<64x32xf32>, vector<32x4xf32>, vector<64x4xf32> -> vector<64x4xf32>
    %c0_12 = arith.constant 0 : index
    %c0_13 = arith.constant 0 : index
    %27 = vector.load %arg5[%c0_12, %c0_13] : memref<64x4xf32, #tpu.memory_space<vmem>>, vector<64x4xf32>
    tpu.vector_store %arg5[%c0_12, %c0_13], %26 {strides = array<i32>} : memref<64x4xf32, #tpu.memory_space<vmem>>, vector<64x4xf32>,
    return
  }
  func.func @transform_0(%arg0: i32) -> (i32, i32) {
    %c0_i32 = arith.constant 0 : i32
    %c0_i32_0 = arith.constant 0 : i32
    return %arg0, %c0_i32 : i32, i32
  }
  func.func @transform_1(%arg0: i32) -> (i32, i32) {
    %c0_i32 = arith.constant 0 : i32
    %c0_i32_0 = arith.constant 0 : i32
    %c0_i32_1 = arith.constant 0 : i32
    return %c0_i32, %c0_i32_0 : i32, i32
  }
  func.func @transform_2(%arg0: i32) -> (i32, i32) {
    %c0_i32 = arith.constant 0 : i32
    %c0_i32_0 = arith.constant 0 : i32
    %c0_i32_1 = arith.constant 0 : i32
    return %c0_i32, %c0_i32_0 : i32, i32
  }
  func.func @transform_3(%arg0: i32) -> (i32, i32) {
    %c0_i32 = arith.constant 0 : i32
    %c0_i32_0 = arith.constant 0 : i32
    %c0_i32_1 = arith.constant 0 : i32
    return %c0_i32, %c0_i32_0 : i32, i32
  }
  func.func @transform_4(%arg0: i32) -> (i32, i32) {
    %c0_i32 = arith.constant 0 : i32
    %c0_i32_0 = arith.constant 0 : i32
    return %arg0, %c0_i32 : i32, i32
  }
}

module attributes {stable_mosaic.version = 11 : i64} {
  func.func @_ln_linear_kernel(%arg0: i32, %arg1: memref<8x16xf32, #tpu.memory_space<vmem>>, %arg2: memref<1x16xf32, #tpu.memory_space<vmem>>, %arg3: memref<1x16xf32, #tpu.memory_space<vmem>>, %arg4: memref<16x32xf32, #tpu.memory_space<vmem>>, %arg5: memref<1x32xf32, #tpu.memory_space<vmem>>, %arg6: memref<8x32xf32, #tpu.memory_space<vmem>>) attributes {dimension_semantics = [#tpu.dimension_semantics<parallel>], iteration_bounds = array<i64: 1>, scalar_prefetch = 0 : i64, scratch_operands = 0 : i64, tpu.core_type = #tpu.core_type<tc>, window_params = [{transform_indices = @transform_0, window_bounds = array<i64: 8, 16>}, {pipeline_mode = #tpu.pipeline_mode<synchronous>, transform_indices = @transform_1, window_bounds = array<i64: 1, 16>}, {pipeline_mode = #tpu.pipeline_mode<synchronous>, transform_indices = @transform_2, window_bounds = array<i64: 1, 16>}, {pipeline_mode = #tpu.pipeline_mode<synchronous>, transform_indices = @transform_3, window_bounds = array<i64: 16, 32>}, {pipeline_mode = #tpu.pipeline_mode<synchronous>, transform_indices = @transform_4, window_bounds = array<i64: 1, 32>}, {transform_indices = @transform_5, window_bounds = array<i64: 8, 32>}]} {
    %c0 = arith.constant 0 : index
    %c0_0 = arith.constant 0 : index
    %0 = vector.load %arg1[%c0, %c0_0] : memref<8x16xf32, #tpu.memory_space<vmem>>, vector<8x16xf32>
    %cst = arith.constant dense<0.000000e+00> : vector<8xf32>
    %1 = vector.multi_reduction <add>, %0, %cst [1] : vector<8x16xf32> to vector<8xf32>
    %2 = vector.shape_cast %1 : vector<8xf32> to vector<8x1xf32>
    %cst_1 = arith.constant 1.600000e+01 : f32
    %3 = vector.broadcast %cst_1 : f32 to vector<8x1xf32>
    %4 = arith.divf %2, %3 : vector<8x1xf32>
    %5 = vector.broadcast %4 : vector<8x1xf32> to vector<8x16xf32>
    %6 = arith.subf %0, %5 : vector<8x16xf32>
    %7 = arith.mulf %6, %6 : vector<8x16xf32>
    %cst_2 = arith.constant dense<0.000000e+00> : vector<8xf32>
    %8 = vector.multi_reduction <add>, %7, %cst_2 [1] : vector<8x16xf32> to vector<8xf32>
    %9 = vector.shape_cast %8 : vector<8xf32> to vector<8x1xf32>
    %cst_3 = arith.constant 1.600000e+01 : f32
    %10 = vector.broadcast %cst_3 : f32 to vector<8x1xf32>
    %11 = arith.divf %9, %10 : vector<8x1xf32>
    %12 = vector.broadcast %4 : vector<8x1xf32> to vector<8x16xf32>
    %13 = arith.subf %0, %12 : vector<8x16xf32>
    %cst_4 = arith.constant 9.99999974E-6 : f32
    %14 = vector.broadcast %cst_4 : f32 to vector<8x1xf32>
    %15 = arith.addf %11, %14 : vector<8x1xf32>
    %16 = math.rsqrt %15 : vector<8x1xf32>
    %17 = vector.broadcast %16 : vector<8x1xf32> to vector<8x16xf32>
    %18 = arith.mulf %13, %17 : vector<8x16xf32>
    %c0_5 = arith.constant 0 : index
    %c0_6 = arith.constant 0 : index
    %19 = vector.load %arg2[%c0_5, %c0_6] : memref<1x16xf32, #tpu.memory_space<vmem>>, vector<1x16xf32>
    %20 = vector.broadcast %19 : vector<1x16xf32> to vector<8x16xf32>
    %21 = arith.mulf %18, %20 : vector<8x16xf32>
    %c0_7 = arith.constant 0 : index
    %c0_8 = arith.constant 0 : index
    %22 = vector.load %arg3[%c0_7, %c0_8] : memref<1x16xf32, #tpu.memory_space<vmem>>, vector<1x16xf32>
    %23 = vector.broadcast %22 : vector<1x16xf32> to vector<8x16xf32>
    %24 = arith.addf %21, %23 : vector<8x16xf32>
    %c0_9 = arith.constant 0 : index
    %c0_10 = arith.constant 0 : index
    %25 = vector.load %arg4[%c0_9, %c0_10] : memref<16x32xf32, #tpu.memory_space<vmem>>, vector<16x32xf32>
    %cst_11 = arith.constant dense<0.000000e+00> : vector<8x32xf32>
    %26 = tpu.matmul %24, %25, %cst_11 {dimension_numbers = #tpu.dot_dimension_numbers<[1], [0], [0], [1], [0, 0, 1, 1], [], []>} : vector<8x16xf32>, vector<16x32xf32>, vector<8x32xf32> -> vector<8x32xf32>
    %c0_12 = arith.constant 0 : index
    %c0_13 = arith.constant 0 : index
    %27 = vector.load %arg5[%c0_12, %c0_13] : memref<1x32xf32, #tpu.memory_space<vmem>>, vector<1x32xf32>
    %28 = vector.broadcast %27 : vector<1x32xf32> to vector<8x32xf32>
    %29 = arith.addf %26, %28 : vector<8x32xf32>
    %c0_14 = arith.constant 0 : index
    %c0_15 = arith.constant 0 : index
    %30 = vector.load %arg6[%c0_14, %c0_15] : memref<8x32xf32, #tpu.memory_space<vmem>>, vector<8x32xf32>
    tpu.vector_store %arg6[%c0_14, %c0_15], %29 {strides = array<i32>} : memref<8x32xf32, #tpu.memory_space<vmem>>, vector<8x32xf32>,
    return
  }
  func.func @transform_0(%arg0: i32) -> (i32, i32) {
    %c0_i32 = arith.constant 0 : i32
    %c0_i32_0 = arith.constant 0 : i32
    return %arg0, %c0_i32 : i32, i32
  }
  func.func @transform_1(%arg0: i32) -> (i32, i32) {
    %c0_i32 = arith.constant 0 : i32
    %c0_i32_0 = arith.constant 0 : i32
    %c0_i32_1 = arith.constant 0 : i32
    return %c0_i32, %c0_i32_0 : i32, i32
  }
  func.func @transform_2(%arg0: i32) -> (i32, i32) {
    %c0_i32 = arith.constant 0 : i32
    %c0_i32_0 = arith.constant 0 : i32
    %c0_i32_1 = arith.constant 0 : i32
    return %c0_i32, %c0_i32_0 : i32, i32
  }
  func.func @transform_3(%arg0: i32) -> (i32, i32) {
    %c0_i32 = arith.constant 0 : i32
    %c0_i32_0 = arith.constant 0 : i32
    %c0_i32_1 = arith.constant 0 : i32
    return %c0_i32, %c0_i32_0 : i32, i32
  }
  func.func @transform_4(%arg0: i32) -> (i32, i32) {
    %c0_i32 = arith.constant 0 : i32
    %c0_i32_0 = arith.constant 0 : i32
    %c0_i32_1 = arith.constant 0 : i32
    return %c0_i32, %c0_i32_0 : i32, i32
  }
  func.func @transform_5(%arg0: i32) -> (i32, i32) {
    %c0_i32 = arith.constant 0 : i32
    %c0_i32_0 = arith.constant 0 : i32
    return %arg0, %c0_i32 : i32, i32
  }
}

module attributes {stable_mosaic.version = 11 : i64} {
  func.func @_linear_kernel(%arg0: i32, %arg1: memref<32x32xf32, #tpu.memory_space<vmem>>, %arg2: memref<32x16xf32, #tpu.memory_space<vmem>>, %arg3: memref<1x16xf32, #tpu.memory_space<vmem>>, %arg4: memref<32x16xf32, #tpu.memory_space<vmem>>) attributes {dimension_semantics = [#tpu.dimension_semantics<parallel>], iteration_bounds = array<i64: 1>, scalar_prefetch = 0 : i64, scratch_operands = 0 : i64, tpu.core_type = #tpu.core_type<tc>, window_params = [{transform_indices = @transform_0, window_bounds = array<i64: 32, 32>}, {pipeline_mode = #tpu.pipeline_mode<synchronous>, transform_indices = @transform_1, window_bounds = array<i64: 32, 16>}, {pipeline_mode = #tpu.pipeline_mode<synchronous>, transform_indices = @transform_2, window_bounds = array<i64: 1, 16>}, {transform_indices = @transform_3, window_bounds = array<i64: 32, 16>}]} {
    %c0 = arith.constant 0 : index
    %c0_0 = arith.constant 0 : index
    %0 = vector.load %arg1[%c0, %c0_0] : memref<32x32xf32, #tpu.memory_space<vmem>>, vector<32x32xf32>
    %c0_1 = arith.constant 0 : index
    %c0_2 = arith.constant 0 : index
    %1 = vector.load %arg2[%c0_1, %c0_2] : memref<32x16xf32, #tpu.memory_space<vmem>>, vector<32x16xf32>
    %cst = arith.constant dense<0.000000e+00> : vector<32x16xf32>
    %2 = tpu.matmul %0, %1, %cst {dimension_numbers = #tpu.dot_dimension_numbers<[1], [0], [0], [1], [0, 0, 1, 1], [], []>} : vector<32x32xf32>, vector<32x16xf32>, vector<32x16xf32> -> vector<32x16xf32>
    %c0_3 = arith.constant 0 : index
    %c0_4 = arith.constant 0 : index
    %3 = vector.load %arg3[%c0_3, %c0_4] : memref<1x16xf32, #tpu.memory_space<vmem>>, vector<1x16xf32>
    %4 = vector.broadcast %3 : vector<1x16xf32> to vector<32x16xf32>
    %5 = arith.addf %2, %4 : vector<32x16xf32>
    %c0_5 = arith.constant 0 : index
    %c0_6 = arith.constant 0 : index
    %6 = vector.load %arg4[%c0_5, %c0_6] : memref<32x16xf32, #tpu.memory_space<vmem>>, vector<32x16xf32>
    tpu.vector_store %arg4[%c0_5, %c0_6], %5 {strides = array<i32>} : memref<32x16xf32, #tpu.memory_space<vmem>>, vector<32x16xf32>,
    return
  }
  func.func @transform_0(%arg0: i32) -> (i32, i32) {
    %c0_i32 = arith.constant 0 : i32
    %c0_i32_0 = arith.constant 0 : i32
    return %arg0, %c0_i32 : i32, i32
  }
  func.func @transform_1(%arg0: i32) -> (i32, i32) {
    %c0_i32 = arith.constant 0 : i32
    %c0_i32_0 = arith.constant 0 : i32
    %c0_i32_1 = arith.constant 0 : i32
    return %c0_i32, %c0_i32_0 : i32, i32
  }
  func.func @transform_2(%arg0: i32) -> (i32, i32) {
    %c0_i32 = arith.constant 0 : i32
    %c0_i32_0 = arith.constant 0 : i32
    %c0_i32_1 = arith.constant 0 : i32
    return %c0_i32, %c0_i32_0 : i32, i32
  }
  func.func @transform_3(%arg0: i32) -> (i32, i32) {
    %c0_i32 = arith.constant 0 : i32
    %c0_i32_0 = arith.constant 0 : i32
    return %arg0, %c0_i32 : i32, i32
  }
}

module attributes {stable_mosaic.version = 11 : i64} {
  func.func @_ln_linear_kernel(%arg0: i32, %arg1: memref<32x16xf32, #tpu.memory_space<vmem>>, %arg2: memref<1x16xf32, #tpu.memory_space<vmem>>, %arg3: memref<1x16xf32, #tpu.memory_space<vmem>>, %arg4: memref<16x80xf32, #tpu.memory_space<vmem>>, %arg5: memref<1x80xf32, #tpu.memory_space<vmem>>, %arg6: memref<32x80xf32, #tpu.memory_space<vmem>>) attributes {dimension_semantics = [#tpu.dimension_semantics<parallel>], iteration_bounds = array<i64: 1>, scalar_prefetch = 0 : i64, scratch_operands = 0 : i64, tpu.core_type = #tpu.core_type<tc>, window_params = [{transform_indices = @transform_0, window_bounds = array<i64: 32, 16>}, {pipeline_mode = #tpu.pipeline_mode<synchronous>, transform_indices = @transform_1, window_bounds = array<i64: 1, 16>}, {pipeline_mode = #tpu.pipeline_mode<synchronous>, transform_indices = @transform_2, window_bounds = array<i64: 1, 16>}, {pipeline_mode = #tpu.pipeline_mode<synchronous>, transform_indices = @transform_3, window_bounds = array<i64: 16, 80>}, {pipeline_mode = #tpu.pipeline_mode<synchronous>, transform_indices = @transform_4, window_bounds = array<i64: 1, 80>}, {transform_indices = @transform_5, window_bounds = array<i64: 32, 80>}]} {
    %c0 = arith.constant 0 : index
    %c0_0 = arith.constant 0 : index
    %0 = vector.load %arg1[%c0, %c0_0] : memref<32x16xf32, #tpu.memory_space<vmem>>, vector<32x16xf32>
    %cst = arith.constant dense<0.000000e+00> : vector<32xf32>
    %1 = vector.multi_reduction <add>, %0, %cst [1] : vector<32x16xf32> to vector<32xf32>
    %2 = vector.shape_cast %1 : vector<32xf32> to vector<32x1xf32>
    %cst_1 = arith.constant 1.600000e+01 : f32
    %3 = vector.broadcast %cst_1 : f32 to vector<32x1xf32>
    %4 = arith.divf %2, %3 : vector<32x1xf32>
    %5 = vector.broadcast %4 : vector<32x1xf32> to vector<32x16xf32>
    %6 = arith.subf %0, %5 : vector<32x16xf32>
    %7 = arith.mulf %6, %6 : vector<32x16xf32>
    %cst_2 = arith.constant dense<0.000000e+00> : vector<32xf32>
    %8 = vector.multi_reduction <add>, %7, %cst_2 [1] : vector<32x16xf32> to vector<32xf32>
    %9 = vector.shape_cast %8 : vector<32xf32> to vector<32x1xf32>
    %cst_3 = arith.constant 1.600000e+01 : f32
    %10 = vector.broadcast %cst_3 : f32 to vector<32x1xf32>
    %11 = arith.divf %9, %10 : vector<32x1xf32>
    %12 = vector.broadcast %4 : vector<32x1xf32> to vector<32x16xf32>
    %13 = arith.subf %0, %12 : vector<32x16xf32>
    %cst_4 = arith.constant 9.99999974E-6 : f32
    %14 = vector.broadcast %cst_4 : f32 to vector<32x1xf32>
    %15 = arith.addf %11, %14 : vector<32x1xf32>
    %16 = math.rsqrt %15 : vector<32x1xf32>
    %17 = vector.broadcast %16 : vector<32x1xf32> to vector<32x16xf32>
    %18 = arith.mulf %13, %17 : vector<32x16xf32>
    %c0_5 = arith.constant 0 : index
    %c0_6 = arith.constant 0 : index
    %19 = vector.load %arg2[%c0_5, %c0_6] : memref<1x16xf32, #tpu.memory_space<vmem>>, vector<1x16xf32>
    %20 = vector.broadcast %19 : vector<1x16xf32> to vector<32x16xf32>
    %21 = arith.mulf %18, %20 : vector<32x16xf32>
    %c0_7 = arith.constant 0 : index
    %c0_8 = arith.constant 0 : index
    %22 = vector.load %arg3[%c0_7, %c0_8] : memref<1x16xf32, #tpu.memory_space<vmem>>, vector<1x16xf32>
    %23 = vector.broadcast %22 : vector<1x16xf32> to vector<32x16xf32>
    %24 = arith.addf %21, %23 : vector<32x16xf32>
    %c0_9 = arith.constant 0 : index
    %c0_10 = arith.constant 0 : index
    %25 = vector.load %arg4[%c0_9, %c0_10] : memref<16x80xf32, #tpu.memory_space<vmem>>, vector<16x80xf32>
    %cst_11 = arith.constant dense<0.000000e+00> : vector<32x80xf32>
    %26 = tpu.matmul %24, %25, %cst_11 {dimension_numbers = #tpu.dot_dimension_numbers<[1], [0], [0], [1], [0, 0, 1, 1], [], []>} : vector<32x16xf32>, vector<16x80xf32>, vector<32x80xf32> -> vector<32x80xf32>
    %c0_12 = arith.constant 0 : index
    %c0_13 = arith.constant 0 : index
    %27 = vector.load %arg5[%c0_12, %c0_13] : memref<1x80xf32, #tpu.memory_space<vmem>>, vector<1x80xf32>
    %28 = vector.broadcast %27 : vector<1x80xf32> to vector<32x80xf32>
    %29 = arith.addf %26, %28 : vector<32x80xf32>
    %c0_14 = arith.constant 0 : index
    %c0_15 = arith.constant 0 : index
    %30 = vector.load %arg6[%c0_14, %c0_15] : memref<32x80xf32, #tpu.memory_space<vmem>>, vector<32x80xf32>
    tpu.vector_store %arg6[%c0_14, %c0_15], %29 {strides = array<i32>} : memref<32x80xf32, #tpu.memory_space<vmem>>, vector<32x80xf32>,
    return
  }
  func.func @transform_0(%arg0: i32) -> (i32, i32) {
    %c0_i32 = arith.constant 0 : i32
    %c0_i32_0 = arith.constant 0 : i32
    return %arg0, %c0_i32 : i32, i32
  }
  func.func @transform_1(%arg0: i32) -> (i32, i32) {
    %c0_i32 = arith.constant 0 : i32
    %c0_i32_0 = arith.constant 0 : i32
    %c0_i32_1 = arith.constant 0 : i32
    return %c0_i32, %c0_i32_0 : i32, i32
  }
  func.func @transform_2(%arg0: i32) -> (i32, i32) {
    %c0_i32 = arith.constant 0 : i32
    %c0_i32_0 = arith.constant 0 : i32
    %c0_i32_1 = arith.constant 0 : i32
    return %c0_i32, %c0_i32_0 : i32, i32
  }
  func.func @transform_3(%arg0: i32) -> (i32, i32) {
    %c0_i32 = arith.constant 0 : i32
    %c0_i32_0 = arith.constant 0 : i32
    %c0_i32_1 = arith.constant 0 : i32
    return %c0_i32, %c0_i32_0 : i32, i32
  }
  func.func @transform_4(%arg0: i32) -> (i32, i32) {
    %c0_i32 = arith.constant 0 : i32
    %c0_i32_0 = arith.constant 0 : i32
    %c0_i32_1 = arith.constant 0 : i32
    return %c0_i32, %c0_i32_0 : i32, i32
  }
  func.func @transform_5(%arg0: i32) -> (i32, i32) {
    %c0_i32 = arith.constant 0 : i32
    %c0_i32_0 = arith.constant 0 : i32
    return %arg0, %c0_i32 : i32, i32
  }
}

module attributes {stable_mosaic.version = 11 : i64} {
  func.func @_ln_linear_kernel(%arg0: i32, %arg1: memref<32x16xf32, #tpu.memory_space<vmem>>, %arg2: memref<1x16xf32, #tpu.memory_space<vmem>>, %arg3: memref<1x16xf32, #tpu.memory_space<vmem>>, %arg4: memref<16x8xf32, #tpu.memory_space<vmem>>, %arg5: memref<1x8xf32, #tpu.memory_space<vmem>>, %arg6: memref<32x8xf32, #tpu.memory_space<vmem>>) attributes {dimension_semantics = [#tpu.dimension_semantics<parallel>], iteration_bounds = array<i64: 1>, scalar_prefetch = 0 : i64, scratch_operands = 0 : i64, tpu.core_type = #tpu.core_type<tc>, window_params = [{transform_indices = @transform_0, window_bounds = array<i64: 32, 16>}, {pipeline_mode = #tpu.pipeline_mode<synchronous>, transform_indices = @transform_1, window_bounds = array<i64: 1, 16>}, {pipeline_mode = #tpu.pipeline_mode<synchronous>, transform_indices = @transform_2, window_bounds = array<i64: 1, 16>}, {pipeline_mode = #tpu.pipeline_mode<synchronous>, transform_indices = @transform_3, window_bounds = array<i64: 16, 8>}, {pipeline_mode = #tpu.pipeline_mode<synchronous>, transform_indices = @transform_4, window_bounds = array<i64: 1, 8>}, {transform_indices = @transform_5, window_bounds = array<i64: 32, 8>}]} {
    %c0 = arith.constant 0 : index
    %c0_0 = arith.constant 0 : index
    %0 = vector.load %arg1[%c0, %c0_0] : memref<32x16xf32, #tpu.memory_space<vmem>>, vector<32x16xf32>
    %cst = arith.constant dense<0.000000e+00> : vector<32xf32>
    %1 = vector.multi_reduction <add>, %0, %cst [1] : vector<32x16xf32> to vector<32xf32>
    %2 = vector.shape_cast %1 : vector<32xf32> to vector<32x1xf32>
    %cst_1 = arith.constant 1.600000e+01 : f32
    %3 = vector.broadcast %cst_1 : f32 to vector<32x1xf32>
    %4 = arith.divf %2, %3 : vector<32x1xf32>
    %5 = vector.broadcast %4 : vector<32x1xf32> to vector<32x16xf32>
    %6 = arith.subf %0, %5 : vector<32x16xf32>
    %7 = arith.mulf %6, %6 : vector<32x16xf32>
    %cst_2 = arith.constant dense<0.000000e+00> : vector<32xf32>
    %8 = vector.multi_reduction <add>, %7, %cst_2 [1] : vector<32x16xf32> to vector<32xf32>
    %9 = vector.shape_cast %8 : vector<32xf32> to vector<32x1xf32>
    %cst_3 = arith.constant 1.600000e+01 : f32
    %10 = vector.broadcast %cst_3 : f32 to vector<32x1xf32>
    %11 = arith.divf %9, %10 : vector<32x1xf32>
    %12 = vector.broadcast %4 : vector<32x1xf32> to vector<32x16xf32>
    %13 = arith.subf %0, %12 : vector<32x16xf32>
    %cst_4 = arith.constant 9.99999974E-6 : f32
    %14 = vector.broadcast %cst_4 : f32 to vector<32x1xf32>
    %15 = arith.addf %11, %14 : vector<32x1xf32>
    %16 = math.rsqrt %15 : vector<32x1xf32>
    %17 = vector.broadcast %16 : vector<32x1xf32> to vector<32x16xf32>
    %18 = arith.mulf %13, %17 : vector<32x16xf32>
    %c0_5 = arith.constant 0 : index
    %c0_6 = arith.constant 0 : index
    %19 = vector.load %arg2[%c0_5, %c0_6] : memref<1x16xf32, #tpu.memory_space<vmem>>, vector<1x16xf32>
    %20 = vector.broadcast %19 : vector<1x16xf32> to vector<32x16xf32>
    %21 = arith.mulf %18, %20 : vector<32x16xf32>
    %c0_7 = arith.constant 0 : index
    %c0_8 = arith.constant 0 : index
    %22 = vector.load %arg3[%c0_7, %c0_8] : memref<1x16xf32, #tpu.memory_space<vmem>>, vector<1x16xf32>
    %23 = vector.broadcast %22 : vector<1x16xf32> to vector<32x16xf32>
    %24 = arith.addf %21, %23 : vector<32x16xf32>
    %c0_9 = arith.constant 0 : index
    %c0_10 = arith.constant 0 : index
    %25 = vector.load %arg4[%c0_9, %c0_10] : memref<16x8xf32, #tpu.memory_space<vmem>>, vector<16x8xf32>
    %cst_11 = arith.constant dense<0.000000e+00> : vector<32x8xf32>
    %26 = tpu.matmul %24, %25, %cst_11 {dimension_numbers = #tpu.dot_dimension_numbers<[1], [0], [0], [1], [0, 0, 1, 1], [], []>} : vector<32x16xf32>, vector<16x8xf32>, vector<32x8xf32> -> vector<32x8xf32>
    %c0_12 = arith.constant 0 : index
    %c0_13 = arith.constant 0 : index
    %27 = vector.load %arg5[%c0_12, %c0_13] : memref<1x8xf32, #tpu.memory_space<vmem>>, vector<1x8xf32>
    %28 = vector.broadcast %27 : vector<1x8xf32> to vector<32x8xf32>
    %29 = arith.addf %26, %28 : vector<32x8xf32>
    %c0_14 = arith.constant 0 : index
    %c0_15 = arith.constant 0 : index
    %30 = vector.load %arg6[%c0_14, %c0_15] : memref<32x8xf32, #tpu.memory_space<vmem>>, vector<32x8xf32>
    tpu.vector_store %arg6[%c0_14, %c0_15], %29 {strides = array<i32>} : memref<32x8xf32, #tpu.memory_space<vmem>>, vector<32x8xf32>,
    return
  }
  func.func @transform_0(%arg0: i32) -> (i32, i32) {
    %c0_i32 = arith.constant 0 : i32
    %c0_i32_0 = arith.constant 0 : i32
    return %arg0, %c0_i32 : i32, i32
  }
  func.func @transform_1(%arg0: i32) -> (i32, i32) {
    %c0_i32 = arith.constant 0 : i32
    %c0_i32_0 = arith.constant 0 : i32
    %c0_i32_1 = arith.constant 0 : i32
    return %c0_i32, %c0_i32_0 : i32, i32
  }
  func.func @transform_2(%arg0: i32) -> (i32, i32) {
    %c0_i32 = arith.constant 0 : i32
    %c0_i32_0 = arith.constant 0 : i32
    %c0_i32_1 = arith.constant 0 : i32
    return %c0_i32, %c0_i32_0 : i32, i32
  }
  func.func @transform_3(%arg0: i32) -> (i32, i32) {
    %c0_i32 = arith.constant 0 : i32
    %c0_i32_0 = arith.constant 0 : i32
    %c0_i32_1 = arith.constant 0 : i32
    return %c0_i32, %c0_i32_0 : i32, i32
  }
  func.func @transform_4(%arg0: i32) -> (i32, i32) {
    %c0_i32 = arith.constant 0 : i32
    %c0_i32_0 = arith.constant 0 : i32
    %c0_i32_1 = arith.constant 0 : i32
    return %c0_i32, %c0_i32_0 : i32, i32
  }
  func.func @transform_5(%arg0: i32) -> (i32, i32) {
    %c0_i32 = arith.constant 0 : i32
    %c0_i32_0 = arith.constant 0 : i32
    return %arg0, %c0_i32 : i32, i32
  }
}

module attributes {stable_mosaic.version = 11 : i64} {
  func.func @_linear_kernel(%arg0: i32, %arg1: memref<32x64xf32, #tpu.memory_space<vmem>>, %arg2: memref<64x16xf32, #tpu.memory_space<vmem>>, %arg3: memref<1x16xf32, #tpu.memory_space<vmem>>, %arg4: memref<32x16xf32, #tpu.memory_space<vmem>>) attributes {dimension_semantics = [#tpu.dimension_semantics<parallel>], iteration_bounds = array<i64: 1>, scalar_prefetch = 0 : i64, scratch_operands = 0 : i64, tpu.core_type = #tpu.core_type<tc>, window_params = [{transform_indices = @transform_0, window_bounds = array<i64: 32, 64>}, {pipeline_mode = #tpu.pipeline_mode<synchronous>, transform_indices = @transform_1, window_bounds = array<i64: 64, 16>}, {pipeline_mode = #tpu.pipeline_mode<synchronous>, transform_indices = @transform_2, window_bounds = array<i64: 1, 16>}, {transform_indices = @transform_3, window_bounds = array<i64: 32, 16>}]} {
    %c0 = arith.constant 0 : index
    %c0_0 = arith.constant 0 : index
    %0 = vector.load %arg1[%c0, %c0_0] : memref<32x64xf32, #tpu.memory_space<vmem>>, vector<32x64xf32>
    %c0_1 = arith.constant 0 : index
    %c0_2 = arith.constant 0 : index
    %1 = vector.load %arg2[%c0_1, %c0_2] : memref<64x16xf32, #tpu.memory_space<vmem>>, vector<64x16xf32>
    %cst = arith.constant dense<0.000000e+00> : vector<32x16xf32>
    %2 = tpu.matmul %0, %1, %cst {dimension_numbers = #tpu.dot_dimension_numbers<[1], [0], [0], [1], [0, 0, 1, 1], [], []>} : vector<32x64xf32>, vector<64x16xf32>, vector<32x16xf32> -> vector<32x16xf32>
    %c0_3 = arith.constant 0 : index
    %c0_4 = arith.constant 0 : index
    %3 = vector.load %arg3[%c0_3, %c0_4] : memref<1x16xf32, #tpu.memory_space<vmem>>, vector<1x16xf32>
    %4 = vector.broadcast %3 : vector<1x16xf32> to vector<32x16xf32>
    %5 = arith.addf %2, %4 : vector<32x16xf32>
    %c0_5 = arith.constant 0 : index
    %c0_6 = arith.constant 0 : index
    %6 = vector.load %arg4[%c0_5, %c0_6] : memref<32x16xf32, #tpu.memory_space<vmem>>, vector<32x16xf32>
    tpu.vector_store %arg4[%c0_5, %c0_6], %5 {strides = array<i32>} : memref<32x16xf32, #tpu.memory_space<vmem>>, vector<32x16xf32>,
    return
  }
  func.func @transform_0(%arg0: i32) -> (i32, i32) {
    %c0_i32 = arith.constant 0 : i32
    %c0_i32_0 = arith.constant 0 : i32
    return %arg0, %c0_i32 : i32, i32
  }
  func.func @transform_1(%arg0: i32) -> (i32, i32) {
    %c0_i32 = arith.constant 0 : i32
    %c0_i32_0 = arith.constant 0 : i32
    %c0_i32_1 = arith.constant 0 : i32
    return %c0_i32, %c0_i32_0 : i32, i32
  }
  func.func @transform_2(%arg0: i32) -> (i32, i32) {
    %c0_i32 = arith.constant 0 : i32
    %c0_i32_0 = arith.constant 0 : i32
    %c0_i32_1 = arith.constant 0 : i32
    return %c0_i32, %c0_i32_0 : i32, i32
  }
  func.func @transform_3(%arg0: i32) -> (i32, i32) {
    %c0_i32 = arith.constant 0 : i32
    %c0_i32_0 = arith.constant 0 : i32
    return %arg0, %c0_i32 : i32, i32
  }
}

module attributes {stable_mosaic.version = 11 : i64} {
  func.func @_ln_linear_kernel(%arg0: i32, %arg1: memref<32x16xf32, #tpu.memory_space<vmem>>, %arg2: memref<1x16xf32, #tpu.memory_space<vmem>>, %arg3: memref<1x16xf32, #tpu.memory_space<vmem>>, %arg4: memref<16x64xf32, #tpu.memory_space<vmem>>, %arg5: memref<1x64xf32, #tpu.memory_space<vmem>>, %arg6: memref<32x64xf32, #tpu.memory_space<vmem>>) attributes {dimension_semantics = [#tpu.dimension_semantics<parallel>], iteration_bounds = array<i64: 1>, scalar_prefetch = 0 : i64, scratch_operands = 0 : i64, tpu.core_type = #tpu.core_type<tc>, window_params = [{transform_indices = @transform_0, window_bounds = array<i64: 32, 16>}, {pipeline_mode = #tpu.pipeline_mode<synchronous>, transform_indices = @transform_1, window_bounds = array<i64: 1, 16>}, {pipeline_mode = #tpu.pipeline_mode<synchronous>, transform_indices = @transform_2, window_bounds = array<i64: 1, 16>}, {pipeline_mode = #tpu.pipeline_mode<synchronous>, transform_indices = @transform_3, window_bounds = array<i64: 16, 64>}, {pipeline_mode = #tpu.pipeline_mode<synchronous>, transform_indices = @transform_4, window_bounds = array<i64: 1, 64>}, {transform_indices = @transform_5, window_bounds = array<i64: 32, 64>}]} {
    %c0 = arith.constant 0 : index
    %c0_0 = arith.constant 0 : index
    %0 = vector.load %arg1[%c0, %c0_0] : memref<32x16xf32, #tpu.memory_space<vmem>>, vector<32x16xf32>
    %cst = arith.constant dense<0.000000e+00> : vector<32xf32>
    %1 = vector.multi_reduction <add>, %0, %cst [1] : vector<32x16xf32> to vector<32xf32>
    %2 = vector.shape_cast %1 : vector<32xf32> to vector<32x1xf32>
    %cst_1 = arith.constant 1.600000e+01 : f32
    %3 = vector.broadcast %cst_1 : f32 to vector<32x1xf32>
    %4 = arith.divf %2, %3 : vector<32x1xf32>
    %5 = vector.broadcast %4 : vector<32x1xf32> to vector<32x16xf32>
    %6 = arith.subf %0, %5 : vector<32x16xf32>
    %7 = arith.mulf %6, %6 : vector<32x16xf32>
    %cst_2 = arith.constant dense<0.000000e+00> : vector<32xf32>
    %8 = vector.multi_reduction <add>, %7, %cst_2 [1] : vector<32x16xf32> to vector<32xf32>
    %9 = vector.shape_cast %8 : vector<32xf32> to vector<32x1xf32>
    %cst_3 = arith.constant 1.600000e+01 : f32
    %10 = vector.broadcast %cst_3 : f32 to vector<32x1xf32>
    %11 = arith.divf %9, %10 : vector<32x1xf32>
    %12 = vector.broadcast %4 : vector<32x1xf32> to vector<32x16xf32>
    %13 = arith.subf %0, %12 : vector<32x16xf32>
    %cst_4 = arith.constant 9.99999974E-6 : f32
    %14 = vector.broadcast %cst_4 : f32 to vector<32x1xf32>
    %15 = arith.addf %11, %14 : vector<32x1xf32>
    %16 = math.rsqrt %15 : vector<32x1xf32>
    %17 = vector.broadcast %16 : vector<32x1xf32> to vector<32x16xf32>
    %18 = arith.mulf %13, %17 : vector<32x16xf32>
    %c0_5 = arith.constant 0 : index
    %c0_6 = arith.constant 0 : index
    %19 = vector.load %arg2[%c0_5, %c0_6] : memref<1x16xf32, #tpu.memory_space<vmem>>, vector<1x16xf32>
    %20 = vector.broadcast %19 : vector<1x16xf32> to vector<32x16xf32>
    %21 = arith.mulf %18, %20 : vector<32x16xf32>
    %c0_7 = arith.constant 0 : index
    %c0_8 = arith.constant 0 : index
    %22 = vector.load %arg3[%c0_7, %c0_8] : memref<1x16xf32, #tpu.memory_space<vmem>>, vector<1x16xf32>
    %23 = vector.broadcast %22 : vector<1x16xf32> to vector<32x16xf32>
    %24 = arith.addf %21, %23 : vector<32x16xf32>
    %c0_9 = arith.constant 0 : index
    %c0_10 = arith.constant 0 : index
    %25 = vector.load %arg4[%c0_9, %c0_10] : memref<16x64xf32, #tpu.memory_space<vmem>>, vector<16x64xf32>
    %cst_11 = arith.constant dense<0.000000e+00> : vector<32x64xf32>
    %26 = tpu.matmul %24, %25, %cst_11 {dimension_numbers = #tpu.dot_dimension_numbers<[1], [0], [0], [1], [0, 0, 1, 1], [], []>} : vector<32x16xf32>, vector<16x64xf32>, vector<32x64xf32> -> vector<32x64xf32>
    %c0_12 = arith.constant 0 : index
    %c0_13 = arith.constant 0 : index
    %27 = vector.load %arg5[%c0_12, %c0_13] : memref<1x64xf32, #tpu.memory_space<vmem>>, vector<1x64xf32>
    %28 = vector.broadcast %27 : vector<1x64xf32> to vector<32x64xf32>
    %29 = arith.addf %26, %28 : vector<32x64xf32>
    %c0_14 = arith.constant 0 : index
    %c0_15 = arith.constant 0 : index
    %30 = vector.load %arg6[%c0_14, %c0_15] : memref<32x64xf32, #tpu.memory_space<vmem>>, vector<32x64xf32>
    tpu.vector_store %arg6[%c0_14, %c0_15], %29 {strides = array<i32>} : memref<32x64xf32, #tpu.memory_space<vmem>>, vector<32x64xf32>,
    return
  }
  func.func @transform_0(%arg0: i32) -> (i32, i32) {
    %c0_i32 = arith.constant 0 : i32
    %c0_i32_0 = arith.constant 0 : i32
    return %arg0, %c0_i32 : i32, i32
  }
  func.func @transform_1(%arg0: i32) -> (i32, i32) {
    %c0_i32 = arith.constant 0 : i32
    %c0_i32_0 = arith.constant 0 : i32
    %c0_i32_1 = arith.constant 0 : i32
    return %c0_i32, %c0_i32_0 : i32, i32
  }
  func.func @transform_2(%arg0: i32) -> (i32, i32) {
    %c0_i32 = arith.constant 0 : i32
    %c0_i32_0 = arith.constant 0 : i32
    %c0_i32_1 = arith.constant 0 : i32
    return %c0_i32, %c0_i32_0 : i32, i32
  }
  func.func @transform_3(%arg0: i32) -> (i32, i32) {
    %c0_i32 = arith.constant 0 : i32
    %c0_i32_0 = arith.constant 0 : i32
    %c0_i32_1 = arith.constant 0 : i32
    return %c0_i32, %c0_i32_0 : i32, i32
  }
  func.func @transform_4(%arg0: i32) -> (i32, i32) {
    %c0_i32 = arith.constant 0 : i32
    %c0_i32_0 = arith.constant 0 : i32
    %c0_i32_1 = arith.constant 0 : i32
    return %c0_i32, %c0_i32_0 : i32, i32
  }
  func.func @transform_5(%arg0: i32) -> (i32, i32) {
    %c0_i32 = arith.constant 0 : i32
    %c0_i32_0 = arith.constant 0 : i32
    return %arg0, %c0_i32 : i32, i32
  }
}

module attributes {stable_mosaic.version = 11 : i64} {
  func.func @_linear_kernel(%arg0: i32, %arg1: memref<64x16xf32, #tpu.memory_space<vmem>>, %arg2: memref<16x32xf32, #tpu.memory_space<vmem>>, %arg3: memref<1x32xf32, #tpu.memory_space<vmem>>, %arg4: memref<64x32xf32, #tpu.memory_space<vmem>>) attributes {dimension_semantics = [#tpu.dimension_semantics<parallel>], iteration_bounds = array<i64: 1>, scalar_prefetch = 0 : i64, scratch_operands = 0 : i64, tpu.core_type = #tpu.core_type<tc>, window_params = [{transform_indices = @transform_0, window_bounds = array<i64: 64, 16>}, {pipeline_mode = #tpu.pipeline_mode<synchronous>, transform_indices = @transform_1, window_bounds = array<i64: 16, 32>}, {pipeline_mode = #tpu.pipeline_mode<synchronous>, transform_indices = @transform_2, window_bounds = array<i64: 1, 32>}, {transform_indices = @transform_3, window_bounds = array<i64: 64, 32>}]} {
    %c0 = arith.constant 0 : index
    %c0_0 = arith.constant 0 : index
    %0 = vector.load %arg1[%c0, %c0_0] : memref<64x16xf32, #tpu.memory_space<vmem>>, vector<64x16xf32>
    %c0_1 = arith.constant 0 : index
    %c0_2 = arith.constant 0 : index
    %1 = vector.load %arg2[%c0_1, %c0_2] : memref<16x32xf32, #tpu.memory_space<vmem>>, vector<16x32xf32>
    %cst = arith.constant dense<0.000000e+00> : vector<64x32xf32>
    %2 = tpu.matmul %0, %1, %cst {dimension_numbers = #tpu.dot_dimension_numbers<[1], [0], [0], [1], [0, 0, 1, 1], [], []>} : vector<64x16xf32>, vector<16x32xf32>, vector<64x32xf32> -> vector<64x32xf32>
    %c0_3 = arith.constant 0 : index
    %c0_4 = arith.constant 0 : index
    %3 = vector.load %arg3[%c0_3, %c0_4] : memref<1x32xf32, #tpu.memory_space<vmem>>, vector<1x32xf32>
    %4 = vector.broadcast %3 : vector<1x32xf32> to vector<64x32xf32>
    %5 = arith.addf %2, %4 : vector<64x32xf32>
    %c0_5 = arith.constant 0 : index
    %c0_6 = arith.constant 0 : index
    %6 = vector.load %arg4[%c0_5, %c0_6] : memref<64x32xf32, #tpu.memory_space<vmem>>, vector<64x32xf32>
    tpu.vector_store %arg4[%c0_5, %c0_6], %5 {strides = array<i32>} : memref<64x32xf32, #tpu.memory_space<vmem>>, vector<64x32xf32>,
    return
  }
  func.func @transform_0(%arg0: i32) -> (i32, i32) {
    %c0_i32 = arith.constant 0 : i32
    %c0_i32_0 = arith.constant 0 : i32
    return %arg0, %c0_i32 : i32, i32
  }
  func.func @transform_1(%arg0: i32) -> (i32, i32) {
    %c0_i32 = arith.constant 0 : i32
    %c0_i32_0 = arith.constant 0 : i32
    %c0_i32_1 = arith.constant 0 : i32
    return %c0_i32, %c0_i32_0 : i32, i32
  }
  func.func @transform_2(%arg0: i32) -> (i32, i32) {
    %c0_i32 = arith.constant 0 : i32
    %c0_i32_0 = arith.constant 0 : i32
    %c0_i32_1 = arith.constant 0 : i32
    return %c0_i32, %c0_i32_0 : i32, i32
  }
  func.func @transform_3(%arg0: i32) -> (i32, i32) {
    %c0_i32 = arith.constant 0 : i32
    %c0_i32_0 = arith.constant 0 : i32
    return %arg0, %c0_i32 : i32, i32
  }
}

module attributes {stable_mosaic.version = 11 : i64} {
  func.func @_ln_linear_kernel(%arg0: i32, %arg1: memref<64x32xf32, #tpu.memory_space<vmem>>, %arg2: memref<1x32xf32, #tpu.memory_space<vmem>>, %arg3: memref<1x32xf32, #tpu.memory_space<vmem>>, %arg4: memref<32x64xf32, #tpu.memory_space<vmem>>, %arg5: memref<1x64xf32, #tpu.memory_space<vmem>>, %arg6: memref<64x64xf32, #tpu.memory_space<vmem>>) attributes {dimension_semantics = [#tpu.dimension_semantics<parallel>], iteration_bounds = array<i64: 1>, scalar_prefetch = 0 : i64, scratch_operands = 0 : i64, tpu.core_type = #tpu.core_type<tc>, window_params = [{transform_indices = @transform_0, window_bounds = array<i64: 64, 32>}, {pipeline_mode = #tpu.pipeline_mode<synchronous>, transform_indices = @transform_1, window_bounds = array<i64: 1, 32>}, {pipeline_mode = #tpu.pipeline_mode<synchronous>, transform_indices = @transform_2, window_bounds = array<i64: 1, 32>}, {pipeline_mode = #tpu.pipeline_mode<synchronous>, transform_indices = @transform_3, window_bounds = array<i64: 32, 64>}, {pipeline_mode = #tpu.pipeline_mode<synchronous>, transform_indices = @transform_4, window_bounds = array<i64: 1, 64>}, {transform_indices = @transform_5, window_bounds = array<i64: 64, 64>}]} {
    %c0 = arith.constant 0 : index
    %c0_0 = arith.constant 0 : index
    %0 = vector.load %arg1[%c0, %c0_0] : memref<64x32xf32, #tpu.memory_space<vmem>>, vector<64x32xf32>
    %cst = arith.constant dense<0.000000e+00> : vector<64xf32>
    %1 = vector.multi_reduction <add>, %0, %cst [1] : vector<64x32xf32> to vector<64xf32>
    %2 = vector.shape_cast %1 : vector<64xf32> to vector<64x1xf32>
    %cst_1 = arith.constant 3.200000e+01 : f32
    %3 = vector.broadcast %cst_1 : f32 to vector<64x1xf32>
    %4 = arith.divf %2, %3 : vector<64x1xf32>
    %5 = vector.broadcast %4 : vector<64x1xf32> to vector<64x32xf32>
    %6 = arith.subf %0, %5 : vector<64x32xf32>
    %7 = arith.mulf %6, %6 : vector<64x32xf32>
    %cst_2 = arith.constant dense<0.000000e+00> : vector<64xf32>
    %8 = vector.multi_reduction <add>, %7, %cst_2 [1] : vector<64x32xf32> to vector<64xf32>
    %9 = vector.shape_cast %8 : vector<64xf32> to vector<64x1xf32>
    %cst_3 = arith.constant 3.200000e+01 : f32
    %10 = vector.broadcast %cst_3 : f32 to vector<64x1xf32>
    %11 = arith.divf %9, %10 : vector<64x1xf32>
    %12 = vector.broadcast %4 : vector<64x1xf32> to vector<64x32xf32>
    %13 = arith.subf %0, %12 : vector<64x32xf32>
    %cst_4 = arith.constant 9.99999974E-6 : f32
    %14 = vector.broadcast %cst_4 : f32 to vector<64x1xf32>
    %15 = arith.addf %11, %14 : vector<64x1xf32>
    %16 = math.rsqrt %15 : vector<64x1xf32>
    %17 = vector.broadcast %16 : vector<64x1xf32> to vector<64x32xf32>
    %18 = arith.mulf %13, %17 : vector<64x32xf32>
    %c0_5 = arith.constant 0 : index
    %c0_6 = arith.constant 0 : index
    %19 = vector.load %arg2[%c0_5, %c0_6] : memref<1x32xf32, #tpu.memory_space<vmem>>, vector<1x32xf32>
    %20 = vector.broadcast %19 : vector<1x32xf32> to vector<64x32xf32>
    %21 = arith.mulf %18, %20 : vector<64x32xf32>
    %c0_7 = arith.constant 0 : index
    %c0_8 = arith.constant 0 : index
    %22 = vector.load %arg3[%c0_7, %c0_8] : memref<1x32xf32, #tpu.memory_space<vmem>>, vector<1x32xf32>
    %23 = vector.broadcast %22 : vector<1x32xf32> to vector<64x32xf32>
    %24 = arith.addf %21, %23 : vector<64x32xf32>
    %c0_9 = arith.constant 0 : index
    %c0_10 = arith.constant 0 : index
    %25 = vector.load %arg4[%c0_9, %c0_10] : memref<32x64xf32, #tpu.memory_space<vmem>>, vector<32x64xf32>
    %cst_11 = arith.constant dense<0.000000e+00> : vector<64x64xf32>
    %26 = tpu.matmul %24, %25, %cst_11 {dimension_numbers = #tpu.dot_dimension_numbers<[1], [0], [0], [1], [0, 0, 1, 1], [], []>} : vector<64x32xf32>, vector<32x64xf32>, vector<64x64xf32> -> vector<64x64xf32>
    %c0_12 = arith.constant 0 : index
    %c0_13 = arith.constant 0 : index
    %27 = vector.load %arg5[%c0_12, %c0_13] : memref<1x64xf32, #tpu.memory_space<vmem>>, vector<1x64xf32>
    %28 = vector.broadcast %27 : vector<1x64xf32> to vector<64x64xf32>
    %29 = arith.addf %26, %28 : vector<64x64xf32>
    %c0_14 = arith.constant 0 : index
    %c0_15 = arith.constant 0 : index
    %30 = vector.load %arg6[%c0_14, %c0_15] : memref<64x64xf32, #tpu.memory_space<vmem>>, vector<64x64xf32>
    tpu.vector_store %arg6[%c0_14, %c0_15], %29 {strides = array<i32>} : memref<64x64xf32, #tpu.memory_space<vmem>>, vector<64x64xf32>,
    return
  }
  func.func @transform_0(%arg0: i32) -> (i32, i32) {
    %c0_i32 = arith.constant 0 : i32
    %c0_i32_0 = arith.constant 0 : i32
    return %arg0, %c0_i32 : i32, i32
  }
  func.func @transform_1(%arg0: i32) -> (i32, i32) {
    %c0_i32 = arith.constant 0 : i32
    %c0_i32_0 = arith.constant 0 : i32
    %c0_i32_1 = arith.constant 0 : i32
    return %c0_i32, %c0_i32_0 : i32, i32
  }
  func.func @transform_2(%arg0: i32) -> (i32, i32) {
    %c0_i32 = arith.constant 0 : i32
    %c0_i32_0 = arith.constant 0 : i32
    %c0_i32_1 = arith.constant 0 : i32
    return %c0_i32, %c0_i32_0 : i32, i32
  }
  func.func @transform_3(%arg0: i32) -> (i32, i32) {
    %c0_i32 = arith.constant 0 : i32
    %c0_i32_0 = arith.constant 0 : i32
    %c0_i32_1 = arith.constant 0 : i32
    return %c0_i32, %c0_i32_0 : i32, i32
  }
  func.func @transform_4(%arg0: i32) -> (i32, i32) {
    %c0_i32 = arith.constant 0 : i32
    %c0_i32_0 = arith.constant 0 : i32
    %c0_i32_1 = arith.constant 0 : i32
    return %c0_i32, %c0_i32_0 : i32, i32
  }
  func.func @transform_5(%arg0: i32) -> (i32, i32) {
    %c0_i32 = arith.constant 0 : i32
    %c0_i32_0 = arith.constant 0 : i32
    return %arg0, %c0_i32 : i32, i32
  }
}

module attributes {stable_mosaic.version = 11 : i64} {
  func.func @_linear_kernel(%arg0: i32, %arg1: memref<64x36xf32, #tpu.memory_space<vmem>>, %arg2: memref<36x8xf32, #tpu.memory_space<vmem>>, %arg3: memref<1x8xf32, #tpu.memory_space<vmem>>, %arg4: memref<64x8xf32, #tpu.memory_space<vmem>>) attributes {dimension_semantics = [#tpu.dimension_semantics<parallel>], iteration_bounds = array<i64: 1>, scalar_prefetch = 0 : i64, scratch_operands = 0 : i64, tpu.core_type = #tpu.core_type<tc>, window_params = [{transform_indices = @transform_0, window_bounds = array<i64: 64, 36>}, {pipeline_mode = #tpu.pipeline_mode<synchronous>, transform_indices = @transform_1, window_bounds = array<i64: 36, 8>}, {pipeline_mode = #tpu.pipeline_mode<synchronous>, transform_indices = @transform_2, window_bounds = array<i64: 1, 8>}, {transform_indices = @transform_3, window_bounds = array<i64: 64, 8>}]} {
    %c0 = arith.constant 0 : index
    %c0_0 = arith.constant 0 : index
    %0 = vector.load %arg1[%c0, %c0_0] : memref<64x36xf32, #tpu.memory_space<vmem>>, vector<64x36xf32>
    %c0_1 = arith.constant 0 : index
    %c0_2 = arith.constant 0 : index
    %1 = vector.load %arg2[%c0_1, %c0_2] : memref<36x8xf32, #tpu.memory_space<vmem>>, vector<36x8xf32>
    %cst = arith.constant dense<0.000000e+00> : vector<64x8xf32>
    %2 = tpu.matmul %0, %1, %cst {dimension_numbers = #tpu.dot_dimension_numbers<[1], [0], [0], [1], [0, 0, 1, 1], [], []>} : vector<64x36xf32>, vector<36x8xf32>, vector<64x8xf32> -> vector<64x8xf32>
    %c0_3 = arith.constant 0 : index
    %c0_4 = arith.constant 0 : index
    %3 = vector.load %arg3[%c0_3, %c0_4] : memref<1x8xf32, #tpu.memory_space<vmem>>, vector<1x8xf32>
    %4 = vector.broadcast %3 : vector<1x8xf32> to vector<64x8xf32>
    %5 = arith.addf %2, %4 : vector<64x8xf32>
    %c0_5 = arith.constant 0 : index
    %c0_6 = arith.constant 0 : index
    %6 = vector.load %arg4[%c0_5, %c0_6] : memref<64x8xf32, #tpu.memory_space<vmem>>, vector<64x8xf32>
    tpu.vector_store %arg4[%c0_5, %c0_6], %5 {strides = array<i32>} : memref<64x8xf32, #tpu.memory_space<vmem>>, vector<64x8xf32>,
    return
  }
  func.func @transform_0(%arg0: i32) -> (i32, i32) {
    %c0_i32 = arith.constant 0 : i32
    %c0_i32_0 = arith.constant 0 : i32
    return %arg0, %c0_i32 : i32, i32
  }
  func.func @transform_1(%arg0: i32) -> (i32, i32) {
    %c0_i32 = arith.constant 0 : i32
    %c0_i32_0 = arith.constant 0 : i32
    %c0_i32_1 = arith.constant 0 : i32
    return %c0_i32, %c0_i32_0 : i32, i32
  }
  func.func @transform_2(%arg0: i32) -> (i32, i32) {
    %c0_i32 = arith.constant 0 : i32
    %c0_i32_0 = arith.constant 0 : i32
    %c0_i32_1 = arith.constant 0 : i32
    return %c0_i32, %c0_i32_0 : i32, i32
  }
  func.func @transform_3(%arg0: i32) -> (i32, i32) {
    %c0_i32 = arith.constant 0 : i32
    %c0_i32_0 = arith.constant 0 : i32
    return %arg0, %c0_i32 : i32, i32
  }
}

module attributes {stable_mosaic.version = 11 : i64} {
  func.func @_linear_kernel(%arg0: i32, %arg1: memref<64x8xf32, #tpu.memory_space<vmem>>, %arg2: memref<8x32xf32, #tpu.memory_space<vmem>>, %arg3: memref<1x32xf32, #tpu.memory_space<vmem>>, %arg4: memref<64x32xf32, #tpu.memory_space<vmem>>) attributes {dimension_semantics = [#tpu.dimension_semantics<parallel>], iteration_bounds = array<i64: 1>, scalar_prefetch = 0 : i64, scratch_operands = 0 : i64, tpu.core_type = #tpu.core_type<tc>, window_params = [{transform_indices = @transform_0, window_bounds = array<i64: 64, 8>}, {pipeline_mode = #tpu.pipeline_mode<synchronous>, transform_indices = @transform_1, window_bounds = array<i64: 8, 32>}, {pipeline_mode = #tpu.pipeline_mode<synchronous>, transform_indices = @transform_2, window_bounds = array<i64: 1, 32>}, {transform_indices = @transform_3, window_bounds = array<i64: 64, 32>}]} {
    %c0 = arith.constant 0 : index
    %c0_0 = arith.constant 0 : index
    %0 = vector.load %arg1[%c0, %c0_0] : memref<64x8xf32, #tpu.memory_space<vmem>>, vector<64x8xf32>
    %c0_1 = arith.constant 0 : index
    %c0_2 = arith.constant 0 : index
    %1 = vector.load %arg2[%c0_1, %c0_2] : memref<8x32xf32, #tpu.memory_space<vmem>>, vector<8x32xf32>
    %cst = arith.constant dense<0.000000e+00> : vector<64x32xf32>
    %2 = tpu.matmul %0, %1, %cst {dimension_numbers = #tpu.dot_dimension_numbers<[1], [0], [0], [1], [0, 0, 1, 1], [], []>} : vector<64x8xf32>, vector<8x32xf32>, vector<64x32xf32> -> vector<64x32xf32>
    %c0_3 = arith.constant 0 : index
    %c0_4 = arith.constant 0 : index
    %3 = vector.load %arg3[%c0_3, %c0_4] : memref<1x32xf32, #tpu.memory_space<vmem>>, vector<1x32xf32>
    %4 = vector.broadcast %3 : vector<1x32xf32> to vector<64x32xf32>
    %5 = arith.addf %2, %4 : vector<64x32xf32>
    %c0_5 = arith.constant 0 : index
    %c0_6 = arith.constant 0 : index
    %6 = vector.load %arg4[%c0_5, %c0_6] : memref<64x32xf32, #tpu.memory_space<vmem>>, vector<64x32xf32>
    tpu.vector_store %arg4[%c0_5, %c0_6], %5 {strides = array<i32>} : memref<64x32xf32, #tpu.memory_space<vmem>>, vector<64x32xf32>,
    return
  }
  func.func @transform_0(%arg0: i32) -> (i32, i32) {
    %c0_i32 = arith.constant 0 : i32
    %c0_i32_0 = arith.constant 0 : i32
    return %arg0, %c0_i32 : i32, i32
  }
  func.func @transform_1(%arg0: i32) -> (i32, i32) {
    %c0_i32 = arith.constant 0 : i32
    %c0_i32_0 = arith.constant 0 : i32
    %c0_i32_1 = arith.constant 0 : i32
    return %c0_i32, %c0_i32_0 : i32, i32
  }
  func.func @transform_2(%arg0: i32) -> (i32, i32) {
    %c0_i32 = arith.constant 0 : i32
    %c0_i32_0 = arith.constant 0 : i32
    %c0_i32_1 = arith.constant 0 : i32
    return %c0_i32, %c0_i32_0 : i32, i32
  }
  func.func @transform_3(%arg0: i32) -> (i32, i32) {
    %c0_i32 = arith.constant 0 : i32
    %c0_i32_0 = arith.constant 0 : i32
    return %arg0, %c0_i32 : i32, i32
  }
}

module attributes {stable_mosaic.version = 11 : i64} {
  func.func @_ln_linear_nobias_kernel(%arg0: i32, %arg1: memref<64x32xf32, #tpu.memory_space<vmem>>, %arg2: memref<1x32xf32, #tpu.memory_space<vmem>>, %arg3: memref<1x32xf32, #tpu.memory_space<vmem>>, %arg4: memref<32x2xf32, #tpu.memory_space<vmem>>, %arg5: memref<64x2xf32, #tpu.memory_space<vmem>>) attributes {dimension_semantics = [#tpu.dimension_semantics<parallel>], iteration_bounds = array<i64: 1>, scalar_prefetch = 0 : i64, scratch_operands = 0 : i64, tpu.core_type = #tpu.core_type<tc>, window_params = [{transform_indices = @transform_0, window_bounds = array<i64: 64, 32>}, {pipeline_mode = #tpu.pipeline_mode<synchronous>, transform_indices = @transform_1, window_bounds = array<i64: 1, 32>}, {pipeline_mode = #tpu.pipeline_mode<synchronous>, transform_indices = @transform_2, window_bounds = array<i64: 1, 32>}, {pipeline_mode = #tpu.pipeline_mode<synchronous>, transform_indices = @transform_3, window_bounds = array<i64: 32, 2>}, {transform_indices = @transform_4, window_bounds = array<i64: 64, 2>}]} {
    %c0 = arith.constant 0 : index
    %c0_0 = arith.constant 0 : index
    %0 = vector.load %arg1[%c0, %c0_0] : memref<64x32xf32, #tpu.memory_space<vmem>>, vector<64x32xf32>
    %cst = arith.constant dense<0.000000e+00> : vector<64xf32>
    %1 = vector.multi_reduction <add>, %0, %cst [1] : vector<64x32xf32> to vector<64xf32>
    %2 = vector.shape_cast %1 : vector<64xf32> to vector<64x1xf32>
    %cst_1 = arith.constant 3.200000e+01 : f32
    %3 = vector.broadcast %cst_1 : f32 to vector<64x1xf32>
    %4 = arith.divf %2, %3 : vector<64x1xf32>
    %5 = vector.broadcast %4 : vector<64x1xf32> to vector<64x32xf32>
    %6 = arith.subf %0, %5 : vector<64x32xf32>
    %7 = arith.mulf %6, %6 : vector<64x32xf32>
    %cst_2 = arith.constant dense<0.000000e+00> : vector<64xf32>
    %8 = vector.multi_reduction <add>, %7, %cst_2 [1] : vector<64x32xf32> to vector<64xf32>
    %9 = vector.shape_cast %8 : vector<64xf32> to vector<64x1xf32>
    %cst_3 = arith.constant 3.200000e+01 : f32
    %10 = vector.broadcast %cst_3 : f32 to vector<64x1xf32>
    %11 = arith.divf %9, %10 : vector<64x1xf32>
    %12 = vector.broadcast %4 : vector<64x1xf32> to vector<64x32xf32>
    %13 = arith.subf %0, %12 : vector<64x32xf32>
    %cst_4 = arith.constant 9.99999974E-6 : f32
    %14 = vector.broadcast %cst_4 : f32 to vector<64x1xf32>
    %15 = arith.addf %11, %14 : vector<64x1xf32>
    %16 = math.rsqrt %15 : vector<64x1xf32>
    %17 = vector.broadcast %16 : vector<64x1xf32> to vector<64x32xf32>
    %18 = arith.mulf %13, %17 : vector<64x32xf32>
    %c0_5 = arith.constant 0 : index
    %c0_6 = arith.constant 0 : index
    %19 = vector.load %arg2[%c0_5, %c0_6] : memref<1x32xf32, #tpu.memory_space<vmem>>, vector<1x32xf32>
    %20 = vector.broadcast %19 : vector<1x32xf32> to vector<64x32xf32>
    %21 = arith.mulf %18, %20 : vector<64x32xf32>
    %c0_7 = arith.constant 0 : index
    %c0_8 = arith.constant 0 : index
    %22 = vector.load %arg3[%c0_7, %c0_8] : memref<1x32xf32, #tpu.memory_space<vmem>>, vector<1x32xf32>
    %23 = vector.broadcast %22 : vector<1x32xf32> to vector<64x32xf32>
    %24 = arith.addf %21, %23 : vector<64x32xf32>
    %c0_9 = arith.constant 0 : index
    %c0_10 = arith.constant 0 : index
    %25 = vector.load %arg4[%c0_9, %c0_10] : memref<32x2xf32, #tpu.memory_space<vmem>>, vector<32x2xf32>
    %cst_11 = arith.constant dense<0.000000e+00> : vector<64x2xf32>
    %26 = tpu.matmul %24, %25, %cst_11 {dimension_numbers = #tpu.dot_dimension_numbers<[1], [0], [0], [1], [0, 0, 1, 1], [], []>} : vector<64x32xf32>, vector<32x2xf32>, vector<64x2xf32> -> vector<64x2xf32>
    %c0_12 = arith.constant 0 : index
    %c0_13 = arith.constant 0 : index
    %27 = vector.load %arg5[%c0_12, %c0_13] : memref<64x2xf32, #tpu.memory_space<vmem>>, vector<64x2xf32>
    tpu.vector_store %arg5[%c0_12, %c0_13], %26 {strides = array<i32>} : memref<64x2xf32, #tpu.memory_space<vmem>>, vector<64x2xf32>,
    return
  }
  func.func @transform_0(%arg0: i32) -> (i32, i32) {
    %c0_i32 = arith.constant 0 : i32
    %c0_i32_0 = arith.constant 0 : i32
    return %arg0, %c0_i32 : i32, i32
  }
  func.func @transform_1(%arg0: i32) -> (i32, i32) {
    %c0_i32 = arith.constant 0 : i32
    %c0_i32_0 = arith.constant 0 : i32
    %c0_i32_1 = arith.constant 0 : i32
    return %c0_i32, %c0_i32_0 : i32, i32
  }
  func.func @transform_2(%arg0: i32) -> (i32, i32) {
    %c0_i32 = arith.constant 0 : i32
    %c0_i32_0 = arith.constant 0 : i32
    %c0_i32_1 = arith.constant 0 : i32
    return %c0_i32, %c0_i32_0 : i32, i32
  }
  func.func @transform_3(%arg0: i32) -> (i32, i32) {
    %c0_i32 = arith.constant 0 : i32
    %c0_i32_0 = arith.constant 0 : i32
    %c0_i32_1 = arith.constant 0 : i32
    return %c0_i32, %c0_i32_0 : i32, i32
  }
  func.func @transform_4(%arg0: i32) -> (i32, i32) {
    %c0_i32 = arith.constant 0 : i32
    %c0_i32_0 = arith.constant 0 : i32
    return %arg0, %c0_i32 : i32, i32
  }
}

module attributes {stable_mosaic.version = 11 : i64} {
  func.func @_linear_nobias_kernel(%arg0: i32, %arg1: memref<64x36xf32, #tpu.memory_space<vmem>>, %arg2: memref<36x16xf32, #tpu.memory_space<vmem>>, %arg3: memref<64x16xf32, #tpu.memory_space<vmem>>) attributes {dimension_semantics = [#tpu.dimension_semantics<parallel>], iteration_bounds = array<i64: 1>, scalar_prefetch = 0 : i64, scratch_operands = 0 : i64, tpu.core_type = #tpu.core_type<tc>, window_params = [{transform_indices = @transform_0, window_bounds = array<i64: 64, 36>}, {pipeline_mode = #tpu.pipeline_mode<synchronous>, transform_indices = @transform_1, window_bounds = array<i64: 36, 16>}, {transform_indices = @transform_2, window_bounds = array<i64: 64, 16>}]} {
    %c0 = arith.constant 0 : index
    %c0_0 = arith.constant 0 : index
    %0 = vector.load %arg1[%c0, %c0_0] : memref<64x36xf32, #tpu.memory_space<vmem>>, vector<64x36xf32>
    %c0_1 = arith.constant 0 : index
    %c0_2 = arith.constant 0 : index
    %1 = vector.load %arg2[%c0_1, %c0_2] : memref<36x16xf32, #tpu.memory_space<vmem>>, vector<36x16xf32>
    %cst = arith.constant dense<0.000000e+00> : vector<64x16xf32>
    %2 = tpu.matmul %0, %1, %cst {dimension_numbers = #tpu.dot_dimension_numbers<[1], [0], [0], [1], [0, 0, 1, 1], [], []>} : vector<64x36xf32>, vector<36x16xf32>, vector<64x16xf32> -> vector<64x16xf32>
    %c0_3 = arith.constant 0 : index
    %c0_4 = arith.constant 0 : index
    %3 = vector.load %arg3[%c0_3, %c0_4] : memref<64x16xf32, #tpu.memory_space<vmem>>, vector<64x16xf32>
    tpu.vector_store %arg3[%c0_3, %c0_4], %2 {strides = array<i32>} : memref<64x16xf32, #tpu.memory_space<vmem>>, vector<64x16xf32>,
    return
  }
  func.func @transform_0(%arg0: i32) -> (i32, i32) {
    %c0_i32 = arith.constant 0 : i32
    %c0_i32_0 = arith.constant 0 : i32
    return %arg0, %c0_i32 : i32, i32
  }
  func.func @transform_1(%arg0: i32) -> (i32, i32) {
    %c0_i32 = arith.constant 0 : i32
    %c0_i32_0 = arith.constant 0 : i32
    %c0_i32_1 = arith.constant 0 : i32
    return %c0_i32, %c0_i32_0 : i32, i32
  }
  func.func @transform_2(%arg0: i32) -> (i32, i32) {
    %c0_i32 = arith.constant 0 : i32
    %c0_i32_0 = arith.constant 0 : i32
    return %arg0, %c0_i32 : i32, i32
  }
}

module attributes {stable_mosaic.version = 11 : i64} {
  func.func @_linear_kernel(%arg0: i32, %arg1: memref<64x64xf32, #tpu.memory_space<vmem>>, %arg2: memref<64x32xf32, #tpu.memory_space<vmem>>, %arg3: memref<1x32xf32, #tpu.memory_space<vmem>>, %arg4: memref<64x32xf32, #tpu.memory_space<vmem>>) attributes {dimension_semantics = [#tpu.dimension_semantics<parallel>], iteration_bounds = array<i64: 1>, scalar_prefetch = 0 : i64, scratch_operands = 0 : i64, tpu.core_type = #tpu.core_type<tc>, window_params = [{transform_indices = @transform_0, window_bounds = array<i64: 64, 64>}, {pipeline_mode = #tpu.pipeline_mode<synchronous>, transform_indices = @transform_1, window_bounds = array<i64: 64, 32>}, {pipeline_mode = #tpu.pipeline_mode<synchronous>, transform_indices = @transform_2, window_bounds = array<i64: 1, 32>}, {transform_indices = @transform_3, window_bounds = array<i64: 64, 32>}]} {
    %c0 = arith.constant 0 : index
    %c0_0 = arith.constant 0 : index
    %0 = vector.load %arg1[%c0, %c0_0] : memref<64x64xf32, #tpu.memory_space<vmem>>, vector<64x64xf32>
    %c0_1 = arith.constant 0 : index
    %c0_2 = arith.constant 0 : index
    %1 = vector.load %arg2[%c0_1, %c0_2] : memref<64x32xf32, #tpu.memory_space<vmem>>, vector<64x32xf32>
    %cst = arith.constant dense<0.000000e+00> : vector<64x32xf32>
    %2 = tpu.matmul %0, %1, %cst {dimension_numbers = #tpu.dot_dimension_numbers<[1], [0], [0], [1], [0, 0, 1, 1], [], []>} : vector<64x64xf32>, vector<64x32xf32>, vector<64x32xf32> -> vector<64x32xf32>
    %c0_3 = arith.constant 0 : index
    %c0_4 = arith.constant 0 : index
    %3 = vector.load %arg3[%c0_3, %c0_4] : memref<1x32xf32, #tpu.memory_space<vmem>>, vector<1x32xf32>
    %4 = vector.broadcast %3 : vector<1x32xf32> to vector<64x32xf32>
    %5 = arith.addf %2, %4 : vector<64x32xf32>
    %c0_5 = arith.constant 0 : index
    %c0_6 = arith.constant 0 : index
    %6 = vector.load %arg4[%c0_5, %c0_6] : memref<64x32xf32, #tpu.memory_space<vmem>>, vector<64x32xf32>
    tpu.vector_store %arg4[%c0_5, %c0_6], %5 {strides = array<i32>} : memref<64x32xf32, #tpu.memory_space<vmem>>, vector<64x32xf32>,
    return
  }
  func.func @transform_0(%arg0: i32) -> (i32, i32) {
    %c0_i32 = arith.constant 0 : i32
    %c0_i32_0 = arith.constant 0 : i32
    return %arg0, %c0_i32 : i32, i32
  }
  func.func @transform_1(%arg0: i32) -> (i32, i32) {
    %c0_i32 = arith.constant 0 : i32
    %c0_i32_0 = arith.constant 0 : i32
    %c0_i32_1 = arith.constant 0 : i32
    return %c0_i32, %c0_i32_0 : i32, i32
  }
  func.func @transform_2(%arg0: i32) -> (i32, i32) {
    %c0_i32 = arith.constant 0 : i32
    %c0_i32_0 = arith.constant 0 : i32
    %c0_i32_1 = arith.constant 0 : i32
    return %c0_i32, %c0_i32_0 : i32, i32
  }
  func.func @transform_3(%arg0: i32) -> (i32, i32) {
    %c0_i32 = arith.constant 0 : i32
    %c0_i32_0 = arith.constant 0 : i32
    return %arg0, %c0_i32 : i32, i32
  }
}

module attributes {stable_mosaic.version = 11 : i64} {
  func.func @_ln_linear_kernel(%arg0: i32, %arg1: memref<64x16xf32, #tpu.memory_space<vmem>>, %arg2: memref<1x16xf32, #tpu.memory_space<vmem>>, %arg3: memref<1x16xf32, #tpu.memory_space<vmem>>, %arg4: memref<16x16xf32, #tpu.memory_space<vmem>>, %arg5: memref<1x16xf32, #tpu.memory_space<vmem>>, %arg6: memref<64x16xf32, #tpu.memory_space<vmem>>) attributes {dimension_semantics = [#tpu.dimension_semantics<parallel>], iteration_bounds = array<i64: 1>, scalar_prefetch = 0 : i64, scratch_operands = 0 : i64, tpu.core_type = #tpu.core_type<tc>, window_params = [{transform_indices = @transform_0, window_bounds = array<i64: 64, 16>}, {pipeline_mode = #tpu.pipeline_mode<synchronous>, transform_indices = @transform_1, window_bounds = array<i64: 1, 16>}, {pipeline_mode = #tpu.pipeline_mode<synchronous>, transform_indices = @transform_2, window_bounds = array<i64: 1, 16>}, {pipeline_mode = #tpu.pipeline_mode<synchronous>, transform_indices = @transform_3, window_bounds = array<i64: 16, 16>}, {pipeline_mode = #tpu.pipeline_mode<synchronous>, transform_indices = @transform_4, window_bounds = array<i64: 1, 16>}, {transform_indices = @transform_5, window_bounds = array<i64: 64, 16>}]} {
    %c0 = arith.constant 0 : index
    %c0_0 = arith.constant 0 : index
    %0 = vector.load %arg1[%c0, %c0_0] : memref<64x16xf32, #tpu.memory_space<vmem>>, vector<64x16xf32>
    %cst = arith.constant dense<0.000000e+00> : vector<64xf32>
    %1 = vector.multi_reduction <add>, %0, %cst [1] : vector<64x16xf32> to vector<64xf32>
    %2 = vector.shape_cast %1 : vector<64xf32> to vector<64x1xf32>
    %cst_1 = arith.constant 1.600000e+01 : f32
    %3 = vector.broadcast %cst_1 : f32 to vector<64x1xf32>
    %4 = arith.divf %2, %3 : vector<64x1xf32>
    %5 = vector.broadcast %4 : vector<64x1xf32> to vector<64x16xf32>
    %6 = arith.subf %0, %5 : vector<64x16xf32>
    %7 = arith.mulf %6, %6 : vector<64x16xf32>
    %cst_2 = arith.constant dense<0.000000e+00> : vector<64xf32>
    %8 = vector.multi_reduction <add>, %7, %cst_2 [1] : vector<64x16xf32> to vector<64xf32>
    %9 = vector.shape_cast %8 : vector<64xf32> to vector<64x1xf32>
    %cst_3 = arith.constant 1.600000e+01 : f32
    %10 = vector.broadcast %cst_3 : f32 to vector<64x1xf32>
    %11 = arith.divf %9, %10 : vector<64x1xf32>
    %12 = vector.broadcast %4 : vector<64x1xf32> to vector<64x16xf32>
    %13 = arith.subf %0, %12 : vector<64x16xf32>
    %cst_4 = arith.constant 9.99999974E-6 : f32
    %14 = vector.broadcast %cst_4 : f32 to vector<64x1xf32>
    %15 = arith.addf %11, %14 : vector<64x1xf32>
    %16 = math.rsqrt %15 : vector<64x1xf32>
    %17 = vector.broadcast %16 : vector<64x1xf32> to vector<64x16xf32>
    %18 = arith.mulf %13, %17 : vector<64x16xf32>
    %c0_5 = arith.constant 0 : index
    %c0_6 = arith.constant 0 : index
    %19 = vector.load %arg2[%c0_5, %c0_6] : memref<1x16xf32, #tpu.memory_space<vmem>>, vector<1x16xf32>
    %20 = vector.broadcast %19 : vector<1x16xf32> to vector<64x16xf32>
    %21 = arith.mulf %18, %20 : vector<64x16xf32>
    %c0_7 = arith.constant 0 : index
    %c0_8 = arith.constant 0 : index
    %22 = vector.load %arg3[%c0_7, %c0_8] : memref<1x16xf32, #tpu.memory_space<vmem>>, vector<1x16xf32>
    %23 = vector.broadcast %22 : vector<1x16xf32> to vector<64x16xf32>
    %24 = arith.addf %21, %23 : vector<64x16xf32>
    %c0_9 = arith.constant 0 : index
    %c0_10 = arith.constant 0 : index
    %25 = vector.load %arg4[%c0_9, %c0_10] : memref<16x16xf32, #tpu.memory_space<vmem>>, vector<16x16xf32>
    %cst_11 = arith.constant dense<0.000000e+00> : vector<64x16xf32>
    %26 = tpu.matmul %24, %25, %cst_11 {dimension_numbers = #tpu.dot_dimension_numbers<[1], [0], [0], [1], [0, 0, 1, 1], [], []>} : vector<64x16xf32>, vector<16x16xf32>, vector<64x16xf32> -> vector<64x16xf32>
    %c0_12 = arith.constant 0 : index
    %c0_13 = arith.constant 0 : index
    %27 = vector.load %arg5[%c0_12, %c0_13] : memref<1x16xf32, #tpu.memory_space<vmem>>, vector<1x16xf32>
    %28 = vector.broadcast %27 : vector<1x16xf32> to vector<64x16xf32>
    %29 = arith.addf %26, %28 : vector<64x16xf32>
    %c0_14 = arith.constant 0 : index
    %c0_15 = arith.constant 0 : index
    %30 = vector.load %arg6[%c0_14, %c0_15] : memref<64x16xf32, #tpu.memory_space<vmem>>, vector<64x16xf32>
    tpu.vector_store %arg6[%c0_14, %c0_15], %29 {strides = array<i32>} : memref<64x16xf32, #tpu.memory_space<vmem>>, vector<64x16xf32>,
    return
  }
  func.func @transform_0(%arg0: i32) -> (i32, i32) {
    %c0_i32 = arith.constant 0 : i32
    %c0_i32_0 = arith.constant 0 : i32
    return %arg0, %c0_i32 : i32, i32
  }
  func.func @transform_1(%arg0: i32) -> (i32, i32) {
    %c0_i32 = arith.constant 0 : i32
    %c0_i32_0 = arith.constant 0 : i32
    %c0_i32_1 = arith.constant 0 : i32
    return %c0_i32, %c0_i32_0 : i32, i32
  }
  func.func @transform_2(%arg0: i32) -> (i32, i32) {
    %c0_i32 = arith.constant 0 : i32
    %c0_i32_0 = arith.constant 0 : i32
    %c0_i32_1 = arith.constant 0 : i32
    return %c0_i32, %c0_i32_0 : i32, i32
  }
  func.func @transform_3(%arg0: i32) -> (i32, i32) {
    %c0_i32 = arith.constant 0 : i32
    %c0_i32_0 = arith.constant 0 : i32
    %c0_i32_1 = arith.constant 0 : i32
    return %c0_i32, %c0_i32_0 : i32, i32
  }
  func.func @transform_4(%arg0: i32) -> (i32, i32) {
    %c0_i32 = arith.constant 0 : i32
    %c0_i32_0 = arith.constant 0 : i32
    %c0_i32_1 = arith.constant 0 : i32
    return %c0_i32, %c0_i32_0 : i32, i32
  }
  func.func @transform_5(%arg0: i32) -> (i32, i32) {
    %c0_i32 = arith.constant 0 : i32
    %c0_i32_0 = arith.constant 0 : i32
    return %arg0, %c0_i32 : i32, i32
  }
}

module attributes {stable_mosaic.version = 11 : i64} {
  func.func @_ln_linear_kernel(%arg0: i32, %arg1: memref<64x32xf32, #tpu.memory_space<vmem>>, %arg2: memref<1x32xf32, #tpu.memory_space<vmem>>, %arg3: memref<1x32xf32, #tpu.memory_space<vmem>>, %arg4: memref<32x16xf32, #tpu.memory_space<vmem>>, %arg5: memref<1x16xf32, #tpu.memory_space<vmem>>, %arg6: memref<64x16xf32, #tpu.memory_space<vmem>>) attributes {dimension_semantics = [#tpu.dimension_semantics<parallel>], iteration_bounds = array<i64: 1>, scalar_prefetch = 0 : i64, scratch_operands = 0 : i64, tpu.core_type = #tpu.core_type<tc>, window_params = [{transform_indices = @transform_0, window_bounds = array<i64: 64, 32>}, {pipeline_mode = #tpu.pipeline_mode<synchronous>, transform_indices = @transform_1, window_bounds = array<i64: 1, 32>}, {pipeline_mode = #tpu.pipeline_mode<synchronous>, transform_indices = @transform_2, window_bounds = array<i64: 1, 32>}, {pipeline_mode = #tpu.pipeline_mode<synchronous>, transform_indices = @transform_3, window_bounds = array<i64: 32, 16>}, {pipeline_mode = #tpu.pipeline_mode<synchronous>, transform_indices = @transform_4, window_bounds = array<i64: 1, 16>}, {transform_indices = @transform_5, window_bounds = array<i64: 64, 16>}]} {
    %c0 = arith.constant 0 : index
    %c0_0 = arith.constant 0 : index
    %0 = vector.load %arg1[%c0, %c0_0] : memref<64x32xf32, #tpu.memory_space<vmem>>, vector<64x32xf32>
    %cst = arith.constant dense<0.000000e+00> : vector<64xf32>
    %1 = vector.multi_reduction <add>, %0, %cst [1] : vector<64x32xf32> to vector<64xf32>
    %2 = vector.shape_cast %1 : vector<64xf32> to vector<64x1xf32>
    %cst_1 = arith.constant 3.200000e+01 : f32
    %3 = vector.broadcast %cst_1 : f32 to vector<64x1xf32>
    %4 = arith.divf %2, %3 : vector<64x1xf32>
    %5 = vector.broadcast %4 : vector<64x1xf32> to vector<64x32xf32>
    %6 = arith.subf %0, %5 : vector<64x32xf32>
    %7 = arith.mulf %6, %6 : vector<64x32xf32>
    %cst_2 = arith.constant dense<0.000000e+00> : vector<64xf32>
    %8 = vector.multi_reduction <add>, %7, %cst_2 [1] : vector<64x32xf32> to vector<64xf32>
    %9 = vector.shape_cast %8 : vector<64xf32> to vector<64x1xf32>
    %cst_3 = arith.constant 3.200000e+01 : f32
    %10 = vector.broadcast %cst_3 : f32 to vector<64x1xf32>
    %11 = arith.divf %9, %10 : vector<64x1xf32>
    %12 = vector.broadcast %4 : vector<64x1xf32> to vector<64x32xf32>
    %13 = arith.subf %0, %12 : vector<64x32xf32>
    %cst_4 = arith.constant 9.99999974E-6 : f32
    %14 = vector.broadcast %cst_4 : f32 to vector<64x1xf32>
    %15 = arith.addf %11, %14 : vector<64x1xf32>
    %16 = math.rsqrt %15 : vector<64x1xf32>
    %17 = vector.broadcast %16 : vector<64x1xf32> to vector<64x32xf32>
    %18 = arith.mulf %13, %17 : vector<64x32xf32>
    %c0_5 = arith.constant 0 : index
    %c0_6 = arith.constant 0 : index
    %19 = vector.load %arg2[%c0_5, %c0_6] : memref<1x32xf32, #tpu.memory_space<vmem>>, vector<1x32xf32>
    %20 = vector.broadcast %19 : vector<1x32xf32> to vector<64x32xf32>
    %21 = arith.mulf %18, %20 : vector<64x32xf32>
    %c0_7 = arith.constant 0 : index
    %c0_8 = arith.constant 0 : index
    %22 = vector.load %arg3[%c0_7, %c0_8] : memref<1x32xf32, #tpu.memory_space<vmem>>, vector<1x32xf32>
    %23 = vector.broadcast %22 : vector<1x32xf32> to vector<64x32xf32>
    %24 = arith.addf %21, %23 : vector<64x32xf32>
    %c0_9 = arith.constant 0 : index
    %c0_10 = arith.constant 0 : index
    %25 = vector.load %arg4[%c0_9, %c0_10] : memref<32x16xf32, #tpu.memory_space<vmem>>, vector<32x16xf32>
    %cst_11 = arith.constant dense<0.000000e+00> : vector<64x16xf32>
    %26 = tpu.matmul %24, %25, %cst_11 {dimension_numbers = #tpu.dot_dimension_numbers<[1], [0], [0], [1], [0, 0, 1, 1], [], []>} : vector<64x32xf32>, vector<32x16xf32>, vector<64x16xf32> -> vector<64x16xf32>
    %c0_12 = arith.constant 0 : index
    %c0_13 = arith.constant 0 : index
    %27 = vector.load %arg5[%c0_12, %c0_13] : memref<1x16xf32, #tpu.memory_space<vmem>>, vector<1x16xf32>
    %28 = vector.broadcast %27 : vector<1x16xf32> to vector<64x16xf32>
    %29 = arith.addf %26, %28 : vector<64x16xf32>
    %c0_14 = arith.constant 0 : index
    %c0_15 = arith.constant 0 : index
    %30 = vector.load %arg6[%c0_14, %c0_15] : memref<64x16xf32, #tpu.memory_space<vmem>>, vector<64x16xf32>
    tpu.vector_store %arg6[%c0_14, %c0_15], %29 {strides = array<i32>} : memref<64x16xf32, #tpu.memory_space<vmem>>, vector<64x16xf32>,
    return
  }
  func.func @transform_0(%arg0: i32) -> (i32, i32) {
    %c0_i32 = arith.constant 0 : i32
    %c0_i32_0 = arith.constant 0 : i32
    return %arg0, %c0_i32 : i32, i32
  }
  func.func @transform_1(%arg0: i32) -> (i32, i32) {
    %c0_i32 = arith.constant 0 : i32
    %c0_i32_0 = arith.constant 0 : i32
    %c0_i32_1 = arith.constant 0 : i32
    return %c0_i32, %c0_i32_0 : i32, i32
  }
  func.func @transform_2(%arg0: i32) -> (i32, i32) {
    %c0_i32 = arith.constant 0 : i32
    %c0_i32_0 = arith.constant 0 : i32
    %c0_i32_1 = arith.constant 0 : i32
    return %c0_i32, %c0_i32_0 : i32, i32
  }
  func.func @transform_3(%arg0: i32) -> (i32, i32) {
    %c0_i32 = arith.constant 0 : i32
    %c0_i32_0 = arith.constant 0 : i32
    %c0_i32_1 = arith.constant 0 : i32
    return %c0_i32, %c0_i32_0 : i32, i32
  }
  func.func @transform_4(%arg0: i32) -> (i32, i32) {
    %c0_i32 = arith.constant 0 : i32
    %c0_i32_0 = arith.constant 0 : i32
    %c0_i32_1 = arith.constant 0 : i32
    return %c0_i32, %c0_i32_0 : i32, i32
  }
  func.func @transform_5(%arg0: i32) -> (i32, i32) {
    %c0_i32 = arith.constant 0 : i32
    %c0_i32_0 = arith.constant 0 : i32
    return %arg0, %c0_i32 : i32, i32
  }
}

module attributes {stable_mosaic.version = 11 : i64} {
  func.func @_layernorm_kernel(%arg0: i32, %arg1: memref<64x16xf32, #tpu.memory_space<vmem>>, %arg2: memref<1x16xf32, #tpu.memory_space<vmem>>, %arg3: memref<1x16xf32, #tpu.memory_space<vmem>>, %arg4: memref<64x16xf32, #tpu.memory_space<vmem>>) attributes {dimension_semantics = [#tpu.dimension_semantics<parallel>], iteration_bounds = array<i64: 1>, scalar_prefetch = 0 : i64, scratch_operands = 0 : i64, tpu.core_type = #tpu.core_type<tc>, window_params = [{transform_indices = @transform_0, window_bounds = array<i64: 64, 16>}, {pipeline_mode = #tpu.pipeline_mode<synchronous>, transform_indices = @transform_1, window_bounds = array<i64: 1, 16>}, {pipeline_mode = #tpu.pipeline_mode<synchronous>, transform_indices = @transform_2, window_bounds = array<i64: 1, 16>}, {transform_indices = @transform_3, window_bounds = array<i64: 64, 16>}]} {
    %c0 = arith.constant 0 : index
    %c0_0 = arith.constant 0 : index
    %0 = vector.load %arg1[%c0, %c0_0] : memref<64x16xf32, #tpu.memory_space<vmem>>, vector<64x16xf32>
    %cst = arith.constant dense<0.000000e+00> : vector<64xf32>
    %1 = vector.multi_reduction <add>, %0, %cst [1] : vector<64x16xf32> to vector<64xf32>
    %2 = vector.shape_cast %1 : vector<64xf32> to vector<64x1xf32>
    %cst_1 = arith.constant 1.600000e+01 : f32
    %3 = vector.broadcast %cst_1 : f32 to vector<64x1xf32>
    %4 = arith.divf %2, %3 : vector<64x1xf32>
    %5 = vector.broadcast %4 : vector<64x1xf32> to vector<64x16xf32>
    %6 = arith.subf %0, %5 : vector<64x16xf32>
    %7 = arith.mulf %6, %6 : vector<64x16xf32>
    %cst_2 = arith.constant dense<0.000000e+00> : vector<64xf32>
    %8 = vector.multi_reduction <add>, %7, %cst_2 [1] : vector<64x16xf32> to vector<64xf32>
    %9 = vector.shape_cast %8 : vector<64xf32> to vector<64x1xf32>
    %cst_3 = arith.constant 1.600000e+01 : f32
    %10 = vector.broadcast %cst_3 : f32 to vector<64x1xf32>
    %11 = arith.divf %9, %10 : vector<64x1xf32>
    %12 = vector.broadcast %4 : vector<64x1xf32> to vector<64x16xf32>
    %13 = arith.subf %0, %12 : vector<64x16xf32>
    %cst_4 = arith.constant 9.99999974E-6 : f32
    %14 = vector.broadcast %cst_4 : f32 to vector<64x1xf32>
    %15 = arith.addf %11, %14 : vector<64x1xf32>
    %16 = math.rsqrt %15 : vector<64x1xf32>
    %17 = vector.broadcast %16 : vector<64x1xf32> to vector<64x16xf32>
    %18 = arith.mulf %13, %17 : vector<64x16xf32>
    %c0_5 = arith.constant 0 : index
    %c0_6 = arith.constant 0 : index
    %19 = vector.load %arg2[%c0_5, %c0_6] : memref<1x16xf32, #tpu.memory_space<vmem>>, vector<1x16xf32>
    %20 = vector.broadcast %19 : vector<1x16xf32> to vector<64x16xf32>
    %21 = arith.mulf %18, %20 : vector<64x16xf32>
    %c0_7 = arith.constant 0 : index
    %c0_8 = arith.constant 0 : index
    %22 = vector.load %arg3[%c0_7, %c0_8] : memref<1x16xf32, #tpu.memory_space<vmem>>, vector<1x16xf32>
    %23 = vector.broadcast %22 : vector<1x16xf32> to vector<64x16xf32>
    %24 = arith.addf %21, %23 : vector<64x16xf32>
    %c0_9 = arith.constant 0 : index
    %c0_10 = arith.constant 0 : index
    %25 = vector.load %arg4[%c0_9, %c0_10] : memref<64x16xf32, #tpu.memory_space<vmem>>, vector<64x16xf32>
    tpu.vector_store %arg4[%c0_9, %c0_10], %24 {strides = array<i32>} : memref<64x16xf32, #tpu.memory_space<vmem>>, vector<64x16xf32>,
    return
  }
  func.func @transform_0(%arg0: i32) -> (i32, i32) {
    %c0_i32 = arith.constant 0 : i32
    %c0_i32_0 = arith.constant 0 : i32
    return %arg0, %c0_i32 : i32, i32
  }
  func.func @transform_1(%arg0: i32) -> (i32, i32) {
    %c0_i32 = arith.constant 0 : i32
    %c0_i32_0 = arith.constant 0 : i32
    %c0_i32_1 = arith.constant 0 : i32
    return %c0_i32, %c0_i32_0 : i32, i32
  }
  func.func @transform_2(%arg0: i32) -> (i32, i32) {
    %c0_i32 = arith.constant 0 : i32
    %c0_i32_0 = arith.constant 0 : i32
    %c0_i32_1 = arith.constant 0 : i32
    return %c0_i32, %c0_i32_0 : i32, i32
  }
  func.func @transform_3(%arg0: i32) -> (i32, i32) {
    %c0_i32 = arith.constant 0 : i32
    %c0_i32_0 = arith.constant 0 : i32
    return %arg0, %c0_i32 : i32, i32
  }
}

module attributes {stable_mosaic.version = 11 : i64} {
  func.func @_ln_linear_kernel(%arg0: i32, %arg1: memref<8x16xf32, #tpu.memory_space<vmem>>, %arg2: memref<1x16xf32, #tpu.memory_space<vmem>>, %arg3: memref<1x16xf32, #tpu.memory_space<vmem>>, %arg4: memref<16x16xf32, #tpu.memory_space<vmem>>, %arg5: memref<1x16xf32, #tpu.memory_space<vmem>>, %arg6: memref<8x16xf32, #tpu.memory_space<vmem>>) attributes {dimension_semantics = [#tpu.dimension_semantics<parallel>], iteration_bounds = array<i64: 1>, scalar_prefetch = 0 : i64, scratch_operands = 0 : i64, tpu.core_type = #tpu.core_type<tc>, window_params = [{transform_indices = @transform_0, window_bounds = array<i64: 8, 16>}, {pipeline_mode = #tpu.pipeline_mode<synchronous>, transform_indices = @transform_1, window_bounds = array<i64: 1, 16>}, {pipeline_mode = #tpu.pipeline_mode<synchronous>, transform_indices = @transform_2, window_bounds = array<i64: 1, 16>}, {pipeline_mode = #tpu.pipeline_mode<synchronous>, transform_indices = @transform_3, window_bounds = array<i64: 16, 16>}, {pipeline_mode = #tpu.pipeline_mode<synchronous>, transform_indices = @transform_4, window_bounds = array<i64: 1, 16>}, {transform_indices = @transform_5, window_bounds = array<i64: 8, 16>}]} {
    %c0 = arith.constant 0 : index
    %c0_0 = arith.constant 0 : index
    %0 = vector.load %arg1[%c0, %c0_0] : memref<8x16xf32, #tpu.memory_space<vmem>>, vector<8x16xf32>
    %cst = arith.constant dense<0.000000e+00> : vector<8xf32>
    %1 = vector.multi_reduction <add>, %0, %cst [1] : vector<8x16xf32> to vector<8xf32>
    %2 = vector.shape_cast %1 : vector<8xf32> to vector<8x1xf32>
    %cst_1 = arith.constant 1.600000e+01 : f32
    %3 = vector.broadcast %cst_1 : f32 to vector<8x1xf32>
    %4 = arith.divf %2, %3 : vector<8x1xf32>
    %5 = vector.broadcast %4 : vector<8x1xf32> to vector<8x16xf32>
    %6 = arith.subf %0, %5 : vector<8x16xf32>
    %7 = arith.mulf %6, %6 : vector<8x16xf32>
    %cst_2 = arith.constant dense<0.000000e+00> : vector<8xf32>
    %8 = vector.multi_reduction <add>, %7, %cst_2 [1] : vector<8x16xf32> to vector<8xf32>
    %9 = vector.shape_cast %8 : vector<8xf32> to vector<8x1xf32>
    %cst_3 = arith.constant 1.600000e+01 : f32
    %10 = vector.broadcast %cst_3 : f32 to vector<8x1xf32>
    %11 = arith.divf %9, %10 : vector<8x1xf32>
    %12 = vector.broadcast %4 : vector<8x1xf32> to vector<8x16xf32>
    %13 = arith.subf %0, %12 : vector<8x16xf32>
    %cst_4 = arith.constant 9.99999974E-6 : f32
    %14 = vector.broadcast %cst_4 : f32 to vector<8x1xf32>
    %15 = arith.addf %11, %14 : vector<8x1xf32>
    %16 = math.rsqrt %15 : vector<8x1xf32>
    %17 = vector.broadcast %16 : vector<8x1xf32> to vector<8x16xf32>
    %18 = arith.mulf %13, %17 : vector<8x16xf32>
    %c0_5 = arith.constant 0 : index
    %c0_6 = arith.constant 0 : index
    %19 = vector.load %arg2[%c0_5, %c0_6] : memref<1x16xf32, #tpu.memory_space<vmem>>, vector<1x16xf32>
    %20 = vector.broadcast %19 : vector<1x16xf32> to vector<8x16xf32>
    %21 = arith.mulf %18, %20 : vector<8x16xf32>
    %c0_7 = arith.constant 0 : index
    %c0_8 = arith.constant 0 : index
    %22 = vector.load %arg3[%c0_7, %c0_8] : memref<1x16xf32, #tpu.memory_space<vmem>>, vector<1x16xf32>
    %23 = vector.broadcast %22 : vector<1x16xf32> to vector<8x16xf32>
    %24 = arith.addf %21, %23 : vector<8x16xf32>
    %c0_9 = arith.constant 0 : index
    %c0_10 = arith.constant 0 : index
    %25 = vector.load %arg4[%c0_9, %c0_10] : memref<16x16xf32, #tpu.memory_space<vmem>>, vector<16x16xf32>
    %cst_11 = arith.constant dense<0.000000e+00> : vector<8x16xf32>
    %26 = tpu.matmul %24, %25, %cst_11 {dimension_numbers = #tpu.dot_dimension_numbers<[1], [0], [0], [1], [0, 0, 1, 1], [], []>} : vector<8x16xf32>, vector<16x16xf32>, vector<8x16xf32> -> vector<8x16xf32>
    %c0_12 = arith.constant 0 : index
    %c0_13 = arith.constant 0 : index
    %27 = vector.load %arg5[%c0_12, %c0_13] : memref<1x16xf32, #tpu.memory_space<vmem>>, vector<1x16xf32>
    %28 = vector.broadcast %27 : vector<1x16xf32> to vector<8x16xf32>
    %29 = arith.addf %26, %28 : vector<8x16xf32>
    %c0_14 = arith.constant 0 : index
    %c0_15 = arith.constant 0 : index
    %30 = vector.load %arg6[%c0_14, %c0_15] : memref<8x16xf32, #tpu.memory_space<vmem>>, vector<8x16xf32>
    tpu.vector_store %arg6[%c0_14, %c0_15], %29 {strides = array<i32>} : memref<8x16xf32, #tpu.memory_space<vmem>>, vector<8x16xf32>,
    return
  }
  func.func @transform_0(%arg0: i32) -> (i32, i32) {
    %c0_i32 = arith.constant 0 : i32
    %c0_i32_0 = arith.constant 0 : i32
    return %arg0, %c0_i32 : i32, i32
  }
  func.func @transform_1(%arg0: i32) -> (i32, i32) {
    %c0_i32 = arith.constant 0 : i32
    %c0_i32_0 = arith.constant 0 : i32
    %c0_i32_1 = arith.constant 0 : i32
    return %c0_i32, %c0_i32_0 : i32, i32
  }
  func.func @transform_2(%arg0: i32) -> (i32, i32) {
    %c0_i32 = arith.constant 0 : i32
    %c0_i32_0 = arith.constant 0 : i32
    %c0_i32_1 = arith.constant 0 : i32
    return %c0_i32, %c0_i32_0 : i32, i32
  }
  func.func @transform_3(%arg0: i32) -> (i32, i32) {
    %c0_i32 = arith.constant 0 : i32
    %c0_i32_0 = arith.constant 0 : i32
    %c0_i32_1 = arith.constant 0 : i32
    return %c0_i32, %c0_i32_0 : i32, i32
  }
  func.func @transform_4(%arg0: i32) -> (i32, i32) {
    %c0_i32 = arith.constant 0 : i32
    %c0_i32_0 = arith.constant 0 : i32
    %c0_i32_1 = arith.constant 0 : i32
    return %c0_i32, %c0_i32_0 : i32, i32
  }
  func.func @transform_5(%arg0: i32) -> (i32, i32) {
    %c0_i32 = arith.constant 0 : i32
    %c0_i32_0 = arith.constant 0 : i32
    return %arg0, %c0_i32 : i32, i32
  }
}

module attributes {stable_mosaic.version = 11 : i64} {
  func.func @_ln_linear_nobias_kernel(%arg0: i32, %arg1: memref<8x8xf32, #tpu.memory_space<vmem>>, %arg2: memref<1x8xf32, #tpu.memory_space<vmem>>, %arg3: memref<1x8xf32, #tpu.memory_space<vmem>>, %arg4: memref<8x16xf32, #tpu.memory_space<vmem>>, %arg5: memref<8x16xf32, #tpu.memory_space<vmem>>) attributes {dimension_semantics = [#tpu.dimension_semantics<parallel>], iteration_bounds = array<i64: 1>, scalar_prefetch = 0 : i64, scratch_operands = 0 : i64, tpu.core_type = #tpu.core_type<tc>, window_params = [{transform_indices = @transform_0, window_bounds = array<i64: 8, 8>}, {pipeline_mode = #tpu.pipeline_mode<synchronous>, transform_indices = @transform_1, window_bounds = array<i64: 1, 8>}, {pipeline_mode = #tpu.pipeline_mode<synchronous>, transform_indices = @transform_2, window_bounds = array<i64: 1, 8>}, {pipeline_mode = #tpu.pipeline_mode<synchronous>, transform_indices = @transform_3, window_bounds = array<i64: 8, 16>}, {transform_indices = @transform_4, window_bounds = array<i64: 8, 16>}]} {
    %c0 = arith.constant 0 : index
    %c0_0 = arith.constant 0 : index
    %0 = vector.load %arg1[%c0, %c0_0] : memref<8x8xf32, #tpu.memory_space<vmem>>, vector<8x8xf32>
    %cst = arith.constant dense<0.000000e+00> : vector<8xf32>
    %1 = vector.multi_reduction <add>, %0, %cst [1] : vector<8x8xf32> to vector<8xf32>
    %2 = vector.shape_cast %1 : vector<8xf32> to vector<8x1xf32>
    %cst_1 = arith.constant 8.000000e+00 : f32
    %3 = vector.broadcast %cst_1 : f32 to vector<8x1xf32>
    %4 = arith.divf %2, %3 : vector<8x1xf32>
    %5 = vector.broadcast %4 : vector<8x1xf32> to vector<8x8xf32>
    %6 = arith.subf %0, %5 : vector<8x8xf32>
    %7 = arith.mulf %6, %6 : vector<8x8xf32>
    %cst_2 = arith.constant dense<0.000000e+00> : vector<8xf32>
    %8 = vector.multi_reduction <add>, %7, %cst_2 [1] : vector<8x8xf32> to vector<8xf32>
    %9 = vector.shape_cast %8 : vector<8xf32> to vector<8x1xf32>
    %cst_3 = arith.constant 8.000000e+00 : f32
    %10 = vector.broadcast %cst_3 : f32 to vector<8x1xf32>
    %11 = arith.divf %9, %10 : vector<8x1xf32>
    %12 = vector.broadcast %4 : vector<8x1xf32> to vector<8x8xf32>
    %13 = arith.subf %0, %12 : vector<8x8xf32>
    %cst_4 = arith.constant 9.99999974E-6 : f32
    %14 = vector.broadcast %cst_4 : f32 to vector<8x1xf32>
    %15 = arith.addf %11, %14 : vector<8x1xf32>
    %16 = math.rsqrt %15 : vector<8x1xf32>
    %17 = vector.broadcast %16 : vector<8x1xf32> to vector<8x8xf32>
    %18 = arith.mulf %13, %17 : vector<8x8xf32>
    %c0_5 = arith.constant 0 : index
    %c0_6 = arith.constant 0 : index
    %19 = vector.load %arg2[%c0_5, %c0_6] : memref<1x8xf32, #tpu.memory_space<vmem>>, vector<1x8xf32>
    %20 = vector.broadcast %19 : vector<1x8xf32> to vector<8x8xf32>
    %21 = arith.mulf %18, %20 : vector<8x8xf32>
    %c0_7 = arith.constant 0 : index
    %c0_8 = arith.constant 0 : index
    %22 = vector.load %arg3[%c0_7, %c0_8] : memref<1x8xf32, #tpu.memory_space<vmem>>, vector<1x8xf32>
    %23 = vector.broadcast %22 : vector<1x8xf32> to vector<8x8xf32>
    %24 = arith.addf %21, %23 : vector<8x8xf32>
    %c0_9 = arith.constant 0 : index
    %c0_10 = arith.constant 0 : index
    %25 = vector.load %arg4[%c0_9, %c0_10] : memref<8x16xf32, #tpu.memory_space<vmem>>, vector<8x16xf32>
    %cst_11 = arith.constant dense<0.000000e+00> : vector<8x16xf32>
    %26 = tpu.matmul %24, %25, %cst_11 {dimension_numbers = #tpu.dot_dimension_numbers<[1], [0], [0], [1], [0, 0, 1, 1], [], []>} : vector<8x8xf32>, vector<8x16xf32>, vector<8x16xf32> -> vector<8x16xf32>
    %c0_12 = arith.constant 0 : index
    %c0_13 = arith.constant 0 : index
    %27 = vector.load %arg5[%c0_12, %c0_13] : memref<8x16xf32, #tpu.memory_space<vmem>>, vector<8x16xf32>
    tpu.vector_store %arg5[%c0_12, %c0_13], %26 {strides = array<i32>} : memref<8x16xf32, #tpu.memory_space<vmem>>, vector<8x16xf32>,
    return
  }
  func.func @transform_0(%arg0: i32) -> (i32, i32) {
    %c0_i32 = arith.constant 0 : i32
    %c0_i32_0 = arith.constant 0 : i32
    return %arg0, %c0_i32 : i32, i32
  }
  func.func @transform_1(%arg0: i32) -> (i32, i32) {
    %c0_i32 = arith.constant 0 : i32
    %c0_i32_0 = arith.constant 0 : i32
    %c0_i32_1 = arith.constant 0 : i32
    return %c0_i32, %c0_i32_0 : i32, i32
  }
  func.func @transform_2(%arg0: i32) -> (i32, i32) {
    %c0_i32 = arith.constant 0 : i32
    %c0_i32_0 = arith.constant 0 : i32
    %c0_i32_1 = arith.constant 0 : i32
    return %c0_i32, %c0_i32_0 : i32, i32
  }
  func.func @transform_3(%arg0: i32) -> (i32, i32) {
    %c0_i32 = arith.constant 0 : i32
    %c0_i32_0 = arith.constant 0 : i32
    %c0_i32_1 = arith.constant 0 : i32
    return %c0_i32, %c0_i32_0 : i32, i32
  }
  func.func @transform_4(%arg0: i32) -> (i32, i32) {
    %c0_i32 = arith.constant 0 : i32
    %c0_i32_0 = arith.constant 0 : i32
    return %arg0, %c0_i32 : i32, i32
  }
}

module attributes {stable_mosaic.version = 11 : i64} {
  func.func @_layernorm_kernel(%arg0: i32, %arg1: memref<8x16xf32, #tpu.memory_space<vmem>>, %arg2: memref<1x16xf32, #tpu.memory_space<vmem>>, %arg3: memref<1x16xf32, #tpu.memory_space<vmem>>, %arg4: memref<8x16xf32, #tpu.memory_space<vmem>>) attributes {dimension_semantics = [#tpu.dimension_semantics<parallel>], iteration_bounds = array<i64: 1>, scalar_prefetch = 0 : i64, scratch_operands = 0 : i64, tpu.core_type = #tpu.core_type<tc>, window_params = [{transform_indices = @transform_0, window_bounds = array<i64: 8, 16>}, {pipeline_mode = #tpu.pipeline_mode<synchronous>, transform_indices = @transform_1, window_bounds = array<i64: 1, 16>}, {pipeline_mode = #tpu.pipeline_mode<synchronous>, transform_indices = @transform_2, window_bounds = array<i64: 1, 16>}, {transform_indices = @transform_3, window_bounds = array<i64: 8, 16>}]} {
    %c0 = arith.constant 0 : index
    %c0_0 = arith.constant 0 : index
    %0 = vector.load %arg1[%c0, %c0_0] : memref<8x16xf32, #tpu.memory_space<vmem>>, vector<8x16xf32>
    %cst = arith.constant dense<0.000000e+00> : vector<8xf32>
    %1 = vector.multi_reduction <add>, %0, %cst [1] : vector<8x16xf32> to vector<8xf32>
    %2 = vector.shape_cast %1 : vector<8xf32> to vector<8x1xf32>
    %cst_1 = arith.constant 1.600000e+01 : f32
    %3 = vector.broadcast %cst_1 : f32 to vector<8x1xf32>
    %4 = arith.divf %2, %3 : vector<8x1xf32>
    %5 = vector.broadcast %4 : vector<8x1xf32> to vector<8x16xf32>
    %6 = arith.subf %0, %5 : vector<8x16xf32>
    %7 = arith.mulf %6, %6 : vector<8x16xf32>
    %cst_2 = arith.constant dense<0.000000e+00> : vector<8xf32>
    %8 = vector.multi_reduction <add>, %7, %cst_2 [1] : vector<8x16xf32> to vector<8xf32>
    %9 = vector.shape_cast %8 : vector<8xf32> to vector<8x1xf32>
    %cst_3 = arith.constant 1.600000e+01 : f32
    %10 = vector.broadcast %cst_3 : f32 to vector<8x1xf32>
    %11 = arith.divf %9, %10 : vector<8x1xf32>
    %12 = vector.broadcast %4 : vector<8x1xf32> to vector<8x16xf32>
    %13 = arith.subf %0, %12 : vector<8x16xf32>
    %cst_4 = arith.constant 9.99999974E-6 : f32
    %14 = vector.broadcast %cst_4 : f32 to vector<8x1xf32>
    %15 = arith.addf %11, %14 : vector<8x1xf32>
    %16 = math.rsqrt %15 : vector<8x1xf32>
    %17 = vector.broadcast %16 : vector<8x1xf32> to vector<8x16xf32>
    %18 = arith.mulf %13, %17 : vector<8x16xf32>
    %c0_5 = arith.constant 0 : index
    %c0_6 = arith.constant 0 : index
    %19 = vector.load %arg2[%c0_5, %c0_6] : memref<1x16xf32, #tpu.memory_space<vmem>>, vector<1x16xf32>
    %20 = vector.broadcast %19 : vector<1x16xf32> to vector<8x16xf32>
    %21 = arith.mulf %18, %20 : vector<8x16xf32>
    %c0_7 = arith.constant 0 : index
    %c0_8 = arith.constant 0 : index
    %22 = vector.load %arg3[%c0_7, %c0_8] : memref<1x16xf32, #tpu.memory_space<vmem>>, vector<1x16xf32>
    %23 = vector.broadcast %22 : vector<1x16xf32> to vector<8x16xf32>
    %24 = arith.addf %21, %23 : vector<8x16xf32>
    %c0_9 = arith.constant 0 : index
    %c0_10 = arith.constant 0 : index
    %25 = vector.load %arg4[%c0_9, %c0_10] : memref<8x16xf32, #tpu.memory_space<vmem>>, vector<8x16xf32>
    tpu.vector_store %arg4[%c0_9, %c0_10], %24 {strides = array<i32>} : memref<8x16xf32, #tpu.memory_space<vmem>>, vector<8x16xf32>,
    return
  }
  func.func @transform_0(%arg0: i32) -> (i32, i32) {
    %c0_i32 = arith.constant 0 : i32
    %c0_i32_0 = arith.constant 0 : i32
    return %arg0, %c0_i32 : i32, i32
  }
  func.func @transform_1(%arg0: i32) -> (i32, i32) {
    %c0_i32 = arith.constant 0 : i32
    %c0_i32_0 = arith.constant 0 : i32
    %c0_i32_1 = arith.constant 0 : i32
    return %c0_i32, %c0_i32_0 : i32, i32
  }
  func.func @transform_2(%arg0: i32) -> (i32, i32) {
    %c0_i32 = arith.constant 0 : i32
    %c0_i32_0 = arith.constant 0 : i32
    %c0_i32_1 = arith.constant 0 : i32
    return %c0_i32, %c0_i32_0 : i32, i32
  }
  func.func @transform_3(%arg0: i32) -> (i32, i32) {
    %c0_i32 = arith.constant 0 : i32
    %c0_i32_0 = arith.constant 0 : i32
    return %arg0, %c0_i32 : i32, i32
  }
}

module attributes {stable_mosaic.version = 11 : i64} {
  func.func @_linear_kernel(%arg0: i32, %arg1: memref<8x32xf32, #tpu.memory_space<vmem>>, %arg2: memref<32x14xf32, #tpu.memory_space<vmem>>, %arg3: memref<1x14xf32, #tpu.memory_space<vmem>>, %arg4: memref<8x14xf32, #tpu.memory_space<vmem>>) attributes {dimension_semantics = [#tpu.dimension_semantics<parallel>], iteration_bounds = array<i64: 1>, scalar_prefetch = 0 : i64, scratch_operands = 0 : i64, tpu.core_type = #tpu.core_type<tc>, window_params = [{transform_indices = @transform_0, window_bounds = array<i64: 8, 32>}, {pipeline_mode = #tpu.pipeline_mode<synchronous>, transform_indices = @transform_1, window_bounds = array<i64: 32, 14>}, {pipeline_mode = #tpu.pipeline_mode<synchronous>, transform_indices = @transform_2, window_bounds = array<i64: 1, 14>}, {transform_indices = @transform_3, window_bounds = array<i64: 8, 14>}]} {
    %c0 = arith.constant 0 : index
    %c0_0 = arith.constant 0 : index
    %0 = vector.load %arg1[%c0, %c0_0] : memref<8x32xf32, #tpu.memory_space<vmem>>, vector<8x32xf32>
    %c0_1 = arith.constant 0 : index
    %c0_2 = arith.constant 0 : index
    %1 = vector.load %arg2[%c0_1, %c0_2] : memref<32x14xf32, #tpu.memory_space<vmem>>, vector<32x14xf32>
    %cst = arith.constant dense<0.000000e+00> : vector<8x14xf32>
    %2 = tpu.matmul %0, %1, %cst {dimension_numbers = #tpu.dot_dimension_numbers<[1], [0], [0], [1], [0, 0, 1, 1], [], []>} : vector<8x32xf32>, vector<32x14xf32>, vector<8x14xf32> -> vector<8x14xf32>
    %c0_3 = arith.constant 0 : index
    %c0_4 = arith.constant 0 : index
    %3 = vector.load %arg3[%c0_3, %c0_4] : memref<1x14xf32, #tpu.memory_space<vmem>>, vector<1x14xf32>
    %4 = vector.broadcast %3 : vector<1x14xf32> to vector<8x14xf32>
    %5 = arith.addf %2, %4 : vector<8x14xf32>
    %c0_5 = arith.constant 0 : index
    %c0_6 = arith.constant 0 : index
    %6 = vector.load %arg4[%c0_5, %c0_6] : memref<8x14xf32, #tpu.memory_space<vmem>>, vector<8x14xf32>
    tpu.vector_store %arg4[%c0_5, %c0_6], %5 {strides = array<i32>} : memref<8x14xf32, #tpu.memory_space<vmem>>, vector<8x14xf32>,
    return
  }
  func.func @transform_0(%arg0: i32) -> (i32, i32) {
    %c0_i32 = arith.constant 0 : i32
    %c0_i32_0 = arith.constant 0 : i32
    return %arg0, %c0_i32 : i32, i32
  }
  func.func @transform_1(%arg0: i32) -> (i32, i32) {
    %c0_i32 = arith.constant 0 : i32
    %c0_i32_0 = arith.constant 0 : i32
    %c0_i32_1 = arith.constant 0 : i32
    return %c0_i32, %c0_i32_0 : i32, i32
  }
  func.func @transform_2(%arg0: i32) -> (i32, i32) {
    %c0_i32 = arith.constant 0 : i32
    %c0_i32_0 = arith.constant 0 : i32
    %c0_i32_1 = arith.constant 0 : i32
    return %c0_i32, %c0_i32_0 : i32, i32
  }
  func.func @transform_3(%arg0: i32) -> (i32, i32) {
    %c0_i32 = arith.constant 0 : i32
    %c0_i32_0 = arith.constant 0 : i32
    return %arg0, %c0_i32 : i32, i32
  }
}

module attributes {stable_mosaic.version = 11 : i64} {
  func.func @_ln_linear_kernel(%arg0: i32, %arg1: memref<8x8xf32, #tpu.memory_space<vmem>>, %arg2: memref<1x8xf32, #tpu.memory_space<vmem>>, %arg3: memref<1x8xf32, #tpu.memory_space<vmem>>, %arg4: memref<8x32xf32, #tpu.memory_space<vmem>>, %arg5: memref<1x32xf32, #tpu.memory_space<vmem>>, %arg6: memref<8x32xf32, #tpu.memory_space<vmem>>) attributes {dimension_semantics = [#tpu.dimension_semantics<parallel>], iteration_bounds = array<i64: 1>, scalar_prefetch = 0 : i64, scratch_operands = 0 : i64, tpu.core_type = #tpu.core_type<tc>, window_params = [{transform_indices = @transform_0, window_bounds = array<i64: 8, 8>}, {pipeline_mode = #tpu.pipeline_mode<synchronous>, transform_indices = @transform_1, window_bounds = array<i64: 1, 8>}, {pipeline_mode = #tpu.pipeline_mode<synchronous>, transform_indices = @transform_2, window_bounds = array<i64: 1, 8>}, {pipeline_mode = #tpu.pipeline_mode<synchronous>, transform_indices = @transform_3, window_bounds = array<i64: 8, 32>}, {pipeline_mode = #tpu.pipeline_mode<synchronous>, transform_indices = @transform_4, window_bounds = array<i64: 1, 32>}, {transform_indices = @transform_5, window_bounds = array<i64: 8, 32>}]} {
    %c0 = arith.constant 0 : index
    %c0_0 = arith.constant 0 : index
    %0 = vector.load %arg1[%c0, %c0_0] : memref<8x8xf32, #tpu.memory_space<vmem>>, vector<8x8xf32>
    %cst = arith.constant dense<0.000000e+00> : vector<8xf32>
    %1 = vector.multi_reduction <add>, %0, %cst [1] : vector<8x8xf32> to vector<8xf32>
    %2 = vector.shape_cast %1 : vector<8xf32> to vector<8x1xf32>
    %cst_1 = arith.constant 8.000000e+00 : f32
    %3 = vector.broadcast %cst_1 : f32 to vector<8x1xf32>
    %4 = arith.divf %2, %3 : vector<8x1xf32>
    %5 = vector.broadcast %4 : vector<8x1xf32> to vector<8x8xf32>
    %6 = arith.subf %0, %5 : vector<8x8xf32>
    %7 = arith.mulf %6, %6 : vector<8x8xf32>
    %cst_2 = arith.constant dense<0.000000e+00> : vector<8xf32>
    %8 = vector.multi_reduction <add>, %7, %cst_2 [1] : vector<8x8xf32> to vector<8xf32>
    %9 = vector.shape_cast %8 : vector<8xf32> to vector<8x1xf32>
    %cst_3 = arith.constant 8.000000e+00 : f32
    %10 = vector.broadcast %cst_3 : f32 to vector<8x1xf32>
    %11 = arith.divf %9, %10 : vector<8x1xf32>
    %12 = vector.broadcast %4 : vector<8x1xf32> to vector<8x8xf32>
    %13 = arith.subf %0, %12 : vector<8x8xf32>
    %cst_4 = arith.constant 9.99999974E-6 : f32
    %14 = vector.broadcast %cst_4 : f32 to vector<8x1xf32>
    %15 = arith.addf %11, %14 : vector<8x1xf32>
    %16 = math.rsqrt %15 : vector<8x1xf32>
    %17 = vector.broadcast %16 : vector<8x1xf32> to vector<8x8xf32>
    %18 = arith.mulf %13, %17 : vector<8x8xf32>
    %c0_5 = arith.constant 0 : index
    %c0_6 = arith.constant 0 : index
    %19 = vector.load %arg2[%c0_5, %c0_6] : memref<1x8xf32, #tpu.memory_space<vmem>>, vector<1x8xf32>
    %20 = vector.broadcast %19 : vector<1x8xf32> to vector<8x8xf32>
    %21 = arith.mulf %18, %20 : vector<8x8xf32>
    %c0_7 = arith.constant 0 : index
    %c0_8 = arith.constant 0 : index
    %22 = vector.load %arg3[%c0_7, %c0_8] : memref<1x8xf32, #tpu.memory_space<vmem>>, vector<1x8xf32>
    %23 = vector.broadcast %22 : vector<1x8xf32> to vector<8x8xf32>
    %24 = arith.addf %21, %23 : vector<8x8xf32>
    %c0_9 = arith.constant 0 : index
    %c0_10 = arith.constant 0 : index
    %25 = vector.load %arg4[%c0_9, %c0_10] : memref<8x32xf32, #tpu.memory_space<vmem>>, vector<8x32xf32>
    %cst_11 = arith.constant dense<0.000000e+00> : vector<8x32xf32>
    %26 = tpu.matmul %24, %25, %cst_11 {dimension_numbers = #tpu.dot_dimension_numbers<[1], [0], [0], [1], [0, 0, 1, 1], [], []>} : vector<8x8xf32>, vector<8x32xf32>, vector<8x32xf32> -> vector<8x32xf32>
    %c0_12 = arith.constant 0 : index
    %c0_13 = arith.constant 0 : index
    %27 = vector.load %arg5[%c0_12, %c0_13] : memref<1x32xf32, #tpu.memory_space<vmem>>, vector<1x32xf32>
    %28 = vector.broadcast %27 : vector<1x32xf32> to vector<8x32xf32>
    %29 = arith.addf %26, %28 : vector<8x32xf32>
    %c0_14 = arith.constant 0 : index
    %c0_15 = arith.constant 0 : index
    %30 = vector.load %arg6[%c0_14, %c0_15] : memref<8x32xf32, #tpu.memory_space<vmem>>, vector<8x32xf32>
    tpu.vector_store %arg6[%c0_14, %c0_15], %29 {strides = array<i32>} : memref<8x32xf32, #tpu.memory_space<vmem>>, vector<8x32xf32>,
    return
  }
  func.func @transform_0(%arg0: i32) -> (i32, i32) {
    %c0_i32 = arith.constant 0 : i32
    %c0_i32_0 = arith.constant 0 : i32
    return %arg0, %c0_i32 : i32, i32
  }
  func.func @transform_1(%arg0: i32) -> (i32, i32) {
    %c0_i32 = arith.constant 0 : i32
    %c0_i32_0 = arith.constant 0 : i32
    %c0_i32_1 = arith.constant 0 : i32
    return %c0_i32, %c0_i32_0 : i32, i32
  }
  func.func @transform_2(%arg0: i32) -> (i32, i32) {
    %c0_i32 = arith.constant 0 : i32
    %c0_i32_0 = arith.constant 0 : i32
    %c0_i32_1 = arith.constant 0 : i32
    return %c0_i32, %c0_i32_0 : i32, i32
  }
  func.func @transform_3(%arg0: i32) -> (i32, i32) {
    %c0_i32 = arith.constant 0 : i32
    %c0_i32_0 = arith.constant 0 : i32
    %c0_i32_1 = arith.constant 0 : i32
    return %c0_i32, %c0_i32_0 : i32, i32
  }
  func.func @transform_4(%arg0: i32) -> (i32, i32) {
    %c0_i32 = arith.constant 0 : i32
    %c0_i32_0 = arith.constant 0 : i32
    %c0_i32_1 = arith.constant 0 : i32
    return %c0_i32, %c0_i32_0 : i32, i32
  }
  func.func @transform_5(%arg0: i32) -> (i32, i32) {
    %c0_i32 = arith.constant 0 : i32
    %c0_i32_0 = arith.constant 0 : i32
    return %arg0, %c0_i32 : i32, i32
  }
}

module attributes {stable_mosaic.version = 11 : i64} {
  func.func @_ln_linear_kernel(%arg0: i32, %arg1: memref<32x32xf32, #tpu.memory_space<vmem>>, %arg2: memref<1x32xf32, #tpu.memory_space<vmem>>, %arg3: memref<1x32xf32, #tpu.memory_space<vmem>>, %arg4: memref<32x160xf32, #tpu.memory_space<vmem>>, %arg5: memref<1x160xf32, #tpu.memory_space<vmem>>, %arg6: memref<32x160xf32, #tpu.memory_space<vmem>>) attributes {dimension_semantics = [#tpu.dimension_semantics<parallel>], iteration_bounds = array<i64: 1>, scalar_prefetch = 0 : i64, scratch_operands = 0 : i64, tpu.core_type = #tpu.core_type<tc>, window_params = [{transform_indices = @transform_0, window_bounds = array<i64: 32, 32>}, {pipeline_mode = #tpu.pipeline_mode<synchronous>, transform_indices = @transform_1, window_bounds = array<i64: 1, 32>}, {pipeline_mode = #tpu.pipeline_mode<synchronous>, transform_indices = @transform_2, window_bounds = array<i64: 1, 32>}, {pipeline_mode = #tpu.pipeline_mode<synchronous>, transform_indices = @transform_3, window_bounds = array<i64: 32, 160>}, {pipeline_mode = #tpu.pipeline_mode<synchronous>, transform_indices = @transform_4, window_bounds = array<i64: 1, 160>}, {transform_indices = @transform_5, window_bounds = array<i64: 32, 160>}]} {
    %c0 = arith.constant 0 : index
    %c0_0 = arith.constant 0 : index
    %0 = vector.load %arg1[%c0, %c0_0] : memref<32x32xf32, #tpu.memory_space<vmem>>, vector<32x32xf32>
    %cst = arith.constant dense<0.000000e+00> : vector<32xf32>
    %1 = vector.multi_reduction <add>, %0, %cst [1] : vector<32x32xf32> to vector<32xf32>
    %2 = vector.shape_cast %1 : vector<32xf32> to vector<32x1xf32>
    %cst_1 = arith.constant 3.200000e+01 : f32
    %3 = vector.broadcast %cst_1 : f32 to vector<32x1xf32>
    %4 = arith.divf %2, %3 : vector<32x1xf32>
    %5 = vector.broadcast %4 : vector<32x1xf32> to vector<32x32xf32>
    %6 = arith.subf %0, %5 : vector<32x32xf32>
    %7 = arith.mulf %6, %6 : vector<32x32xf32>
    %cst_2 = arith.constant dense<0.000000e+00> : vector<32xf32>
    %8 = vector.multi_reduction <add>, %7, %cst_2 [1] : vector<32x32xf32> to vector<32xf32>
    %9 = vector.shape_cast %8 : vector<32xf32> to vector<32x1xf32>
    %cst_3 = arith.constant 3.200000e+01 : f32
    %10 = vector.broadcast %cst_3 : f32 to vector<32x1xf32>
    %11 = arith.divf %9, %10 : vector<32x1xf32>
    %12 = vector.broadcast %4 : vector<32x1xf32> to vector<32x32xf32>
    %13 = arith.subf %0, %12 : vector<32x32xf32>
    %cst_4 = arith.constant 9.99999974E-6 : f32
    %14 = vector.broadcast %cst_4 : f32 to vector<32x1xf32>
    %15 = arith.addf %11, %14 : vector<32x1xf32>
    %16 = math.rsqrt %15 : vector<32x1xf32>
    %17 = vector.broadcast %16 : vector<32x1xf32> to vector<32x32xf32>
    %18 = arith.mulf %13, %17 : vector<32x32xf32>
    %c0_5 = arith.constant 0 : index
    %c0_6 = arith.constant 0 : index
    %19 = vector.load %arg2[%c0_5, %c0_6] : memref<1x32xf32, #tpu.memory_space<vmem>>, vector<1x32xf32>
    %20 = vector.broadcast %19 : vector<1x32xf32> to vector<32x32xf32>
    %21 = arith.mulf %18, %20 : vector<32x32xf32>
    %c0_7 = arith.constant 0 : index
    %c0_8 = arith.constant 0 : index
    %22 = vector.load %arg3[%c0_7, %c0_8] : memref<1x32xf32, #tpu.memory_space<vmem>>, vector<1x32xf32>
    %23 = vector.broadcast %22 : vector<1x32xf32> to vector<32x32xf32>
    %24 = arith.addf %21, %23 : vector<32x32xf32>
    %c0_9 = arith.constant 0 : index
    %c0_10 = arith.constant 0 : index
    %25 = vector.load %arg4[%c0_9, %c0_10] : memref<32x160xf32, #tpu.memory_space<vmem>>, vector<32x160xf32>
    %cst_11 = arith.constant dense<0.000000e+00> : vector<32x160xf32>
    %26 = tpu.matmul %24, %25, %cst_11 {dimension_numbers = #tpu.dot_dimension_numbers<[1], [0], [0], [1], [0, 0, 1, 1], [], []>} : vector<32x32xf32>, vector<32x160xf32>, vector<32x160xf32> -> vector<32x160xf32>
    %c0_12 = arith.constant 0 : index
    %c0_13 = arith.constant 0 : index
    %27 = vector.load %arg5[%c0_12, %c0_13] : memref<1x160xf32, #tpu.memory_space<vmem>>, vector<1x160xf32>
    %28 = vector.broadcast %27 : vector<1x160xf32> to vector<32x160xf32>
    %29 = arith.addf %26, %28 : vector<32x160xf32>
    %c0_14 = arith.constant 0 : index
    %c0_15 = arith.constant 0 : index
    %30 = vector.load %arg6[%c0_14, %c0_15] : memref<32x160xf32, #tpu.memory_space<vmem>>, vector<32x160xf32>
    tpu.vector_store %arg6[%c0_14, %c0_15], %29 {strides = array<i32>} : memref<32x160xf32, #tpu.memory_space<vmem>>, vector<32x160xf32>,
    return
  }
  func.func @transform_0(%arg0: i32) -> (i32, i32) {
    %c0_i32 = arith.constant 0 : i32
    %c0_i32_0 = arith.constant 0 : i32
    return %arg0, %c0_i32 : i32, i32
  }
  func.func @transform_1(%arg0: i32) -> (i32, i32) {
    %c0_i32 = arith.constant 0 : i32
    %c0_i32_0 = arith.constant 0 : i32
    %c0_i32_1 = arith.constant 0 : i32
    return %c0_i32, %c0_i32_0 : i32, i32
  }
  func.func @transform_2(%arg0: i32) -> (i32, i32) {
    %c0_i32 = arith.constant 0 : i32
    %c0_i32_0 = arith.constant 0 : i32
    %c0_i32_1 = arith.constant 0 : i32
    return %c0_i32, %c0_i32_0 : i32, i32
  }
  func.func @transform_3(%arg0: i32) -> (i32, i32) {
    %c0_i32 = arith.constant 0 : i32
    %c0_i32_0 = arith.constant 0 : i32
    %c0_i32_1 = arith.constant 0 : i32
    return %c0_i32, %c0_i32_0 : i32, i32
  }
  func.func @transform_4(%arg0: i32) -> (i32, i32) {
    %c0_i32 = arith.constant 0 : i32
    %c0_i32_0 = arith.constant 0 : i32
    %c0_i32_1 = arith.constant 0 : i32
    return %c0_i32, %c0_i32_0 : i32, i32
  }
  func.func @transform_5(%arg0: i32) -> (i32, i32) {
    %c0_i32 = arith.constant 0 : i32
    %c0_i32_0 = arith.constant 0 : i32
    return %arg0, %c0_i32 : i32, i32
  }
}

module attributes {stable_mosaic.version = 11 : i64} {
  func.func @_ln_linear_kernel(%arg0: i32, %arg1: memref<8x32xf32, #tpu.memory_space<vmem>>, %arg2: memref<1x32xf32, #tpu.memory_space<vmem>>, %arg3: memref<1x32xf32, #tpu.memory_space<vmem>>, %arg4: memref<32x32xf32, #tpu.memory_space<vmem>>, %arg5: memref<1x32xf32, #tpu.memory_space<vmem>>, %arg6: memref<8x32xf32, #tpu.memory_space<vmem>>) attributes {dimension_semantics = [#tpu.dimension_semantics<parallel>], iteration_bounds = array<i64: 1>, scalar_prefetch = 0 : i64, scratch_operands = 0 : i64, tpu.core_type = #tpu.core_type<tc>, window_params = [{transform_indices = @transform_0, window_bounds = array<i64: 8, 32>}, {pipeline_mode = #tpu.pipeline_mode<synchronous>, transform_indices = @transform_1, window_bounds = array<i64: 1, 32>}, {pipeline_mode = #tpu.pipeline_mode<synchronous>, transform_indices = @transform_2, window_bounds = array<i64: 1, 32>}, {pipeline_mode = #tpu.pipeline_mode<synchronous>, transform_indices = @transform_3, window_bounds = array<i64: 32, 32>}, {pipeline_mode = #tpu.pipeline_mode<synchronous>, transform_indices = @transform_4, window_bounds = array<i64: 1, 32>}, {transform_indices = @transform_5, window_bounds = array<i64: 8, 32>}]} {
    %c0 = arith.constant 0 : index
    %c0_0 = arith.constant 0 : index
    %0 = vector.load %arg1[%c0, %c0_0] : memref<8x32xf32, #tpu.memory_space<vmem>>, vector<8x32xf32>
    %cst = arith.constant dense<0.000000e+00> : vector<8xf32>
    %1 = vector.multi_reduction <add>, %0, %cst [1] : vector<8x32xf32> to vector<8xf32>
    %2 = vector.shape_cast %1 : vector<8xf32> to vector<8x1xf32>
    %cst_1 = arith.constant 3.200000e+01 : f32
    %3 = vector.broadcast %cst_1 : f32 to vector<8x1xf32>
    %4 = arith.divf %2, %3 : vector<8x1xf32>
    %5 = vector.broadcast %4 : vector<8x1xf32> to vector<8x32xf32>
    %6 = arith.subf %0, %5 : vector<8x32xf32>
    %7 = arith.mulf %6, %6 : vector<8x32xf32>
    %cst_2 = arith.constant dense<0.000000e+00> : vector<8xf32>
    %8 = vector.multi_reduction <add>, %7, %cst_2 [1] : vector<8x32xf32> to vector<8xf32>
    %9 = vector.shape_cast %8 : vector<8xf32> to vector<8x1xf32>
    %cst_3 = arith.constant 3.200000e+01 : f32
    %10 = vector.broadcast %cst_3 : f32 to vector<8x1xf32>
    %11 = arith.divf %9, %10 : vector<8x1xf32>
    %12 = vector.broadcast %4 : vector<8x1xf32> to vector<8x32xf32>
    %13 = arith.subf %0, %12 : vector<8x32xf32>
    %cst_4 = arith.constant 9.99999974E-6 : f32
    %14 = vector.broadcast %cst_4 : f32 to vector<8x1xf32>
    %15 = arith.addf %11, %14 : vector<8x1xf32>
    %16 = math.rsqrt %15 : vector<8x1xf32>
    %17 = vector.broadcast %16 : vector<8x1xf32> to vector<8x32xf32>
    %18 = arith.mulf %13, %17 : vector<8x32xf32>
    %c0_5 = arith.constant 0 : index
    %c0_6 = arith.constant 0 : index
    %19 = vector.load %arg2[%c0_5, %c0_6] : memref<1x32xf32, #tpu.memory_space<vmem>>, vector<1x32xf32>
    %20 = vector.broadcast %19 : vector<1x32xf32> to vector<8x32xf32>
    %21 = arith.mulf %18, %20 : vector<8x32xf32>
    %c0_7 = arith.constant 0 : index
    %c0_8 = arith.constant 0 : index
    %22 = vector.load %arg3[%c0_7, %c0_8] : memref<1x32xf32, #tpu.memory_space<vmem>>, vector<1x32xf32>
    %23 = vector.broadcast %22 : vector<1x32xf32> to vector<8x32xf32>
    %24 = arith.addf %21, %23 : vector<8x32xf32>
    %c0_9 = arith.constant 0 : index
    %c0_10 = arith.constant 0 : index
    %25 = vector.load %arg4[%c0_9, %c0_10] : memref<32x32xf32, #tpu.memory_space<vmem>>, vector<32x32xf32>
    %cst_11 = arith.constant dense<0.000000e+00> : vector<8x32xf32>
    %26 = tpu.matmul %24, %25, %cst_11 {dimension_numbers = #tpu.dot_dimension_numbers<[1], [0], [0], [1], [0, 0, 1, 1], [], []>} : vector<8x32xf32>, vector<32x32xf32>, vector<8x32xf32> -> vector<8x32xf32>
    %c0_12 = arith.constant 0 : index
    %c0_13 = arith.constant 0 : index
    %27 = vector.load %arg5[%c0_12, %c0_13] : memref<1x32xf32, #tpu.memory_space<vmem>>, vector<1x32xf32>
    %28 = vector.broadcast %27 : vector<1x32xf32> to vector<8x32xf32>
    %29 = arith.addf %26, %28 : vector<8x32xf32>
    %c0_14 = arith.constant 0 : index
    %c0_15 = arith.constant 0 : index
    %30 = vector.load %arg6[%c0_14, %c0_15] : memref<8x32xf32, #tpu.memory_space<vmem>>, vector<8x32xf32>
    tpu.vector_store %arg6[%c0_14, %c0_15], %29 {strides = array<i32>} : memref<8x32xf32, #tpu.memory_space<vmem>>, vector<8x32xf32>,
    return
  }
  func.func @transform_0(%arg0: i32) -> (i32, i32) {
    %c0_i32 = arith.constant 0 : i32
    %c0_i32_0 = arith.constant 0 : i32
    return %arg0, %c0_i32 : i32, i32
  }
  func.func @transform_1(%arg0: i32) -> (i32, i32) {
    %c0_i32 = arith.constant 0 : i32
    %c0_i32_0 = arith.constant 0 : i32
    %c0_i32_1 = arith.constant 0 : i32
    return %c0_i32, %c0_i32_0 : i32, i32
  }
  func.func @transform_2(%arg0: i32) -> (i32, i32) {
    %c0_i32 = arith.constant 0 : i32
    %c0_i32_0 = arith.constant 0 : i32
    %c0_i32_1 = arith.constant 0 : i32
    return %c0_i32, %c0_i32_0 : i32, i32
  }
  func.func @transform_3(%arg0: i32) -> (i32, i32) {
    %c0_i32 = arith.constant 0 : i32
    %c0_i32_0 = arith.constant 0 : i32
    %c0_i32_1 = arith.constant 0 : i32
    return %c0_i32, %c0_i32_0 : i32, i32
  }
  func.func @transform_4(%arg0: i32) -> (i32, i32) {
    %c0_i32 = arith.constant 0 : i32
    %c0_i32_0 = arith.constant 0 : i32
    %c0_i32_1 = arith.constant 0 : i32
    return %c0_i32, %c0_i32_0 : i32, i32
  }
  func.func @transform_5(%arg0: i32) -> (i32, i32) {
    %c0_i32 = arith.constant 0 : i32
    %c0_i32_0 = arith.constant 0 : i32
    return %arg0, %c0_i32 : i32, i32
  }
}

module attributes {stable_mosaic.version = 11 : i64} {
  func.func @_linear_kernel(%arg0: i32, %arg1: memref<32x32xf32, #tpu.memory_space<vmem>>, %arg2: memref<32x32xf32, #tpu.memory_space<vmem>>, %arg3: memref<1x32xf32, #tpu.memory_space<vmem>>, %arg4: memref<32x32xf32, #tpu.memory_space<vmem>>) attributes {dimension_semantics = [#tpu.dimension_semantics<parallel>], iteration_bounds = array<i64: 1>, scalar_prefetch = 0 : i64, scratch_operands = 0 : i64, tpu.core_type = #tpu.core_type<tc>, window_params = [{transform_indices = @transform_0, window_bounds = array<i64: 32, 32>}, {pipeline_mode = #tpu.pipeline_mode<synchronous>, transform_indices = @transform_1, window_bounds = array<i64: 32, 32>}, {pipeline_mode = #tpu.pipeline_mode<synchronous>, transform_indices = @transform_2, window_bounds = array<i64: 1, 32>}, {transform_indices = @transform_3, window_bounds = array<i64: 32, 32>}]} {
    %c0 = arith.constant 0 : index
    %c0_0 = arith.constant 0 : index
    %0 = vector.load %arg1[%c0, %c0_0] : memref<32x32xf32, #tpu.memory_space<vmem>>, vector<32x32xf32>
    %c0_1 = arith.constant 0 : index
    %c0_2 = arith.constant 0 : index
    %1 = vector.load %arg2[%c0_1, %c0_2] : memref<32x32xf32, #tpu.memory_space<vmem>>, vector<32x32xf32>
    %cst = arith.constant dense<0.000000e+00> : vector<32x32xf32>
    %2 = tpu.matmul %0, %1, %cst {dimension_numbers = #tpu.dot_dimension_numbers<[1], [0], [0], [1], [0, 0, 1, 1], [], []>} : vector<32x32xf32>, vector<32x32xf32>, vector<32x32xf32> -> vector<32x32xf32>
    %c0_3 = arith.constant 0 : index
    %c0_4 = arith.constant 0 : index
    %3 = vector.load %arg3[%c0_3, %c0_4] : memref<1x32xf32, #tpu.memory_space<vmem>>, vector<1x32xf32>
    %4 = vector.broadcast %3 : vector<1x32xf32> to vector<32x32xf32>
    %5 = arith.addf %2, %4 : vector<32x32xf32>
    %c0_5 = arith.constant 0 : index
    %c0_6 = arith.constant 0 : index
    %6 = vector.load %arg4[%c0_5, %c0_6] : memref<32x32xf32, #tpu.memory_space<vmem>>, vector<32x32xf32>
    tpu.vector_store %arg4[%c0_5, %c0_6], %5 {strides = array<i32>} : memref<32x32xf32, #tpu.memory_space<vmem>>, vector<32x32xf32>,
    return
  }
  func.func @transform_0(%arg0: i32) -> (i32, i32) {
    %c0_i32 = arith.constant 0 : i32
    %c0_i32_0 = arith.constant 0 : i32
    return %arg0, %c0_i32 : i32, i32
  }
  func.func @transform_1(%arg0: i32) -> (i32, i32) {
    %c0_i32 = arith.constant 0 : i32
    %c0_i32_0 = arith.constant 0 : i32
    %c0_i32_1 = arith.constant 0 : i32
    return %c0_i32, %c0_i32_0 : i32, i32
  }
  func.func @transform_2(%arg0: i32) -> (i32, i32) {
    %c0_i32 = arith.constant 0 : i32
    %c0_i32_0 = arith.constant 0 : i32
    %c0_i32_1 = arith.constant 0 : i32
    return %c0_i32, %c0_i32_0 : i32, i32
  }
  func.func @transform_3(%arg0: i32) -> (i32, i32) {
    %c0_i32 = arith.constant 0 : i32
    %c0_i32_0 = arith.constant 0 : i32
    return %arg0, %c0_i32 : i32, i32
  }
}

module attributes {stable_mosaic.version = 11 : i64} {
  func.func @_ln_linear_kernel(%arg0: i32, %arg1: memref<32x32xf32, #tpu.memory_space<vmem>>, %arg2: memref<1x32xf32, #tpu.memory_space<vmem>>, %arg3: memref<1x32xf32, #tpu.memory_space<vmem>>, %arg4: memref<32x128xf32, #tpu.memory_space<vmem>>, %arg5: memref<1x128xf32, #tpu.memory_space<vmem>>, %arg6: memref<32x128xf32, #tpu.memory_space<vmem>>) attributes {dimension_semantics = [#tpu.dimension_semantics<parallel>], iteration_bounds = array<i64: 1>, scalar_prefetch = 0 : i64, scratch_operands = 0 : i64, tpu.core_type = #tpu.core_type<tc>, window_params = [{transform_indices = @transform_0, window_bounds = array<i64: 32, 32>}, {pipeline_mode = #tpu.pipeline_mode<synchronous>, transform_indices = @transform_1, window_bounds = array<i64: 1, 32>}, {pipeline_mode = #tpu.pipeline_mode<synchronous>, transform_indices = @transform_2, window_bounds = array<i64: 1, 32>}, {pipeline_mode = #tpu.pipeline_mode<synchronous>, transform_indices = @transform_3, window_bounds = array<i64: 32, 128>}, {pipeline_mode = #tpu.pipeline_mode<synchronous>, transform_indices = @transform_4, window_bounds = array<i64: 1, 128>}, {transform_indices = @transform_5, window_bounds = array<i64: 32, 128>}]} {
    %c0 = arith.constant 0 : index
    %c0_0 = arith.constant 0 : index
    %0 = vector.load %arg1[%c0, %c0_0] : memref<32x32xf32, #tpu.memory_space<vmem>>, vector<32x32xf32>
    %cst = arith.constant dense<0.000000e+00> : vector<32xf32>
    %1 = vector.multi_reduction <add>, %0, %cst [1] : vector<32x32xf32> to vector<32xf32>
    %2 = vector.shape_cast %1 : vector<32xf32> to vector<32x1xf32>
    %cst_1 = arith.constant 3.200000e+01 : f32
    %3 = vector.broadcast %cst_1 : f32 to vector<32x1xf32>
    %4 = arith.divf %2, %3 : vector<32x1xf32>
    %5 = vector.broadcast %4 : vector<32x1xf32> to vector<32x32xf32>
    %6 = arith.subf %0, %5 : vector<32x32xf32>
    %7 = arith.mulf %6, %6 : vector<32x32xf32>
    %cst_2 = arith.constant dense<0.000000e+00> : vector<32xf32>
    %8 = vector.multi_reduction <add>, %7, %cst_2 [1] : vector<32x32xf32> to vector<32xf32>
    %9 = vector.shape_cast %8 : vector<32xf32> to vector<32x1xf32>
    %cst_3 = arith.constant 3.200000e+01 : f32
    %10 = vector.broadcast %cst_3 : f32 to vector<32x1xf32>
    %11 = arith.divf %9, %10 : vector<32x1xf32>
    %12 = vector.broadcast %4 : vector<32x1xf32> to vector<32x32xf32>
    %13 = arith.subf %0, %12 : vector<32x32xf32>
    %cst_4 = arith.constant 9.99999974E-6 : f32
    %14 = vector.broadcast %cst_4 : f32 to vector<32x1xf32>
    %15 = arith.addf %11, %14 : vector<32x1xf32>
    %16 = math.rsqrt %15 : vector<32x1xf32>
    %17 = vector.broadcast %16 : vector<32x1xf32> to vector<32x32xf32>
    %18 = arith.mulf %13, %17 : vector<32x32xf32>
    %c0_5 = arith.constant 0 : index
    %c0_6 = arith.constant 0 : index
    %19 = vector.load %arg2[%c0_5, %c0_6] : memref<1x32xf32, #tpu.memory_space<vmem>>, vector<1x32xf32>
    %20 = vector.broadcast %19 : vector<1x32xf32> to vector<32x32xf32>
    %21 = arith.mulf %18, %20 : vector<32x32xf32>
    %c0_7 = arith.constant 0 : index
    %c0_8 = arith.constant 0 : index
    %22 = vector.load %arg3[%c0_7, %c0_8] : memref<1x32xf32, #tpu.memory_space<vmem>>, vector<1x32xf32>
    %23 = vector.broadcast %22 : vector<1x32xf32> to vector<32x32xf32>
    %24 = arith.addf %21, %23 : vector<32x32xf32>
    %c0_9 = arith.constant 0 : index
    %c0_10 = arith.constant 0 : index
    %25 = vector.load %arg4[%c0_9, %c0_10] : memref<32x128xf32, #tpu.memory_space<vmem>>, vector<32x128xf32>
    %cst_11 = arith.constant dense<0.000000e+00> : vector<32x128xf32>
    %26 = tpu.matmul %24, %25, %cst_11 {dimension_numbers = #tpu.dot_dimension_numbers<[1], [0], [0], [1], [0, 0, 1, 1], [], []>} : vector<32x32xf32>, vector<32x128xf32>, vector<32x128xf32> -> vector<32x128xf32>
    %c0_12 = arith.constant 0 : index
    %c0_13 = arith.constant 0 : index
    %27 = vector.load %arg5[%c0_12, %c0_13] : memref<1x128xf32, #tpu.memory_space<vmem>>, vector<1x128xf32>
    %28 = vector.broadcast %27 : vector<1x128xf32> to vector<32x128xf32>
    %29 = arith.addf %26, %28 : vector<32x128xf32>
    %c0_14 = arith.constant 0 : index
    %c0_15 = arith.constant 0 : index
    %30 = vector.load %arg6[%c0_14, %c0_15] : memref<32x128xf32, #tpu.memory_space<vmem>>, vector<32x128xf32>
    tpu.vector_store %arg6[%c0_14, %c0_15], %29 {strides = array<i32>} : memref<32x128xf32, #tpu.memory_space<vmem>>, vector<32x128xf32>,
    return
  }
  func.func @transform_0(%arg0: i32) -> (i32, i32) {
    %c0_i32 = arith.constant 0 : i32
    %c0_i32_0 = arith.constant 0 : i32
    return %arg0, %c0_i32 : i32, i32
  }
  func.func @transform_1(%arg0: i32) -> (i32, i32) {
    %c0_i32 = arith.constant 0 : i32
    %c0_i32_0 = arith.constant 0 : i32
    %c0_i32_1 = arith.constant 0 : i32
    return %c0_i32, %c0_i32_0 : i32, i32
  }
  func.func @transform_2(%arg0: i32) -> (i32, i32) {
    %c0_i32 = arith.constant 0 : i32
    %c0_i32_0 = arith.constant 0 : i32
    %c0_i32_1 = arith.constant 0 : i32
    return %c0_i32, %c0_i32_0 : i32, i32
  }
  func.func @transform_3(%arg0: i32) -> (i32, i32) {
    %c0_i32 = arith.constant 0 : i32
    %c0_i32_0 = arith.constant 0 : i32
    %c0_i32_1 = arith.constant 0 : i32
    return %c0_i32, %c0_i32_0 : i32, i32
  }
  func.func @transform_4(%arg0: i32) -> (i32, i32) {
    %c0_i32 = arith.constant 0 : i32
    %c0_i32_0 = arith.constant 0 : i32
    %c0_i32_1 = arith.constant 0 : i32
    return %c0_i32, %c0_i32_0 : i32, i32
  }
  func.func @transform_5(%arg0: i32) -> (i32, i32) {
    %c0_i32 = arith.constant 0 : i32
    %c0_i32_0 = arith.constant 0 : i32
    return %arg0, %c0_i32 : i32, i32
  }
}

module attributes {stable_mosaic.version = 11 : i64} {
  func.func @_linear_kernel(%arg0: i32, %arg1: memref<32x128xf32, #tpu.memory_space<vmem>>, %arg2: memref<128x32xf32, #tpu.memory_space<vmem>>, %arg3: memref<1x32xf32, #tpu.memory_space<vmem>>, %arg4: memref<32x32xf32, #tpu.memory_space<vmem>>) attributes {dimension_semantics = [#tpu.dimension_semantics<parallel>], iteration_bounds = array<i64: 1>, scalar_prefetch = 0 : i64, scratch_operands = 0 : i64, tpu.core_type = #tpu.core_type<tc>, window_params = [{transform_indices = @transform_0, window_bounds = array<i64: 32, 128>}, {pipeline_mode = #tpu.pipeline_mode<synchronous>, transform_indices = @transform_1, window_bounds = array<i64: 128, 32>}, {pipeline_mode = #tpu.pipeline_mode<synchronous>, transform_indices = @transform_2, window_bounds = array<i64: 1, 32>}, {transform_indices = @transform_3, window_bounds = array<i64: 32, 32>}]} {
    %c0 = arith.constant 0 : index
    %c0_0 = arith.constant 0 : index
    %0 = vector.load %arg1[%c0, %c0_0] : memref<32x128xf32, #tpu.memory_space<vmem>>, vector<32x128xf32>
    %c0_1 = arith.constant 0 : index
    %c0_2 = arith.constant 0 : index
    %1 = vector.load %arg2[%c0_1, %c0_2] : memref<128x32xf32, #tpu.memory_space<vmem>>, vector<128x32xf32>
    %cst = arith.constant dense<0.000000e+00> : vector<32x32xf32>
    %2 = tpu.matmul %0, %1, %cst {dimension_numbers = #tpu.dot_dimension_numbers<[1], [0], [0], [1], [0, 0, 1, 1], [], []>} : vector<32x128xf32>, vector<128x32xf32>, vector<32x32xf32> -> vector<32x32xf32>
    %c0_3 = arith.constant 0 : index
    %c0_4 = arith.constant 0 : index
    %3 = vector.load %arg3[%c0_3, %c0_4] : memref<1x32xf32, #tpu.memory_space<vmem>>, vector<1x32xf32>
    %4 = vector.broadcast %3 : vector<1x32xf32> to vector<32x32xf32>
    %5 = arith.addf %2, %4 : vector<32x32xf32>
    %c0_5 = arith.constant 0 : index
    %c0_6 = arith.constant 0 : index
    %6 = vector.load %arg4[%c0_5, %c0_6] : memref<32x32xf32, #tpu.memory_space<vmem>>, vector<32x32xf32>
    tpu.vector_store %arg4[%c0_5, %c0_6], %5 {strides = array<i32>} : memref<32x32xf32, #tpu.memory_space<vmem>>, vector<32x32xf32>,
    return
  }
  func.func @transform_0(%arg0: i32) -> (i32, i32) {
    %c0_i32 = arith.constant 0 : i32
    %c0_i32_0 = arith.constant 0 : i32
    return %arg0, %c0_i32 : i32, i32
  }
  func.func @transform_1(%arg0: i32) -> (i32, i32) {
    %c0_i32 = arith.constant 0 : i32
    %c0_i32_0 = arith.constant 0 : i32
    %c0_i32_1 = arith.constant 0 : i32
    return %c0_i32, %c0_i32_0 : i32, i32
  }
  func.func @transform_2(%arg0: i32) -> (i32, i32) {
    %c0_i32 = arith.constant 0 : i32
    %c0_i32_0 = arith.constant 0 : i32
    %c0_i32_1 = arith.constant 0 : i32
    return %c0_i32, %c0_i32_0 : i32, i32
  }
  func.func @transform_3(%arg0: i32) -> (i32, i32) {
    %c0_i32 = arith.constant 0 : i32
    %c0_i32_0 = arith.constant 0 : i32
    return %arg0, %c0_i32 : i32, i32
  }
}

module attributes {stable_mosaic.version = 11 : i64} {
  func.func @_ln_linear_kernel(%arg0: i32, %arg1: memref<32x32xf32, #tpu.memory_space<vmem>>, %arg2: memref<1x32xf32, #tpu.memory_space<vmem>>, %arg3: memref<1x32xf32, #tpu.memory_space<vmem>>, %arg4: memref<32x8xf32, #tpu.memory_space<vmem>>, %arg5: memref<1x8xf32, #tpu.memory_space<vmem>>, %arg6: memref<32x8xf32, #tpu.memory_space<vmem>>) attributes {dimension_semantics = [#tpu.dimension_semantics<parallel>], iteration_bounds = array<i64: 1>, scalar_prefetch = 0 : i64, scratch_operands = 0 : i64, tpu.core_type = #tpu.core_type<tc>, window_params = [{transform_indices = @transform_0, window_bounds = array<i64: 32, 32>}, {pipeline_mode = #tpu.pipeline_mode<synchronous>, transform_indices = @transform_1, window_bounds = array<i64: 1, 32>}, {pipeline_mode = #tpu.pipeline_mode<synchronous>, transform_indices = @transform_2, window_bounds = array<i64: 1, 32>}, {pipeline_mode = #tpu.pipeline_mode<synchronous>, transform_indices = @transform_3, window_bounds = array<i64: 32, 8>}, {pipeline_mode = #tpu.pipeline_mode<synchronous>, transform_indices = @transform_4, window_bounds = array<i64: 1, 8>}, {transform_indices = @transform_5, window_bounds = array<i64: 32, 8>}]} {
    %c0 = arith.constant 0 : index
    %c0_0 = arith.constant 0 : index
    %0 = vector.load %arg1[%c0, %c0_0] : memref<32x32xf32, #tpu.memory_space<vmem>>, vector<32x32xf32>
    %cst = arith.constant dense<0.000000e+00> : vector<32xf32>
    %1 = vector.multi_reduction <add>, %0, %cst [1] : vector<32x32xf32> to vector<32xf32>
    %2 = vector.shape_cast %1 : vector<32xf32> to vector<32x1xf32>
    %cst_1 = arith.constant 3.200000e+01 : f32
    %3 = vector.broadcast %cst_1 : f32 to vector<32x1xf32>
    %4 = arith.divf %2, %3 : vector<32x1xf32>
    %5 = vector.broadcast %4 : vector<32x1xf32> to vector<32x32xf32>
    %6 = arith.subf %0, %5 : vector<32x32xf32>
    %7 = arith.mulf %6, %6 : vector<32x32xf32>
    %cst_2 = arith.constant dense<0.000000e+00> : vector<32xf32>
    %8 = vector.multi_reduction <add>, %7, %cst_2 [1] : vector<32x32xf32> to vector<32xf32>
    %9 = vector.shape_cast %8 : vector<32xf32> to vector<32x1xf32>
    %cst_3 = arith.constant 3.200000e+01 : f32
    %10 = vector.broadcast %cst_3 : f32 to vector<32x1xf32>
    %11 = arith.divf %9, %10 : vector<32x1xf32>
    %12 = vector.broadcast %4 : vector<32x1xf32> to vector<32x32xf32>
    %13 = arith.subf %0, %12 : vector<32x32xf32>
    %cst_4 = arith.constant 9.99999974E-6 : f32
    %14 = vector.broadcast %cst_4 : f32 to vector<32x1xf32>
    %15 = arith.addf %11, %14 : vector<32x1xf32>
    %16 = math.rsqrt %15 : vector<32x1xf32>
    %17 = vector.broadcast %16 : vector<32x1xf32> to vector<32x32xf32>
    %18 = arith.mulf %13, %17 : vector<32x32xf32>
    %c0_5 = arith.constant 0 : index
    %c0_6 = arith.constant 0 : index
    %19 = vector.load %arg2[%c0_5, %c0_6] : memref<1x32xf32, #tpu.memory_space<vmem>>, vector<1x32xf32>
    %20 = vector.broadcast %19 : vector<1x32xf32> to vector<32x32xf32>
    %21 = arith.mulf %18, %20 : vector<32x32xf32>
    %c0_7 = arith.constant 0 : index
    %c0_8 = arith.constant 0 : index
    %22 = vector.load %arg3[%c0_7, %c0_8] : memref<1x32xf32, #tpu.memory_space<vmem>>, vector<1x32xf32>
    %23 = vector.broadcast %22 : vector<1x32xf32> to vector<32x32xf32>
    %24 = arith.addf %21, %23 : vector<32x32xf32>
    %c0_9 = arith.constant 0 : index
    %c0_10 = arith.constant 0 : index
    %25 = vector.load %arg4[%c0_9, %c0_10] : memref<32x8xf32, #tpu.memory_space<vmem>>, vector<32x8xf32>
    %cst_11 = arith.constant dense<0.000000e+00> : vector<32x8xf32>
    %26 = tpu.matmul %24, %25, %cst_11 {dimension_numbers = #tpu.dot_dimension_numbers<[1], [0], [0], [1], [0, 0, 1, 1], [], []>} : vector<32x32xf32>, vector<32x8xf32>, vector<32x8xf32> -> vector<32x8xf32>
    %c0_12 = arith.constant 0 : index
    %c0_13 = arith.constant 0 : index
    %27 = vector.load %arg5[%c0_12, %c0_13] : memref<1x8xf32, #tpu.memory_space<vmem>>, vector<1x8xf32>
    %28 = vector.broadcast %27 : vector<1x8xf32> to vector<32x8xf32>
    %29 = arith.addf %26, %28 : vector<32x8xf32>
    %c0_14 = arith.constant 0 : index
    %c0_15 = arith.constant 0 : index
    %30 = vector.load %arg6[%c0_14, %c0_15] : memref<32x8xf32, #tpu.memory_space<vmem>>, vector<32x8xf32>
    tpu.vector_store %arg6[%c0_14, %c0_15], %29 {strides = array<i32>} : memref<32x8xf32, #tpu.memory_space<vmem>>, vector<32x8xf32>,
    return
  }
  func.func @transform_0(%arg0: i32) -> (i32, i32) {
    %c0_i32 = arith.constant 0 : i32
    %c0_i32_0 = arith.constant 0 : i32
    return %arg0, %c0_i32 : i32, i32
  }
  func.func @transform_1(%arg0: i32) -> (i32, i32) {
    %c0_i32 = arith.constant 0 : i32
    %c0_i32_0 = arith.constant 0 : i32
    %c0_i32_1 = arith.constant 0 : i32
    return %c0_i32, %c0_i32_0 : i32, i32
  }
  func.func @transform_2(%arg0: i32) -> (i32, i32) {
    %c0_i32 = arith.constant 0 : i32
    %c0_i32_0 = arith.constant 0 : i32
    %c0_i32_1 = arith.constant 0 : i32
    return %c0_i32, %c0_i32_0 : i32, i32
  }
  func.func @transform_3(%arg0: i32) -> (i32, i32) {
    %c0_i32 = arith.constant 0 : i32
    %c0_i32_0 = arith.constant 0 : i32
    %c0_i32_1 = arith.constant 0 : i32
    return %c0_i32, %c0_i32_0 : i32, i32
  }
  func.func @transform_4(%arg0: i32) -> (i32, i32) {
    %c0_i32 = arith.constant 0 : i32
    %c0_i32_0 = arith.constant 0 : i32
    %c0_i32_1 = arith.constant 0 : i32
    return %c0_i32, %c0_i32_0 : i32, i32
  }
  func.func @transform_5(%arg0: i32) -> (i32, i32) {
    %c0_i32 = arith.constant 0 : i32
    %c0_i32_0 = arith.constant 0 : i32
    return %arg0, %c0_i32 : i32, i32
  }
}

module attributes {stable_mosaic.version = 11 : i64} {
  func.func @_ln_linear_kernel(%arg0: i32, %arg1: memref<8x32xf32, #tpu.memory_space<vmem>>, %arg2: memref<1x32xf32, #tpu.memory_space<vmem>>, %arg3: memref<1x32xf32, #tpu.memory_space<vmem>>, %arg4: memref<32x16xf32, #tpu.memory_space<vmem>>, %arg5: memref<1x16xf32, #tpu.memory_space<vmem>>, %arg6: memref<8x16xf32, #tpu.memory_space<vmem>>) attributes {dimension_semantics = [#tpu.dimension_semantics<parallel>], iteration_bounds = array<i64: 1>, scalar_prefetch = 0 : i64, scratch_operands = 0 : i64, tpu.core_type = #tpu.core_type<tc>, window_params = [{transform_indices = @transform_0, window_bounds = array<i64: 8, 32>}, {pipeline_mode = #tpu.pipeline_mode<synchronous>, transform_indices = @transform_1, window_bounds = array<i64: 1, 32>}, {pipeline_mode = #tpu.pipeline_mode<synchronous>, transform_indices = @transform_2, window_bounds = array<i64: 1, 32>}, {pipeline_mode = #tpu.pipeline_mode<synchronous>, transform_indices = @transform_3, window_bounds = array<i64: 32, 16>}, {pipeline_mode = #tpu.pipeline_mode<synchronous>, transform_indices = @transform_4, window_bounds = array<i64: 1, 16>}, {transform_indices = @transform_5, window_bounds = array<i64: 8, 16>}]} {
    %c0 = arith.constant 0 : index
    %c0_0 = arith.constant 0 : index
    %0 = vector.load %arg1[%c0, %c0_0] : memref<8x32xf32, #tpu.memory_space<vmem>>, vector<8x32xf32>
    %cst = arith.constant dense<0.000000e+00> : vector<8xf32>
    %1 = vector.multi_reduction <add>, %0, %cst [1] : vector<8x32xf32> to vector<8xf32>
    %2 = vector.shape_cast %1 : vector<8xf32> to vector<8x1xf32>
    %cst_1 = arith.constant 3.200000e+01 : f32
    %3 = vector.broadcast %cst_1 : f32 to vector<8x1xf32>
    %4 = arith.divf %2, %3 : vector<8x1xf32>
    %5 = vector.broadcast %4 : vector<8x1xf32> to vector<8x32xf32>
    %6 = arith.subf %0, %5 : vector<8x32xf32>
    %7 = arith.mulf %6, %6 : vector<8x32xf32>
    %cst_2 = arith.constant dense<0.000000e+00> : vector<8xf32>
    %8 = vector.multi_reduction <add>, %7, %cst_2 [1] : vector<8x32xf32> to vector<8xf32>
    %9 = vector.shape_cast %8 : vector<8xf32> to vector<8x1xf32>
    %cst_3 = arith.constant 3.200000e+01 : f32
    %10 = vector.broadcast %cst_3 : f32 to vector<8x1xf32>
    %11 = arith.divf %9, %10 : vector<8x1xf32>
    %12 = vector.broadcast %4 : vector<8x1xf32> to vector<8x32xf32>
    %13 = arith.subf %0, %12 : vector<8x32xf32>
    %cst_4 = arith.constant 9.99999974E-6 : f32
    %14 = vector.broadcast %cst_4 : f32 to vector<8x1xf32>
    %15 = arith.addf %11, %14 : vector<8x1xf32>
    %16 = math.rsqrt %15 : vector<8x1xf32>
    %17 = vector.broadcast %16 : vector<8x1xf32> to vector<8x32xf32>
    %18 = arith.mulf %13, %17 : vector<8x32xf32>
    %c0_5 = arith.constant 0 : index
    %c0_6 = arith.constant 0 : index
    %19 = vector.load %arg2[%c0_5, %c0_6] : memref<1x32xf32, #tpu.memory_space<vmem>>, vector<1x32xf32>
    %20 = vector.broadcast %19 : vector<1x32xf32> to vector<8x32xf32>
    %21 = arith.mulf %18, %20 : vector<8x32xf32>
    %c0_7 = arith.constant 0 : index
    %c0_8 = arith.constant 0 : index
    %22 = vector.load %arg3[%c0_7, %c0_8] : memref<1x32xf32, #tpu.memory_space<vmem>>, vector<1x32xf32>
    %23 = vector.broadcast %22 : vector<1x32xf32> to vector<8x32xf32>
    %24 = arith.addf %21, %23 : vector<8x32xf32>
    %c0_9 = arith.constant 0 : index
    %c0_10 = arith.constant 0 : index
    %25 = vector.load %arg4[%c0_9, %c0_10] : memref<32x16xf32, #tpu.memory_space<vmem>>, vector<32x16xf32>
    %cst_11 = arith.constant dense<0.000000e+00> : vector<8x16xf32>
    %26 = tpu.matmul %24, %25, %cst_11 {dimension_numbers = #tpu.dot_dimension_numbers<[1], [0], [0], [1], [0, 0, 1, 1], [], []>} : vector<8x32xf32>, vector<32x16xf32>, vector<8x16xf32> -> vector<8x16xf32>
    %c0_12 = arith.constant 0 : index
    %c0_13 = arith.constant 0 : index
    %27 = vector.load %arg5[%c0_12, %c0_13] : memref<1x16xf32, #tpu.memory_space<vmem>>, vector<1x16xf32>
    %28 = vector.broadcast %27 : vector<1x16xf32> to vector<8x16xf32>
    %29 = arith.addf %26, %28 : vector<8x16xf32>
    %c0_14 = arith.constant 0 : index
    %c0_15 = arith.constant 0 : index
    %30 = vector.load %arg6[%c0_14, %c0_15] : memref<8x16xf32, #tpu.memory_space<vmem>>, vector<8x16xf32>
    tpu.vector_store %arg6[%c0_14, %c0_15], %29 {strides = array<i32>} : memref<8x16xf32, #tpu.memory_space<vmem>>, vector<8x16xf32>,
    return
  }
  func.func @transform_0(%arg0: i32) -> (i32, i32) {
    %c0_i32 = arith.constant 0 : i32
    %c0_i32_0 = arith.constant 0 : i32
    return %arg0, %c0_i32 : i32, i32
  }
  func.func @transform_1(%arg0: i32) -> (i32, i32) {
    %c0_i32 = arith.constant 0 : i32
    %c0_i32_0 = arith.constant 0 : i32
    %c0_i32_1 = arith.constant 0 : i32
    return %c0_i32, %c0_i32_0 : i32, i32
  }
  func.func @transform_2(%arg0: i32) -> (i32, i32) {
    %c0_i32 = arith.constant 0 : i32
    %c0_i32_0 = arith.constant 0 : i32
    %c0_i32_1 = arith.constant 0 : i32
    return %c0_i32, %c0_i32_0 : i32, i32
  }
  func.func @transform_3(%arg0: i32) -> (i32, i32) {
    %c0_i32 = arith.constant 0 : i32
    %c0_i32_0 = arith.constant 0 : i32
    %c0_i32_1 = arith.constant 0 : i32
    return %c0_i32, %c0_i32_0 : i32, i32
  }
  func.func @transform_4(%arg0: i32) -> (i32, i32) {
    %c0_i32 = arith.constant 0 : i32
    %c0_i32_0 = arith.constant 0 : i32
    %c0_i32_1 = arith.constant 0 : i32
    return %c0_i32, %c0_i32_0 : i32, i32
  }
  func.func @transform_5(%arg0: i32) -> (i32, i32) {
    %c0_i32 = arith.constant 0 : i32
    %c0_i32_0 = arith.constant 0 : i32
    return %arg0, %c0_i32 : i32, i32
  }
}

module attributes {stable_mosaic.version = 11 : i64} {
  func.func @_ln_linear_kernel(%arg0: i32, %arg1: memref<8x8xf32, #tpu.memory_space<vmem>>, %arg2: memref<1x8xf32, #tpu.memory_space<vmem>>, %arg3: memref<1x8xf32, #tpu.memory_space<vmem>>, %arg4: memref<8x128xf32, #tpu.memory_space<vmem>>, %arg5: memref<1x128xf32, #tpu.memory_space<vmem>>, %arg6: memref<8x128xf32, #tpu.memory_space<vmem>>) attributes {dimension_semantics = [#tpu.dimension_semantics<parallel>], iteration_bounds = array<i64: 1>, scalar_prefetch = 0 : i64, scratch_operands = 0 : i64, tpu.core_type = #tpu.core_type<tc>, window_params = [{transform_indices = @transform_0, window_bounds = array<i64: 8, 8>}, {pipeline_mode = #tpu.pipeline_mode<synchronous>, transform_indices = @transform_1, window_bounds = array<i64: 1, 8>}, {pipeline_mode = #tpu.pipeline_mode<synchronous>, transform_indices = @transform_2, window_bounds = array<i64: 1, 8>}, {pipeline_mode = #tpu.pipeline_mode<synchronous>, transform_indices = @transform_3, window_bounds = array<i64: 8, 128>}, {pipeline_mode = #tpu.pipeline_mode<synchronous>, transform_indices = @transform_4, window_bounds = array<i64: 1, 128>}, {transform_indices = @transform_5, window_bounds = array<i64: 8, 128>}]} {
    %c0 = arith.constant 0 : index
    %c0_0 = arith.constant 0 : index
    %0 = vector.load %arg1[%c0, %c0_0] : memref<8x8xf32, #tpu.memory_space<vmem>>, vector<8x8xf32>
    %cst = arith.constant dense<0.000000e+00> : vector<8xf32>
    %1 = vector.multi_reduction <add>, %0, %cst [1] : vector<8x8xf32> to vector<8xf32>
    %2 = vector.shape_cast %1 : vector<8xf32> to vector<8x1xf32>
    %cst_1 = arith.constant 8.000000e+00 : f32
    %3 = vector.broadcast %cst_1 : f32 to vector<8x1xf32>
    %4 = arith.divf %2, %3 : vector<8x1xf32>
    %5 = vector.broadcast %4 : vector<8x1xf32> to vector<8x8xf32>
    %6 = arith.subf %0, %5 : vector<8x8xf32>
    %7 = arith.mulf %6, %6 : vector<8x8xf32>
    %cst_2 = arith.constant dense<0.000000e+00> : vector<8xf32>
    %8 = vector.multi_reduction <add>, %7, %cst_2 [1] : vector<8x8xf32> to vector<8xf32>
    %9 = vector.shape_cast %8 : vector<8xf32> to vector<8x1xf32>
    %cst_3 = arith.constant 8.000000e+00 : f32
    %10 = vector.broadcast %cst_3 : f32 to vector<8x1xf32>
    %11 = arith.divf %9, %10 : vector<8x1xf32>
    %12 = vector.broadcast %4 : vector<8x1xf32> to vector<8x8xf32>
    %13 = arith.subf %0, %12 : vector<8x8xf32>
    %cst_4 = arith.constant 9.99999974E-6 : f32
    %14 = vector.broadcast %cst_4 : f32 to vector<8x1xf32>
    %15 = arith.addf %11, %14 : vector<8x1xf32>
    %16 = math.rsqrt %15 : vector<8x1xf32>
    %17 = vector.broadcast %16 : vector<8x1xf32> to vector<8x8xf32>
    %18 = arith.mulf %13, %17 : vector<8x8xf32>
    %c0_5 = arith.constant 0 : index
    %c0_6 = arith.constant 0 : index
    %19 = vector.load %arg2[%c0_5, %c0_6] : memref<1x8xf32, #tpu.memory_space<vmem>>, vector<1x8xf32>
    %20 = vector.broadcast %19 : vector<1x8xf32> to vector<8x8xf32>
    %21 = arith.mulf %18, %20 : vector<8x8xf32>
    %c0_7 = arith.constant 0 : index
    %c0_8 = arith.constant 0 : index
    %22 = vector.load %arg3[%c0_7, %c0_8] : memref<1x8xf32, #tpu.memory_space<vmem>>, vector<1x8xf32>
    %23 = vector.broadcast %22 : vector<1x8xf32> to vector<8x8xf32>
    %24 = arith.addf %21, %23 : vector<8x8xf32>
    %c0_9 = arith.constant 0 : index
    %c0_10 = arith.constant 0 : index
    %25 = vector.load %arg4[%c0_9, %c0_10] : memref<8x128xf32, #tpu.memory_space<vmem>>, vector<8x128xf32>
    %cst_11 = arith.constant dense<0.000000e+00> : vector<8x128xf32>
    %26 = tpu.matmul %24, %25, %cst_11 {dimension_numbers = #tpu.dot_dimension_numbers<[1], [0], [0], [1], [0, 0, 1, 1], [], []>} : vector<8x8xf32>, vector<8x128xf32>, vector<8x128xf32> -> vector<8x128xf32>
    %c0_12 = arith.constant 0 : index
    %c0_13 = arith.constant 0 : index
    %27 = vector.load %arg5[%c0_12, %c0_13] : memref<1x128xf32, #tpu.memory_space<vmem>>, vector<1x128xf32>
    %28 = vector.broadcast %27 : vector<1x128xf32> to vector<8x128xf32>
    %29 = arith.addf %26, %28 : vector<8x128xf32>
    %c0_14 = arith.constant 0 : index
    %c0_15 = arith.constant 0 : index
    %30 = vector.load %arg6[%c0_14, %c0_15] : memref<8x128xf32, #tpu.memory_space<vmem>>, vector<8x128xf32>
    tpu.vector_store %arg6[%c0_14, %c0_15], %29 {strides = array<i32>} : memref<8x128xf32, #tpu.memory_space<vmem>>, vector<8x128xf32>,
    return
  }
  func.func @transform_0(%arg0: i32) -> (i32, i32) {
    %c0_i32 = arith.constant 0 : i32
    %c0_i32_0 = arith.constant 0 : i32
    return %arg0, %c0_i32 : i32, i32
  }
  func.func @transform_1(%arg0: i32) -> (i32, i32) {
    %c0_i32 = arith.constant 0 : i32
    %c0_i32_0 = arith.constant 0 : i32
    %c0_i32_1 = arith.constant 0 : i32
    return %c0_i32, %c0_i32_0 : i32, i32
  }
  func.func @transform_2(%arg0: i32) -> (i32, i32) {
    %c0_i32 = arith.constant 0 : i32
    %c0_i32_0 = arith.constant 0 : i32
    %c0_i32_1 = arith.constant 0 : i32
    return %c0_i32, %c0_i32_0 : i32, i32
  }
  func.func @transform_3(%arg0: i32) -> (i32, i32) {
    %c0_i32 = arith.constant 0 : i32
    %c0_i32_0 = arith.constant 0 : i32
    %c0_i32_1 = arith.constant 0 : i32
    return %c0_i32, %c0_i32_0 : i32, i32
  }
  func.func @transform_4(%arg0: i32) -> (i32, i32) {
    %c0_i32 = arith.constant 0 : i32
    %c0_i32_0 = arith.constant 0 : i32
    %c0_i32_1 = arith.constant 0 : i32
    return %c0_i32, %c0_i32_0 : i32, i32
  }
  func.func @transform_5(%arg0: i32) -> (i32, i32) {
    %c0_i32 = arith.constant 0 : i32
    %c0_i32_0 = arith.constant 0 : i32
    return %arg0, %c0_i32 : i32, i32
  }
}

module attributes {stable_mosaic.version = 11 : i64} {
  func.func @_ln_linear_kernel(%arg0: i32, %arg1: memref<8x32xf32, #tpu.memory_space<vmem>>, %arg2: memref<1x32xf32, #tpu.memory_space<vmem>>, %arg3: memref<1x32xf32, #tpu.memory_space<vmem>>, %arg4: memref<32x128xf32, #tpu.memory_space<vmem>>, %arg5: memref<1x128xf32, #tpu.memory_space<vmem>>, %arg6: memref<8x128xf32, #tpu.memory_space<vmem>>) attributes {dimension_semantics = [#tpu.dimension_semantics<parallel>], iteration_bounds = array<i64: 1>, scalar_prefetch = 0 : i64, scratch_operands = 0 : i64, tpu.core_type = #tpu.core_type<tc>, window_params = [{transform_indices = @transform_0, window_bounds = array<i64: 8, 32>}, {pipeline_mode = #tpu.pipeline_mode<synchronous>, transform_indices = @transform_1, window_bounds = array<i64: 1, 32>}, {pipeline_mode = #tpu.pipeline_mode<synchronous>, transform_indices = @transform_2, window_bounds = array<i64: 1, 32>}, {pipeline_mode = #tpu.pipeline_mode<synchronous>, transform_indices = @transform_3, window_bounds = array<i64: 32, 128>}, {pipeline_mode = #tpu.pipeline_mode<synchronous>, transform_indices = @transform_4, window_bounds = array<i64: 1, 128>}, {transform_indices = @transform_5, window_bounds = array<i64: 8, 128>}]} {
    %c0 = arith.constant 0 : index
    %c0_0 = arith.constant 0 : index
    %0 = vector.load %arg1[%c0, %c0_0] : memref<8x32xf32, #tpu.memory_space<vmem>>, vector<8x32xf32>
    %cst = arith.constant dense<0.000000e+00> : vector<8xf32>
    %1 = vector.multi_reduction <add>, %0, %cst [1] : vector<8x32xf32> to vector<8xf32>
    %2 = vector.shape_cast %1 : vector<8xf32> to vector<8x1xf32>
    %cst_1 = arith.constant 3.200000e+01 : f32
    %3 = vector.broadcast %cst_1 : f32 to vector<8x1xf32>
    %4 = arith.divf %2, %3 : vector<8x1xf32>
    %5 = vector.broadcast %4 : vector<8x1xf32> to vector<8x32xf32>
    %6 = arith.subf %0, %5 : vector<8x32xf32>
    %7 = arith.mulf %6, %6 : vector<8x32xf32>
    %cst_2 = arith.constant dense<0.000000e+00> : vector<8xf32>
    %8 = vector.multi_reduction <add>, %7, %cst_2 [1] : vector<8x32xf32> to vector<8xf32>
    %9 = vector.shape_cast %8 : vector<8xf32> to vector<8x1xf32>
    %cst_3 = arith.constant 3.200000e+01 : f32
    %10 = vector.broadcast %cst_3 : f32 to vector<8x1xf32>
    %11 = arith.divf %9, %10 : vector<8x1xf32>
    %12 = vector.broadcast %4 : vector<8x1xf32> to vector<8x32xf32>
    %13 = arith.subf %0, %12 : vector<8x32xf32>
    %cst_4 = arith.constant 9.99999974E-6 : f32
    %14 = vector.broadcast %cst_4 : f32 to vector<8x1xf32>
    %15 = arith.addf %11, %14 : vector<8x1xf32>
    %16 = math.rsqrt %15 : vector<8x1xf32>
    %17 = vector.broadcast %16 : vector<8x1xf32> to vector<8x32xf32>
    %18 = arith.mulf %13, %17 : vector<8x32xf32>
    %c0_5 = arith.constant 0 : index
    %c0_6 = arith.constant 0 : index
    %19 = vector.load %arg2[%c0_5, %c0_6] : memref<1x32xf32, #tpu.memory_space<vmem>>, vector<1x32xf32>
    %20 = vector.broadcast %19 : vector<1x32xf32> to vector<8x32xf32>
    %21 = arith.mulf %18, %20 : vector<8x32xf32>
    %c0_7 = arith.constant 0 : index
    %c0_8 = arith.constant 0 : index
    %22 = vector.load %arg3[%c0_7, %c0_8] : memref<1x32xf32, #tpu.memory_space<vmem>>, vector<1x32xf32>
    %23 = vector.broadcast %22 : vector<1x32xf32> to vector<8x32xf32>
    %24 = arith.addf %21, %23 : vector<8x32xf32>
    %c0_9 = arith.constant 0 : index
    %c0_10 = arith.constant 0 : index
    %25 = vector.load %arg4[%c0_9, %c0_10] : memref<32x128xf32, #tpu.memory_space<vmem>>, vector<32x128xf32>
    %cst_11 = arith.constant dense<0.000000e+00> : vector<8x128xf32>
    %26 = tpu.matmul %24, %25, %cst_11 {dimension_numbers = #tpu.dot_dimension_numbers<[1], [0], [0], [1], [0, 0, 1, 1], [], []>} : vector<8x32xf32>, vector<32x128xf32>, vector<8x128xf32> -> vector<8x128xf32>
    %c0_12 = arith.constant 0 : index
    %c0_13 = arith.constant 0 : index
    %27 = vector.load %arg5[%c0_12, %c0_13] : memref<1x128xf32, #tpu.memory_space<vmem>>, vector<1x128xf32>
    %28 = vector.broadcast %27 : vector<1x128xf32> to vector<8x128xf32>
    %29 = arith.addf %26, %28 : vector<8x128xf32>
    %c0_14 = arith.constant 0 : index
    %c0_15 = arith.constant 0 : index
    %30 = vector.load %arg6[%c0_14, %c0_15] : memref<8x128xf32, #tpu.memory_space<vmem>>, vector<8x128xf32>
    tpu.vector_store %arg6[%c0_14, %c0_15], %29 {strides = array<i32>} : memref<8x128xf32, #tpu.memory_space<vmem>>, vector<8x128xf32>,
    return
  }
  func.func @transform_0(%arg0: i32) -> (i32, i32) {
    %c0_i32 = arith.constant 0 : i32
    %c0_i32_0 = arith.constant 0 : i32
    return %arg0, %c0_i32 : i32, i32
  }
  func.func @transform_1(%arg0: i32) -> (i32, i32) {
    %c0_i32 = arith.constant 0 : i32
    %c0_i32_0 = arith.constant 0 : i32
    %c0_i32_1 = arith.constant 0 : i32
    return %c0_i32, %c0_i32_0 : i32, i32
  }
  func.func @transform_2(%arg0: i32) -> (i32, i32) {
    %c0_i32 = arith.constant 0 : i32
    %c0_i32_0 = arith.constant 0 : i32
    %c0_i32_1 = arith.constant 0 : i32
    return %c0_i32, %c0_i32_0 : i32, i32
  }
  func.func @transform_3(%arg0: i32) -> (i32, i32) {
    %c0_i32 = arith.constant 0 : i32
    %c0_i32_0 = arith.constant 0 : i32
    %c0_i32_1 = arith.constant 0 : i32
    return %c0_i32, %c0_i32_0 : i32, i32
  }
  func.func @transform_4(%arg0: i32) -> (i32, i32) {
    %c0_i32 = arith.constant 0 : i32
    %c0_i32_0 = arith.constant 0 : i32
    %c0_i32_1 = arith.constant 0 : i32
    return %c0_i32, %c0_i32_0 : i32, i32
  }
  func.func @transform_5(%arg0: i32) -> (i32, i32) {
    %c0_i32 = arith.constant 0 : i32
    %c0_i32_0 = arith.constant 0 : i32
    return %arg0, %c0_i32 : i32, i32
  }
}

module attributes {stable_mosaic.version = 11 : i64} {
  func.func @_linear_kernel(%arg0: i32, %arg1: memref<8x128xf32, #tpu.memory_space<vmem>>, %arg2: memref<128x128xf32, #tpu.memory_space<vmem>>, %arg3: memref<1x128xf32, #tpu.memory_space<vmem>>, %arg4: memref<8x128xf32, #tpu.memory_space<vmem>>) attributes {dimension_semantics = [#tpu.dimension_semantics<parallel>], iteration_bounds = array<i64: 1>, scalar_prefetch = 0 : i64, scratch_operands = 0 : i64, tpu.core_type = #tpu.core_type<tc>, window_params = [{transform_indices = @transform_0, window_bounds = array<i64: 8, 128>}, {pipeline_mode = #tpu.pipeline_mode<synchronous>, transform_indices = @transform_1, window_bounds = array<i64: 128, 128>}, {pipeline_mode = #tpu.pipeline_mode<synchronous>, transform_indices = @transform_2, window_bounds = array<i64: 1, 128>}, {transform_indices = @transform_3, window_bounds = array<i64: 8, 128>}]} {
    %c0 = arith.constant 0 : index
    %c0_0 = arith.constant 0 : index
    %0 = vector.load %arg1[%c0, %c0_0] : memref<8x128xf32, #tpu.memory_space<vmem>>, vector<8x128xf32>
    %c0_1 = arith.constant 0 : index
    %c0_2 = arith.constant 0 : index
    %1 = vector.load %arg2[%c0_1, %c0_2] : memref<128x128xf32, #tpu.memory_space<vmem>>, vector<128x128xf32>
    %cst = arith.constant dense<0.000000e+00> : vector<8x128xf32>
    %2 = tpu.matmul %0, %1, %cst {dimension_numbers = #tpu.dot_dimension_numbers<[1], [0], [0], [1], [0, 0, 1, 1], [], []>} : vector<8x128xf32>, vector<128x128xf32>, vector<8x128xf32> -> vector<8x128xf32>
    %c0_3 = arith.constant 0 : index
    %c0_4 = arith.constant 0 : index
    %3 = vector.load %arg3[%c0_3, %c0_4] : memref<1x128xf32, #tpu.memory_space<vmem>>, vector<1x128xf32>
    %4 = vector.broadcast %3 : vector<1x128xf32> to vector<8x128xf32>
    %5 = arith.addf %2, %4 : vector<8x128xf32>
    %c0_5 = arith.constant 0 : index
    %c0_6 = arith.constant 0 : index
    %6 = vector.load %arg4[%c0_5, %c0_6] : memref<8x128xf32, #tpu.memory_space<vmem>>, vector<8x128xf32>
    tpu.vector_store %arg4[%c0_5, %c0_6], %5 {strides = array<i32>} : memref<8x128xf32, #tpu.memory_space<vmem>>, vector<8x128xf32>,
    return
  }
  func.func @transform_0(%arg0: i32) -> (i32, i32) {
    %c0_i32 = arith.constant 0 : i32
    %c0_i32_0 = arith.constant 0 : i32
    return %arg0, %c0_i32 : i32, i32
  }
  func.func @transform_1(%arg0: i32) -> (i32, i32) {
    %c0_i32 = arith.constant 0 : i32
    %c0_i32_0 = arith.constant 0 : i32
    %c0_i32_1 = arith.constant 0 : i32
    return %c0_i32, %c0_i32_0 : i32, i32
  }
  func.func @transform_2(%arg0: i32) -> (i32, i32) {
    %c0_i32 = arith.constant 0 : i32
    %c0_i32_0 = arith.constant 0 : i32
    %c0_i32_1 = arith.constant 0 : i32
    return %c0_i32, %c0_i32_0 : i32, i32
  }
  func.func @transform_3(%arg0: i32) -> (i32, i32) {
    %c0_i32 = arith.constant 0 : i32
    %c0_i32_0 = arith.constant 0 : i32
    return %arg0, %c0_i32 : i32, i32
  }
}

module attributes {stable_mosaic.version = 11 : i64} {
  func.func @_linear_kernel(%arg0: i32, %arg1: memref<8x128xf32, #tpu.memory_space<vmem>>, %arg2: memref<128x20xf32, #tpu.memory_space<vmem>>, %arg3: memref<1x20xf32, #tpu.memory_space<vmem>>, %arg4: memref<8x20xf32, #tpu.memory_space<vmem>>) attributes {dimension_semantics = [#tpu.dimension_semantics<parallel>], iteration_bounds = array<i64: 1>, scalar_prefetch = 0 : i64, scratch_operands = 0 : i64, tpu.core_type = #tpu.core_type<tc>, window_params = [{transform_indices = @transform_0, window_bounds = array<i64: 8, 128>}, {pipeline_mode = #tpu.pipeline_mode<synchronous>, transform_indices = @transform_1, window_bounds = array<i64: 128, 20>}, {pipeline_mode = #tpu.pipeline_mode<synchronous>, transform_indices = @transform_2, window_bounds = array<i64: 1, 20>}, {transform_indices = @transform_3, window_bounds = array<i64: 8, 20>}]} {
    %c0 = arith.constant 0 : index
    %c0_0 = arith.constant 0 : index
    %0 = vector.load %arg1[%c0, %c0_0] : memref<8x128xf32, #tpu.memory_space<vmem>>, vector<8x128xf32>
    %c0_1 = arith.constant 0 : index
    %c0_2 = arith.constant 0 : index
    %1 = vector.load %arg2[%c0_1, %c0_2] : memref<128x20xf32, #tpu.memory_space<vmem>>, vector<128x20xf32>
    %cst = arith.constant dense<0.000000e+00> : vector<8x20xf32>
    %2 = tpu.matmul %0, %1, %cst {dimension_numbers = #tpu.dot_dimension_numbers<[1], [0], [0], [1], [0, 0, 1, 1], [], []>} : vector<8x128xf32>, vector<128x20xf32>, vector<8x20xf32> -> vector<8x20xf32>
    %c0_3 = arith.constant 0 : index
    %c0_4 = arith.constant 0 : index
    %3 = vector.load %arg3[%c0_3, %c0_4] : memref<1x20xf32, #tpu.memory_space<vmem>>, vector<1x20xf32>
    %4 = vector.broadcast %3 : vector<1x20xf32> to vector<8x20xf32>
    %5 = arith.addf %2, %4 : vector<8x20xf32>
    %c0_5 = arith.constant 0 : index
    %c0_6 = arith.constant 0 : index
    %6 = vector.load %arg4[%c0_5, %c0_6] : memref<8x20xf32, #tpu.memory_space<vmem>>, vector<8x20xf32>
    tpu.vector_store %arg4[%c0_5, %c0_6], %5 {strides = array<i32>} : memref<8x20xf32, #tpu.memory_space<vmem>>, vector<8x20xf32>,
    return
  }
  func.func @transform_0(%arg0: i32) -> (i32, i32) {
    %c0_i32 = arith.constant 0 : i32
    %c0_i32_0 = arith.constant 0 : i32
    return %arg0, %c0_i32 : i32, i32
  }
  func.func @transform_1(%arg0: i32) -> (i32, i32) {
    %c0_i32 = arith.constant 0 : i32
    %c0_i32_0 = arith.constant 0 : i32
    %c0_i32_1 = arith.constant 0 : i32
    return %c0_i32, %c0_i32_0 : i32, i32
  }
  func.func @transform_2(%arg0: i32) -> (i32, i32) {
    %c0_i32 = arith.constant 0 : i32
    %c0_i32_0 = arith.constant 0 : i32
    %c0_i32_1 = arith.constant 0 : i32
    return %c0_i32, %c0_i32_0 : i32, i32
  }
  func.func @transform_3(%arg0: i32) -> (i32, i32) {
    %c0_i32 = arith.constant 0 : i32
    %c0_i32_0 = arith.constant 0 : i32
    return %arg0, %c0_i32 : i32, i32
  }
}

module attributes {stable_mosaic.version = 11 : i64} {
  func.func @_ln_linear_kernel(%arg0: i32, %arg1: memref<8x16xf32, #tpu.memory_space<vmem>>, %arg2: memref<1x16xf32, #tpu.memory_space<vmem>>, %arg3: memref<1x16xf32, #tpu.memory_space<vmem>>, %arg4: memref<16x128xf32, #tpu.memory_space<vmem>>, %arg5: memref<1x128xf32, #tpu.memory_space<vmem>>, %arg6: memref<8x128xf32, #tpu.memory_space<vmem>>) attributes {dimension_semantics = [#tpu.dimension_semantics<parallel>], iteration_bounds = array<i64: 1>, scalar_prefetch = 0 : i64, scratch_operands = 0 : i64, tpu.core_type = #tpu.core_type<tc>, window_params = [{transform_indices = @transform_0, window_bounds = array<i64: 8, 16>}, {pipeline_mode = #tpu.pipeline_mode<synchronous>, transform_indices = @transform_1, window_bounds = array<i64: 1, 16>}, {pipeline_mode = #tpu.pipeline_mode<synchronous>, transform_indices = @transform_2, window_bounds = array<i64: 1, 16>}, {pipeline_mode = #tpu.pipeline_mode<synchronous>, transform_indices = @transform_3, window_bounds = array<i64: 16, 128>}, {pipeline_mode = #tpu.pipeline_mode<synchronous>, transform_indices = @transform_4, window_bounds = array<i64: 1, 128>}, {transform_indices = @transform_5, window_bounds = array<i64: 8, 128>}]} {
    %c0 = arith.constant 0 : index
    %c0_0 = arith.constant 0 : index
    %0 = vector.load %arg1[%c0, %c0_0] : memref<8x16xf32, #tpu.memory_space<vmem>>, vector<8x16xf32>
    %cst = arith.constant dense<0.000000e+00> : vector<8xf32>
    %1 = vector.multi_reduction <add>, %0, %cst [1] : vector<8x16xf32> to vector<8xf32>
    %2 = vector.shape_cast %1 : vector<8xf32> to vector<8x1xf32>
    %cst_1 = arith.constant 1.600000e+01 : f32
    %3 = vector.broadcast %cst_1 : f32 to vector<8x1xf32>
    %4 = arith.divf %2, %3 : vector<8x1xf32>
    %5 = vector.broadcast %4 : vector<8x1xf32> to vector<8x16xf32>
    %6 = arith.subf %0, %5 : vector<8x16xf32>
    %7 = arith.mulf %6, %6 : vector<8x16xf32>
    %cst_2 = arith.constant dense<0.000000e+00> : vector<8xf32>
    %8 = vector.multi_reduction <add>, %7, %cst_2 [1] : vector<8x16xf32> to vector<8xf32>
    %9 = vector.shape_cast %8 : vector<8xf32> to vector<8x1xf32>
    %cst_3 = arith.constant 1.600000e+01 : f32
    %10 = vector.broadcast %cst_3 : f32 to vector<8x1xf32>
    %11 = arith.divf %9, %10 : vector<8x1xf32>
    %12 = vector.broadcast %4 : vector<8x1xf32> to vector<8x16xf32>
    %13 = arith.subf %0, %12 : vector<8x16xf32>
    %cst_4 = arith.constant 9.99999974E-6 : f32
    %14 = vector.broadcast %cst_4 : f32 to vector<8x1xf32>
    %15 = arith.addf %11, %14 : vector<8x1xf32>
    %16 = math.rsqrt %15 : vector<8x1xf32>
    %17 = vector.broadcast %16 : vector<8x1xf32> to vector<8x16xf32>
    %18 = arith.mulf %13, %17 : vector<8x16xf32>
    %c0_5 = arith.constant 0 : index
    %c0_6 = arith.constant 0 : index
    %19 = vector.load %arg2[%c0_5, %c0_6] : memref<1x16xf32, #tpu.memory_space<vmem>>, vector<1x16xf32>
    %20 = vector.broadcast %19 : vector<1x16xf32> to vector<8x16xf32>
    %21 = arith.mulf %18, %20 : vector<8x16xf32>
    %c0_7 = arith.constant 0 : index
    %c0_8 = arith.constant 0 : index
    %22 = vector.load %arg3[%c0_7, %c0_8] : memref<1x16xf32, #tpu.memory_space<vmem>>, vector<1x16xf32>
    %23 = vector.broadcast %22 : vector<1x16xf32> to vector<8x16xf32>
    %24 = arith.addf %21, %23 : vector<8x16xf32>
    %c0_9 = arith.constant 0 : index
    %c0_10 = arith.constant 0 : index
    %25 = vector.load %arg4[%c0_9, %c0_10] : memref<16x128xf32, #tpu.memory_space<vmem>>, vector<16x128xf32>
    %cst_11 = arith.constant dense<0.000000e+00> : vector<8x128xf32>
    %26 = tpu.matmul %24, %25, %cst_11 {dimension_numbers = #tpu.dot_dimension_numbers<[1], [0], [0], [1], [0, 0, 1, 1], [], []>} : vector<8x16xf32>, vector<16x128xf32>, vector<8x128xf32> -> vector<8x128xf32>
    %c0_12 = arith.constant 0 : index
    %c0_13 = arith.constant 0 : index
    %27 = vector.load %arg5[%c0_12, %c0_13] : memref<1x128xf32, #tpu.memory_space<vmem>>, vector<1x128xf32>
    %28 = vector.broadcast %27 : vector<1x128xf32> to vector<8x128xf32>
    %29 = arith.addf %26, %28 : vector<8x128xf32>
    %c0_14 = arith.constant 0 : index
    %c0_15 = arith.constant 0 : index
    %30 = vector.load %arg6[%c0_14, %c0_15] : memref<8x128xf32, #tpu.memory_space<vmem>>, vector<8x128xf32>
    tpu.vector_store %arg6[%c0_14, %c0_15], %29 {strides = array<i32>} : memref<8x128xf32, #tpu.memory_space<vmem>>, vector<8x128xf32>,
    return
  }
  func.func @transform_0(%arg0: i32) -> (i32, i32) {
    %c0_i32 = arith.constant 0 : i32
    %c0_i32_0 = arith.constant 0 : i32
    return %arg0, %c0_i32 : i32, i32
  }
  func.func @transform_1(%arg0: i32) -> (i32, i32) {
    %c0_i32 = arith.constant 0 : i32
    %c0_i32_0 = arith.constant 0 : i32
    %c0_i32_1 = arith.constant 0 : i32
    return %c0_i32, %c0_i32_0 : i32, i32
  }
  func.func @transform_2(%arg0: i32) -> (i32, i32) {
    %c0_i32 = arith.constant 0 : i32
    %c0_i32_0 = arith.constant 0 : i32
    %c0_i32_1 = arith.constant 0 : i32
    return %c0_i32, %c0_i32_0 : i32, i32
  }
  func.func @transform_3(%arg0: i32) -> (i32, i32) {
    %c0_i32 = arith.constant 0 : i32
    %c0_i32_0 = arith.constant 0 : i32
    %c0_i32_1 = arith.constant 0 : i32
    return %c0_i32, %c0_i32_0 : i32, i32
  }
  func.func @transform_4(%arg0: i32) -> (i32, i32) {
    %c0_i32 = arith.constant 0 : i32
    %c0_i32_0 = arith.constant 0 : i32
    %c0_i32_1 = arith.constant 0 : i32
    return %c0_i32, %c0_i32_0 : i32, i32
  }
  func.func @transform_5(%arg0: i32) -> (i32, i32) {
    %c0_i32 = arith.constant 0 : i32
    %c0_i32_0 = arith.constant 0 : i32
    return %arg0, %c0_i32 : i32, i32
  }
}

</mosaic_0001>

<bundles_post_ra>
// kernel: _lambda_.96
= control target key start
LH: loop header
LB: loop body
LE: loop exit
PB: predicated region body
PF: predicated region fallthrough
CT: control target
= control target key end

     0   :  { %vm21_vm0 = vcmask 64512   ;;  %v154_v7 = vmov 0.0   ;;  %vm155_vm1 = vmmov 0   ;;  %vm133_vm2 = vcmask 130048   ;;  %s207_s0 = inlined_call_operand.vmem [shape: f32[8,8], index: 0, kind: input, shape index: {}]   ;;  %s208_s3 = inlined_call_operand.vmem [shape: f32[8,16], index: 3, kind: input, shape index: {}]   ;;  %s209_s1 = inlined_call_operand.vmem [shape: f32[1,8], index: 1, kind: input, shape index: {}]   ;;  %s210_s2 = inlined_call_operand.vmem [shape: f32[1,8], index: 2, kind: input, shape index: {}]   ;;  %s211_s4 = inlined_call_operand.vmem [shape: f32[1,16], index: 4, kind: input, shape index: {}]   ;;  %s212_s5 = inlined_call_operand.vmem [shape: f32[8,16], index: 5, kind: output, shape index: {}]  }
   0x1   :  { %v20_v0 = vld [vmem:[%s207_s0] sm:$0xff]  ;;  %145 = vmatprep.subr.mxu0 %v154_v7  ;;  %147 = vmatprep.mubr.msk.f32.mxu0 %vm155_vm1, %v154_v7 }
   0x2   :  { %v22_v1 = vsel %vm21_vm0, %v20_v0, 0.0  ;;  %v52_v8 = vld [vmem:[%s208_s3] sm:$0xff] }
   0x3   :  { %23 = vadd.xlane.f32.xlu0 %v22_v1  ;;  %146 = vmatpush3.msra.mxu0 %v52_v8  ;;  %v139_v13 = vld [vmem:[%s209_s1] ss:$0 sm:$0xff] }
   0x4   :  { %v140_v15 = vld [vmem:[%s210_s2] ss:$0 sm:$0xff] }
   0x5   :  { %v141_v18 = vld [vmem:[%s211_s4] ss:$0 sm:$0xff] }
  0x90   :  { %v24_v2 = vpop.xlane.xlu0 %23 }
  0x91   :  { %v26_v3 = vmul.f32 0.125, %v24_v2 }
  0x93   :  { %v27_v4 = vsub.f32 %v20_v0, %v26_v3 }
  0x95   :  { %v28_v5 = vmul.f32 %v27_v4, %v27_v4 }
  0x97   :  { %v29_v6 = vsel %vm21_vm0, %v28_v5, 0.0 }
  0x98   :  { %30 = vadd.xlane.f32.xlu0 %v29_v6 }
 0x125   :  { %v31_v9 = vpop.xlane.xlu0 %30 }
 0x126   :  { %v32_v10 = vmul.f32 0.125, %v31_v9 }
 0x128   :  { %v33_v11 = vadd.f32 1e-05, %v32_v10 }
 0x12a   :  { %152 = vrsqrt.f32 %v33_v11 }
 0x134   :  { %v153_v12 = vpop.eup %152 }
 0x135   :  { %v35_v14 = vmul.f32 %v153_v12, %v27_v4 }
 0x137   :  { %v43_v16 = vmul.f32 %v139_v13, %v35_v14 }
 0x139   :  { %v51_v17 = vadd.f32 %v140_v15, %v43_v16 }
 0x13b   :  { %148 = vmatmul.mubr.msk.f32.vlgmr.msra.gmra.mrb[0].mxu0 %vm21_vm0, %v51_v17 }
 0x20e   :  { %v129_v19 = vpop.f32.mrb[0].mxu0 }
 0x20f   :  { %v130_v20 = vadd.f32 %v141_v18, %v129_v19  ;;  %v149_v21 = vpop.f32.mrb[1].mxu0 }
 0x211   :  { %134 = vst.msk [vmem:[%s212_s5] sm:$0xff] %vm133_vm2, %v130_v20 }

// kernel: _lambda_.93
= control target key start
LH: loop header
LB: loop body
LE: loop exit
PB: predicated region body
PF: predicated region fallthrough
CT: control target
= control target key end

     0   :  { %vm23_vm0 = vcmask 64512   ;;  %v113_v0 = vmov 0.0   ;;  %vm114_vm1 = vmmov 0   ;;  %s147_s1 = inlined_call_operand.vmem [shape: f32[8,8], index: 1, kind: input, shape index: {}]   ;;  %s148_s0 = inlined_call_operand.vmem [shape: f32[8,8], index: 0, kind: input, shape index: {}]   ;;  %s149_s2 = inlined_call_operand.vmem [shape: f32[1,8], index: 2, kind: input, shape index: {}]   ;;  %s150_s3 = inlined_call_operand.vmem [shape: f32[8,8], index: 3, kind: output, shape index: {}]  }
   0x1   :  { %106 = vmatprep.subr.mxu0 %v113_v0  ;;  %v15_v1 = vld [vmem:[%s147_s1] sm:$0xff]  ;;  %108 = vmatprep.mubr.msk.f32.mxu0 %vm114_vm1, %v113_v0 }
   0x2   :  { %v14_v2 = vld [vmem:[%s148_s0] sm:$0xff]  ;;  %107 = vmatpush3.msra.mxu0 %v15_v1 }
   0x3   :  { %109 = vmatmul.mubr.msk.f32.vlgmr.msra.gmra.mrb[0].mxu0 %vm23_vm0, %v14_v2  ;;  %v102_v3 = vld [vmem:[%s149_s2] ss:$0 sm:$0xff] }
  0xd6   :  { %v93_v4 = vpop.f32.mrb[0].mxu0 }
  0xd7   :  { %v94_v5 = vadd.f32 %v102_v3, %v93_v4  ;;  %v110_v6 = vpop.f32.mrb[1].mxu0 }
  0xd9   :  { %97 = vst.msk [vmem:[%s150_s3] sm:$0xff] %vm23_vm0, %v94_v5 }

// kernel: _lambda_.97
= control target key start
LH: loop header
LB: loop body
LE: loop exit
PB: predicated region body
PF: predicated region fallthrough
CT: control target
= control target key end

     0   :  { %vm24_vm0 = vcmask 130048   ;;  %v251_v31 = vmov 0.0   ;;  %vm218_vm1 = vcmask 261120   ;;  %s355_s0 = inlined_call_operand.vmem [shape: f32[32,16], index: 0, kind: input, shape index: {}]   ;;  %s356_s3 = inlined_call_operand.vmem [shape: f32[16,160], index: 3, kind: input, shape index: {}]   ;;  %s357_s1 = inlined_call_operand.vmem [shape: f32[1,16], index: 1, kind: input, shape index: {}]   ;;  %s358_s2 = inlined_call_operand.vmem [shape: f32[1,16], index: 2, kind: input, shape index: {}]   ;;  %s359_s4 = inlined_call_operand.vmem [shape: f32[1,160], index: 4, kind: input, shape index: {}]   ;;  %s360_s5 = inlined_call_operand.vmem [shape: f32[32,160], index: 5, kind: output, shape index: {}]  }
   0x1   :  { %v20_v0 = vld [vmem:[%s355_s0] sm:$0xff]  ;;  %v21_v1 = vld [vmem:[%s355_s0 + $0x8] sm:$0xff]  ;;  %v22_v2 = vld [vmem:[%s355_s0 + $0x10] sm:$0xff]  ;;  %192 = vmatprep.mubr.f32.mxu0 %v251_v31  ;;  %204 = vmatprep.mubr.f32.mxu1 %v251_v31 }
   0x2   :  { %v25_v3 = vsel %vm24_vm0, %v20_v0, 0.0  ;;  %v28_v4 = vsel %vm24_vm0, %v21_v1, 0.0  ;;  %v23_v5 = vld [vmem:[%s355_s0 + $0x18] sm:$0xff]  ;;  %v31_v6 = vsel %vm24_vm0, %v22_v2, 0.0  ;;  %v101_v28 = vld [vmem:[%s356_s3 + $0x8] sm:$0xff]  ;;  %v100_v30 = vld [vmem:[%s356_s3] sm:$0xff] }
   0x3   :  { %26 = vadd.xlane.f32.xlu0 %v25_v3  ;;  %29 = vadd.xlane.f32.xlu1 %v28_v4  ;;  %v34_v7 = vsel %vm24_vm0, %v23_v5, 0.0  ;;  %v103_v29 = vld [vmem:[%s356_s3 + $0x18] sm:$0xff]  ;;  %v102_v33 = vld [vmem:[%s356_s3 + $0x10] sm:$0xff]  ;;  %v230_v48 = vld [vmem:[%s357_s1] ss:$0 sm:$0xff] }
   0x4   :  { %v236_v32 = vpack.c.bf16 %v103_v29, %v101_v28  ;;  %v238_v34 = vpack.c.bf16 %v102_v33, %v100_v30  ;;  %v231_v50 = vld [vmem:[%s358_s2] ss:$0 sm:$0xff] }
   0x5   :  { %v104_v4 = vld [vmem:[%s359_s4] sm:$0x3] }
   0x6   :  { %237 = vmatprep.subr.bf16.mxu0 %v236_v32  ;;  %240 = vmatprep.subr.bf16.mxu1 %v236_v32 }
   0x7   :  { %32 = vadd.xlane.f32.xlu0 %v31_v6  ;;  %35 = vadd.xlane.f32.xlu1 %v34_v7 }
   0x8   :  { %239 = vmatpush1.bf16.msra.mxu0 %v238_v34  ;;  %241 = vmatpush1.bf16.msra.mxu1 %v238_v34 }
  0x90   :  { %v27_v8 = vpop.xlane.xlu0 %26  ;;  %v30_v9 = vpop.xlane.xlu1 %29 }
  0x91   :  { %v38_v10 = vmul.f32 0.0625, %v27_v8  ;;  %v39_v11 = vmul.f32 0.0625, %v30_v9 }
  0x93   :  { %v42_v12 = vsub.f32 %v20_v0, %v38_v10  ;;  %v43_v13 = vsub.f32 %v21_v1, %v39_v11  ;;  %v106_v1 = vlaneseq }
  0x94   :  { %v33_v14 = vpop.xlane.xlu0 %32  ;;  %v36_v15 = vpop.xlane.xlu1 %35 }
  0x95   :  { %v40_v16 = vmul.f32 0.0625, %v33_v14  ;;  %v41_v17 = vmul.f32 0.0625, %v36_v15  ;;  %v46_v18 = vmul.f32 %v42_v12, %v42_v12  ;;  %v47_v19 = vmul.f32 %v43_v13, %v43_v13 }
  0x97   :  { %v44_v20 = vsub.f32 %v22_v2, %v40_v16  ;;  %v45_v21 = vsub.f32 %v23_v5, %v41_v17  ;;  %v50_v22 = vsel %vm24_vm0, %v46_v18, 0.0  ;;  %v53_v23 = vsel %vm24_vm0, %v47_v19, 0.0 }
  0x98   :  { %51 = vadd.xlane.f32.xlu0 %v50_v22  ;;  %v107_v2 = vshrl.u32 %v106_v1, 7 }
  0x99   :  { %v48_v24 = vmul.f32 %v44_v20, %v44_v20  ;;  %v49_v25 = vmul.f32 %v45_v21, %v45_v21 }
  0x9a   :  { %v108_v3 = vsub.s32 0, %v107_v2  ;;  %v112_v5 = vsub.s32 1, %v107_v2 }
  0x9b   :  { %v56_v26 = vsel %vm24_vm0, %v48_v24, 0.0  ;;  %v59_v27 = vsel %vm24_vm0, %v49_v25, 0.0 }
  0x9c   :  { %54 = vadd.xlane.f32.xlu0 %v53_v23  ;;  %57 = vadd.xlane.f32.xlu1 %v56_v26  ;;  %v109_v6 = vrot.slane %v104_v4, %v108_v3  ;;  %v113_v7 = vrot.slane %v104_v4, %v112_v5 }
  0xa0   :  { %60 = vadd.xlane.f32.xlu1 %v59_v27 }
 0x125   :  { %v52_v35 = vpop.xlane.xlu0 %51 }
 0x126   :  { %v62_v36 = vmul.f32 0.0625, %v52_v35 }
 0x128   :  { %v66_v37 = vadd.f32 1e-05, %v62_v36 }
 0x129   :  { %v58_v38 = vpop.xlane.xlu1 %57  ;;  %v55_v39 = vpop.xlane.xlu0 %54 }
 0x12a   :  { %243 = vrsqrt.f32 %v66_v37  ;;  %v64_v40 = vmul.f32 0.0625, %v58_v38  ;;  %v63_v41 = vmul.f32 0.0625, %v55_v39 }
 0x12c   :  { %v68_v42 = vadd.f32 1e-05, %v64_v40  ;;  %v67_v43 = vadd.f32 1e-05, %v63_v41 }
 0x12d   :  { %v61_v44 = vpop.xlane.xlu1 %60 }
 0x12e   :  { %245 = vrsqrt.f32 %v68_v42  ;;  %v65_v45 = vmul.f32 0.0625, %v61_v44 }
 0x12f   :  { %247 = vrsqrt.f32 %v67_v43 }
 0x130   :  { %v69_v46 = vadd.f32 1e-05, %v65_v45 }
 0x132   :  { %249 = vrsqrt.f32 %v69_v46 }
 0x134   :  { %v244_v47 = vpop.eup %243 }
 0x135   :  { %v74_v49 = vmul.f32 %v244_v47, %v42_v12 }
 0x137   :  { %v85_v51 = vmul.f32 %v230_v48, %v74_v49 }
 0x138   :  { %v246_v52 = vpop.eup %245 }
 0x139   :  { %v248_v53 = vpop.eup %247  ;;  %v96_v54 = vadd.f32 %v231_v50, %v85_v51  ;;  %v76_v55 = vmul.f32 %v246_v52, %v44_v20 }
 0x13a   :  { %v75_v56 = vmul.f32 %v248_v53, %v43_v13 }
 0x13b   :  { %232 = vmatmul.mubr.msk.f32.vlgmr.msra.gmra.mrb[0].mxu0 %vm24_vm0, %v96_v54  ;;  %v87_v57 = vmul.f32 %v230_v48, %v76_v55 }
 0x13c   :  { %v250_v58 = vpop.eup %249  ;;  %198 = vmatprep.mubr.f32.mxu0 %v251_v31  ;;  %v86_v59 = vmul.f32 %v230_v48, %v75_v56 }
 0x13d   :  { %v98_v60 = vadd.f32 %v231_v50, %v87_v57  ;;  %v77_v61 = vmul.f32 %v250_v58, %v45_v21 }
 0x13e   :  { %v97_v62 = vadd.f32 %v231_v50, %v86_v59 }
 0x13f   :  { %234 = vmatmul.mubr.msk.f32.vlgmr.msra.gmra.mrb[0].mxu1 %vm24_vm0, %v98_v60  ;;  %v88_v63 = vmul.f32 %v230_v48, %v77_v61 }
 0x140   :  { %233 = vmatmul.mubr.msk.f32.gmra.mrb[2].mxu0 %vm24_vm0, %v97_v62  ;;  %210 = vmatprep.mubr.f32.mxu1 %v251_v31 }
 0x141   :  { %v99_v0 = vadd.f32 %v231_v50, %v88_v63 }
 0x143   :  { %235 = vmatmul.mubr.msk.f32.gmra.mrb[2].mxu1 %vm24_vm0, %v99_v0 }
 0x20e   :  { %v194_v8 = vpop.f32.mrb[0].mxu0 }
 0x20f   :  { %v195_v9 = vadd.f32 %v194_v8, %v109_v6  ;;  %v196_v10 = vpop.f32.mrb[1].mxu0 }
 0x210   :  { %v197_v11 = vadd.f32 %v196_v10, %v113_v7 }
 0x211   :  { %217 = vst [vmem:[%s360_s5] sm:$0xff] %v195_v9 }
 0x212   :  { %219 = vst.msk [vmem:[%s360_s5 + $0x8] sm:$0xff] %vm218_vm1, %v197_v11  ;;  %v206_v12 = vpop.f32.mrb[0].mxu1 }
 0x213   :  { %v200_v13 = vpop.f32.mrb[2].mxu0  ;;  %v207_v14 = vadd.f32 %v206_v12, %v109_v6  ;;  %v208_v15 = vpop.f32.mrb[1].mxu1 }
 0x214   :  { %v201_v16 = vadd.f32 %v200_v13, %v109_v6  ;;  %v202_v17 = vpop.f32.mrb[3].mxu0  ;;  %v209_v18 = vadd.f32 %v208_v15, %v113_v7 }
 0x215   :  { %222 = vst [vmem:[%s360_s5 + $0x20] sm:$0xff] %v207_v14  ;;  %v203_v19 = vadd.f32 %v202_v17, %v113_v7 }
 0x216   :  { %220 = vst [vmem:[%s360_s5 + $0x10] sm:$0xff] %v201_v16  ;;  %223 = vst.msk [vmem:[%s360_s5 + $0x28] sm:$0xff] %vm218_vm1, %v209_v18  ;;  %v212_v20 = vpop.f32.mrb[2].mxu1 }
 0x217   :  { %221 = vst.msk [vmem:[%s360_s5 + $0x18] sm:$0xff] %vm218_vm1, %v203_v19  ;;  %v213_v21 = vadd.f32 %v212_v20, %v109_v6  ;;  %v214_v22 = vpop.f32.mrb[3].mxu1 }
 0x218   :  { %v215_v23 = vadd.f32 %v214_v22, %v113_v7 }
 0x219   :  { %224 = vst [vmem:[%s360_s5 + $0x30] sm:$0xff] %v213_v21 }
 0x21a   :  { %225 = vst.msk [vmem:[%s360_s5 + $0x38] sm:$0xff] %vm218_vm1, %v215_v23 }

// kernel: _lambda_.94
= control target key start
LH: loop header
LB: loop body
LE: loop exit
PB: predicated region body
PF: predicated region fallthrough
CT: control target
= control target key end

     0   :  { %vm28_vm0 = vcmask 261120   ;;  %s558_s0 = inlined_call_operand.vmem [shape: f32[64,32], index: 0, kind: input, shape index: {}]   ;;  %s559_s3 = inlined_call_operand.vmem [shape: f32[32,32], index: 3, kind: input, shape index: {}]   ;;  %s560_s1 = inlined_call_operand.vmem [shape: f32[1,32], index: 1, kind: input, shape index: {}]   ;;  %s561_s2 = inlined_call_operand.vmem [shape: f32[1,32], index: 2, kind: input, shape index: {}, may-alias: {2,4}]   ;;  %s562_s4 = inlined_call_operand.vmem [shape: f32[1,32], index: 4, kind: input, shape index: {}, may-alias: {2,4}]   ;;  %s563_s5 = inlined_call_operand.vmem [shape: f32[64,32], index: 5, kind: output, shape index: {}]  }
   0x1   :  { %v20_v0 = vld [vmem:[%s558_s0] sm:$0xff]  ;;  %v21_v1 = vld [vmem:[%s558_s0 + $0x8] sm:$0xff]  ;;  %v22_v8 = vld [vmem:[%s558_s0 + $0x10] sm:$0xff] }
   0x2   :  { %v24_v2 = vld [vmem:[%s558_s0 + $0x20] sm:$0xff]  ;;  %v29_v3 = vsel %vm28_vm0, %v20_v0, 0.0  ;;  %v32_v4 = vsel %vm28_vm0, %v21_v1, 0.0  ;;  %v25_v5 = vld [vmem:[%s558_s0 + $0x28] sm:$0xff]  ;;  %v26_v9 = vld [vmem:[%s558_s0 + $0x30] sm:$0xff]  ;;  %v35_v10 = vsel %vm28_vm0, %v22_v8, 0.0 }
   0x3   :  { %30 = vadd.xlane.f32.xlu0 %v29_v3  ;;  %33 = vadd.xlane.f32.xlu1 %v32_v4  ;;  %v41_v6 = vsel %vm28_vm0, %v24_v2, 0.0  ;;  %v44_v7 = vsel %vm28_vm0, %v25_v5, 0.0  ;;  %v47_v11 = vsel %vm28_vm0, %v26_v9, 0.0  ;;  %v23_v12 = vld [vmem:[%s558_s0 + $0x18] sm:$0xff]  ;;  %v164_v56 = vld [vmem:[%s559_s3] sm:$0xff]  ;;  %v165_v57 = vld [vmem:[%s559_s3 + $0x8] sm:$0xff] }
   0x4   :  { %v27_v13 = vld [vmem:[%s558_s0 + $0x38] sm:$0xff]  ;;  %v38_v14 = vsel %vm28_vm0, %v23_v12, 0.0  ;;  %v359_v58 = vpack.c.bf16 %v165_v57, %v164_v56  ;;  %v166_v59 = vld [vmem:[%s559_s3 + $0x10] sm:$0xff] }
   0x5   :  { %v50_v15 = vsel %vm28_vm0, %v27_v13, 0.0  ;;  %v167_v60 = vld [vmem:[%s559_s3 + $0x18] sm:$0xff] }
   0x6   :  { %360 = vmatprep.subr.bf16.mxu0 %v359_v58  ;;  %367 = vmatprep.subr.bf16.mxu1 %v359_v58  ;;  %v363_v61 = vpack.c.bf16 %v167_v60, %v166_v59 }
   0x7   :  { %42 = vadd.xlane.f32.xlu0 %v41_v6  ;;  %45 = vadd.xlane.f32.xlu1 %v44_v7 }
   0x8   :  { %362 = vmatpush3.bf16.msra.mxu0 %v359_v58  ;;  %369 = vmatpush3.bf16.msra.mxu1 %v359_v58 }
   0x9   :  { %364 = vmatprep.subr.bf16.mxu0 %v363_v61  ;;  %368 = vmatprep.subr.bf16.mxu1 %v363_v61 }
   0xb   :  { %36 = vadd.xlane.f32.xlu0 %v35_v10  ;;  %48 = vadd.xlane.f32.xlu1 %v47_v11 }
   0xc   :  { %366 = vmatpush3.bf16.msra.mxu0 %v363_v61  ;;  %370 = vmatpush3.bf16.msra.mxu1 %v363_v61 }
   0xf   :  { %39 = vadd.xlane.f32.xlu0 %v38_v14  ;;  %51 = vadd.xlane.f32.xlu1 %v50_v15 }
  0x90   :  { %v31_v16 = vpop.xlane.xlu0 %30  ;;  %v34_v17 = vpop.xlane.xlu1 %33 }
  0x91   :  { %v54_v18 = vmul.f32 0.03125, %v31_v16  ;;  %v55_v19 = vmul.f32 0.03125, %v34_v17 }
  0x93   :  { %v449_v20 = vsub.f32 %v20_v0, %v54_v18  ;;  %v451_v21 = vsub.f32 %v21_v1, %v55_v19 }
  0x94   :  { %v43_v22 = vpop.xlane.xlu0 %42  ;;  %v46_v23 = vpop.xlane.xlu1 %45 }
  0x95   :  { %v58_v24 = vmul.f32 0.03125, %v43_v22  ;;  %v59_v25 = vmul.f32 0.03125, %v46_v23  ;;  %v70_v26 = vmul.f32 %v449_v20, %v449_v20  ;;  %v71_v27 = vmul.f32 %v451_v21, %v451_v21  ;;  %v316_v22 = vld [vmem:[%s560_s1] ss:$0 sm:$0xff] }
  0x97   :  { %v457_v28 = vsub.f32 %v24_v2, %v58_v24  ;;  %v459_v29 = vsub.f32 %v25_v5, %v59_v25  ;;  %v78_v30 = vsel %vm28_vm0, %v70_v26, 0.0  ;;  %v81_v33 = vsel %vm28_vm0, %v71_v27, 0.0  ;;  %v317_v26 = vld [vmem:[%s561_s2] ss:$0 sm:$0xff] }
  0x98   :  { %79 = vadd.xlane.f32.xlu0 %v78_v30  ;;  %v37_v31 = vpop.xlane.xlu0 %36  ;;  %v49_v32 = vpop.xlane.xlu1 %48 }
  0x99   :  { %v56_v34 = vmul.f32 0.03125, %v37_v31  ;;  %v60_v35 = vmul.f32 0.03125, %v49_v32  ;;  %v74_v36 = vmul.f32 %v457_v28, %v457_v28  ;;  %v75_v37 = vmul.f32 %v459_v29, %v459_v29 }
  0x9b   :  { %v467_v38 = vsub.f32 %v22_v8, %v56_v34  ;;  %v469_v39 = vsub.f32 %v26_v9, %v60_v35  ;;  %v90_v40 = vsel %vm28_vm0, %v74_v36, 0.0  ;;  %v93_v43 = vsel %vm28_vm0, %v75_v37, 0.0 }
  0x9c   :  { %82 = vadd.xlane.f32.xlu0 %v81_v33  ;;  %91 = vadd.xlane.f32.xlu1 %v90_v40  ;;  %v40_v41 = vpop.xlane.xlu0 %39  ;;  %v52_v42 = vpop.xlane.xlu1 %51 }
  0x9d   :  { %v57_v44 = vmul.f32 0.03125, %v40_v41  ;;  %v61_v45 = vmul.f32 0.03125, %v52_v42  ;;  %v72_v46 = vmul.f32 %v467_v38, %v467_v38  ;;  %v76_v47 = vmul.f32 %v469_v39, %v469_v39 }
  0x9f   :  { %v477_v48 = vsub.f32 %v23_v12, %v57_v44  ;;  %v479_v49 = vsub.f32 %v27_v13, %v61_v45  ;;  %v84_v50 = vsel %vm28_vm0, %v72_v46, 0.0  ;;  %v96_v51 = vsel %vm28_vm0, %v76_v47, 0.0 }
  0xa0   :  { %94 = vadd.xlane.f32.xlu1 %v93_v43  ;;  %85 = vadd.xlane.f32.xlu0 %v84_v50 }
  0xa1   :  { %v73_v52 = vmul.f32 %v477_v48, %v477_v48  ;;  %v77_v53 = vmul.f32 %v479_v49, %v479_v49 }
  0xa3   :  { %v87_v54 = vsel %vm28_vm0, %v73_v52, 0.0  ;;  %v99_v55 = vsel %vm28_vm0, %v77_v53, 0.0 }
  0xa4   :  { %97 = vadd.xlane.f32.xlu1 %v96_v51  ;;  %88 = vadd.xlane.f32.xlu0 %v87_v54 }
  0xa8   :  { %100 = vadd.xlane.f32.xlu1 %v99_v55 }
 0x125   :  { %v80_v62 = vpop.xlane.xlu0 %79 }
 0x126   :  { %v102_v63 = vmul.f32 0.03125, %v80_v62 }
 0x128   :  { %v110_v0 = vadd.f32 1e-05, %v102_v63 }
 0x129   :  { %v92_v1 = vpop.xlane.xlu1 %91  ;;  %v83_v2 = vpop.xlane.xlu0 %82 }
 0x12a   :  { %371 = vrsqrt.f32 %v110_v0  ;;  %v106_v3 = vmul.f32 0.03125, %v92_v1  ;;  %v103_v4 = vmul.f32 0.03125, %v83_v2 }
 0x12c   :  { %v114_v5 = vadd.f32 1e-05, %v106_v3  ;;  %v111_v6 = vadd.f32 1e-05, %v103_v4 }
 0x12d   :  { %v95_v7 = vpop.xlane.xlu1 %94  ;;  %v86_v8 = vpop.xlane.xlu0 %85 }
 0x12e   :  { %373 = vrsqrt.f32 %v114_v5  ;;  %v107_v9 = vmul.f32 0.03125, %v95_v7  ;;  %v104_v10 = vmul.f32 0.03125, %v86_v8 }
 0x12f   :  { %375 = vrsqrt.f32 %v111_v6 }
 0x130   :  { %v115_v11 = vadd.f32 1e-05, %v107_v9  ;;  %v112_v12 = vadd.f32 1e-05, %v104_v10 }
 0x131   :  { %v98_v13 = vpop.xlane.xlu1 %97  ;;  %v89_v14 = vpop.xlane.xlu0 %88 }
 0x132   :  { %377 = vrsqrt.f32 %v115_v11  ;;  %v108_v15 = vmul.f32 0.03125, %v98_v13  ;;  %v105_v16 = vmul.f32 0.03125, %v89_v14 }
 0x133   :  { %379 = vrsqrt.f32 %v112_v12 }
 0x134   :  { %v372_v17 = vpop.eup %371  ;;  %v116_v18 = vadd.f32 1e-05, %v108_v15  ;;  %v113_v19 = vadd.f32 1e-05, %v105_v16 }
 0x135   :  { %v101_v23 = vpop.xlane.xlu1 %100  ;;  %v126_v24 = vmul.f32 %v372_v17, %v449_v20 }
 0x136   :  { %381 = vrsqrt.f32 %v116_v18  ;;  %v109_v25 = vmul.f32 0.03125, %v101_v23 }
 0x137   :  { %383 = vrsqrt.f32 %v113_v19  ;;  %v141_v27 = vmul.f32 %v316_v22, %v126_v24 }
 0x138   :  { %v374_v30 = vpop.eup %373  ;;  %v117_v31 = vadd.f32 1e-05, %v109_v25 }
 0x139   :  { %v376_v32 = vpop.eup %375  ;;  %v156_v33 = vadd.f32 %v317_v26, %v141_v27  ;;  %v130_v34 = vmul.f32 %v374_v30, %v457_v28 }
 0x13a   :  { %385 = vrsqrt.f32 %v117_v31  ;;  %v127_v35 = vmul.f32 %v376_v32, %v451_v21 }
 0x13b   :  { %347 = vmatprep.mubr.msk.f32.mxu0 %vm28_vm0, %v156_v33  ;;  %v145_v20 = vmul.f32 %v316_v22, %v130_v34 }
 0x13c   :  { %v378_v36 = vpop.eup %377  ;;  %v142_v37 = vmul.f32 %v316_v22, %v127_v35 }
 0x13d   :  { %v380_v40 = vpop.eup %379  ;;  %v160_v41 = vadd.f32 %v317_v26, %v145_v20  ;;  %v131_v42 = vmul.f32 %v378_v36, %v459_v29 }
 0x13e   :  { %v157_v43 = vadd.f32 %v317_v26, %v142_v37  ;;  %v128_v44 = vmul.f32 %v380_v40, %v467_v38 }
 0x13f   :  { %353 = vmatprep.mubr.msk.f32.mxu1 %vm28_vm0, %v160_v41  ;;  %v146_v45 = vmul.f32 %v316_v22, %v131_v42 }
 0x140   :  { %v382_v46 = vpop.eup %381  ;;  %348 = vmatmul.mubr.msk.f32.vlgmr.msra.gmra.mrb[0].mxu0 %vm28_vm0, %v157_v43  ;;  %v143_v28 = vmul.f32 %v316_v22, %v128_v44 }
 0x141   :  { %v384_v21 = vpop.eup %383  ;;  %v161_v47 = vadd.f32 %v317_v26, %v146_v45  ;;  %v132_v50 = vmul.f32 %v382_v46, %v469_v39 }
 0x142   :  { %v158_v51 = vadd.f32 %v317_v26, %v143_v28  ;;  %v129_v52 = vmul.f32 %v384_v21, %v477_v48  ;;  %v318_v48 = vld [vmem:[%s562_s4] ss:$0 sm:$0xff] }
 0x143   :  { %354 = vmatmul.mubr.msk.f32.vlgmr.msra.gmra.mrb[0].mxu1 %vm28_vm0, %v161_v47  ;;  %v147_v29 = vmul.f32 %v316_v22, %v132_v50 }
 0x144   :  { %v386_v53 = vpop.eup %385  ;;  %350 = vmatprep.mubr.msk.f32.mxu0 %vm28_vm0, %v158_v51  ;;  %v144_v38 = vmul.f32 %v316_v22, %v129_v52 }
 0x145   :  { %v162_v54 = vadd.f32 %v317_v26, %v147_v29  ;;  %v133_v55 = vmul.f32 %v386_v53, %v479_v49 }
 0x146   :  { %v159_v56 = vadd.f32 %v317_v26, %v144_v38 }
 0x147   :  { %356 = vmatprep.mubr.msk.f32.mxu1 %vm28_vm0, %v162_v54  ;;  %v148_v57 = vmul.f32 %v316_v22, %v133_v55 }
 0x148   :  { %351 = vmatmul.mubr.msk.f32.gmra.mrb[2].mxu0 %vm28_vm0, %v159_v56 }
 0x149   :  { %v163_v39 = vadd.f32 %v317_v26, %v148_v57 }
 0x14b   :  { %357 = vmatmul.mubr.msk.f32.gmra.mrb[2].mxu1 %vm28_vm0, %v163_v39 }
 0x213   :  { %v349_v58 = vpop.f32.mrb[0].mxu0 }
 0x214   :  { %v271_v59 = vadd.f32 %v349_v58, %v318_v48  ;;  %v265_v60 = vpop.f32.mrb[1].mxu0 }
 0x215   :  { %v266_v61 = vadd.f32 %v318_v48, %v265_v60 }
 0x216   :  { %305 = vst.msk [vmem:[%s563_s5 + $0x8] sm:$0xff] %vm28_vm0, %v271_v59  ;;  %v355_v49 = vpop.f32.mrb[0].mxu1 }
 0x217   :  { %304 = vst.msk [vmem:[%s563_s5] sm:$0xff] %vm28_vm0, %v266_v61  ;;  %v291_v62 = vadd.f32 %v355_v49, %v318_v48  ;;  %v285_v63 = vpop.f32.mrb[1].mxu1 }
 0x218   :  { %v286_v0 = vadd.f32 %v318_v48, %v285_v63 }
 0x219   :  { %309 = vst.msk [vmem:[%s563_s5 + $0x28] sm:$0xff] %vm28_vm0, %v291_v62 }
 0x21a   :  { %308 = vst.msk [vmem:[%s563_s5 + $0x20] sm:$0xff] %vm28_vm0, %v286_v0 }
 0x21b   :  { %v352_v1 = vpop.f32.mrb[2].mxu0 }
 0x21c   :  { %v281_v2 = vadd.f32 %v352_v1, %v318_v48  ;;  %v275_v3 = vpop.f32.mrb[3].mxu0 }
 0x21d   :  { %v276_v4 = vadd.f32 %v318_v48, %v275_v3 }
 0x21e   :  { %307 = vst.msk [vmem:[%s563_s5 + $0x18] sm:$0xff] %vm28_vm0, %v281_v2  ;;  %v358_v5 = vpop.f32.mrb[2].mxu1 }
 0x21f   :  { %306 = vst.msk [vmem:[%s563_s5 + $0x10] sm:$0xff] %vm28_vm0, %v276_v4  ;;  %v301_v6 = vadd.f32 %v358_v5, %v318_v48  ;;  %v295_v7 = vpop.f32.mrb[3].mxu1 }
 0x220   :  { %v296_v8 = vadd.f32 %v318_v48, %v295_v7 }
 0x221   :  { %311 = vst.msk [vmem:[%s563_s5 + $0x38] sm:$0xff] %vm28_vm0, %v301_v6 }
 0x222   :  { %310 = vst.msk [vmem:[%s563_s5 + $0x30] sm:$0xff] %vm28_vm0, %v296_v8 }

// kernel: _lambda_.95
= control target key start
LH: loop header
LB: loop body
LE: loop exit
PB: predicated region body
PF: predicated region fallthrough
CT: control target
= control target key end

     0   :  { %vm24_vm0 = vcmask 293888   ;;  %vm49_vm1 = vcmask 1043456   ;;  %vm158_vm2 = vcmask 261120   ;;  %s323_s1 = inlined_call_operand.vmem [shape: f32[36,32], index: 1, kind: input, shape index: {}]   ;;  %s324_s0 = inlined_call_operand.vmem [shape: f32[64,36], index: 0, kind: input, shape index: {}]   ;;  %s325_s2 = inlined_call_operand.vmem [shape: f32[64,32], index: 2, kind: output, shape index: {}]  }
   0x1   :  { %v19_v0 = vld [vmem:[%s323_s1] sm:$0xff]  ;;  %v20_v1 = vld [vmem:[%s323_s1 + $0x8] sm:$0xff]  ;;  %v21_v2 = vld [vmem:[%s323_s1 + $0x10] sm:$0xff] }
   0x2   :  { %v215_v3 = vpack.c.bf16 %v20_v1, %v19_v0  ;;  %v22_v4 = vld [vmem:[%s323_s1 + $0x18] sm:$0xff]  ;;  %v11_v5 = vld [vmem:[%s324_s0] sm:$0xff]  ;;  %v12_v9 = vld [vmem:[%s324_s0 + $0x8] sm:$0xff] }
   0x3   :  { %v219_v6 = vpack.c.bf16 %v22_v4, %v21_v2  ;;  %203 = vmatprep.mubr.msk.f32.mxu0 %vm24_vm0, %v11_v5  ;;  %v15_v7 = vld [vmem:[%s324_s0 + $0x20] sm:$0xff]  ;;  %v16_v10 = vld [vmem:[%s324_s0 + $0x28] sm:$0xff]  ;;  %v13_v11 = vld [vmem:[%s324_s0 + $0x10] sm:$0xff] }
   0x4   :  { %216 = vmatprep.subr.bf16.mxu0 %v215_v3  ;;  %223 = vmatprep.subr.bf16.mxu1 %v215_v3  ;;  %v23_v8 = vld [vmem:[%s323_s1 + $0x20] sm:$0xf]  ;;  %v17_v12 = vld [vmem:[%s324_s0 + $0x30] sm:$0xff]  ;;  %v14_v13 = vld [vmem:[%s324_s0 + $0x18] sm:$0xff] }
   0x5   :  { %218 = vmatpush3.bf16.msra.mxu0 %v215_v3  ;;  %226 = vmatpush3.bf16.msra.mxu1 %v215_v3  ;;  %v18_v14 = vld [vmem:[%s324_s0 + $0x38] sm:$0xff] }
   0x6   :  { %220 = vmatprep.subr.bf16.mxu0 %v219_v6  ;;  %224 = vmatprep.subr.bf16.mxu1 %v219_v6 }
   0x7   :  { %209 = vmatprep.mubr.msk.f32.mxu1 %vm24_vm0, %v15_v7 }
   0x9   :  { %222 = vmatpush3.bf16.msra.mxu0 %v219_v6  ;;  %227 = vmatpush3.bf16.msra.mxu1 %v219_v6 }
   0xa   :  { %201 = vmatprep.subr.msk.mxu0 %vm49_vm1, %v23_v8  ;;  %225 = vmatprep.subr.msk.mxu1 %vm49_vm1, %v23_v8 }
   0xd   :  { %202 = vmatpush3.msk.msra.mxu0 %vm49_vm1, %v23_v8  ;;  %228 = vmatpush3.msk.msra.mxu1 %vm49_vm1, %v23_v8 }
   0xe   :  { %204 = vmatmul.mubr.msk.f32.vlgmr.msra.gmra.mrb[0].mxu0 %vm24_vm0, %v12_v9  ;;  %210 = vmatmul.mubr.msk.f32.vlgmr.msra.gmra.mrb[0].mxu1 %vm24_vm0, %v16_v10 }
   0xf   :  { %206 = vmatprep.mubr.msk.f32.mxu0 %vm24_vm0, %v13_v11  ;;  %212 = vmatprep.mubr.msk.f32.mxu1 %vm24_vm0, %v17_v12 }
  0x12   :  { %207 = vmatmul.mubr.msk.f32.gmra.mrb[2].mxu0 %vm24_vm0, %v14_v13  ;;  %213 = vmatmul.mubr.msk.f32.gmra.mrb[2].mxu1 %vm24_vm0, %v18_v14 }
  0xe1   :  { %v205_v15 = vpop.f32.mrb[0].mxu0  ;;  %v211_v16 = vpop.f32.mrb[0].mxu1 }
  0xe2   :  { %160 = vst.msk [vmem:[%s325_s2 + $0x8] sm:$0xff] %vm158_vm2, %v205_v15  ;;  %164 = vst.msk [vmem:[%s325_s2 + $0x28] sm:$0xff] %vm158_vm2, %v211_v16  ;;  %v119_v17 = vpop.f32.mrb[1].mxu0  ;;  %v139_v18 = vpop.f32.mrb[1].mxu1 }
  0xe3   :  { %159 = vst.msk [vmem:[%s325_s2] sm:$0xff] %vm158_vm2, %v119_v17  ;;  %163 = vst.msk [vmem:[%s325_s2 + $0x20] sm:$0xff] %vm158_vm2, %v139_v18 }
  0xe5   :  { %v208_v19 = vpop.f32.mrb[2].mxu0  ;;  %v214_v20 = vpop.f32.mrb[2].mxu1 }
  0xe6   :  { %162 = vst.msk [vmem:[%s325_s2 + $0x18] sm:$0xff] %vm158_vm2, %v208_v19  ;;  %166 = vst.msk [vmem:[%s325_s2 + $0x38] sm:$0xff] %vm158_vm2, %v214_v20  ;;  %v129_v21 = vpop.f32.mrb[3].mxu0  ;;  %v149_v22 = vpop.f32.mrb[3].mxu1 }
  0xe7   :  { %161 = vst.msk [vmem:[%s325_s2 + $0x10] sm:$0xff] %vm158_vm2, %v129_v21  ;;  %165 = vst.msk [vmem:[%s325_s2 + $0x30] sm:$0xff] %vm158_vm2, %v149_v22 }

// kernel: _lambda_.99
= control target key start
LH: loop header
LB: loop body
LE: loop exit
PB: predicated region body
PF: predicated region fallthrough
CT: control target
= control target key end

     0   :  { %vm25_vm0 = vcmask 261120   ;;  %vm294_vm1 = vcmask 31744   ;;  %s540_s0 = inlined_call_operand.vmem [shape: f32[64,32], index: 0, kind: input, shape index: {}]   ;;  %s541_s3 = inlined_call_operand.vmem [shape: f32[32,4], index: 3, kind: input, shape index: {}]   ;;  %s542_s1 = inlined_call_operand.vmem [shape: f32[1,32], index: 1, kind: input, shape index: {}]   ;;  %s543_s2 = inlined_call_operand.vmem [shape: f32[1,32], index: 2, kind: input, shape index: {}]   ;;  %s544_s4 = inlined_call_operand.vmem [shape: f32[64,4], index: 4, kind: output, shape index: {}]  }
   0x1   :  { %v17_v0 = vld [vmem:[%s540_s0] sm:$0xff]  ;;  %v18_v1 = vld [vmem:[%s540_s0 + $0x8] sm:$0xff]  ;;  %v19_v8 = vld [vmem:[%s540_s0 + $0x10] sm:$0xff] }
   0x2   :  { %v21_v2 = vld [vmem:[%s540_s0 + $0x20] sm:$0xff]  ;;  %v26_v3 = vsel %vm25_vm0, %v17_v0, 0.0  ;;  %v29_v4 = vsel %vm25_vm0, %v18_v1, 0.0  ;;  %v22_v5 = vld [vmem:[%s540_s0 + $0x28] sm:$0xff]  ;;  %v23_v9 = vld [vmem:[%s540_s0 + $0x30] sm:$0xff]  ;;  %v32_v10 = vsel %vm25_vm0, %v19_v8, 0.0 }
   0x3   :  { %27 = vadd.xlane.f32.xlu0 %v26_v3  ;;  %30 = vadd.xlane.f32.xlu1 %v29_v4  ;;  %v38_v6 = vsel %vm25_vm0, %v21_v2, 0.0  ;;  %v41_v7 = vsel %vm25_vm0, %v22_v5, 0.0  ;;  %v44_v11 = vsel %vm25_vm0, %v23_v9, 0.0  ;;  %v20_v12 = vld [vmem:[%s540_s0 + $0x18] sm:$0xff]  ;;  %v161_v56 = vld [vmem:[%s541_s3] sm:$0xff]  ;;  %v162_v57 = vld [vmem:[%s541_s3 + $0x8] sm:$0xff] }
   0x4   :  { %v24_v13 = vld [vmem:[%s540_s0 + $0x38] sm:$0xff]  ;;  %v35_v14 = vsel %vm25_vm0, %v20_v12, 0.0  ;;  %v349_v58 = vpack.c.bf16 %v162_v57, %v161_v56  ;;  %v163_v59 = vld [vmem:[%s541_s3 + $0x10] sm:$0xff] }
   0x5   :  { %v47_v15 = vsel %vm25_vm0, %v24_v13, 0.0  ;;  %v164_v60 = vld [vmem:[%s541_s3 + $0x18] sm:$0xff] }
   0x6   :  { %350 = vmatprep.subr.bf16.mxu0 %v349_v58  ;;  %357 = vmatprep.subr.bf16.mxu1 %v349_v58  ;;  %v353_v61 = vpack.c.bf16 %v164_v60, %v163_v59 }
   0x7   :  { %39 = vadd.xlane.f32.xlu0 %v38_v6  ;;  %42 = vadd.xlane.f32.xlu1 %v41_v7 }
   0x8   :  { %352 = vmatpush3.bf16.msra.mxu0 %v349_v58  ;;  %359 = vmatpush3.bf16.msra.mxu1 %v349_v58 }
   0x9   :  { %354 = vmatprep.subr.bf16.mxu0 %v353_v61  ;;  %358 = vmatprep.subr.bf16.mxu1 %v353_v61 }
   0xb   :  { %33 = vadd.xlane.f32.xlu0 %v32_v10  ;;  %45 = vadd.xlane.f32.xlu1 %v44_v11 }
   0xc   :  { %356 = vmatpush3.bf16.msra.mxu0 %v353_v61  ;;  %360 = vmatpush3.bf16.msra.mxu1 %v353_v61 }
   0xf   :  { %36 = vadd.xlane.f32.xlu0 %v35_v14  ;;  %48 = vadd.xlane.f32.xlu1 %v47_v15 }
  0x90   :  { %v28_v16 = vpop.xlane.xlu0 %27  ;;  %v31_v17 = vpop.xlane.xlu1 %30 }
  0x91   :  { %v51_v18 = vmul.f32 0.03125, %v28_v16  ;;  %v52_v19 = vmul.f32 0.03125, %v31_v17 }
  0x93   :  { %v434_v20 = vsub.f32 %v17_v0, %v51_v18  ;;  %v436_v21 = vsub.f32 %v18_v1, %v52_v19 }
  0x94   :  { %v40_v22 = vpop.xlane.xlu0 %39  ;;  %v43_v23 = vpop.xlane.xlu1 %42 }
  0x95   :  { %v55_v24 = vmul.f32 0.03125, %v40_v22  ;;  %v56_v25 = vmul.f32 0.03125, %v43_v23  ;;  %v67_v26 = vmul.f32 %v434_v20, %v434_v20  ;;  %v68_v27 = vmul.f32 %v436_v21, %v436_v21  ;;  %v307_v22 = vld [vmem:[%s542_s1] ss:$0 sm:$0xff] }
  0x97   :  { %v442_v28 = vsub.f32 %v21_v2, %v55_v24  ;;  %v444_v29 = vsub.f32 %v22_v5, %v56_v25  ;;  %v75_v30 = vsel %vm25_vm0, %v67_v26, 0.0  ;;  %v78_v33 = vsel %vm25_vm0, %v68_v27, 0.0  ;;  %v308_v26 = vld [vmem:[%s543_s2] ss:$0 sm:$0xff] }
  0x98   :  { %76 = vadd.xlane.f32.xlu0 %v75_v30  ;;  %v34_v31 = vpop.xlane.xlu0 %33  ;;  %v46_v32 = vpop.xlane.xlu1 %45 }
  0x99   :  { %v53_v34 = vmul.f32 0.03125, %v34_v31  ;;  %v57_v35 = vmul.f32 0.03125, %v46_v32  ;;  %v71_v36 = vmul.f32 %v442_v28, %v442_v28  ;;  %v72_v37 = vmul.f32 %v444_v29, %v444_v29 }
  0x9b   :  { %v452_v38 = vsub.f32 %v19_v8, %v53_v34  ;;  %v454_v39 = vsub.f32 %v23_v9, %v57_v35  ;;  %v87_v40 = vsel %vm25_vm0, %v71_v36, 0.0  ;;  %v90_v43 = vsel %vm25_vm0, %v72_v37, 0.0 }
  0x9c   :  { %79 = vadd.xlane.f32.xlu0 %v78_v33  ;;  %88 = vadd.xlane.f32.xlu1 %v87_v40  ;;  %v37_v41 = vpop.xlane.xlu0 %36  ;;  %v49_v42 = vpop.xlane.xlu1 %48 }
  0x9d   :  { %v54_v44 = vmul.f32 0.03125, %v37_v41  ;;  %v58_v45 = vmul.f32 0.03125, %v49_v42  ;;  %v69_v46 = vmul.f32 %v452_v38, %v452_v38  ;;  %v73_v47 = vmul.f32 %v454_v39, %v454_v39 }
  0x9f   :  { %v462_v48 = vsub.f32 %v20_v12, %v54_v44  ;;  %v464_v49 = vsub.f32 %v24_v13, %v58_v45  ;;  %v81_v50 = vsel %vm25_vm0, %v69_v46, 0.0  ;;  %v93_v51 = vsel %vm25_vm0, %v73_v47, 0.0 }
  0xa0   :  { %91 = vadd.xlane.f32.xlu1 %v90_v43  ;;  %82 = vadd.xlane.f32.xlu0 %v81_v50 }
  0xa1   :  { %v70_v52 = vmul.f32 %v462_v48, %v462_v48  ;;  %v74_v53 = vmul.f32 %v464_v49, %v464_v49 }
  0xa3   :  { %v84_v54 = vsel %vm25_vm0, %v70_v52, 0.0  ;;  %v96_v55 = vsel %vm25_vm0, %v74_v53, 0.0 }
  0xa4   :  { %94 = vadd.xlane.f32.xlu1 %v93_v51  ;;  %85 = vadd.xlane.f32.xlu0 %v84_v54 }
  0xa8   :  { %97 = vadd.xlane.f32.xlu1 %v96_v55 }
 0x125   :  { %v77_v62 = vpop.xlane.xlu0 %76 }
 0x126   :  { %v99_v63 = vmul.f32 0.03125, %v77_v62 }
 0x128   :  { %v107_v0 = vadd.f32 1e-05, %v99_v63 }
 0x129   :  { %v89_v1 = vpop.xlane.xlu1 %88  ;;  %v80_v2 = vpop.xlane.xlu0 %79 }
 0x12a   :  { %361 = vrsqrt.f32 %v107_v0  ;;  %v103_v3 = vmul.f32 0.03125, %v89_v1  ;;  %v100_v4 = vmul.f32 0.03125, %v80_v2 }
 0x12c   :  { %v111_v5 = vadd.f32 1e-05, %v103_v3  ;;  %v108_v6 = vadd.f32 1e-05, %v100_v4 }
 0x12d   :  { %v92_v7 = vpop.xlane.xlu1 %91  ;;  %v83_v8 = vpop.xlane.xlu0 %82 }
 0x12e   :  { %363 = vrsqrt.f32 %v111_v5  ;;  %v104_v9 = vmul.f32 0.03125, %v92_v7  ;;  %v101_v10 = vmul.f32 0.03125, %v83_v8 }
 0x12f   :  { %365 = vrsqrt.f32 %v108_v6 }
 0x130   :  { %v112_v11 = vadd.f32 1e-05, %v104_v9  ;;  %v109_v12 = vadd.f32 1e-05, %v101_v10 }
 0x131   :  { %v95_v13 = vpop.xlane.xlu1 %94  ;;  %v86_v14 = vpop.xlane.xlu0 %85 }
 0x132   :  { %367 = vrsqrt.f32 %v112_v11  ;;  %v105_v15 = vmul.f32 0.03125, %v95_v13  ;;  %v102_v16 = vmul.f32 0.03125, %v86_v14 }
 0x133   :  { %369 = vrsqrt.f32 %v109_v12 }
 0x134   :  { %v362_v17 = vpop.eup %361  ;;  %v113_v18 = vadd.f32 1e-05, %v105_v15  ;;  %v110_v19 = vadd.f32 1e-05, %v102_v16 }
 0x135   :  { %v98_v23 = vpop.xlane.xlu1 %97  ;;  %v123_v24 = vmul.f32 %v362_v17, %v434_v20 }
 0x136   :  { %371 = vrsqrt.f32 %v113_v18  ;;  %v106_v25 = vmul.f32 0.03125, %v98_v23 }
 0x137   :  { %373 = vrsqrt.f32 %v110_v19  ;;  %v138_v27 = vmul.f32 %v307_v22, %v123_v24 }
 0x138   :  { %v364_v30 = vpop.eup %363  ;;  %v114_v31 = vadd.f32 1e-05, %v106_v25 }
 0x139   :  { %v366_v32 = vpop.eup %365  ;;  %v153_v33 = vadd.f32 %v308_v26, %v138_v27  ;;  %v127_v34 = vmul.f32 %v364_v30, %v442_v28 }
 0x13a   :  { %375 = vrsqrt.f32 %v114_v31  ;;  %v124_v35 = vmul.f32 %v366_v32, %v436_v21 }
 0x13b   :  { %337 = vmatprep.mubr.msk.f32.mxu0 %vm25_vm0, %v153_v33  ;;  %v142_v20 = vmul.f32 %v307_v22, %v127_v34 }
 0x13c   :  { %v368_v36 = vpop.eup %367  ;;  %v139_v37 = vmul.f32 %v307_v22, %v124_v35 }
 0x13d   :  { %v370_v40 = vpop.eup %369  ;;  %v157_v41 = vadd.f32 %v308_v26, %v142_v20  ;;  %v128_v42 = vmul.f32 %v368_v36, %v444_v29 }
 0x13e   :  { %v154_v43 = vadd.f32 %v308_v26, %v139_v37  ;;  %v125_v44 = vmul.f32 %v370_v40, %v452_v38 }
 0x13f   :  { %343 = vmatprep.mubr.msk.f32.mxu1 %vm25_vm0, %v157_v41  ;;  %v143_v45 = vmul.f32 %v307_v22, %v128_v42 }
 0x140   :  { %v372_v46 = vpop.eup %371  ;;  %338 = vmatmul.mubr.msk.f32.vlgmr.msra.gmra.mrb[0].mxu0 %vm25_vm0, %v154_v43  ;;  %v140_v28 = vmul.f32 %v307_v22, %v125_v44 }
 0x141   :  { %v374_v21 = vpop.eup %373  ;;  %v158_v47 = vadd.f32 %v308_v26, %v143_v45  ;;  %v129_v50 = vmul.f32 %v372_v46, %v454_v39 }
 0x142   :  { %v155_v51 = vadd.f32 %v308_v26, %v140_v28  ;;  %v126_v52 = vmul.f32 %v374_v21, %v462_v48 }
 0x143   :  { %344 = vmatmul.mubr.msk.f32.vlgmr.msra.gmra.mrb[0].mxu1 %vm25_vm0, %v158_v47  ;;  %v144_v29 = vmul.f32 %v307_v22, %v129_v50 }
 0x144   :  { %v376_v53 = vpop.eup %375  ;;  %340 = vmatprep.mubr.msk.f32.mxu0 %vm25_vm0, %v155_v51  ;;  %v141_v38 = vmul.f32 %v307_v22, %v126_v52 }
 0x145   :  { %v159_v54 = vadd.f32 %v308_v26, %v144_v29  ;;  %v130_v55 = vmul.f32 %v376_v53, %v464_v49 }
 0x146   :  { %v156_v56 = vadd.f32 %v308_v26, %v141_v38 }
 0x147   :  { %346 = vmatprep.mubr.msk.f32.mxu1 %vm25_vm0, %v159_v54  ;;  %v145_v57 = vmul.f32 %v307_v22, %v130_v55 }
 0x148   :  { %341 = vmatmul.mubr.msk.f32.gmra.mrb[2].mxu0 %vm25_vm0, %v156_v56 }
 0x149   :  { %v160_v39 = vadd.f32 %v308_v26, %v145_v57 }
 0x14b   :  { %347 = vmatmul.mubr.msk.f32.gmra.mrb[2].mxu1 %vm25_vm0, %v160_v39 }
 0x213   :  { %v339_v48 = vpop.f32.mrb[0].mxu0 }
 0x214   :  { %296 = vst.msk [vmem:[%s544_s4 + $0x8] sm:$0xff] %vm294_vm1, %v339_v48  ;;  %v255_v58 = vpop.f32.mrb[1].mxu0 }
 0x215   :  { %295 = vst.msk [vmem:[%s544_s4] sm:$0xff] %vm294_vm1, %v255_v58 }
 0x216   :  { %v345_v49 = vpop.f32.mrb[0].mxu1 }
 0x217   :  { %300 = vst.msk [vmem:[%s544_s4 + $0x28] sm:$0xff] %vm294_vm1, %v345_v49  ;;  %v275_v59 = vpop.f32.mrb[1].mxu1 }
 0x218   :  { %299 = vst.msk [vmem:[%s544_s4 + $0x20] sm:$0xff] %vm294_vm1, %v275_v59 }
 0x21b   :  { %v342_v60 = vpop.f32.mrb[2].mxu0 }
 0x21c   :  { %298 = vst.msk [vmem:[%s544_s4 + $0x18] sm:$0xff] %vm294_vm1, %v342_v60  ;;  %v265_v61 = vpop.f32.mrb[3].mxu0 }
 0x21d   :  { %297 = vst.msk [vmem:[%s544_s4 + $0x10] sm:$0xff] %vm294_vm1, %v265_v61 }
 0x21e   :  { %v348_v62 = vpop.f32.mrb[2].mxu1 }
 0x21f   :  { %302 = vst.msk [vmem:[%s544_s4 + $0x38] sm:$0xff] %vm294_vm1, %v348_v62  ;;  %v285_v63 = vpop.f32.mrb[3].mxu1 }
 0x220   :  { %301 = vst.msk [vmem:[%s544_s4 + $0x30] sm:$0xff] %vm294_vm1, %v285_v63 }

// kernel: _lambda_.98
= control target key start
LH: loop header
LB: loop body
LE: loop exit
PB: predicated region body
PF: predicated region fallthrough
CT: control target
= control target key end

     0   :  { %vm21_vm0 = vcmask 130048   ;;  %v162_v7 = vmov 0.0|0.0   ;;  %vm163_vm1 = vmmov 0   ;;  %v164_v10 = vmov 0.0   ;;  %s219_s0 = inlined_call_operand.vmem [shape: f32[8,16], index: 0, kind: input, shape index: {}]   ;;  %s220_s3 = inlined_call_operand.vmem [shape: f32[16,32], index: 3, kind: input, shape index: {}]   ;;  %s221_s1 = inlined_call_operand.vmem [shape: f32[1,16], index: 1, kind: input, shape index: {}]   ;;  %s222_s2 = inlined_call_operand.vmem [shape: f32[1,16], index: 2, kind: input, shape index: {}]   ;;  %s223_s4 = inlined_call_operand.vmem [shape: f32[1,32], index: 4, kind: input, shape index: {}]   ;;  %s224_s5 = inlined_call_operand.vmem [shape: f32[8,32], index: 5, kind: output, shape index: {}]  }
   0x1   :  { %v20_v0 = vld [vmem:[%s219_s0] sm:$0xff]  ;;  %154 = vmatprep.subr.bf16.mxu0 %v162_v7  ;;  %v53_v9 = vld [vmem:[%s220_s3 + $0x8] sm:$0xff]  ;;  %151 = vmatprep.mubr.msk.f32.mxu0 %vm163_vm1, %v164_v10  ;;  %vm134_vm2 = vcmask 261120  }
   0x2   :  { %v22_v1 = vsel %vm21_vm0, %v20_v0, 0.0  ;;  %v52_v8 = vld [vmem:[%s220_s3] sm:$0xff] }
   0x3   :  { %23 = vadd.xlane.f32.xlu0 %v22_v1  ;;  %v155_v11 = vpack.c.bf16 %v53_v9, %v52_v8  ;;  %v140_v16 = vld [vmem:[%s221_s1] ss:$0 sm:$0xff] }
   0x4   :  { %v141_v18 = vld [vmem:[%s222_s2] ss:$0 sm:$0xff] }
   0x5   :  { %156 = vmatpush3.bf16.msra.mxu0 %v155_v11  ;;  %v142_v21 = vld [vmem:[%s223_s4] ss:$0 sm:$0xff] }
  0x90   :  { %v24_v2 = vpop.xlane.xlu0 %23 }
  0x91   :  { %v26_v3 = vmul.f32 0.0625, %v24_v2 }
  0x93   :  { %v27_v4 = vsub.f32 %v20_v0, %v26_v3 }
  0x95   :  { %v28_v5 = vmul.f32 %v27_v4, %v27_v4 }
  0x97   :  { %v29_v6 = vsel %vm21_vm0, %v28_v5, 0.0 }
  0x98   :  { %30 = vadd.xlane.f32.xlu0 %v29_v6 }
 0x125   :  { %v31_v12 = vpop.xlane.xlu0 %30 }
 0x126   :  { %v32_v13 = vmul.f32 0.0625, %v31_v12 }
 0x128   :  { %v33_v14 = vadd.f32 1e-05, %v32_v13 }
 0x12a   :  { %160 = vrsqrt.f32 %v33_v14 }
 0x134   :  { %v161_v15 = vpop.eup %160 }
 0x135   :  { %v35_v17 = vmul.f32 %v161_v15, %v27_v4 }
 0x137   :  { %v43_v19 = vmul.f32 %v140_v16, %v35_v17 }
 0x139   :  { %v51_v20 = vadd.f32 %v141_v18, %v43_v19 }
 0x13b   :  { %152 = vmatmul.mubr.msk.f32.vlgmr.msra.gmra.mrb[0].mxu0 %vm21_vm0, %v51_v20 }
 0x20e   :  { %v130_v22 = vpop.f32.mrb[0].mxu0 }
 0x20f   :  { %v131_v23 = vadd.f32 %v142_v21, %v130_v22  ;;  %v153_v24 = vpop.f32.mrb[1].mxu0 }
 0x211   :  { %135 = vst.msk [vmem:[%s224_s5] sm:$0xff] %vm134_vm2, %v131_v23 }

// kernel: _lambda_.100
= control target key start
LH: loop header
LB: loop body
LE: loop exit
PB: predicated region body
PF: predicated region fallthrough
CT: control target
= control target key end

     0   :  { %vm29_vm0 = vcmask 261120   ;;  %vm127_vm1 = vcmask 130048   ;;  %s238_s1 = inlined_call_operand.vmem [shape: f32[32,16], index: 1, kind: input, shape index: {}]   ;;  %s239_s0 = inlined_call_operand.vmem [shape: f32[32,32], index: 0, kind: input, shape index: {}]   ;;  %s240_s2 = inlined_call_operand.vmem [shape: f32[1,16], index: 2, kind: input, shape index: {}]   ;;  %s241_s3 = inlined_call_operand.vmem [shape: f32[32,16], index: 3, kind: output, shape index: {}]  }
   0x1   :  { %v18_v0 = vld [vmem:[%s238_s1] sm:$0xff]  ;;  %v19_v1 = vld [vmem:[%s238_s1 + $0x8] sm:$0xff]  ;;  %v20_v2 = vld [vmem:[%s238_s1 + $0x10] sm:$0xff] }
   0x2   :  { %v163_v3 = vpack.c.bf16 %v19_v1, %v18_v0  ;;  %v21_v4 = vld [vmem:[%s238_s1 + $0x18] sm:$0xff]  ;;  %v14_v5 = vld [vmem:[%s239_s0] sm:$0xff]  ;;  %v16_v6 = vld [vmem:[%s239_s0 + $0x10] sm:$0xff] }
   0x3   :  { %v167_v7 = vpack.c.bf16 %v21_v4, %v20_v2  ;;  %157 = vmatprep.mubr.msk.f32.mxu0 %vm29_vm0, %v14_v5  ;;  %160 = vmatprep.mubr.msk.f32.mxu1 %vm29_vm0, %v16_v6  ;;  %v15_v8 = vld [vmem:[%s239_s0 + $0x8] sm:$0xff]  ;;  %v17_v9 = vld [vmem:[%s239_s0 + $0x18] sm:$0xff]  ;;  %v136_v10 = vld [vmem:[%s240_s2] ss:$0 sm:$0xff] }
   0x4   :  { %164 = vmatprep.subr.bf16.mxu0 %v163_v3  ;;  %171 = vmatprep.subr.bf16.mxu1 %v163_v3 }
   0x5   :  { %166 = vmatpush3.bf16.msra.mxu0 %v163_v3  ;;  %173 = vmatpush3.bf16.msra.mxu1 %v163_v3 }
   0x6   :  { %168 = vmatprep.subr.bf16.mxu0 %v167_v7  ;;  %172 = vmatprep.subr.bf16.mxu1 %v167_v7 }
   0x9   :  { %170 = vmatpush3.bf16.msra.mxu0 %v167_v7  ;;  %174 = vmatpush3.bf16.msra.mxu1 %v167_v7 }
   0xc   :  { %158 = vmatmul.mubr.msk.f32.vlgmr.msra.gmra.mrb[0].mxu0 %vm29_vm0, %v15_v8  ;;  %161 = vmatmul.mubr.msk.f32.vlgmr.msra.gmra.mrb[0].mxu1 %vm29_vm0, %v17_v9 }
  0xdf   :  { %v159_v11 = vpop.f32.mrb[0].mxu0  ;;  %v162_v12 = vpop.f32.mrb[0].mxu1 }
  0xe0   :  { %v114_v13 = vadd.f32 %v159_v11, %v136_v10  ;;  %v124_v14 = vadd.f32 %v162_v12, %v136_v10  ;;  %v108_v15 = vpop.f32.mrb[1].mxu0  ;;  %v118_v16 = vpop.f32.mrb[1].mxu1 }
  0xe1   :  { %v109_v17 = vadd.f32 %v136_v10, %v108_v15  ;;  %v119_v18 = vadd.f32 %v136_v10, %v118_v16 }
  0xe2   :  { %129 = vst.msk [vmem:[%s241_s3 + $0x8] sm:$0xff] %vm127_vm1, %v114_v13  ;;  %131 = vst.msk [vmem:[%s241_s3 + $0x18] sm:$0xff] %vm127_vm1, %v124_v14 }
  0xe3   :  { %128 = vst.msk [vmem:[%s241_s3] sm:$0xff] %vm127_vm1, %v109_v17  ;;  %130 = vst.msk [vmem:[%s241_s3 + $0x10] sm:$0xff] %vm127_vm1, %v119_v18 }

// kernel: _lambda_.101
= control target key start
LH: loop header
LB: loop body
LE: loop exit
PB: predicated region body
PF: predicated region fallthrough
CT: control target
= control target key end

     0   :  { %vm24_vm0 = vcmask 130048   ;;  %vm206_vm1 = vcmask 654336   ;;  %s333_s0 = inlined_call_operand.vmem [shape: f32[32,16], index: 0, kind: input, shape index: {}]   ;;  %s334_s3 = inlined_call_operand.vmem [shape: f32[16,80], index: 3, kind: input, shape index: {}]   ;;  %s335_s1 = inlined_call_operand.vmem [shape: f32[1,16], index: 1, kind: input, shape index: {}]   ;;  %s336_s2 = inlined_call_operand.vmem [shape: f32[1,16], index: 2, kind: input, shape index: {}]   ;;  %s337_s4 = inlined_call_operand.vmem [shape: f32[1,80], index: 4, kind: input, shape index: {}]   ;;  %s338_s5 = inlined_call_operand.vmem [shape: f32[32,80], index: 5, kind: output, shape index: {}]  }
   0x1   :  { %v20_v0 = vld [vmem:[%s333_s0] sm:$0xff]  ;;  %v21_v1 = vld [vmem:[%s333_s0 + $0x8] sm:$0xff]  ;;  %v22_v2 = vld [vmem:[%s333_s0 + $0x10] sm:$0xff] }
   0x2   :  { %v25_v3 = vsel %vm24_vm0, %v20_v0, 0.0  ;;  %v28_v4 = vsel %vm24_vm0, %v21_v1, 0.0  ;;  %v23_v5 = vld [vmem:[%s333_s0 + $0x18] sm:$0xff]  ;;  %v31_v6 = vsel %vm24_vm0, %v22_v2, 0.0  ;;  %v100_v28 = vld [vmem:[%s334_s3] sm:$0xff]  ;;  %v101_v29 = vld [vmem:[%s334_s3 + $0x8] sm:$0xff] }
   0x3   :  { %26 = vadd.xlane.f32.xlu0 %v25_v3  ;;  %29 = vadd.xlane.f32.xlu1 %v28_v4  ;;  %v34_v7 = vsel %vm24_vm0, %v23_v5, 0.0  ;;  %v238_v30 = vpack.c.bf16 %v101_v29, %v100_v28  ;;  %v215_v44 = vld [vmem:[%s335_s1] ss:$0 sm:$0xff] }
   0x4   :  { %v216_v46 = vld [vmem:[%s336_s2] ss:$0 sm:$0xff] }
   0x5   :  { %239 = vmatprep.subr.bf16.mxu0 %v238_v30  ;;  %242 = vmatprep.subr.bf16.mxu1 %v238_v30  ;;  %v217_v61 = vld [vmem:[%s337_s4] ss:$0 sm:$0xff] }
   0x6   :  { %241 = vmatpush3.bf16.msra.mxu0 %v238_v30  ;;  %243 = vmatpush3.bf16.msra.mxu1 %v238_v30 }
   0x7   :  { %32 = vadd.xlane.f32.xlu0 %v31_v6  ;;  %35 = vadd.xlane.f32.xlu1 %v34_v7 }
  0x90   :  { %v27_v8 = vpop.xlane.xlu0 %26  ;;  %v30_v9 = vpop.xlane.xlu1 %29 }
  0x91   :  { %v38_v10 = vmul.f32 0.0625, %v27_v8  ;;  %v39_v11 = vmul.f32 0.0625, %v30_v9 }
  0x93   :  { %v42_v12 = vsub.f32 %v20_v0, %v38_v10  ;;  %v43_v13 = vsub.f32 %v21_v1, %v39_v11 }
  0x94   :  { %v33_v14 = vpop.xlane.xlu0 %32  ;;  %v36_v15 = vpop.xlane.xlu1 %35 }
  0x95   :  { %v40_v16 = vmul.f32 0.0625, %v33_v14  ;;  %v41_v17 = vmul.f32 0.0625, %v36_v15  ;;  %v46_v18 = vmul.f32 %v42_v12, %v42_v12  ;;  %v47_v19 = vmul.f32 %v43_v13, %v43_v13 }
  0x97   :  { %v44_v20 = vsub.f32 %v22_v2, %v40_v16  ;;  %v45_v21 = vsub.f32 %v23_v5, %v41_v17  ;;  %v50_v22 = vsel %vm24_vm0, %v46_v18, 0.0  ;;  %v53_v23 = vsel %vm24_vm0, %v47_v19, 0.0 }
  0x98   :  { %51 = vadd.xlane.f32.xlu0 %v50_v22 }
  0x99   :  { %v48_v24 = vmul.f32 %v44_v20, %v44_v20  ;;  %v49_v25 = vmul.f32 %v45_v21, %v45_v21 }
  0x9b   :  { %v56_v26 = vsel %vm24_vm0, %v48_v24, 0.0  ;;  %v59_v27 = vsel %vm24_vm0, %v49_v25, 0.0 }
  0x9c   :  { %54 = vadd.xlane.f32.xlu0 %v53_v23  ;;  %57 = vadd.xlane.f32.xlu1 %v56_v26 }
  0xa0   :  { %60 = vadd.xlane.f32.xlu1 %v59_v27 }
 0x125   :  { %v52_v31 = vpop.xlane.xlu0 %51 }
 0x126   :  { %v62_v32 = vmul.f32 0.0625, %v52_v31 }
 0x128   :  { %v66_v33 = vadd.f32 1e-05, %v62_v32 }
 0x129   :  { %v58_v34 = vpop.xlane.xlu1 %57  ;;  %v55_v35 = vpop.xlane.xlu0 %54 }
 0x12a   :  { %244 = vrsqrt.f32 %v66_v33  ;;  %v64_v36 = vmul.f32 0.0625, %v58_v34  ;;  %v63_v37 = vmul.f32 0.0625, %v55_v35 }
 0x12c   :  { %v68_v38 = vadd.f32 1e-05, %v64_v36  ;;  %v67_v39 = vadd.f32 1e-05, %v63_v37 }
 0x12d   :  { %v61_v40 = vpop.xlane.xlu1 %60 }
 0x12e   :  { %246 = vrsqrt.f32 %v68_v38  ;;  %v65_v41 = vmul.f32 0.0625, %v61_v40 }
 0x12f   :  { %248 = vrsqrt.f32 %v67_v39 }
 0x130   :  { %v69_v42 = vadd.f32 1e-05, %v65_v41 }
 0x132   :  { %250 = vrsqrt.f32 %v69_v42 }
 0x134   :  { %v245_v43 = vpop.eup %244 }
 0x135   :  { %v74_v45 = vmul.f32 %v245_v43, %v42_v12 }
 0x137   :  { %v85_v47 = vmul.f32 %v215_v44, %v74_v45 }
 0x138   :  { %v247_v48 = vpop.eup %246 }
 0x139   :  { %v249_v49 = vpop.eup %248  ;;  %v96_v50 = vadd.f32 %v216_v46, %v85_v47  ;;  %v76_v51 = vmul.f32 %v247_v48, %v44_v20 }
 0x13a   :  { %v75_v52 = vmul.f32 %v249_v49, %v43_v13 }
 0x13b   :  { %232 = vmatprep.mubr.msk.f32.mxu0 %vm24_vm0, %v96_v50  ;;  %v87_v53 = vmul.f32 %v215_v44, %v76_v51 }
 0x13c   :  { %v251_v54 = vpop.eup %250  ;;  %v86_v55 = vmul.f32 %v215_v44, %v75_v52 }
 0x13d   :  { %v98_v56 = vadd.f32 %v216_v46, %v87_v53  ;;  %v77_v57 = vmul.f32 %v251_v54, %v45_v21 }
 0x13e   :  { %v97_v58 = vadd.f32 %v216_v46, %v86_v55 }
 0x13f   :  { %235 = vmatprep.mubr.msk.f32.mxu1 %vm24_vm0, %v98_v56  ;;  %v88_v59 = vmul.f32 %v215_v44, %v77_v57 }
 0x140   :  { %233 = vmatmul.mubr.msk.f32.vlgmr.msra.gmra.mrb[0].mxu0 %vm24_vm0, %v97_v58 }
 0x141   :  { %v99_v60 = vadd.f32 %v216_v46, %v88_v59 }
 0x143   :  { %236 = vmatmul.mubr.msk.f32.vlgmr.msra.gmra.mrb[0].mxu1 %vm24_vm0, %v99_v60 }
 0x213   :  { %v234_v62 = vpop.f32.mrb[0].mxu0 }
 0x214   :  { %v193_v63 = vadd.f32 %v234_v62, %v217_v61  ;;  %v187_v0 = vpop.f32.mrb[1].mxu0 }
 0x215   :  { %v188_v1 = vadd.f32 %v217_v61, %v187_v0 }
 0x216   :  { %208 = vst.msk [vmem:[%s338_s5 + $0x8] sm:$0xff] %vm206_vm1, %v193_v63  ;;  %v237_v2 = vpop.f32.mrb[0].mxu1 }
 0x217   :  { %207 = vst.msk [vmem:[%s338_s5] sm:$0xff] %vm206_vm1, %v188_v1  ;;  %v203_v3 = vadd.f32 %v237_v2, %v217_v61  ;;  %v197_v4 = vpop.f32.mrb[1].mxu1 }
 0x218   :  { %v198_v5 = vadd.f32 %v217_v61, %v197_v4 }
 0x219   :  { %210 = vst.msk [vmem:[%s338_s5 + $0x18] sm:$0xff] %vm206_vm1, %v203_v3 }
 0x21a   :  { %209 = vst.msk [vmem:[%s338_s5 + $0x10] sm:$0xff] %vm206_vm1, %v198_v5 }

// kernel: _lambda_.104
= control target key start
LH: loop header
LB: loop body
LE: loop exit
PB: predicated region body
PF: predicated region fallthrough
CT: control target
= control target key end

     0   :  { %vm33_vm0 = vcmask 523264   ;;  %vm131_vm1 = vcmask 130048   ;;  %s278_s1 = inlined_call_operand.vmem [shape: f32[64,16], index: 1, kind: input, shape index: {}]   ;;  %s279_s0 = inlined_call_operand.vmem [shape: f32[32,64], index: 0, kind: input, shape index: {}]   ;;  %s280_s2 = inlined_call_operand.vmem [shape: f32[1,16], index: 2, kind: input, shape index: {}]   ;;  %s281_s3 = inlined_call_operand.vmem [shape: f32[32,16], index: 3, kind: output, shape index: {}]  }
   0x1   :  { %v18_v0 = vld [vmem:[%s278_s1] sm:$0xff]  ;;  %v19_v1 = vld [vmem:[%s278_s1 + $0x8] sm:$0xff]  ;;  %v20_v2 = vld [vmem:[%s278_s1 + $0x10] sm:$0xff] }
   0x2   :  { %v179_v3 = vpack.c.bf16 %v19_v1, %v18_v0  ;;  %v21_v4 = vld [vmem:[%s278_s1 + $0x18] sm:$0xff]  ;;  %v22_v6 = vld [vmem:[%s278_s1 + $0x20] sm:$0xff]  ;;  %v23_v7 = vld [vmem:[%s278_s1 + $0x28] sm:$0xff] }
   0x3   :  { %v183_v5 = vpack.c.bf16 %v21_v4, %v20_v2  ;;  %v14_v8 = vld [vmem:[%s279_s0] sm:$0xff]  ;;  %v16_v9 = vld [vmem:[%s279_s0 + $0x10] sm:$0xff]  ;;  %v187_v10 = vpack.c.bf16 %v23_v7, %v22_v6  ;;  %v25_v12 = vld [vmem:[%s278_s1 + $0x38] sm:$0xff] }
   0x4   :  { %180 = vmatprep.subr.bf16.mxu0 %v179_v3  ;;  %195 = vmatprep.subr.bf16.mxu1 %v179_v3  ;;  %v24_v11 = vld [vmem:[%s278_s1 + $0x30] sm:$0xff]  ;;  %v15_v14 = vld [vmem:[%s279_s0 + $0x8] sm:$0xff]  ;;  %v17_v15 = vld [vmem:[%s279_s0 + $0x18] sm:$0xff] }
   0x5   :  { %182 = vmatpush3.bf16.msra.mxu0 %v179_v3  ;;  %199 = vmatpush3.bf16.msra.mxu1 %v179_v3  ;;  %v191_v13 = vpack.c.bf16 %v25_v12, %v24_v11  ;;  %v140_v16 = vld [vmem:[%s280_s2] ss:$0 sm:$0xff] }
   0x6   :  { %184 = vmatprep.subr.bf16.mxu0 %v183_v5  ;;  %196 = vmatprep.subr.bf16.mxu1 %v183_v5 }
   0x7   :  { %173 = vmatprep.mubr.msk.f32.mxu0 %vm33_vm0, %v14_v8  ;;  %176 = vmatprep.mubr.msk.f32.mxu1 %vm33_vm0, %v16_v9 }
   0x9   :  { %186 = vmatpush3.bf16.msra.mxu0 %v183_v5  ;;  %200 = vmatpush3.bf16.msra.mxu1 %v183_v5 }
   0xa   :  { %188 = vmatprep.subr.bf16.mxu0 %v187_v10  ;;  %197 = vmatprep.subr.bf16.mxu1 %v187_v10 }
   0xd   :  { %190 = vmatpush3.bf16.msra.mxu0 %v187_v10  ;;  %201 = vmatpush3.bf16.msra.mxu1 %v187_v10 }
   0xe   :  { %192 = vmatprep.subr.bf16.mxu0 %v191_v13  ;;  %198 = vmatprep.subr.bf16.mxu1 %v191_v13 }
  0x11   :  { %194 = vmatpush3.bf16.msra.mxu0 %v191_v13  ;;  %202 = vmatpush3.bf16.msra.mxu1 %v191_v13 }
  0x14   :  { %174 = vmatmul.mubr.msk.f32.vlgmr.msra.gmra.mrb[0].mxu0 %vm33_vm0, %v15_v14  ;;  %177 = vmatmul.mubr.msk.f32.vlgmr.msra.gmra.mrb[0].mxu1 %vm33_vm0, %v17_v15 }
  0xe7   :  { %v175_v17 = vpop.f32.mrb[0].mxu0  ;;  %v178_v18 = vpop.f32.mrb[0].mxu1 }
  0xe8   :  { %v118_v19 = vadd.f32 %v175_v17, %v140_v16  ;;  %v128_v20 = vadd.f32 %v178_v18, %v140_v16  ;;  %v112_v21 = vpop.f32.mrb[1].mxu0  ;;  %v122_v22 = vpop.f32.mrb[1].mxu1 }
  0xe9   :  { %v113_v23 = vadd.f32 %v140_v16, %v112_v21  ;;  %v123_v24 = vadd.f32 %v140_v16, %v122_v22 }
  0xea   :  { %133 = vst.msk [vmem:[%s281_s3 + $0x8] sm:$0xff] %vm131_vm1, %v118_v19  ;;  %135 = vst.msk [vmem:[%s281_s3 + $0x18] sm:$0xff] %vm131_vm1, %v128_v20 }
  0xeb   :  { %132 = vst.msk [vmem:[%s281_s3] sm:$0xff] %vm131_vm1, %v113_v23  ;;  %134 = vst.msk [vmem:[%s281_s3 + $0x10] sm:$0xff] %vm131_vm1, %v123_v24 }

// kernel: _lambda_.105
= control target key start
LH: loop header
LB: loop body
LE: loop exit
PB: predicated region body
PF: predicated region fallthrough
CT: control target
= control target key end

     0   :  { %vm24_vm0 = vcmask 130048   ;;  %vm206_vm1 = vcmask 64512   ;;  %s333_s0 = inlined_call_operand.vmem [shape: f32[32,16], index: 0, kind: input, shape index: {}]   ;;  %s334_s3 = inlined_call_operand.vmem [shape: f32[16,8], index: 3, kind: input, shape index: {}]   ;;  %s335_s1 = inlined_call_operand.vmem [shape: f32[1,16], index: 1, kind: input, shape index: {}]   ;;  %s336_s2 = inlined_call_operand.vmem [shape: f32[1,16], index: 2, kind: input, shape index: {}]   ;;  %s337_s4 = inlined_call_operand.vmem [shape: f32[1,8], index: 4, kind: input, shape index: {}]   ;;  %s338_s5 = inlined_call_operand.vmem [shape: f32[32,8], index: 5, kind: output, shape index: {}]  }
   0x1   :  { %v20_v0 = vld [vmem:[%s333_s0] sm:$0xff]  ;;  %v21_v1 = vld [vmem:[%s333_s0 + $0x8] sm:$0xff]  ;;  %v22_v2 = vld [vmem:[%s333_s0 + $0x10] sm:$0xff] }
   0x2   :  { %v25_v3 = vsel %vm24_vm0, %v20_v0, 0.0  ;;  %v28_v4 = vsel %vm24_vm0, %v21_v1, 0.0  ;;  %v23_v5 = vld [vmem:[%s333_s0 + $0x18] sm:$0xff]  ;;  %v31_v6 = vsel %vm24_vm0, %v22_v2, 0.0  ;;  %v100_v28 = vld [vmem:[%s334_s3] sm:$0xff]  ;;  %v101_v29 = vld [vmem:[%s334_s3 + $0x8] sm:$0xff] }
   0x3   :  { %26 = vadd.xlane.f32.xlu0 %v25_v3  ;;  %29 = vadd.xlane.f32.xlu1 %v28_v4  ;;  %v34_v7 = vsel %vm24_vm0, %v23_v5, 0.0  ;;  %v238_v30 = vpack.c.bf16 %v101_v29, %v100_v28  ;;  %v215_v44 = vld [vmem:[%s335_s1] ss:$0 sm:$0xff] }
   0x4   :  { %v216_v46 = vld [vmem:[%s336_s2] ss:$0 sm:$0xff] }
   0x5   :  { %239 = vmatprep.subr.bf16.mxu0 %v238_v30  ;;  %242 = vmatprep.subr.bf16.mxu1 %v238_v30  ;;  %v217_v61 = vld [vmem:[%s337_s4] ss:$0 sm:$0xff] }
   0x6   :  { %241 = vmatpush3.bf16.msra.mxu0 %v238_v30  ;;  %243 = vmatpush3.bf16.msra.mxu1 %v238_v30 }
   0x7   :  { %32 = vadd.xlane.f32.xlu0 %v31_v6  ;;  %35 = vadd.xlane.f32.xlu1 %v34_v7 }
  0x90   :  { %v27_v8 = vpop.xlane.xlu0 %26  ;;  %v30_v9 = vpop.xlane.xlu1 %29 }
  0x91   :  { %v38_v10 = vmul.f32 0.0625, %v27_v8  ;;  %v39_v11 = vmul.f32 0.0625, %v30_v9 }
  0x93   :  { %v42_v12 = vsub.f32 %v20_v0, %v38_v10  ;;  %v43_v13 = vsub.f32 %v21_v1, %v39_v11 }
  0x94   :  { %v33_v14 = vpop.xlane.xlu0 %32  ;;  %v36_v15 = vpop.xlane.xlu1 %35 }
  0x95   :  { %v40_v16 = vmul.f32 0.0625, %v33_v14  ;;  %v41_v17 = vmul.f32 0.0625, %v36_v15  ;;  %v46_v18 = vmul.f32 %v42_v12, %v42_v12  ;;  %v47_v19 = vmul.f32 %v43_v13, %v43_v13 }
  0x97   :  { %v44_v20 = vsub.f32 %v22_v2, %v40_v16  ;;  %v45_v21 = vsub.f32 %v23_v5, %v41_v17  ;;  %v50_v22 = vsel %vm24_vm0, %v46_v18, 0.0  ;;  %v53_v23 = vsel %vm24_vm0, %v47_v19, 0.0 }
  0x98   :  { %51 = vadd.xlane.f32.xlu0 %v50_v22 }
  0x99   :  { %v48_v24 = vmul.f32 %v44_v20, %v44_v20  ;;  %v49_v25 = vmul.f32 %v45_v21, %v45_v21 }
  0x9b   :  { %v56_v26 = vsel %vm24_vm0, %v48_v24, 0.0  ;;  %v59_v27 = vsel %vm24_vm0, %v49_v25, 0.0 }
  0x9c   :  { %54 = vadd.xlane.f32.xlu0 %v53_v23  ;;  %57 = vadd.xlane.f32.xlu1 %v56_v26 }
  0xa0   :  { %60 = vadd.xlane.f32.xlu1 %v59_v27 }
 0x125   :  { %v52_v31 = vpop.xlane.xlu0 %51 }
 0x126   :  { %v62_v32 = vmul.f32 0.0625, %v52_v31 }
 0x128   :  { %v66_v33 = vadd.f32 1e-05, %v62_v32 }
 0x129   :  { %v58_v34 = vpop.xlane.xlu1 %57  ;;  %v55_v35 = vpop.xlane.xlu0 %54 }
 0x12a   :  { %244 = vrsqrt.f32 %v66_v33  ;;  %v64_v36 = vmul.f32 0.0625, %v58_v34  ;;  %v63_v37 = vmul.f32 0.0625, %v55_v35 }
 0x12c   :  { %v68_v38 = vadd.f32 1e-05, %v64_v36  ;;  %v67_v39 = vadd.f32 1e-05, %v63_v37 }
 0x12d   :  { %v61_v40 = vpop.xlane.xlu1 %60 }
 0x12e   :  { %246 = vrsqrt.f32 %v68_v38  ;;  %v65_v41 = vmul.f32 0.0625, %v61_v40 }
 0x12f   :  { %248 = vrsqrt.f32 %v67_v39 }
 0x130   :  { %v69_v42 = vadd.f32 1e-05, %v65_v41 }
 0x132   :  { %250 = vrsqrt.f32 %v69_v42 }
 0x134   :  { %v245_v43 = vpop.eup %244 }
 0x135   :  { %v74_v45 = vmul.f32 %v245_v43, %v42_v12 }
 0x137   :  { %v85_v47 = vmul.f32 %v215_v44, %v74_v45 }
 0x138   :  { %v247_v48 = vpop.eup %246 }
 0x139   :  { %v249_v49 = vpop.eup %248  ;;  %v96_v50 = vadd.f32 %v216_v46, %v85_v47  ;;  %v76_v51 = vmul.f32 %v247_v48, %v44_v20 }
 0x13a   :  { %v75_v52 = vmul.f32 %v249_v49, %v43_v13 }
 0x13b   :  { %232 = vmatprep.mubr.msk.f32.mxu0 %vm24_vm0, %v96_v50  ;;  %v87_v53 = vmul.f32 %v215_v44, %v76_v51 }
 0x13c   :  { %v251_v54 = vpop.eup %250  ;;  %v86_v55 = vmul.f32 %v215_v44, %v75_v52 }
 0x13d   :  { %v98_v56 = vadd.f32 %v216_v46, %v87_v53  ;;  %v77_v57 = vmul.f32 %v251_v54, %v45_v21 }
 0x13e   :  { %v97_v58 = vadd.f32 %v216_v46, %v86_v55 }
 0x13f   :  { %235 = vmatprep.mubr.msk.f32.mxu1 %vm24_vm0, %v98_v56  ;;  %v88_v59 = vmul.f32 %v215_v44, %v77_v57 }
 0x140   :  { %233 = vmatmul.mubr.msk.f32.vlgmr.msra.gmra.mrb[0].mxu0 %vm24_vm0, %v97_v58 }
 0x141   :  { %v99_v60 = vadd.f32 %v216_v46, %v88_v59 }
 0x143   :  { %236 = vmatmul.mubr.msk.f32.vlgmr.msra.gmra.mrb[0].mxu1 %vm24_vm0, %v99_v60 }
 0x213   :  { %v234_v62 = vpop.f32.mrb[0].mxu0 }
 0x214   :  { %v193_v63 = vadd.f32 %v234_v62, %v217_v61  ;;  %v187_v0 = vpop.f32.mrb[1].mxu0 }
 0x215   :  { %v188_v1 = vadd.f32 %v217_v61, %v187_v0 }
 0x216   :  { %208 = vst.msk [vmem:[%s338_s5 + $0x8] sm:$0xff] %vm206_vm1, %v193_v63  ;;  %v237_v2 = vpop.f32.mrb[0].mxu1 }
 0x217   :  { %207 = vst.msk [vmem:[%s338_s5] sm:$0xff] %vm206_vm1, %v188_v1  ;;  %v203_v3 = vadd.f32 %v237_v2, %v217_v61  ;;  %v197_v4 = vpop.f32.mrb[1].mxu1 }
 0x218   :  { %v198_v5 = vadd.f32 %v217_v61, %v197_v4 }
 0x219   :  { %210 = vst.msk [vmem:[%s338_s5 + $0x18] sm:$0xff] %vm206_vm1, %v203_v3 }
 0x21a   :  { %209 = vst.msk [vmem:[%s338_s5 + $0x10] sm:$0xff] %vm206_vm1, %v198_v5 }

// kernel: _lambda_.103
= control target key start
LH: loop header
LB: loop body
LE: loop exit
PB: predicated region body
PF: predicated region fallthrough
CT: control target
= control target key end

     0   :  { %vm24_vm0 = vcmask 130048   ;;  %vm206_vm1 = vcmask 523264   ;;  %s333_s0 = inlined_call_operand.vmem [shape: f32[32,16], index: 0, kind: input, shape index: {}]   ;;  %s334_s3 = inlined_call_operand.vmem [shape: f32[16,64], index: 3, kind: input, shape index: {}]   ;;  %s335_s1 = inlined_call_operand.vmem [shape: f32[1,16], index: 1, kind: input, shape index: {}]   ;;  %s336_s2 = inlined_call_operand.vmem [shape: f32[1,16], index: 2, kind: input, shape index: {}]   ;;  %s337_s4 = inlined_call_operand.vmem [shape: f32[1,64], index: 4, kind: input, shape index: {}]   ;;  %s338_s5 = inlined_call_operand.vmem [shape: f32[32,64], index: 5, kind: output, shape index: {}]  }
   0x1   :  { %v20_v0 = vld [vmem:[%s333_s0] sm:$0xff]  ;;  %v21_v1 = vld [vmem:[%s333_s0 + $0x8] sm:$0xff]  ;;  %v22_v2 = vld [vmem:[%s333_s0 + $0x10] sm:$0xff] }
   0x2   :  { %v25_v3 = vsel %vm24_vm0, %v20_v0, 0.0  ;;  %v28_v4 = vsel %vm24_vm0, %v21_v1, 0.0  ;;  %v23_v5 = vld [vmem:[%s333_s0 + $0x18] sm:$0xff]  ;;  %v31_v6 = vsel %vm24_vm0, %v22_v2, 0.0  ;;  %v100_v28 = vld [vmem:[%s334_s3] sm:$0xff]  ;;  %v101_v29 = vld [vmem:[%s334_s3 + $0x8] sm:$0xff] }
   0x3   :  { %26 = vadd.xlane.f32.xlu0 %v25_v3  ;;  %29 = vadd.xlane.f32.xlu1 %v28_v4  ;;  %v34_v7 = vsel %vm24_vm0, %v23_v5, 0.0  ;;  %v238_v30 = vpack.c.bf16 %v101_v29, %v100_v28  ;;  %v215_v44 = vld [vmem:[%s335_s1] ss:$0 sm:$0xff] }
   0x4   :  { %v216_v46 = vld [vmem:[%s336_s2] ss:$0 sm:$0xff] }
   0x5   :  { %239 = vmatprep.subr.bf16.mxu0 %v238_v30  ;;  %242 = vmatprep.subr.bf16.mxu1 %v238_v30  ;;  %v217_v61 = vld [vmem:[%s337_s4] ss:$0 sm:$0xff] }
   0x6   :  { %241 = vmatpush3.bf16.msra.mxu0 %v238_v30  ;;  %243 = vmatpush3.bf16.msra.mxu1 %v238_v30 }
   0x7   :  { %32 = vadd.xlane.f32.xlu0 %v31_v6  ;;  %35 = vadd.xlane.f32.xlu1 %v34_v7 }
  0x90   :  { %v27_v8 = vpop.xlane.xlu0 %26  ;;  %v30_v9 = vpop.xlane.xlu1 %29 }
  0x91   :  { %v38_v10 = vmul.f32 0.0625, %v27_v8  ;;  %v39_v11 = vmul.f32 0.0625, %v30_v9 }
  0x93   :  { %v42_v12 = vsub.f32 %v20_v0, %v38_v10  ;;  %v43_v13 = vsub.f32 %v21_v1, %v39_v11 }
  0x94   :  { %v33_v14 = vpop.xlane.xlu0 %32  ;;  %v36_v15 = vpop.xlane.xlu1 %35 }
  0x95   :  { %v40_v16 = vmul.f32 0.0625, %v33_v14  ;;  %v41_v17 = vmul.f32 0.0625, %v36_v15  ;;  %v46_v18 = vmul.f32 %v42_v12, %v42_v12  ;;  %v47_v19 = vmul.f32 %v43_v13, %v43_v13 }
  0x97   :  { %v44_v20 = vsub.f32 %v22_v2, %v40_v16  ;;  %v45_v21 = vsub.f32 %v23_v5, %v41_v17  ;;  %v50_v22 = vsel %vm24_vm0, %v46_v18, 0.0  ;;  %v53_v23 = vsel %vm24_vm0, %v47_v19, 0.0 }
  0x98   :  { %51 = vadd.xlane.f32.xlu0 %v50_v22 }
  0x99   :  { %v48_v24 = vmul.f32 %v44_v20, %v44_v20  ;;  %v49_v25 = vmul.f32 %v45_v21, %v45_v21 }
  0x9b   :  { %v56_v26 = vsel %vm24_vm0, %v48_v24, 0.0  ;;  %v59_v27 = vsel %vm24_vm0, %v49_v25, 0.0 }
  0x9c   :  { %54 = vadd.xlane.f32.xlu0 %v53_v23  ;;  %57 = vadd.xlane.f32.xlu1 %v56_v26 }
  0xa0   :  { %60 = vadd.xlane.f32.xlu1 %v59_v27 }
 0x125   :  { %v52_v31 = vpop.xlane.xlu0 %51 }
 0x126   :  { %v62_v32 = vmul.f32 0.0625, %v52_v31 }
 0x128   :  { %v66_v33 = vadd.f32 1e-05, %v62_v32 }
 0x129   :  { %v58_v34 = vpop.xlane.xlu1 %57  ;;  %v55_v35 = vpop.xlane.xlu0 %54 }
 0x12a   :  { %244 = vrsqrt.f32 %v66_v33  ;;  %v64_v36 = vmul.f32 0.0625, %v58_v34  ;;  %v63_v37 = vmul.f32 0.0625, %v55_v35 }
 0x12c   :  { %v68_v38 = vadd.f32 1e-05, %v64_v36  ;;  %v67_v39 = vadd.f32 1e-05, %v63_v37 }
 0x12d   :  { %v61_v40 = vpop.xlane.xlu1 %60 }
 0x12e   :  { %246 = vrsqrt.f32 %v68_v38  ;;  %v65_v41 = vmul.f32 0.0625, %v61_v40 }
 0x12f   :  { %248 = vrsqrt.f32 %v67_v39 }
 0x130   :  { %v69_v42 = vadd.f32 1e-05, %v65_v41 }
 0x132   :  { %250 = vrsqrt.f32 %v69_v42 }
 0x134   :  { %v245_v43 = vpop.eup %244 }
 0x135   :  { %v74_v45 = vmul.f32 %v245_v43, %v42_v12 }
 0x137   :  { %v85_v47 = vmul.f32 %v215_v44, %v74_v45 }
 0x138   :  { %v247_v48 = vpop.eup %246 }
 0x139   :  { %v249_v49 = vpop.eup %248  ;;  %v96_v50 = vadd.f32 %v216_v46, %v85_v47  ;;  %v76_v51 = vmul.f32 %v247_v48, %v44_v20 }
 0x13a   :  { %v75_v52 = vmul.f32 %v249_v49, %v43_v13 }
 0x13b   :  { %232 = vmatprep.mubr.msk.f32.mxu0 %vm24_vm0, %v96_v50  ;;  %v87_v53 = vmul.f32 %v215_v44, %v76_v51 }
 0x13c   :  { %v251_v54 = vpop.eup %250  ;;  %v86_v55 = vmul.f32 %v215_v44, %v75_v52 }
 0x13d   :  { %v98_v56 = vadd.f32 %v216_v46, %v87_v53  ;;  %v77_v57 = vmul.f32 %v251_v54, %v45_v21 }
 0x13e   :  { %v97_v58 = vadd.f32 %v216_v46, %v86_v55 }
 0x13f   :  { %235 = vmatprep.mubr.msk.f32.mxu1 %vm24_vm0, %v98_v56  ;;  %v88_v59 = vmul.f32 %v215_v44, %v77_v57 }
 0x140   :  { %233 = vmatmul.mubr.msk.f32.vlgmr.msra.gmra.mrb[0].mxu0 %vm24_vm0, %v97_v58 }
 0x141   :  { %v99_v60 = vadd.f32 %v216_v46, %v88_v59 }
 0x143   :  { %236 = vmatmul.mubr.msk.f32.vlgmr.msra.gmra.mrb[0].mxu1 %vm24_vm0, %v99_v60 }
 0x213   :  { %v234_v62 = vpop.f32.mrb[0].mxu0 }
 0x214   :  { %v193_v63 = vadd.f32 %v234_v62, %v217_v61  ;;  %v187_v0 = vpop.f32.mrb[1].mxu0 }
 0x215   :  { %v188_v1 = vadd.f32 %v217_v61, %v187_v0 }
 0x216   :  { %208 = vst.msk [vmem:[%s338_s5 + $0x8] sm:$0xff] %vm206_vm1, %v193_v63  ;;  %v237_v2 = vpop.f32.mrb[0].mxu1 }
 0x217   :  { %207 = vst.msk [vmem:[%s338_s5] sm:$0xff] %vm206_vm1, %v188_v1  ;;  %v203_v3 = vadd.f32 %v237_v2, %v217_v61  ;;  %v197_v4 = vpop.f32.mrb[1].mxu1 }
 0x218   :  { %v198_v5 = vadd.f32 %v217_v61, %v197_v4 }
 0x219   :  { %210 = vst.msk [vmem:[%s338_s5 + $0x18] sm:$0xff] %vm206_vm1, %v203_v3 }
 0x21a   :  { %209 = vst.msk [vmem:[%s338_s5 + $0x10] sm:$0xff] %vm206_vm1, %v198_v5 }

// kernel: _lambda_.106
= control target key start
LH: loop header
LB: loop body
LE: loop exit
PB: predicated region body
PF: predicated region fallthrough
CT: control target
= control target key end

     0   :  { %vm31_vm0 = vcmask 130048   ;;  %vm161_vm1 = vcmask 261120   ;;  %s308_s1 = inlined_call_operand.vmem [shape: f32[16,32], index: 1, kind: input, shape index: {}]   ;;  %s309_s0 = inlined_call_operand.vmem [shape: f32[64,16], index: 0, kind: input, shape index: {}]   ;;  %s310_s2 = inlined_call_operand.vmem [shape: f32[1,32], index: 2, kind: input, shape index: {}]   ;;  %s311_s3 = inlined_call_operand.vmem [shape: f32[64,32], index: 3, kind: output, shape index: {}]  }
   0x1   :  { %v22_v0 = vld [vmem:[%s308_s1] sm:$0xff]  ;;  %v23_v1 = vld [vmem:[%s308_s1 + $0x8] sm:$0xff]  ;;  %v16_v7 = vld [vmem:[%s309_s0 + $0x10] sm:$0xff] }
   0x2   :  { %v14_v2 = vld [vmem:[%s309_s0] sm:$0xff]  ;;  %v209_v3 = vpack.c.bf16 %v23_v1, %v22_v0  ;;  %v15_v5 = vld [vmem:[%s309_s0 + $0x8] sm:$0xff]  ;;  %v20_v8 = vld [vmem:[%s309_s0 + $0x30] sm:$0xff] }
   0x3   :  { %197 = vmatprep.mubr.msk.f32.mxu0 %vm31_vm0, %v14_v2  ;;  %v18_v4 = vld [vmem:[%s309_s0 + $0x20] sm:$0xff]  ;;  %v19_v6 = vld [vmem:[%s309_s0 + $0x28] sm:$0xff]  ;;  %v17_v9 = vld [vmem:[%s309_s0 + $0x18] sm:$0xff] }
   0x4   :  { %203 = vmatprep.mubr.msk.f32.mxu1 %vm31_vm0, %v18_v4  ;;  %210 = vmatprep.subr.bf16.mxu0 %v209_v3  ;;  %v21_v10 = vld [vmem:[%s309_s0 + $0x38] sm:$0xff]  ;;  %v174_v11 = vld [vmem:[%s310_s2] ss:$0 sm:$0xff] }
   0x5   :  { %213 = vmatprep.subr.bf16.mxu1 %v209_v3  ;;  %212 = vmatpush3.bf16.msra.mxu0 %v209_v3 }
   0x6   :  { %214 = vmatpush3.bf16.msra.mxu1 %v209_v3 }
   0x8   :  { %198 = vmatmul.mubr.msk.f32.vlgmr.msra.gmra.mrb[0].mxu0 %vm31_vm0, %v15_v5 }
   0x9   :  { %204 = vmatmul.mubr.msk.f32.vlgmr.msra.gmra.mrb[0].mxu1 %vm31_vm0, %v19_v6  ;;  %200 = vmatprep.mubr.msk.f32.mxu0 %vm31_vm0, %v16_v7 }
   0xa   :  { %206 = vmatprep.mubr.msk.f32.mxu1 %vm31_vm0, %v20_v8 }
   0xc   :  { %201 = vmatmul.mubr.msk.f32.gmra.mrb[2].mxu0 %vm31_vm0, %v17_v9 }
   0xd   :  { %207 = vmatmul.mubr.msk.f32.gmra.mrb[2].mxu1 %vm31_vm0, %v21_v10 }
  0xdb   :  { %v199_v12 = vpop.f32.mrb[0].mxu0 }
  0xdc   :  { %v205_v13 = vpop.f32.mrb[0].mxu1  ;;  %v128_v14 = vadd.f32 %v199_v12, %v174_v11  ;;  %v122_v16 = vpop.f32.mrb[1].mxu0 }
  0xdd   :  { %v148_v15 = vadd.f32 %v205_v13, %v174_v11  ;;  %v142_v17 = vpop.f32.mrb[1].mxu1  ;;  %v123_v18 = vadd.f32 %v174_v11, %v122_v16 }
  0xde   :  { %v143_v19 = vadd.f32 %v174_v11, %v142_v17  ;;  %163 = vst.msk [vmem:[%s311_s3 + $0x8] sm:$0xff] %vm161_vm1, %v128_v14 }
  0xdf   :  { %167 = vst.msk [vmem:[%s311_s3 + $0x28] sm:$0xff] %vm161_vm1, %v148_v15  ;;  %162 = vst.msk [vmem:[%s311_s3] sm:$0xff] %vm161_vm1, %v123_v18  ;;  %v202_v20 = vpop.f32.mrb[2].mxu0 }
  0xe0   :  { %166 = vst.msk [vmem:[%s311_s3 + $0x20] sm:$0xff] %vm161_vm1, %v143_v19  ;;  %v208_v21 = vpop.f32.mrb[2].mxu1  ;;  %v138_v22 = vadd.f32 %v202_v20, %v174_v11  ;;  %v132_v24 = vpop.f32.mrb[3].mxu0 }
  0xe1   :  { %v158_v23 = vadd.f32 %v208_v21, %v174_v11  ;;  %v152_v25 = vpop.f32.mrb[3].mxu1  ;;  %v133_v26 = vadd.f32 %v174_v11, %v132_v24 }
  0xe2   :  { %v153_v27 = vadd.f32 %v174_v11, %v152_v25  ;;  %165 = vst.msk [vmem:[%s311_s3 + $0x18] sm:$0xff] %vm161_vm1, %v138_v22 }
  0xe3   :  { %169 = vst.msk [vmem:[%s311_s3 + $0x38] sm:$0xff] %vm161_vm1, %v158_v23  ;;  %164 = vst.msk [vmem:[%s311_s3 + $0x10] sm:$0xff] %vm161_vm1, %v133_v26 }
  0xe4   :  { %168 = vst.msk [vmem:[%s311_s3 + $0x30] sm:$0xff] %vm161_vm1, %v153_v27 }

// kernel: _lambda_.107
= control target key start
LH: loop header
LB: loop body
LE: loop exit
PB: predicated region body
PF: predicated region fallthrough
CT: control target
= control target key end

     0   :  { %vm34_vm0 = vcmask 293888   ;;  %vm59_vm1 = vcmask 1043456   ;;  %vm168_vm2 = vcmask 64512   ;;  %s342_s1 = inlined_call_operand.vmem [shape: f32[36,8], index: 1, kind: input, shape index: {}]   ;;  %s343_s0 = inlined_call_operand.vmem [shape: f32[64,36], index: 0, kind: input, shape index: {}]   ;;  %s344_s2 = inlined_call_operand.vmem [shape: f32[1,8], index: 2, kind: input, shape index: {}]   ;;  %s345_s3 = inlined_call_operand.vmem [shape: f32[64,8], index: 3, kind: output, shape index: {}]  }
   0x1   :  { %v22_v0 = vld [vmem:[%s342_s1] sm:$0xff]  ;;  %v23_v1 = vld [vmem:[%s342_s1 + $0x8] sm:$0xff]  ;;  %v24_v2 = vld [vmem:[%s342_s1 + $0x10] sm:$0xff] }
   0x2   :  { %v226_v3 = vpack.c.bf16 %v23_v1, %v22_v0  ;;  %v25_v4 = vld [vmem:[%s342_s1 + $0x18] sm:$0xff]  ;;  %v14_v5 = vld [vmem:[%s343_s0] sm:$0xff]  ;;  %v15_v9 = vld [vmem:[%s343_s0 + $0x8] sm:$0xff] }
   0x3   :  { %v230_v6 = vpack.c.bf16 %v25_v4, %v24_v2  ;;  %214 = vmatprep.mubr.msk.f32.mxu0 %vm34_vm0, %v14_v5  ;;  %v18_v7 = vld [vmem:[%s343_s0 + $0x20] sm:$0xff]  ;;  %v19_v10 = vld [vmem:[%s343_s0 + $0x28] sm:$0xff]  ;;  %v16_v11 = vld [vmem:[%s343_s0 + $0x10] sm:$0xff] }
   0x4   :  { %227 = vmatprep.subr.bf16.mxu0 %v226_v3  ;;  %234 = vmatprep.subr.bf16.mxu1 %v226_v3  ;;  %v26_v8 = vld [vmem:[%s342_s1 + $0x20] sm:$0xf]  ;;  %v20_v12 = vld [vmem:[%s343_s0 + $0x30] sm:$0xff]  ;;  %v17_v13 = vld [vmem:[%s343_s0 + $0x18] sm:$0xff] }
   0x5   :  { %229 = vmatpush3.bf16.msra.mxu0 %v226_v3  ;;  %237 = vmatpush3.bf16.msra.mxu1 %v226_v3  ;;  %v21_v14 = vld [vmem:[%s343_s0 + $0x38] sm:$0xff]  ;;  %v181_v15 = vld [vmem:[%s344_s2] ss:$0 sm:$0xff] }
   0x6   :  { %231 = vmatprep.subr.bf16.mxu0 %v230_v6  ;;  %235 = vmatprep.subr.bf16.mxu1 %v230_v6 }
   0x7   :  { %220 = vmatprep.mubr.msk.f32.mxu1 %vm34_vm0, %v18_v7 }
   0x9   :  { %233 = vmatpush3.bf16.msra.mxu0 %v230_v6  ;;  %238 = vmatpush3.bf16.msra.mxu1 %v230_v6 }
   0xa   :  { %212 = vmatprep.subr.msk.mxu0 %vm59_vm1, %v26_v8  ;;  %236 = vmatprep.subr.msk.mxu1 %vm59_vm1, %v26_v8 }
   0xd   :  { %213 = vmatpush3.msk.msra.mxu0 %vm59_vm1, %v26_v8  ;;  %239 = vmatpush3.msk.msra.mxu1 %vm59_vm1, %v26_v8 }
   0xe   :  { %215 = vmatmul.mubr.msk.f32.vlgmr.msra.gmra.mrb[0].mxu0 %vm34_vm0, %v15_v9  ;;  %221 = vmatmul.mubr.msk.f32.vlgmr.msra.gmra.mrb[0].mxu1 %vm34_vm0, %v19_v10 }
   0xf   :  { %217 = vmatprep.mubr.msk.f32.mxu0 %vm34_vm0, %v16_v11  ;;  %223 = vmatprep.mubr.msk.f32.mxu1 %vm34_vm0, %v20_v12 }
  0x12   :  { %218 = vmatmul.mubr.msk.f32.gmra.mrb[2].mxu0 %vm34_vm0, %v17_v13  ;;  %224 = vmatmul.mubr.msk.f32.gmra.mrb[2].mxu1 %vm34_vm0, %v21_v14 }
  0xe1   :  { %v216_v16 = vpop.f32.mrb[0].mxu0  ;;  %v222_v17 = vpop.f32.mrb[0].mxu1 }
  0xe2   :  { %v135_v18 = vadd.f32 %v216_v16, %v181_v15  ;;  %v155_v19 = vadd.f32 %v222_v17, %v181_v15  ;;  %v129_v20 = vpop.f32.mrb[1].mxu0  ;;  %v149_v21 = vpop.f32.mrb[1].mxu1 }
  0xe3   :  { %v130_v22 = vadd.f32 %v181_v15, %v129_v20  ;;  %v150_v23 = vadd.f32 %v181_v15, %v149_v21 }
  0xe4   :  { %170 = vst.msk [vmem:[%s345_s3 + $0x8] sm:$0xff] %vm168_vm2, %v135_v18  ;;  %174 = vst.msk [vmem:[%s345_s3 + $0x28] sm:$0xff] %vm168_vm2, %v155_v19 }
  0xe5   :  { %169 = vst.msk [vmem:[%s345_s3] sm:$0xff] %vm168_vm2, %v130_v22  ;;  %173 = vst.msk [vmem:[%s345_s3 + $0x20] sm:$0xff] %vm168_vm2, %v150_v23  ;;  %v219_v24 = vpop.f32.mrb[2].mxu0  ;;  %v225_v25 = vpop.f32.mrb[2].mxu1 }
  0xe6   :  { %v145_v26 = vadd.f32 %v219_v24, %v181_v15  ;;  %v165_v27 = vadd.f32 %v225_v25, %v181_v15  ;;  %v139_v28 = vpop.f32.mrb[3].mxu0  ;;  %v159_v29 = vpop.f32.mrb[3].mxu1 }
  0xe7   :  { %v140_v30 = vadd.f32 %v181_v15, %v139_v28  ;;  %v160_v31 = vadd.f32 %v181_v15, %v159_v29 }
  0xe8   :  { %172 = vst.msk [vmem:[%s345_s3 + $0x18] sm:$0xff] %vm168_vm2, %v145_v26  ;;  %176 = vst.msk [vmem:[%s345_s3 + $0x38] sm:$0xff] %vm168_vm2, %v165_v27 }
  0xe9   :  { %171 = vst.msk [vmem:[%s345_s3 + $0x10] sm:$0xff] %vm168_vm2, %v140_v30  ;;  %175 = vst.msk [vmem:[%s345_s3 + $0x30] sm:$0xff] %vm168_vm2, %v160_v31 }

// kernel: _lambda_.109
= control target key start
LH: loop header
LB: loop body
LE: loop exit
PB: predicated region body
PF: predicated region fallthrough
CT: control target
= control target key end

     0   :  { %vm28_vm0 = vcmask 261120   ;;  %vm304_vm1 = vcmask 523264   ;;  %s559_s0 = inlined_call_operand.vmem [shape: f32[64,32], index: 0, kind: input, shape index: {}]   ;;  %s560_s3 = inlined_call_operand.vmem [shape: f32[32,64], index: 3, kind: input, shape index: {}]   ;;  %s561_s1 = inlined_call_operand.vmem [shape: f32[1,32], index: 1, kind: input, shape index: {}]   ;;  %s562_s2 = inlined_call_operand.vmem [shape: f32[1,32], index: 2, kind: input, shape index: {}]   ;;  %s563_s4 = inlined_call_operand.vmem [shape: f32[1,64], index: 4, kind: input, shape index: {}]   ;;  %s564_s5 = inlined_call_operand.vmem [shape: f32[64,64], index: 5, kind: output, shape index: {}]  }
   0x1   :  { %v20_v0 = vld [vmem:[%s559_s0] sm:$0xff]  ;;  %v21_v1 = vld [vmem:[%s559_s0 + $0x8] sm:$0xff]  ;;  %v22_v8 = vld [vmem:[%s559_s0 + $0x10] sm:$0xff] }
   0x2   :  { %v24_v2 = vld [vmem:[%s559_s0 + $0x20] sm:$0xff]  ;;  %v29_v3 = vsel %vm28_vm0, %v20_v0, 0.0  ;;  %v32_v4 = vsel %vm28_vm0, %v21_v1, 0.0  ;;  %v25_v5 = vld [vmem:[%s559_s0 + $0x28] sm:$0xff]  ;;  %v26_v9 = vld [vmem:[%s559_s0 + $0x30] sm:$0xff]  ;;  %v35_v10 = vsel %vm28_vm0, %v22_v8, 0.0 }
   0x3   :  { %30 = vadd.xlane.f32.xlu0 %v29_v3  ;;  %33 = vadd.xlane.f32.xlu1 %v32_v4  ;;  %v41_v6 = vsel %vm28_vm0, %v24_v2, 0.0  ;;  %v44_v7 = vsel %vm28_vm0, %v25_v5, 0.0  ;;  %v47_v11 = vsel %vm28_vm0, %v26_v9, 0.0  ;;  %v23_v12 = vld [vmem:[%s559_s0 + $0x18] sm:$0xff]  ;;  %v164_v56 = vld [vmem:[%s560_s3] sm:$0xff]  ;;  %v165_v57 = vld [vmem:[%s560_s3 + $0x8] sm:$0xff] }
   0x4   :  { %v27_v13 = vld [vmem:[%s559_s0 + $0x38] sm:$0xff]  ;;  %v38_v14 = vsel %vm28_vm0, %v23_v12, 0.0  ;;  %v360_v58 = vpack.c.bf16 %v165_v57, %v164_v56  ;;  %v166_v59 = vld [vmem:[%s560_s3 + $0x10] sm:$0xff] }
   0x5   :  { %v50_v15 = vsel %vm28_vm0, %v27_v13, 0.0  ;;  %v167_v60 = vld [vmem:[%s560_s3 + $0x18] sm:$0xff] }
   0x6   :  { %361 = vmatprep.subr.bf16.mxu0 %v360_v58  ;;  %368 = vmatprep.subr.bf16.mxu1 %v360_v58  ;;  %v364_v61 = vpack.c.bf16 %v167_v60, %v166_v59 }
   0x7   :  { %42 = vadd.xlane.f32.xlu0 %v41_v6  ;;  %45 = vadd.xlane.f32.xlu1 %v44_v7 }
   0x8   :  { %363 = vmatpush3.bf16.msra.mxu0 %v360_v58  ;;  %370 = vmatpush3.bf16.msra.mxu1 %v360_v58 }
   0x9   :  { %365 = vmatprep.subr.bf16.mxu0 %v364_v61  ;;  %369 = vmatprep.subr.bf16.mxu1 %v364_v61 }
   0xb   :  { %36 = vadd.xlane.f32.xlu0 %v35_v10  ;;  %48 = vadd.xlane.f32.xlu1 %v47_v11 }
   0xc   :  { %367 = vmatpush3.bf16.msra.mxu0 %v364_v61  ;;  %371 = vmatpush3.bf16.msra.mxu1 %v364_v61 }
   0xf   :  { %39 = vadd.xlane.f32.xlu0 %v38_v14  ;;  %51 = vadd.xlane.f32.xlu1 %v50_v15 }
  0x90   :  { %v31_v16 = vpop.xlane.xlu0 %30  ;;  %v34_v17 = vpop.xlane.xlu1 %33 }
  0x91   :  { %v54_v18 = vmul.f32 0.03125, %v31_v16  ;;  %v55_v19 = vmul.f32 0.03125, %v34_v17 }
  0x93   :  { %v450_v20 = vsub.f32 %v20_v0, %v54_v18  ;;  %v452_v21 = vsub.f32 %v21_v1, %v55_v19 }
  0x94   :  { %v43_v22 = vpop.xlane.xlu0 %42  ;;  %v46_v23 = vpop.xlane.xlu1 %45 }
  0x95   :  { %v58_v24 = vmul.f32 0.03125, %v43_v22  ;;  %v59_v25 = vmul.f32 0.03125, %v46_v23  ;;  %v70_v26 = vmul.f32 %v450_v20, %v450_v20  ;;  %v71_v27 = vmul.f32 %v452_v21, %v452_v21  ;;  %v317_v22 = vld [vmem:[%s561_s1] ss:$0 sm:$0xff] }
  0x97   :  { %v458_v28 = vsub.f32 %v24_v2, %v58_v24  ;;  %v460_v29 = vsub.f32 %v25_v5, %v59_v25  ;;  %v78_v30 = vsel %vm28_vm0, %v70_v26, 0.0  ;;  %v81_v33 = vsel %vm28_vm0, %v71_v27, 0.0  ;;  %v318_v26 = vld [vmem:[%s562_s2] ss:$0 sm:$0xff] }
  0x98   :  { %79 = vadd.xlane.f32.xlu0 %v78_v30  ;;  %v37_v31 = vpop.xlane.xlu0 %36  ;;  %v49_v32 = vpop.xlane.xlu1 %48 }
  0x99   :  { %v56_v34 = vmul.f32 0.03125, %v37_v31  ;;  %v60_v35 = vmul.f32 0.03125, %v49_v32  ;;  %v74_v36 = vmul.f32 %v458_v28, %v458_v28  ;;  %v75_v37 = vmul.f32 %v460_v29, %v460_v29 }
  0x9b   :  { %v468_v38 = vsub.f32 %v22_v8, %v56_v34  ;;  %v470_v39 = vsub.f32 %v26_v9, %v60_v35  ;;  %v90_v40 = vsel %vm28_vm0, %v74_v36, 0.0  ;;  %v93_v43 = vsel %vm28_vm0, %v75_v37, 0.0 }
  0x9c   :  { %82 = vadd.xlane.f32.xlu0 %v81_v33  ;;  %91 = vadd.xlane.f32.xlu1 %v90_v40  ;;  %v40_v41 = vpop.xlane.xlu0 %39  ;;  %v52_v42 = vpop.xlane.xlu1 %51 }
  0x9d   :  { %v57_v44 = vmul.f32 0.03125, %v40_v41  ;;  %v61_v45 = vmul.f32 0.03125, %v52_v42  ;;  %v72_v46 = vmul.f32 %v468_v38, %v468_v38  ;;  %v76_v47 = vmul.f32 %v470_v39, %v470_v39 }
  0x9f   :  { %v478_v48 = vsub.f32 %v23_v12, %v57_v44  ;;  %v480_v49 = vsub.f32 %v27_v13, %v61_v45  ;;  %v84_v50 = vsel %vm28_vm0, %v72_v46, 0.0  ;;  %v96_v51 = vsel %vm28_vm0, %v76_v47, 0.0 }
  0xa0   :  { %94 = vadd.xlane.f32.xlu1 %v93_v43  ;;  %85 = vadd.xlane.f32.xlu0 %v84_v50 }
  0xa1   :  { %v73_v52 = vmul.f32 %v478_v48, %v478_v48  ;;  %v77_v53 = vmul.f32 %v480_v49, %v480_v49 }
  0xa3   :  { %v87_v54 = vsel %vm28_vm0, %v73_v52, 0.0  ;;  %v99_v55 = vsel %vm28_vm0, %v77_v53, 0.0 }
  0xa4   :  { %97 = vadd.xlane.f32.xlu1 %v96_v51  ;;  %88 = vadd.xlane.f32.xlu0 %v87_v54 }
  0xa8   :  { %100 = vadd.xlane.f32.xlu1 %v99_v55 }
 0x125   :  { %v80_v62 = vpop.xlane.xlu0 %79 }
 0x126   :  { %v102_v63 = vmul.f32 0.03125, %v80_v62 }
 0x128   :  { %v110_v0 = vadd.f32 1e-05, %v102_v63 }
 0x129   :  { %v92_v1 = vpop.xlane.xlu1 %91  ;;  %v83_v2 = vpop.xlane.xlu0 %82 }
 0x12a   :  { %372 = vrsqrt.f32 %v110_v0  ;;  %v106_v3 = vmul.f32 0.03125, %v92_v1  ;;  %v103_v4 = vmul.f32 0.03125, %v83_v2 }
 0x12c   :  { %v114_v5 = vadd.f32 1e-05, %v106_v3  ;;  %v111_v6 = vadd.f32 1e-05, %v103_v4 }
 0x12d   :  { %v95_v7 = vpop.xlane.xlu1 %94  ;;  %v86_v8 = vpop.xlane.xlu0 %85 }
 0x12e   :  { %374 = vrsqrt.f32 %v114_v5  ;;  %v107_v9 = vmul.f32 0.03125, %v95_v7  ;;  %v104_v10 = vmul.f32 0.03125, %v86_v8 }
 0x12f   :  { %376 = vrsqrt.f32 %v111_v6 }
 0x130   :  { %v115_v11 = vadd.f32 1e-05, %v107_v9  ;;  %v112_v12 = vadd.f32 1e-05, %v104_v10 }
 0x131   :  { %v98_v13 = vpop.xlane.xlu1 %97  ;;  %v89_v14 = vpop.xlane.xlu0 %88 }
 0x132   :  { %378 = vrsqrt.f32 %v115_v11  ;;  %v108_v15 = vmul.f32 0.03125, %v98_v13  ;;  %v105_v16 = vmul.f32 0.03125, %v89_v14 }
 0x133   :  { %380 = vrsqrt.f32 %v112_v12 }
 0x134   :  { %v373_v17 = vpop.eup %372  ;;  %v116_v18 = vadd.f32 1e-05, %v108_v15  ;;  %v113_v19 = vadd.f32 1e-05, %v105_v16 }
 0x135   :  { %v101_v23 = vpop.xlane.xlu1 %100  ;;  %v126_v24 = vmul.f32 %v373_v17, %v450_v20 }
 0x136   :  { %382 = vrsqrt.f32 %v116_v18  ;;  %v109_v25 = vmul.f32 0.03125, %v101_v23 }
 0x137   :  { %384 = vrsqrt.f32 %v113_v19  ;;  %v141_v27 = vmul.f32 %v317_v22, %v126_v24 }
 0x138   :  { %v375_v30 = vpop.eup %374  ;;  %v117_v31 = vadd.f32 1e-05, %v109_v25 }
 0x139   :  { %v377_v32 = vpop.eup %376  ;;  %v156_v33 = vadd.f32 %v318_v26, %v141_v27  ;;  %v130_v34 = vmul.f32 %v375_v30, %v458_v28 }
 0x13a   :  { %386 = vrsqrt.f32 %v117_v31  ;;  %v127_v35 = vmul.f32 %v377_v32, %v452_v21 }
 0x13b   :  { %348 = vmatprep.mubr.msk.f32.mxu0 %vm28_vm0, %v156_v33  ;;  %v145_v20 = vmul.f32 %v317_v22, %v130_v34 }
 0x13c   :  { %v379_v36 = vpop.eup %378  ;;  %v142_v37 = vmul.f32 %v317_v22, %v127_v35 }
 0x13d   :  { %v381_v40 = vpop.eup %380  ;;  %v160_v41 = vadd.f32 %v318_v26, %v145_v20  ;;  %v131_v42 = vmul.f32 %v379_v36, %v460_v29 }
 0x13e   :  { %v157_v43 = vadd.f32 %v318_v26, %v142_v37  ;;  %v128_v44 = vmul.f32 %v381_v40, %v468_v38 }
 0x13f   :  { %354 = vmatprep.mubr.msk.f32.mxu1 %vm28_vm0, %v160_v41  ;;  %v146_v45 = vmul.f32 %v317_v22, %v131_v42 }
 0x140   :  { %v383_v46 = vpop.eup %382  ;;  %349 = vmatmul.mubr.msk.f32.vlgmr.msra.gmra.mrb[0].mxu0 %vm28_vm0, %v157_v43  ;;  %v143_v28 = vmul.f32 %v317_v22, %v128_v44 }
 0x141   :  { %v385_v21 = vpop.eup %384  ;;  %v161_v47 = vadd.f32 %v318_v26, %v146_v45  ;;  %v132_v50 = vmul.f32 %v383_v46, %v470_v39 }
 0x142   :  { %v158_v51 = vadd.f32 %v318_v26, %v143_v28  ;;  %v129_v52 = vmul.f32 %v385_v21, %v478_v48  ;;  %v319_v48 = vld [vmem:[%s563_s4] ss:$0 sm:$0xff] }
 0x143   :  { %355 = vmatmul.mubr.msk.f32.vlgmr.msra.gmra.mrb[0].mxu1 %vm28_vm0, %v161_v47  ;;  %v147_v29 = vmul.f32 %v317_v22, %v132_v50 }
 0x144   :  { %v387_v53 = vpop.eup %386  ;;  %351 = vmatprep.mubr.msk.f32.mxu0 %vm28_vm0, %v158_v51  ;;  %v144_v38 = vmul.f32 %v317_v22, %v129_v52 }
 0x145   :  { %v162_v54 = vadd.f32 %v318_v26, %v147_v29  ;;  %v133_v55 = vmul.f32 %v387_v53, %v480_v49 }
 0x146   :  { %v159_v56 = vadd.f32 %v318_v26, %v144_v38 }
 0x147   :  { %357 = vmatprep.mubr.msk.f32.mxu1 %vm28_vm0, %v162_v54  ;;  %v148_v57 = vmul.f32 %v317_v22, %v133_v55 }
 0x148   :  { %352 = vmatmul.mubr.msk.f32.gmra.mrb[2].mxu0 %vm28_vm0, %v159_v56 }
 0x149   :  { %v163_v39 = vadd.f32 %v318_v26, %v148_v57 }
 0x14b   :  { %358 = vmatmul.mubr.msk.f32.gmra.mrb[2].mxu1 %vm28_vm0, %v163_v39 }
 0x213   :  { %v350_v58 = vpop.f32.mrb[0].mxu0 }
 0x214   :  { %v271_v59 = vadd.f32 %v350_v58, %v319_v48  ;;  %v265_v60 = vpop.f32.mrb[1].mxu0 }
 0x215   :  { %v266_v61 = vadd.f32 %v319_v48, %v265_v60 }
 0x216   :  { %306 = vst.msk [vmem:[%s564_s5 + $0x8] sm:$0xff] %vm304_vm1, %v271_v59  ;;  %v356_v49 = vpop.f32.mrb[0].mxu1 }
 0x217   :  { %305 = vst.msk [vmem:[%s564_s5] sm:$0xff] %vm304_vm1, %v266_v61  ;;  %v291_v62 = vadd.f32 %v356_v49, %v319_v48  ;;  %v285_v63 = vpop.f32.mrb[1].mxu1 }
 0x218   :  { %v286_v0 = vadd.f32 %v319_v48, %v285_v63 }
 0x219   :  { %310 = vst.msk [vmem:[%s564_s5 + $0x28] sm:$0xff] %vm304_vm1, %v291_v62 }
 0x21a   :  { %309 = vst.msk [vmem:[%s564_s5 + $0x20] sm:$0xff] %vm304_vm1, %v286_v0 }
 0x21b   :  { %v353_v1 = vpop.f32.mrb[2].mxu0 }
 0x21c   :  { %v281_v2 = vadd.f32 %v353_v1, %v319_v48  ;;  %v275_v3 = vpop.f32.mrb[3].mxu0 }
 0x21d   :  { %v276_v4 = vadd.f32 %v319_v48, %v275_v3 }
 0x21e   :  { %308 = vst.msk [vmem:[%s564_s5 + $0x18] sm:$0xff] %vm304_vm1, %v281_v2  ;;  %v359_v5 = vpop.f32.mrb[2].mxu1 }
 0x21f   :  { %307 = vst.msk [vmem:[%s564_s5 + $0x10] sm:$0xff] %vm304_vm1, %v276_v4  ;;  %v301_v6 = vadd.f32 %v359_v5, %v319_v48  ;;  %v295_v7 = vpop.f32.mrb[3].mxu1 }
 0x220   :  { %v296_v8 = vadd.f32 %v319_v48, %v295_v7 }
 0x221   :  { %312 = vst.msk [vmem:[%s564_s5 + $0x38] sm:$0xff] %vm304_vm1, %v301_v6 }
 0x222   :  { %311 = vst.msk [vmem:[%s564_s5 + $0x30] sm:$0xff] %vm304_vm1, %v296_v8 }

// kernel: _lambda_.108
= control target key start
LH: loop header
LB: loop body
LE: loop exit
PB: predicated region body
PF: predicated region fallthrough
CT: control target
= control target key end

     0   :  { %vm30_vm0 = vcmask 64512   ;;  %vm160_vm1 = vcmask 261120   ;;  %s297_s1 = inlined_call_operand.vmem [shape: f32[8,32], index: 1, kind: input, shape index: {}]   ;;  %s298_s0 = inlined_call_operand.vmem [shape: f32[64,8], index: 0, kind: input, shape index: {}]   ;;  %s299_s2 = inlined_call_operand.vmem [shape: f32[1,32], index: 2, kind: input, shape index: {}]   ;;  %s300_s3 = inlined_call_operand.vmem [shape: f32[64,32], index: 3, kind: output, shape index: {}]  }
   0x1   :  { %v22_v0 = vld [vmem:[%s297_s1] sm:$0xff]  ;;  %v15_v3 = vld [vmem:[%s298_s0 + $0x8] sm:$0xff]  ;;  %v16_v5 = vld [vmem:[%s298_s0 + $0x10] sm:$0xff] }
   0x2   :  { %v14_v1 = vld [vmem:[%s298_s0] sm:$0xff]  ;;  %191 = vmatprep.subr.mxu0 %v22_v0  ;;  %205 = vmatprep.subr.mxu1 %v22_v0  ;;  %v19_v4 = vld [vmem:[%s298_s0 + $0x28] sm:$0xff]  ;;  %v20_v6 = vld [vmem:[%s298_s0 + $0x30] sm:$0xff] }
   0x3   :  { %v18_v2 = vld [vmem:[%s298_s0 + $0x20] sm:$0xff]  ;;  %192 = vmatpush3.msra.mxu0 %v22_v0  ;;  %206 = vmatpush3.msra.mxu1 %v22_v0  ;;  %v17_v7 = vld [vmem:[%s298_s0 + $0x18] sm:$0xff] }
   0x4   :  { %193 = vmatprep.mubr.msk.f32.mxu0 %vm30_vm0, %v14_v1  ;;  %199 = vmatprep.mubr.msk.f32.mxu1 %vm30_vm0, %v18_v2  ;;  %v21_v8 = vld [vmem:[%s298_s0 + $0x38] sm:$0xff]  ;;  %v173_v9 = vld [vmem:[%s299_s2] ss:$0 sm:$0xff] }
   0x5   :  { %194 = vmatmul.mubr.msk.f32.vlgmr.msra.gmra.mrb[0].mxu0 %vm30_vm0, %v15_v3  ;;  %200 = vmatmul.mubr.msk.f32.vlgmr.msra.gmra.mrb[0].mxu1 %vm30_vm0, %v19_v4 }
   0x6   :  { %196 = vmatprep.mubr.msk.f32.mxu0 %vm30_vm0, %v16_v5  ;;  %202 = vmatprep.mubr.msk.f32.mxu1 %vm30_vm0, %v20_v6 }
   0x9   :  { %197 = vmatmul.mubr.msk.f32.gmra.mrb[2].mxu0 %vm30_vm0, %v17_v7  ;;  %203 = vmatmul.mubr.msk.f32.gmra.mrb[2].mxu1 %vm30_vm0, %v21_v8 }
  0xd8   :  { %v195_v10 = vpop.f32.mrb[0].mxu0  ;;  %v201_v11 = vpop.f32.mrb[0].mxu1 }
  0xd9   :  { %v127_v12 = vadd.f32 %v195_v10, %v173_v9  ;;  %v147_v13 = vadd.f32 %v201_v11, %v173_v9  ;;  %v121_v14 = vpop.f32.mrb[1].mxu0  ;;  %v141_v15 = vpop.f32.mrb[1].mxu1 }
  0xda   :  { %v122_v16 = vadd.f32 %v173_v9, %v121_v14  ;;  %v142_v17 = vadd.f32 %v173_v9, %v141_v15 }
  0xdb   :  { %162 = vst.msk [vmem:[%s300_s3 + $0x8] sm:$0xff] %vm160_vm1, %v127_v12  ;;  %166 = vst.msk [vmem:[%s300_s3 + $0x28] sm:$0xff] %vm160_vm1, %v147_v13 }
  0xdc   :  { %161 = vst.msk [vmem:[%s300_s3] sm:$0xff] %vm160_vm1, %v122_v16  ;;  %165 = vst.msk [vmem:[%s300_s3 + $0x20] sm:$0xff] %vm160_vm1, %v142_v17  ;;  %v198_v18 = vpop.f32.mrb[2].mxu0  ;;  %v204_v19 = vpop.f32.mrb[2].mxu1 }
  0xdd   :  { %v137_v20 = vadd.f32 %v198_v18, %v173_v9  ;;  %v157_v21 = vadd.f32 %v204_v19, %v173_v9  ;;  %v131_v22 = vpop.f32.mrb[3].mxu0  ;;  %v151_v23 = vpop.f32.mrb[3].mxu1 }
  0xde   :  { %v132_v24 = vadd.f32 %v173_v9, %v131_v22  ;;  %v152_v25 = vadd.f32 %v173_v9, %v151_v23 }
  0xdf   :  { %164 = vst.msk [vmem:[%s300_s3 + $0x18] sm:$0xff] %vm160_vm1, %v137_v20  ;;  %168 = vst.msk [vmem:[%s300_s3 + $0x38] sm:$0xff] %vm160_vm1, %v157_v21 }
  0xe0   :  { %163 = vst.msk [vmem:[%s300_s3 + $0x10] sm:$0xff] %vm160_vm1, %v132_v24  ;;  %167 = vst.msk [vmem:[%s300_s3 + $0x30] sm:$0xff] %vm160_vm1, %v152_v25 }

// kernel: _lambda_.110
= control target key start
LH: loop header
LB: loop body
LE: loop exit
PB: predicated region body
PF: predicated region fallthrough
CT: control target
= control target key end

     0   :  { %vm25_vm0 = vcmask 261120   ;;  %vm294_vm1 = vcmask 15360   ;;  %s540_s0 = inlined_call_operand.vmem [shape: f32[64,32], index: 0, kind: input, shape index: {}]   ;;  %s541_s3 = inlined_call_operand.vmem [shape: f32[32,2], index: 3, kind: input, shape index: {}]   ;;  %s542_s1 = inlined_call_operand.vmem [shape: f32[1,32], index: 1, kind: input, shape index: {}]   ;;  %s543_s2 = inlined_call_operand.vmem [shape: f32[1,32], index: 2, kind: input, shape index: {}]   ;;  %s544_s4 = inlined_call_operand.vmem [shape: f32[64,2], index: 4, kind: output, shape index: {}]  }
   0x1   :  { %v17_v0 = vld [vmem:[%s540_s0] sm:$0xff]  ;;  %v18_v1 = vld [vmem:[%s540_s0 + $0x8] sm:$0xff]  ;;  %v19_v8 = vld [vmem:[%s540_s0 + $0x10] sm:$0xff] }
   0x2   :  { %v21_v2 = vld [vmem:[%s540_s0 + $0x20] sm:$0xff]  ;;  %v26_v3 = vsel %vm25_vm0, %v17_v0, 0.0  ;;  %v29_v4 = vsel %vm25_vm0, %v18_v1, 0.0  ;;  %v22_v5 = vld [vmem:[%s540_s0 + $0x28] sm:$0xff]  ;;  %v23_v9 = vld [vmem:[%s540_s0 + $0x30] sm:$0xff]  ;;  %v32_v10 = vsel %vm25_vm0, %v19_v8, 0.0 }
   0x3   :  { %27 = vadd.xlane.f32.xlu0 %v26_v3  ;;  %30 = vadd.xlane.f32.xlu1 %v29_v4  ;;  %v38_v6 = vsel %vm25_vm0, %v21_v2, 0.0  ;;  %v41_v7 = vsel %vm25_vm0, %v22_v5, 0.0  ;;  %v44_v11 = vsel %vm25_vm0, %v23_v9, 0.0  ;;  %v20_v12 = vld [vmem:[%s540_s0 + $0x18] sm:$0xff]  ;;  %v161_v56 = vld [vmem:[%s541_s3] sm:$0xff]  ;;  %v162_v57 = vld [vmem:[%s541_s3 + $0x8] sm:$0xff] }
   0x4   :  { %v24_v13 = vld [vmem:[%s540_s0 + $0x38] sm:$0xff]  ;;  %v35_v14 = vsel %vm25_vm0, %v20_v12, 0.0  ;;  %v349_v58 = vpack.c.bf16 %v162_v57, %v161_v56  ;;  %v163_v59 = vld [vmem:[%s541_s3 + $0x10] sm:$0xff] }
   0x5   :  { %v47_v15 = vsel %vm25_vm0, %v24_v13, 0.0  ;;  %v164_v60 = vld [vmem:[%s541_s3 + $0x18] sm:$0xff] }
   0x6   :  { %350 = vmatprep.subr.bf16.mxu0 %v349_v58  ;;  %357 = vmatprep.subr.bf16.mxu1 %v349_v58  ;;  %v353_v61 = vpack.c.bf16 %v164_v60, %v163_v59 }
   0x7   :  { %39 = vadd.xlane.f32.xlu0 %v38_v6  ;;  %42 = vadd.xlane.f32.xlu1 %v41_v7 }
   0x8   :  { %352 = vmatpush3.bf16.msra.mxu0 %v349_v58  ;;  %359 = vmatpush3.bf16.msra.mxu1 %v349_v58 }
   0x9   :  { %354 = vmatprep.subr.bf16.mxu0 %v353_v61  ;;  %358 = vmatprep.subr.bf16.mxu1 %v353_v61 }
   0xb   :  { %33 = vadd.xlane.f32.xlu0 %v32_v10  ;;  %45 = vadd.xlane.f32.xlu1 %v44_v11 }
   0xc   :  { %356 = vmatpush3.bf16.msra.mxu0 %v353_v61  ;;  %360 = vmatpush3.bf16.msra.mxu1 %v353_v61 }
   0xf   :  { %36 = vadd.xlane.f32.xlu0 %v35_v14  ;;  %48 = vadd.xlane.f32.xlu1 %v47_v15 }
  0x90   :  { %v28_v16 = vpop.xlane.xlu0 %27  ;;  %v31_v17 = vpop.xlane.xlu1 %30 }
  0x91   :  { %v51_v18 = vmul.f32 0.03125, %v28_v16  ;;  %v52_v19 = vmul.f32 0.03125, %v31_v17 }
  0x93   :  { %v434_v20 = vsub.f32 %v17_v0, %v51_v18  ;;  %v436_v21 = vsub.f32 %v18_v1, %v52_v19 }
  0x94   :  { %v40_v22 = vpop.xlane.xlu0 %39  ;;  %v43_v23 = vpop.xlane.xlu1 %42 }
  0x95   :  { %v55_v24 = vmul.f32 0.03125, %v40_v22  ;;  %v56_v25 = vmul.f32 0.03125, %v43_v23  ;;  %v67_v26 = vmul.f32 %v434_v20, %v434_v20  ;;  %v68_v27 = vmul.f32 %v436_v21, %v436_v21  ;;  %v307_v22 = vld [vmem:[%s542_s1] ss:$0 sm:$0xff] }
  0x97   :  { %v442_v28 = vsub.f32 %v21_v2, %v55_v24  ;;  %v444_v29 = vsub.f32 %v22_v5, %v56_v25  ;;  %v75_v30 = vsel %vm25_vm0, %v67_v26, 0.0  ;;  %v78_v33 = vsel %vm25_vm0, %v68_v27, 0.0  ;;  %v308_v26 = vld [vmem:[%s543_s2] ss:$0 sm:$0xff] }
  0x98   :  { %76 = vadd.xlane.f32.xlu0 %v75_v30  ;;  %v34_v31 = vpop.xlane.xlu0 %33  ;;  %v46_v32 = vpop.xlane.xlu1 %45 }
  0x99   :  { %v53_v34 = vmul.f32 0.03125, %v34_v31  ;;  %v57_v35 = vmul.f32 0.03125, %v46_v32  ;;  %v71_v36 = vmul.f32 %v442_v28, %v442_v28  ;;  %v72_v37 = vmul.f32 %v444_v29, %v444_v29 }
  0x9b   :  { %v452_v38 = vsub.f32 %v19_v8, %v53_v34  ;;  %v454_v39 = vsub.f32 %v23_v9, %v57_v35  ;;  %v87_v40 = vsel %vm25_vm0, %v71_v36, 0.0  ;;  %v90_v43 = vsel %vm25_vm0, %v72_v37, 0.0 }
  0x9c   :  { %79 = vadd.xlane.f32.xlu0 %v78_v33  ;;  %88 = vadd.xlane.f32.xlu1 %v87_v40  ;;  %v37_v41 = vpop.xlane.xlu0 %36  ;;  %v49_v42 = vpop.xlane.xlu1 %48 }
  0x9d   :  { %v54_v44 = vmul.f32 0.03125, %v37_v41  ;;  %v58_v45 = vmul.f32 0.03125, %v49_v42  ;;  %v69_v46 = vmul.f32 %v452_v38, %v452_v38  ;;  %v73_v47 = vmul.f32 %v454_v39, %v454_v39 }
  0x9f   :  { %v462_v48 = vsub.f32 %v20_v12, %v54_v44  ;;  %v464_v49 = vsub.f32 %v24_v13, %v58_v45  ;;  %v81_v50 = vsel %vm25_vm0, %v69_v46, 0.0  ;;  %v93_v51 = vsel %vm25_vm0, %v73_v47, 0.0 }
  0xa0   :  { %91 = vadd.xlane.f32.xlu1 %v90_v43  ;;  %82 = vadd.xlane.f32.xlu0 %v81_v50 }
  0xa1   :  { %v70_v52 = vmul.f32 %v462_v48, %v462_v48  ;;  %v74_v53 = vmul.f32 %v464_v49, %v464_v49 }
  0xa3   :  { %v84_v54 = vsel %vm25_vm0, %v70_v52, 0.0  ;;  %v96_v55 = vsel %vm25_vm0, %v74_v53, 0.0 }
  0xa4   :  { %94 = vadd.xlane.f32.xlu1 %v93_v51  ;;  %85 = vadd.xlane.f32.xlu0 %v84_v54 }
  0xa8   :  { %97 = vadd.xlane.f32.xlu1 %v96_v55 }
 0x125   :  { %v77_v62 = vpop.xlane.xlu0 %76 }
 0x126   :  { %v99_v63 = vmul.f32 0.03125, %v77_v62 }
 0x128   :  { %v107_v0 = vadd.f32 1e-05, %v99_v63 }
 0x129   :  { %v89_v1 = vpop.xlane.xlu1 %88  ;;  %v80_v2 = vpop.xlane.xlu0 %79 }
 0x12a   :  { %361 = vrsqrt.f32 %v107_v0  ;;  %v103_v3 = vmul.f32 0.03125, %v89_v1  ;;  %v100_v4 = vmul.f32 0.03125, %v80_v2 }
 0x12c   :  { %v111_v5 = vadd.f32 1e-05, %v103_v3  ;;  %v108_v6 = vadd.f32 1e-05, %v100_v4 }
 0x12d   :  { %v92_v7 = vpop.xlane.xlu1 %91  ;;  %v83_v8 = vpop.xlane.xlu0 %82 }
 0x12e   :  { %363 = vrsqrt.f32 %v111_v5  ;;  %v104_v9 = vmul.f32 0.03125, %v92_v7  ;;  %v101_v10 = vmul.f32 0.03125, %v83_v8 }
 0x12f   :  { %365 = vrsqrt.f32 %v108_v6 }
 0x130   :  { %v112_v11 = vadd.f32 1e-05, %v104_v9  ;;  %v109_v12 = vadd.f32 1e-05, %v101_v10 }
 0x131   :  { %v95_v13 = vpop.xlane.xlu1 %94  ;;  %v86_v14 = vpop.xlane.xlu0 %85 }
 0x132   :  { %367 = vrsqrt.f32 %v112_v11  ;;  %v105_v15 = vmul.f32 0.03125, %v95_v13  ;;  %v102_v16 = vmul.f32 0.03125, %v86_v14 }
 0x133   :  { %369 = vrsqrt.f32 %v109_v12 }
 0x134   :  { %v362_v17 = vpop.eup %361  ;;  %v113_v18 = vadd.f32 1e-05, %v105_v15  ;;  %v110_v19 = vadd.f32 1e-05, %v102_v16 }
 0x135   :  { %v98_v23 = vpop.xlane.xlu1 %97  ;;  %v123_v24 = vmul.f32 %v362_v17, %v434_v20 }
 0x136   :  { %371 = vrsqrt.f32 %v113_v18  ;;  %v106_v25 = vmul.f32 0.03125, %v98_v23 }
 0x137   :  { %373 = vrsqrt.f32 %v110_v19  ;;  %v138_v27 = vmul.f32 %v307_v22, %v123_v24 }
 0x138   :  { %v364_v30 = vpop.eup %363  ;;  %v114_v31 = vadd.f32 1e-05, %v106_v25 }
 0x139   :  { %v366_v32 = vpop.eup %365  ;;  %v153_v33 = vadd.f32 %v308_v26, %v138_v27  ;;  %v127_v34 = vmul.f32 %v364_v30, %v442_v28 }
 0x13a   :  { %375 = vrsqrt.f32 %v114_v31  ;;  %v124_v35 = vmul.f32 %v366_v32, %v436_v21 }
 0x13b   :  { %337 = vmatprep.mubr.msk.f32.mxu0 %vm25_vm0, %v153_v33  ;;  %v142_v20 = vmul.f32 %v307_v22, %v127_v34 }
 0x13c   :  { %v368_v36 = vpop.eup %367  ;;  %v139_v37 = vmul.f32 %v307_v22, %v124_v35 }
 0x13d   :  { %v370_v40 = vpop.eup %369  ;;  %v157_v41 = vadd.f32 %v308_v26, %v142_v20  ;;  %v128_v42 = vmul.f32 %v368_v36, %v444_v29 }
 0x13e   :  { %v154_v43 = vadd.f32 %v308_v26, %v139_v37  ;;  %v125_v44 = vmul.f32 %v370_v40, %v452_v38 }
 0x13f   :  { %343 = vmatprep.mubr.msk.f32.mxu1 %vm25_vm0, %v157_v41  ;;  %v143_v45 = vmul.f32 %v307_v22, %v128_v42 }
 0x140   :  { %v372_v46 = vpop.eup %371  ;;  %338 = vmatmul.mubr.msk.f32.vlgmr.msra.gmra.mrb[0].mxu0 %vm25_vm0, %v154_v43  ;;  %v140_v28 = vmul.f32 %v307_v22, %v125_v44 }
 0x141   :  { %v374_v21 = vpop.eup %373  ;;  %v158_v47 = vadd.f32 %v308_v26, %v143_v45  ;;  %v129_v50 = vmul.f32 %v372_v46, %v454_v39 }
 0x142   :  { %v155_v51 = vadd.f32 %v308_v26, %v140_v28  ;;  %v126_v52 = vmul.f32 %v374_v21, %v462_v48 }
 0x143   :  { %344 = vmatmul.mubr.msk.f32.vlgmr.msra.gmra.mrb[0].mxu1 %vm25_vm0, %v158_v47  ;;  %v144_v29 = vmul.f32 %v307_v22, %v129_v50 }
 0x144   :  { %v376_v53 = vpop.eup %375  ;;  %340 = vmatprep.mubr.msk.f32.mxu0 %vm25_vm0, %v155_v51  ;;  %v141_v38 = vmul.f32 %v307_v22, %v126_v52 }
 0x145   :  { %v159_v54 = vadd.f32 %v308_v26, %v144_v29  ;;  %v130_v55 = vmul.f32 %v376_v53, %v464_v49 }
 0x146   :  { %v156_v56 = vadd.f32 %v308_v26, %v141_v38 }
 0x147   :  { %346 = vmatprep.mubr.msk.f32.mxu1 %vm25_vm0, %v159_v54  ;;  %v145_v57 = vmul.f32 %v307_v22, %v130_v55 }
 0x148   :  { %341 = vmatmul.mubr.msk.f32.gmra.mrb[2].mxu0 %vm25_vm0, %v156_v56 }
 0x149   :  { %v160_v39 = vadd.f32 %v308_v26, %v145_v57 }
 0x14b   :  { %347 = vmatmul.mubr.msk.f32.gmra.mrb[2].mxu1 %vm25_vm0, %v160_v39 }
 0x213   :  { %v339_v48 = vpop.f32.mrb[0].mxu0 }
 0x214   :  { %296 = vst.msk [vmem:[%s544_s4 + $0x8] sm:$0xff] %vm294_vm1, %v339_v48  ;;  %v255_v58 = vpop.f32.mrb[1].mxu0 }
 0x215   :  { %295 = vst.msk [vmem:[%s544_s4] sm:$0xff] %vm294_vm1, %v255_v58 }
 0x216   :  { %v345_v49 = vpop.f32.mrb[0].mxu1 }
 0x217   :  { %300 = vst.msk [vmem:[%s544_s4 + $0x28] sm:$0xff] %vm294_vm1, %v345_v49  ;;  %v275_v59 = vpop.f32.mrb[1].mxu1 }
 0x218   :  { %299 = vst.msk [vmem:[%s544_s4 + $0x20] sm:$0xff] %vm294_vm1, %v275_v59 }
 0x21b   :  { %v342_v60 = vpop.f32.mrb[2].mxu0 }
 0x21c   :  { %298 = vst.msk [vmem:[%s544_s4 + $0x18] sm:$0xff] %vm294_vm1, %v342_v60  ;;  %v265_v61 = vpop.f32.mrb[3].mxu0 }
 0x21d   :  { %297 = vst.msk [vmem:[%s544_s4 + $0x10] sm:$0xff] %vm294_vm1, %v265_v61 }
 0x21e   :  { %v348_v62 = vpop.f32.mrb[2].mxu1 }
 0x21f   :  { %302 = vst.msk [vmem:[%s544_s4 + $0x38] sm:$0xff] %vm294_vm1, %v348_v62  ;;  %v285_v63 = vpop.f32.mrb[3].mxu1 }
 0x220   :  { %301 = vst.msk [vmem:[%s544_s4 + $0x30] sm:$0xff] %vm294_vm1, %v285_v63 }

// kernel: _lambda_.122
= control target key start
LH: loop header
LB: loop body
LE: loop exit
PB: predicated region body
PF: predicated region fallthrough
CT: control target
= control target key end

     0   :  { %vm24_vm0 = vcmask 293888   ;;  %vm49_vm1 = vcmask 1043456   ;;  %vm158_vm2 = vcmask 130048   ;;  %s323_s1 = inlined_call_operand.vmem [shape: f32[36,16], index: 1, kind: input, shape index: {}]   ;;  %s324_s0 = inlined_call_operand.vmem [shape: f32[64,36], index: 0, kind: input, shape index: {}]   ;;  %s325_s2 = inlined_call_operand.vmem [shape: f32[64,16], index: 2, kind: output, shape index: {}]  }
   0x1   :  { %v19_v0 = vld [vmem:[%s323_s1] sm:$0xff]  ;;  %v20_v1 = vld [vmem:[%s323_s1 + $0x8] sm:$0xff]  ;;  %v21_v2 = vld [vmem:[%s323_s1 + $0x10] sm:$0xff] }
   0x2   :  { %v215_v3 = vpack.c.bf16 %v20_v1, %v19_v0  ;;  %v22_v4 = vld [vmem:[%s323_s1 + $0x18] sm:$0xff]  ;;  %v11_v5 = vld [vmem:[%s324_s0] sm:$0xff]  ;;  %v12_v9 = vld [vmem:[%s324_s0 + $0x8] sm:$0xff] }
   0x3   :  { %v219_v6 = vpack.c.bf16 %v22_v4, %v21_v2  ;;  %203 = vmatprep.mubr.msk.f32.mxu0 %vm24_vm0, %v11_v5  ;;  %v15_v7 = vld [vmem:[%s324_s0 + $0x20] sm:$0xff]  ;;  %v16_v10 = vld [vmem:[%s324_s0 + $0x28] sm:$0xff]  ;;  %v13_v11 = vld [vmem:[%s324_s0 + $0x10] sm:$0xff] }
   0x4   :  { %216 = vmatprep.subr.bf16.mxu0 %v215_v3  ;;  %223 = vmatprep.subr.bf16.mxu1 %v215_v3  ;;  %v23_v8 = vld [vmem:[%s323_s1 + $0x20] sm:$0xf]  ;;  %v17_v12 = vld [vmem:[%s324_s0 + $0x30] sm:$0xff]  ;;  %v14_v13 = vld [vmem:[%s324_s0 + $0x18] sm:$0xff] }
   0x5   :  { %218 = vmatpush3.bf16.msra.mxu0 %v215_v3  ;;  %226 = vmatpush3.bf16.msra.mxu1 %v215_v3  ;;  %v18_v14 = vld [vmem:[%s324_s0 + $0x38] sm:$0xff] }
   0x6   :  { %220 = vmatprep.subr.bf16.mxu0 %v219_v6  ;;  %224 = vmatprep.subr.bf16.mxu1 %v219_v6 }
   0x7   :  { %209 = vmatprep.mubr.msk.f32.mxu1 %vm24_vm0, %v15_v7 }
   0x9   :  { %222 = vmatpush3.bf16.msra.mxu0 %v219_v6  ;;  %227 = vmatpush3.bf16.msra.mxu1 %v219_v6 }
   0xa   :  { %201 = vmatprep.subr.msk.mxu0 %vm49_vm1, %v23_v8  ;;  %225 = vmatprep.subr.msk.mxu1 %vm49_vm1, %v23_v8 }
   0xd   :  { %202 = vmatpush3.msk.msra.mxu0 %vm49_vm1, %v23_v8  ;;  %228 = vmatpush3.msk.msra.mxu1 %vm49_vm1, %v23_v8 }
   0xe   :  { %204 = vmatmul.mubr.msk.f32.vlgmr.msra.gmra.mrb[0].mxu0 %vm24_vm0, %v12_v9  ;;  %210 = vmatmul.mubr.msk.f32.vlgmr.msra.gmra.mrb[0].mxu1 %vm24_vm0, %v16_v10 }
   0xf   :  { %206 = vmatprep.mubr.msk.f32.mxu0 %vm24_vm0, %v13_v11  ;;  %212 = vmatprep.mubr.msk.f32.mxu1 %vm24_vm0, %v17_v12 }
  0x12   :  { %207 = vmatmul.mubr.msk.f32.gmra.mrb[2].mxu0 %vm24_vm0, %v14_v13  ;;  %213 = vmatmul.mubr.msk.f32.gmra.mrb[2].mxu1 %vm24_vm0, %v18_v14 }
  0xe1   :  { %v205_v15 = vpop.f32.mrb[0].mxu0  ;;  %v211_v16 = vpop.f32.mrb[0].mxu1 }
  0xe2   :  { %160 = vst.msk [vmem:[%s325_s2 + $0x8] sm:$0xff] %vm158_vm2, %v205_v15  ;;  %164 = vst.msk [vmem:[%s325_s2 + $0x28] sm:$0xff] %vm158_vm2, %v211_v16  ;;  %v119_v17 = vpop.f32.mrb[1].mxu0  ;;  %v139_v18 = vpop.f32.mrb[1].mxu1 }
  0xe3   :  { %159 = vst.msk [vmem:[%s325_s2] sm:$0xff] %vm158_vm2, %v119_v17  ;;  %163 = vst.msk [vmem:[%s325_s2 + $0x20] sm:$0xff] %vm158_vm2, %v139_v18 }
  0xe5   :  { %v208_v19 = vpop.f32.mrb[2].mxu0  ;;  %v214_v20 = vpop.f32.mrb[2].mxu1 }
  0xe6   :  { %162 = vst.msk [vmem:[%s325_s2 + $0x18] sm:$0xff] %vm158_vm2, %v208_v19  ;;  %166 = vst.msk [vmem:[%s325_s2 + $0x38] sm:$0xff] %vm158_vm2, %v214_v20  ;;  %v129_v21 = vpop.f32.mrb[3].mxu0  ;;  %v149_v22 = vpop.f32.mrb[3].mxu1 }
  0xe7   :  { %161 = vst.msk [vmem:[%s325_s2 + $0x10] sm:$0xff] %vm158_vm2, %v129_v21  ;;  %165 = vst.msk [vmem:[%s325_s2 + $0x30] sm:$0xff] %vm158_vm2, %v149_v22 }

// kernel: _lambda_.116
= control target key start
LH: loop header
LB: loop body
LE: loop exit
PB: predicated region body
PF: predicated region fallthrough
CT: control target
= control target key end

     0   :  { %vm37_vm0 = vcmask 523264   ;;  %vm167_vm1 = vcmask 261120   ;;  %s368_s1 = inlined_call_operand.vmem [shape: f32[64,32], index: 1, kind: input, shape index: {}]   ;;  %s369_s0 = inlined_call_operand.vmem [shape: f32[64,64], index: 0, kind: input, shape index: {}]   ;;  %s370_s2 = inlined_call_operand.vmem [shape: f32[1,32], index: 2, kind: input, shape index: {}]   ;;  %s371_s3 = inlined_call_operand.vmem [shape: f32[64,32], index: 3, kind: output, shape index: {}]  }
   0x1   :  { %v22_v0 = vld [vmem:[%s368_s1] sm:$0xff]  ;;  %v23_v1 = vld [vmem:[%s368_s1 + $0x8] sm:$0xff]  ;;  %v24_v2 = vld [vmem:[%s368_s1 + $0x10] sm:$0xff] }
   0x2   :  { %v233_v3 = vpack.c.bf16 %v23_v1, %v22_v0  ;;  %v25_v4 = vld [vmem:[%s368_s1 + $0x18] sm:$0xff]  ;;  %v26_v6 = vld [vmem:[%s368_s1 + $0x20] sm:$0xff]  ;;  %v27_v7 = vld [vmem:[%s368_s1 + $0x28] sm:$0xff] }
   0x3   :  { %v237_v5 = vpack.c.bf16 %v25_v4, %v24_v2  ;;  %v14_v8 = vld [vmem:[%s369_s0] sm:$0xff]  ;;  %v241_v10 = vpack.c.bf16 %v27_v7, %v26_v6  ;;  %v28_v11 = vld [vmem:[%s368_s1 + $0x30] sm:$0xff]  ;;  %v29_v12 = vld [vmem:[%s368_s1 + $0x38] sm:$0xff] }
   0x4   :  { %234 = vmatprep.subr.bf16.mxu0 %v233_v3  ;;  %249 = vmatprep.subr.bf16.mxu1 %v233_v3  ;;  %v18_v9 = vld [vmem:[%s369_s0 + $0x20] sm:$0xff]  ;;  %v245_v13 = vpack.c.bf16 %v29_v12, %v28_v11  ;;  %v15_v14 = vld [vmem:[%s369_s0 + $0x8] sm:$0xff]  ;;  %v16_v16 = vld [vmem:[%s369_s0 + $0x10] sm:$0xff] }
   0x5   :  { %236 = vmatpush3.bf16.msra.mxu0 %v233_v3  ;;  %253 = vmatpush3.bf16.msra.mxu1 %v233_v3  ;;  %v19_v15 = vld [vmem:[%s369_s0 + $0x28] sm:$0xff]  ;;  %v20_v17 = vld [vmem:[%s369_s0 + $0x30] sm:$0xff]  ;;  %v17_v18 = vld [vmem:[%s369_s0 + $0x18] sm:$0xff] }
   0x6   :  { %238 = vmatprep.subr.bf16.mxu0 %v237_v5  ;;  %250 = vmatprep.subr.bf16.mxu1 %v237_v5  ;;  %v21_v19 = vld [vmem:[%s369_s0 + $0x38] sm:$0xff]  ;;  %v180_v20 = vld [vmem:[%s370_s2] ss:$0 sm:$0xff] }
   0x7   :  { %221 = vmatprep.mubr.msk.f32.mxu0 %vm37_vm0, %v14_v8  ;;  %227 = vmatprep.mubr.msk.f32.mxu1 %vm37_vm0, %v18_v9 }
   0x9   :  { %240 = vmatpush3.bf16.msra.mxu0 %v237_v5  ;;  %254 = vmatpush3.bf16.msra.mxu1 %v237_v5 }
   0xa   :  { %242 = vmatprep.subr.bf16.mxu0 %v241_v10  ;;  %251 = vmatprep.subr.bf16.mxu1 %v241_v10 }
   0xd   :  { %244 = vmatpush3.bf16.msra.mxu0 %v241_v10  ;;  %255 = vmatpush3.bf16.msra.mxu1 %v241_v10 }
   0xe   :  { %246 = vmatprep.subr.bf16.mxu0 %v245_v13  ;;  %252 = vmatprep.subr.bf16.mxu1 %v245_v13 }
  0x11   :  { %248 = vmatpush3.bf16.msra.mxu0 %v245_v13  ;;  %256 = vmatpush3.bf16.msra.mxu1 %v245_v13 }
  0x14   :  { %222 = vmatmul.mubr.msk.f32.vlgmr.msra.gmra.mrb[0].mxu0 %vm37_vm0, %v15_v14  ;;  %228 = vmatmul.mubr.msk.f32.vlgmr.msra.gmra.mrb[0].mxu1 %vm37_vm0, %v19_v15 }
  0x15   :  { %224 = vmatprep.mubr.msk.f32.mxu0 %vm37_vm0, %v16_v16  ;;  %230 = vmatprep.mubr.msk.f32.mxu1 %vm37_vm0, %v20_v17 }
  0x18   :  { %225 = vmatmul.mubr.msk.f32.gmra.mrb[2].mxu0 %vm37_vm0, %v17_v18  ;;  %231 = vmatmul.mubr.msk.f32.gmra.mrb[2].mxu1 %vm37_vm0, %v21_v19 }
  0xe7   :  { %v223_v21 = vpop.f32.mrb[0].mxu0  ;;  %v229_v22 = vpop.f32.mrb[0].mxu1 }
  0xe8   :  { %v134_v23 = vadd.f32 %v223_v21, %v180_v20  ;;  %v154_v24 = vadd.f32 %v229_v22, %v180_v20  ;;  %v128_v25 = vpop.f32.mrb[1].mxu0  ;;  %v148_v26 = vpop.f32.mrb[1].mxu1 }
  0xe9   :  { %v129_v27 = vadd.f32 %v180_v20, %v128_v25  ;;  %v149_v28 = vadd.f32 %v180_v20, %v148_v26 }
  0xea   :  { %169 = vst.msk [vmem:[%s371_s3 + $0x8] sm:$0xff] %vm167_vm1, %v134_v23  ;;  %173 = vst.msk [vmem:[%s371_s3 + $0x28] sm:$0xff] %vm167_vm1, %v154_v24 }
  0xeb   :  { %168 = vst.msk [vmem:[%s371_s3] sm:$0xff] %vm167_vm1, %v129_v27  ;;  %172 = vst.msk [vmem:[%s371_s3 + $0x20] sm:$0xff] %vm167_vm1, %v149_v28  ;;  %v226_v29 = vpop.f32.mrb[2].mxu0  ;;  %v232_v30 = vpop.f32.mrb[2].mxu1 }
  0xec   :  { %v144_v31 = vadd.f32 %v226_v29, %v180_v20  ;;  %v164_v32 = vadd.f32 %v232_v30, %v180_v20  ;;  %v138_v33 = vpop.f32.mrb[3].mxu0  ;;  %v158_v34 = vpop.f32.mrb[3].mxu1 }
  0xed   :  { %v139_v35 = vadd.f32 %v180_v20, %v138_v33  ;;  %v159_v36 = vadd.f32 %v180_v20, %v158_v34 }
  0xee   :  { %171 = vst.msk [vmem:[%s371_s3 + $0x18] sm:$0xff] %vm167_vm1, %v144_v31  ;;  %175 = vst.msk [vmem:[%s371_s3 + $0x38] sm:$0xff] %vm167_vm1, %v164_v32 }
  0xef   :  { %170 = vst.msk [vmem:[%s371_s3 + $0x10] sm:$0xff] %vm167_vm1, %v139_v35  ;;  %174 = vst.msk [vmem:[%s371_s3 + $0x30] sm:$0xff] %vm167_vm1, %v159_v36 }

// kernel: _lambda_.120
= control target key start
LH: loop header
LB: loop body
LE: loop exit
PB: predicated region body
PF: predicated region fallthrough
CT: control target
= control target key end

     0   :  { %vm28_vm0 = vcmask 261120   ;;  %vm304_vm1 = vcmask 130048   ;;  %s559_s0 = inlined_call_operand.vmem [shape: f32[64,32], index: 0, kind: input, shape index: {}]   ;;  %s560_s3 = inlined_call_operand.vmem [shape: f32[32,16], index: 3, kind: input, shape index: {}]   ;;  %s561_s1 = inlined_call_operand.vmem [shape: f32[1,32], index: 1, kind: input, shape index: {}]   ;;  %s562_s2 = inlined_call_operand.vmem [shape: f32[1,32], index: 2, kind: input, shape index: {}]   ;;  %s563_s4 = inlined_call_operand.vmem [shape: f32[1,16], index: 4, kind: input, shape index: {}]   ;;  %s564_s5 = inlined_call_operand.vmem [shape: f32[64,16], index: 5, kind: output, shape index: {}]  }
   0x1   :  { %v20_v0 = vld [vmem:[%s559_s0] sm:$0xff]  ;;  %v21_v1 = vld [vmem:[%s559_s0 + $0x8] sm:$0xff]  ;;  %v22_v8 = vld [vmem:[%s559_s0 + $0x10] sm:$0xff] }
   0x2   :  { %v24_v2 = vld [vmem:[%s559_s0 + $0x20] sm:$0xff]  ;;  %v29_v3 = vsel %vm28_vm0, %v20_v0, 0.0  ;;  %v32_v4 = vsel %vm28_vm0, %v21_v1, 0.0  ;;  %v25_v5 = vld [vmem:[%s559_s0 + $0x28] sm:$0xff]  ;;  %v26_v9 = vld [vmem:[%s559_s0 + $0x30] sm:$0xff]  ;;  %v35_v10 = vsel %vm28_vm0, %v22_v8, 0.0 }
   0x3   :  { %30 = vadd.xlane.f32.xlu0 %v29_v3  ;;  %33 = vadd.xlane.f32.xlu1 %v32_v4  ;;  %v41_v6 = vsel %vm28_vm0, %v24_v2, 0.0  ;;  %v44_v7 = vsel %vm28_vm0, %v25_v5, 0.0  ;;  %v47_v11 = vsel %vm28_vm0, %v26_v9, 0.0  ;;  %v23_v12 = vld [vmem:[%s559_s0 + $0x18] sm:$0xff]  ;;  %v164_v56 = vld [vmem:[%s560_s3] sm:$0xff]  ;;  %v165_v57 = vld [vmem:[%s560_s3 + $0x8] sm:$0xff] }
   0x4   :  { %v27_v13 = vld [vmem:[%s559_s0 + $0x38] sm:$0xff]  ;;  %v38_v14 = vsel %vm28_vm0, %v23_v12, 0.0  ;;  %v360_v58 = vpack.c.bf16 %v165_v57, %v164_v56  ;;  %v166_v59 = vld [vmem:[%s560_s3 + $0x10] sm:$0xff] }
   0x5   :  { %v50_v15 = vsel %vm28_vm0, %v27_v13, 0.0  ;;  %v167_v60 = vld [vmem:[%s560_s3 + $0x18] sm:$0xff] }
   0x6   :  { %361 = vmatprep.subr.bf16.mxu0 %v360_v58  ;;  %368 = vmatprep.subr.bf16.mxu1 %v360_v58  ;;  %v364_v61 = vpack.c.bf16 %v167_v60, %v166_v59 }
   0x7   :  { %42 = vadd.xlane.f32.xlu0 %v41_v6  ;;  %45 = vadd.xlane.f32.xlu1 %v44_v7 }
   0x8   :  { %363 = vmatpush3.bf16.msra.mxu0 %v360_v58  ;;  %370 = vmatpush3.bf16.msra.mxu1 %v360_v58 }
   0x9   :  { %365 = vmatprep.subr.bf16.mxu0 %v364_v61  ;;  %369 = vmatprep.subr.bf16.mxu1 %v364_v61 }
   0xb   :  { %36 = vadd.xlane.f32.xlu0 %v35_v10  ;;  %48 = vadd.xlane.f32.xlu1 %v47_v11 }
   0xc   :  { %367 = vmatpush3.bf16.msra.mxu0 %v364_v61  ;;  %371 = vmatpush3.bf16.msra.mxu1 %v364_v61 }
   0xf   :  { %39 = vadd.xlane.f32.xlu0 %v38_v14  ;;  %51 = vadd.xlane.f32.xlu1 %v50_v15 }
  0x90   :  { %v31_v16 = vpop.xlane.xlu0 %30  ;;  %v34_v17 = vpop.xlane.xlu1 %33 }
  0x91   :  { %v54_v18 = vmul.f32 0.03125, %v31_v16  ;;  %v55_v19 = vmul.f32 0.03125, %v34_v17 }
  0x93   :  { %v450_v20 = vsub.f32 %v20_v0, %v54_v18  ;;  %v452_v21 = vsub.f32 %v21_v1, %v55_v19 }
  0x94   :  { %v43_v22 = vpop.xlane.xlu0 %42  ;;  %v46_v23 = vpop.xlane.xlu1 %45 }
  0x95   :  { %v58_v24 = vmul.f32 0.03125, %v43_v22  ;;  %v59_v25 = vmul.f32 0.03125, %v46_v23  ;;  %v70_v26 = vmul.f32 %v450_v20, %v450_v20  ;;  %v71_v27 = vmul.f32 %v452_v21, %v452_v21  ;;  %v317_v22 = vld [vmem:[%s561_s1] ss:$0 sm:$0xff] }
  0x97   :  { %v458_v28 = vsub.f32 %v24_v2, %v58_v24  ;;  %v460_v29 = vsub.f32 %v25_v5, %v59_v25  ;;  %v78_v30 = vsel %vm28_vm0, %v70_v26, 0.0  ;;  %v81_v33 = vsel %vm28_vm0, %v71_v27, 0.0  ;;  %v318_v26 = vld [vmem:[%s562_s2] ss:$0 sm:$0xff] }
  0x98   :  { %79 = vadd.xlane.f32.xlu0 %v78_v30  ;;  %v37_v31 = vpop.xlane.xlu0 %36  ;;  %v49_v32 = vpop.xlane.xlu1 %48 }
  0x99   :  { %v56_v34 = vmul.f32 0.03125, %v37_v31  ;;  %v60_v35 = vmul.f32 0.03125, %v49_v32  ;;  %v74_v36 = vmul.f32 %v458_v28, %v458_v28  ;;  %v75_v37 = vmul.f32 %v460_v29, %v460_v29 }
  0x9b   :  { %v468_v38 = vsub.f32 %v22_v8, %v56_v34  ;;  %v470_v39 = vsub.f32 %v26_v9, %v60_v35  ;;  %v90_v40 = vsel %vm28_vm0, %v74_v36, 0.0  ;;  %v93_v43 = vsel %vm28_vm0, %v75_v37, 0.0 }
  0x9c   :  { %82 = vadd.xlane.f32.xlu0 %v81_v33  ;;  %91 = vadd.xlane.f32.xlu1 %v90_v40  ;;  %v40_v41 = vpop.xlane.xlu0 %39  ;;  %v52_v42 = vpop.xlane.xlu1 %51 }
  0x9d   :  { %v57_v44 = vmul.f32 0.03125, %v40_v41  ;;  %v61_v45 = vmul.f32 0.03125, %v52_v42  ;;  %v72_v46 = vmul.f32 %v468_v38, %v468_v38  ;;  %v76_v47 = vmul.f32 %v470_v39, %v470_v39 }
  0x9f   :  { %v478_v48 = vsub.f32 %v23_v12, %v57_v44  ;;  %v480_v49 = vsub.f32 %v27_v13, %v61_v45  ;;  %v84_v50 = vsel %vm28_vm0, %v72_v46, 0.0  ;;  %v96_v51 = vsel %vm28_vm0, %v76_v47, 0.0 }
  0xa0   :  { %94 = vadd.xlane.f32.xlu1 %v93_v43  ;;  %85 = vadd.xlane.f32.xlu0 %v84_v50 }
  0xa1   :  { %v73_v52 = vmul.f32 %v478_v48, %v478_v48  ;;  %v77_v53 = vmul.f32 %v480_v49, %v480_v49 }
  0xa3   :  { %v87_v54 = vsel %vm28_vm0, %v73_v52, 0.0  ;;  %v99_v55 = vsel %vm28_vm0, %v77_v53, 0.0 }
  0xa4   :  { %97 = vadd.xlane.f32.xlu1 %v96_v51  ;;  %88 = vadd.xlane.f32.xlu0 %v87_v54 }
  0xa8   :  { %100 = vadd.xlane.f32.xlu1 %v99_v55 }
 0x125   :  { %v80_v62 = vpop.xlane.xlu0 %79 }
 0x126   :  { %v102_v63 = vmul.f32 0.03125, %v80_v62 }
 0x128   :  { %v110_v0 = vadd.f32 1e-05, %v102_v63 }
 0x129   :  { %v92_v1 = vpop.xlane.xlu1 %91  ;;  %v83_v2 = vpop.xlane.xlu0 %82 }
 0x12a   :  { %372 = vrsqrt.f32 %v110_v0  ;;  %v106_v3 = vmul.f32 0.03125, %v92_v1  ;;  %v103_v4 = vmul.f32 0.03125, %v83_v2 }
 0x12c   :  { %v114_v5 = vadd.f32 1e-05, %v106_v3  ;;  %v111_v6 = vadd.f32 1e-05, %v103_v4 }
 0x12d   :  { %v95_v7 = vpop.xlane.xlu1 %94  ;;  %v86_v8 = vpop.xlane.xlu0 %85 }
 0x12e   :  { %374 = vrsqrt.f32 %v114_v5  ;;  %v107_v9 = vmul.f32 0.03125, %v95_v7  ;;  %v104_v10 = vmul.f32 0.03125, %v86_v8 }
 0x12f   :  { %376 = vrsqrt.f32 %v111_v6 }
 0x130   :  { %v115_v11 = vadd.f32 1e-05, %v107_v9  ;;  %v112_v12 = vadd.f32 1e-05, %v104_v10 }
 0x131   :  { %v98_v13 = vpop.xlane.xlu1 %97  ;;  %v89_v14 = vpop.xlane.xlu0 %88 }
 0x132   :  { %378 = vrsqrt.f32 %v115_v11  ;;  %v108_v15 = vmul.f32 0.03125, %v98_v13  ;;  %v105_v16 = vmul.f32 0.03125, %v89_v14 }
 0x133   :  { %380 = vrsqrt.f32 %v112_v12 }
 0x134   :  { %v373_v17 = vpop.eup %372  ;;  %v116_v18 = vadd.f32 1e-05, %v108_v15  ;;  %v113_v19 = vadd.f32 1e-05, %v105_v16 }
 0x135   :  { %v101_v23 = vpop.xlane.xlu1 %100  ;;  %v126_v24 = vmul.f32 %v373_v17, %v450_v20 }
 0x136   :  { %382 = vrsqrt.f32 %v116_v18  ;;  %v109_v25 = vmul.f32 0.03125, %v101_v23 }
 0x137   :  { %384 = vrsqrt.f32 %v113_v19  ;;  %v141_v27 = vmul.f32 %v317_v22, %v126_v24 }
 0x138   :  { %v375_v30 = vpop.eup %374  ;;  %v117_v31 = vadd.f32 1e-05, %v109_v25 }
 0x139   :  { %v377_v32 = vpop.eup %376  ;;  %v156_v33 = vadd.f32 %v318_v26, %v141_v27  ;;  %v130_v34 = vmul.f32 %v375_v30, %v458_v28 }
 0x13a   :  { %386 = vrsqrt.f32 %v117_v31  ;;  %v127_v35 = vmul.f32 %v377_v32, %v452_v21 }
 0x13b   :  { %348 = vmatprep.mubr.msk.f32.mxu0 %vm28_vm0, %v156_v33  ;;  %v145_v20 = vmul.f32 %v317_v22, %v130_v34 }
 0x13c   :  { %v379_v36 = vpop.eup %378  ;;  %v142_v37 = vmul.f32 %v317_v22, %v127_v35 }
 0x13d   :  { %v381_v40 = vpop.eup %380  ;;  %v160_v41 = vadd.f32 %v318_v26, %v145_v20  ;;  %v131_v42 = vmul.f32 %v379_v36, %v460_v29 }
 0x13e   :  { %v157_v43 = vadd.f32 %v318_v26, %v142_v37  ;;  %v128_v44 = vmul.f32 %v381_v40, %v468_v38 }
 0x13f   :  { %354 = vmatprep.mubr.msk.f32.mxu1 %vm28_vm0, %v160_v41  ;;  %v146_v45 = vmul.f32 %v317_v22, %v131_v42 }
 0x140   :  { %v383_v46 = vpop.eup %382  ;;  %349 = vmatmul.mubr.msk.f32.vlgmr.msra.gmra.mrb[0].mxu0 %vm28_vm0, %v157_v43  ;;  %v143_v28 = vmul.f32 %v317_v22, %v128_v44 }
 0x141   :  { %v385_v21 = vpop.eup %384  ;;  %v161_v47 = vadd.f32 %v318_v26, %v146_v45  ;;  %v132_v50 = vmul.f32 %v383_v46, %v470_v39 }
 0x142   :  { %v158_v51 = vadd.f32 %v318_v26, %v143_v28  ;;  %v129_v52 = vmul.f32 %v385_v21, %v478_v48  ;;  %v319_v48 = vld [vmem:[%s563_s4] ss:$0 sm:$0xff] }
 0x143   :  { %355 = vmatmul.mubr.msk.f32.vlgmr.msra.gmra.mrb[0].mxu1 %vm28_vm0, %v161_v47  ;;  %v147_v29 = vmul.f32 %v317_v22, %v132_v50 }
 0x144   :  { %v387_v53 = vpop.eup %386  ;;  %351 = vmatprep.mubr.msk.f32.mxu0 %vm28_vm0, %v158_v51  ;;  %v144_v38 = vmul.f32 %v317_v22, %v129_v52 }
 0x145   :  { %v162_v54 = vadd.f32 %v318_v26, %v147_v29  ;;  %v133_v55 = vmul.f32 %v387_v53, %v480_v49 }
 0x146   :  { %v159_v56 = vadd.f32 %v318_v26, %v144_v38 }
 0x147   :  { %357 = vmatprep.mubr.msk.f32.mxu1 %vm28_vm0, %v162_v54  ;;  %v148_v57 = vmul.f32 %v317_v22, %v133_v55 }
 0x148   :  { %352 = vmatmul.mubr.msk.f32.gmra.mrb[2].mxu0 %vm28_vm0, %v159_v56 }
 0x149   :  { %v163_v39 = vadd.f32 %v318_v26, %v148_v57 }
 0x14b   :  { %358 = vmatmul.mubr.msk.f32.gmra.mrb[2].mxu1 %vm28_vm0, %v163_v39 }
 0x213   :  { %v350_v58 = vpop.f32.mrb[0].mxu0 }
 0x214   :  { %v271_v59 = vadd.f32 %v350_v58, %v319_v48  ;;  %v265_v60 = vpop.f32.mrb[1].mxu0 }
 0x215   :  { %v266_v61 = vadd.f32 %v319_v48, %v265_v60 }
 0x216   :  { %306 = vst.msk [vmem:[%s564_s5 + $0x8] sm:$0xff] %vm304_vm1, %v271_v59  ;;  %v356_v49 = vpop.f32.mrb[0].mxu1 }
 0x217   :  { %305 = vst.msk [vmem:[%s564_s5] sm:$0xff] %vm304_vm1, %v266_v61  ;;  %v291_v62 = vadd.f32 %v356_v49, %v319_v48  ;;  %v285_v63 = vpop.f32.mrb[1].mxu1 }
 0x218   :  { %v286_v0 = vadd.f32 %v319_v48, %v285_v63 }
 0x219   :  { %310 = vst.msk [vmem:[%s564_s5 + $0x28] sm:$0xff] %vm304_vm1, %v291_v62 }
 0x21a   :  { %309 = vst.msk [vmem:[%s564_s5 + $0x20] sm:$0xff] %vm304_vm1, %v286_v0 }
 0x21b   :  { %v353_v1 = vpop.f32.mrb[2].mxu0 }
 0x21c   :  { %v281_v2 = vadd.f32 %v353_v1, %v319_v48  ;;  %v275_v3 = vpop.f32.mrb[3].mxu0 }
 0x21d   :  { %v276_v4 = vadd.f32 %v319_v48, %v275_v3 }
 0x21e   :  { %308 = vst.msk [vmem:[%s564_s5 + $0x18] sm:$0xff] %vm304_vm1, %v281_v2  ;;  %v359_v5 = vpop.f32.mrb[2].mxu1 }
 0x21f   :  { %307 = vst.msk [vmem:[%s564_s5 + $0x10] sm:$0xff] %vm304_vm1, %v276_v4  ;;  %v301_v6 = vadd.f32 %v359_v5, %v319_v48  ;;  %v295_v7 = vpop.f32.mrb[3].mxu1 }
 0x220   :  { %v296_v8 = vadd.f32 %v319_v48, %v295_v7 }
 0x221   :  { %312 = vst.msk [vmem:[%s564_s5 + $0x38] sm:$0xff] %vm304_vm1, %v301_v6 }
 0x222   :  { %311 = vst.msk [vmem:[%s564_s5 + $0x30] sm:$0xff] %vm304_vm1, %v296_v8 }

// kernel: _lambda_.121
= control target key start
LH: loop header
LB: loop body
LE: loop exit
PB: predicated region body
PF: predicated region fallthrough
CT: control target
= control target key end

     0   :  { %vm28_vm0 = vcmask 130048   ;;  %s538_s0 = inlined_call_operand.vmem [shape: f32[64,16], index: 0, kind: input, shape index: {}]   ;;  %s539_s3 = inlined_call_operand.vmem [shape: f32[16,16], index: 3, kind: input, shape index: {}]   ;;  %s540_s1 = inlined_call_operand.vmem [shape: f32[1,16], index: 1, kind: input, shape index: {}]   ;;  %s541_s2 = inlined_call_operand.vmem [shape: f32[1,16], index: 2, kind: input, shape index: {}, may-alias: {2,4}]   ;;  %s542_s4 = inlined_call_operand.vmem [shape: f32[1,16], index: 4, kind: input, shape index: {}, may-alias: {2,4}]   ;;  %s543_s5 = inlined_call_operand.vmem [shape: f32[64,16], index: 5, kind: output, shape index: {}]  }
   0x1   :  { %v20_v0 = vld [vmem:[%s538_s0] sm:$0xff]  ;;  %v21_v1 = vld [vmem:[%s538_s0 + $0x8] sm:$0xff]  ;;  %v22_v8 = vld [vmem:[%s538_s0 + $0x10] sm:$0xff] }
   0x2   :  { %v24_v2 = vld [vmem:[%s538_s0 + $0x20] sm:$0xff]  ;;  %v29_v3 = vsel %vm28_vm0, %v20_v0, 0.0  ;;  %v32_v4 = vsel %vm28_vm0, %v21_v1, 0.0  ;;  %v25_v5 = vld [vmem:[%s538_s0 + $0x28] sm:$0xff]  ;;  %v26_v9 = vld [vmem:[%s538_s0 + $0x30] sm:$0xff]  ;;  %v35_v10 = vsel %vm28_vm0, %v22_v8, 0.0 }
   0x3   :  { %30 = vadd.xlane.f32.xlu0 %v29_v3  ;;  %33 = vadd.xlane.f32.xlu1 %v32_v4  ;;  %v41_v6 = vsel %vm28_vm0, %v24_v2, 0.0  ;;  %v44_v7 = vsel %vm28_vm0, %v25_v5, 0.0  ;;  %v47_v11 = vsel %vm28_vm0, %v26_v9, 0.0  ;;  %v23_v12 = vld [vmem:[%s538_s0 + $0x18] sm:$0xff]  ;;  %v164_v56 = vld [vmem:[%s539_s3] sm:$0xff]  ;;  %v165_v57 = vld [vmem:[%s539_s3 + $0x8] sm:$0xff] }
   0x4   :  { %v27_v13 = vld [vmem:[%s538_s0 + $0x38] sm:$0xff]  ;;  %v38_v14 = vsel %vm28_vm0, %v23_v12, 0.0  ;;  %v351_v58 = vpack.c.bf16 %v165_v57, %v164_v56 }
   0x5   :  { %v50_v15 = vsel %vm28_vm0, %v27_v13, 0.0 }
   0x6   :  { %352 = vmatprep.subr.bf16.mxu0 %v351_v58  ;;  %355 = vmatprep.subr.bf16.mxu1 %v351_v58 }
   0x7   :  { %42 = vadd.xlane.f32.xlu0 %v41_v6  ;;  %45 = vadd.xlane.f32.xlu1 %v44_v7 }
   0x8   :  { %354 = vmatpush3.bf16.msra.mxu0 %v351_v58  ;;  %356 = vmatpush3.bf16.msra.mxu1 %v351_v58 }
   0xb   :  { %36 = vadd.xlane.f32.xlu0 %v35_v10  ;;  %48 = vadd.xlane.f32.xlu1 %v47_v11 }
   0xf   :  { %39 = vadd.xlane.f32.xlu0 %v38_v14  ;;  %51 = vadd.xlane.f32.xlu1 %v50_v15 }
  0x90   :  { %v31_v16 = vpop.xlane.xlu0 %30  ;;  %v34_v17 = vpop.xlane.xlu1 %33 }
  0x91   :  { %v54_v18 = vmul.f32 0.0625, %v31_v16  ;;  %v55_v19 = vmul.f32 0.0625, %v34_v17  ;;  %v314_v17 = vld [vmem:[%s540_s1] ss:$0 sm:$0xff] }
  0x93   :  { %v435_v20 = vsub.f32 %v20_v0, %v54_v18  ;;  %v437_v21 = vsub.f32 %v21_v1, %v55_v19 }
  0x94   :  { %v43_v22 = vpop.xlane.xlu0 %42  ;;  %v46_v23 = vpop.xlane.xlu1 %45 }
  0x95   :  { %v58_v24 = vmul.f32 0.0625, %v43_v22  ;;  %v59_v25 = vmul.f32 0.0625, %v46_v23  ;;  %v70_v26 = vmul.f32 %v435_v20, %v435_v20  ;;  %v71_v27 = vmul.f32 %v437_v21, %v437_v21  ;;  %v315_v23 = vld [vmem:[%s541_s2] ss:$0 sm:$0xff] }
  0x97   :  { %v443_v28 = vsub.f32 %v24_v2, %v58_v24  ;;  %v445_v29 = vsub.f32 %v25_v5, %v59_v25  ;;  %v78_v30 = vsel %vm28_vm0, %v70_v26, 0.0  ;;  %v81_v33 = vsel %vm28_vm0, %v71_v27, 0.0 }
  0x98   :  { %79 = vadd.xlane.f32.xlu0 %v78_v30  ;;  %v37_v31 = vpop.xlane.xlu0 %36  ;;  %v49_v32 = vpop.xlane.xlu1 %48 }
  0x99   :  { %v56_v34 = vmul.f32 0.0625, %v37_v31  ;;  %v60_v35 = vmul.f32 0.0625, %v49_v32  ;;  %v74_v36 = vmul.f32 %v443_v28, %v443_v28  ;;  %v75_v37 = vmul.f32 %v445_v29, %v445_v29 }
  0x9b   :  { %v453_v38 = vsub.f32 %v22_v8, %v56_v34  ;;  %v455_v39 = vsub.f32 %v26_v9, %v60_v35  ;;  %v90_v40 = vsel %vm28_vm0, %v74_v36, 0.0  ;;  %v93_v43 = vsel %vm28_vm0, %v75_v37, 0.0 }
  0x9c   :  { %82 = vadd.xlane.f32.xlu0 %v81_v33  ;;  %91 = vadd.xlane.f32.xlu1 %v90_v40  ;;  %v40_v41 = vpop.xlane.xlu0 %39  ;;  %v52_v42 = vpop.xlane.xlu1 %51 }
  0x9d   :  { %v57_v44 = vmul.f32 0.0625, %v40_v41  ;;  %v61_v45 = vmul.f32 0.0625, %v52_v42  ;;  %v72_v46 = vmul.f32 %v453_v38, %v453_v38  ;;  %v76_v47 = vmul.f32 %v455_v39, %v455_v39 }
  0x9f   :  { %v463_v48 = vsub.f32 %v23_v12, %v57_v44  ;;  %v465_v49 = vsub.f32 %v27_v13, %v61_v45  ;;  %v84_v50 = vsel %vm28_vm0, %v72_v46, 0.0  ;;  %v96_v51 = vsel %vm28_vm0, %v76_v47, 0.0 }
  0xa0   :  { %94 = vadd.xlane.f32.xlu1 %v93_v43  ;;  %85 = vadd.xlane.f32.xlu0 %v84_v50 }
  0xa1   :  { %v73_v52 = vmul.f32 %v463_v48, %v463_v48  ;;  %v77_v53 = vmul.f32 %v465_v49, %v465_v49 }
  0xa3   :  { %v87_v54 = vsel %vm28_vm0, %v73_v52, 0.0  ;;  %v99_v55 = vsel %vm28_vm0, %v77_v53, 0.0 }
  0xa4   :  { %97 = vadd.xlane.f32.xlu1 %v96_v51  ;;  %88 = vadd.xlane.f32.xlu0 %v87_v54 }
  0xa8   :  { %100 = vadd.xlane.f32.xlu1 %v99_v55 }
 0x125   :  { %v80_v59 = vpop.xlane.xlu0 %79 }
 0x126   :  { %v102_v60 = vmul.f32 0.0625, %v80_v59 }
 0x128   :  { %v110_v61 = vadd.f32 1e-05, %v102_v60 }
 0x129   :  { %v92_v62 = vpop.xlane.xlu1 %91  ;;  %v83_v63 = vpop.xlane.xlu0 %82 }
 0x12a   :  { %357 = vrsqrt.f32 %v110_v61  ;;  %v106_v0 = vmul.f32 0.0625, %v92_v62  ;;  %v103_v1 = vmul.f32 0.0625, %v83_v63 }
 0x12c   :  { %v114_v2 = vadd.f32 1e-05, %v106_v0  ;;  %v111_v3 = vadd.f32 1e-05, %v103_v1 }
 0x12d   :  { %v95_v4 = vpop.xlane.xlu1 %94  ;;  %v86_v5 = vpop.xlane.xlu0 %85 }
 0x12e   :  { %359 = vrsqrt.f32 %v114_v2  ;;  %v107_v6 = vmul.f32 0.0625, %v95_v4  ;;  %v104_v7 = vmul.f32 0.0625, %v86_v5 }
 0x12f   :  { %361 = vrsqrt.f32 %v111_v3 }
 0x130   :  { %v115_v8 = vadd.f32 1e-05, %v107_v6  ;;  %v112_v9 = vadd.f32 1e-05, %v104_v7 }
 0x131   :  { %v98_v10 = vpop.xlane.xlu1 %97  ;;  %v89_v11 = vpop.xlane.xlu0 %88 }
 0x132   :  { %363 = vrsqrt.f32 %v115_v8  ;;  %v108_v12 = vmul.f32 0.0625, %v98_v10  ;;  %v105_v13 = vmul.f32 0.0625, %v89_v11 }
 0x133   :  { %365 = vrsqrt.f32 %v112_v9 }
 0x134   :  { %v358_v14 = vpop.eup %357  ;;  %v116_v15 = vadd.f32 1e-05, %v108_v12  ;;  %v113_v16 = vadd.f32 1e-05, %v105_v13 }
 0x135   :  { %v101_v18 = vpop.xlane.xlu1 %100  ;;  %v126_v19 = vmul.f32 %v358_v14, %v435_v20 }
 0x136   :  { %367 = vrsqrt.f32 %v116_v15  ;;  %v109_v22 = vmul.f32 0.0625, %v101_v18 }
 0x137   :  { %369 = vrsqrt.f32 %v113_v16  ;;  %v141_v24 = vmul.f32 %v314_v17, %v126_v19 }
 0x138   :  { %v360_v25 = vpop.eup %359  ;;  %v117_v26 = vadd.f32 1e-05, %v109_v22 }
 0x139   :  { %v362_v27 = vpop.eup %361  ;;  %v156_v30 = vadd.f32 %v315_v23, %v141_v24  ;;  %v130_v31 = vmul.f32 %v360_v25, %v443_v28 }
 0x13a   :  { %371 = vrsqrt.f32 %v117_v26  ;;  %v127_v32 = vmul.f32 %v362_v27, %v437_v21 }
 0x13b   :  { %339 = vmatprep.mubr.msk.f32.mxu0 %vm28_vm0, %v156_v30  ;;  %v145_v20 = vmul.f32 %v314_v17, %v130_v31 }
 0x13c   :  { %v364_v33 = vpop.eup %363  ;;  %v142_v34 = vmul.f32 %v314_v17, %v127_v32 }
 0x13d   :  { %v366_v35 = vpop.eup %365  ;;  %v160_v36 = vadd.f32 %v315_v23, %v145_v20  ;;  %v131_v37 = vmul.f32 %v364_v33, %v445_v29 }
 0x13e   :  { %v157_v40 = vadd.f32 %v315_v23, %v142_v34  ;;  %v128_v41 = vmul.f32 %v366_v35, %v453_v38 }
 0x13f   :  { %345 = vmatprep.mubr.msk.f32.mxu1 %vm28_vm0, %v160_v36  ;;  %v146_v42 = vmul.f32 %v314_v17, %v131_v37 }
 0x140   :  { %v368_v43 = vpop.eup %367  ;;  %340 = vmatmul.mubr.msk.f32.vlgmr.msra.gmra.mrb[0].mxu0 %vm28_vm0, %v157_v40  ;;  %v143_v28 = vmul.f32 %v314_v17, %v128_v41 }
 0x141   :  { %v370_v21 = vpop.eup %369  ;;  %v161_v44 = vadd.f32 %v315_v23, %v146_v42  ;;  %v132_v45 = vmul.f32 %v368_v43, %v455_v39 }
 0x142   :  { %v158_v46 = vadd.f32 %v315_v23, %v143_v28  ;;  %v129_v47 = vmul.f32 %v370_v21, %v463_v48  ;;  %v316_v48 = vld [vmem:[%s542_s4] ss:$0 sm:$0xff] }
 0x143   :  { %346 = vmatmul.mubr.msk.f32.vlgmr.msra.gmra.mrb[0].mxu1 %vm28_vm0, %v161_v44  ;;  %v147_v29 = vmul.f32 %v314_v17, %v132_v45 }
 0x144   :  { %v372_v50 = vpop.eup %371  ;;  %342 = vmatprep.mubr.msk.f32.mxu0 %vm28_vm0, %v158_v46  ;;  %v144_v38 = vmul.f32 %v314_v17, %v129_v47 }
 0x145   :  { %v162_v51 = vadd.f32 %v315_v23, %v147_v29  ;;  %v133_v52 = vmul.f32 %v372_v50, %v465_v49 }
 0x146   :  { %v159_v53 = vadd.f32 %v315_v23, %v144_v38 }
 0x147   :  { %348 = vmatprep.mubr.msk.f32.mxu1 %vm28_vm0, %v162_v51  ;;  %v148_v54 = vmul.f32 %v314_v17, %v133_v52 }
 0x148   :  { %343 = vmatmul.mubr.msk.f32.gmra.mrb[2].mxu0 %vm28_vm0, %v159_v53 }
 0x149   :  { %v163_v39 = vadd.f32 %v315_v23, %v148_v54 }
 0x14b   :  { %349 = vmatmul.mubr.msk.f32.gmra.mrb[2].mxu1 %vm28_vm0, %v163_v39 }
 0x213   :  { %v341_v55 = vpop.f32.mrb[0].mxu0 }
 0x214   :  { %v269_v56 = vadd.f32 %v341_v55, %v316_v48  ;;  %v263_v57 = vpop.f32.mrb[1].mxu0 }
 0x215   :  { %v264_v58 = vadd.f32 %v316_v48, %v263_v57 }
 0x216   :  { %303 = vst.msk [vmem:[%s543_s5 + $0x8] sm:$0xff] %vm28_vm0, %v269_v56  ;;  %v347_v49 = vpop.f32.mrb[0].mxu1 }
 0x217   :  { %302 = vst.msk [vmem:[%s543_s5] sm:$0xff] %vm28_vm0, %v264_v58  ;;  %v289_v59 = vadd.f32 %v347_v49, %v316_v48  ;;  %v283_v60 = vpop.f32.mrb[1].mxu1 }
 0x218   :  { %v284_v61 = vadd.f32 %v316_v48, %v283_v60 }
 0x219   :  { %307 = vst.msk [vmem:[%s543_s5 + $0x28] sm:$0xff] %vm28_vm0, %v289_v59 }
 0x21a   :  { %306 = vst.msk [vmem:[%s543_s5 + $0x20] sm:$0xff] %vm28_vm0, %v284_v61 }
 0x21b   :  { %v344_v62 = vpop.f32.mrb[2].mxu0 }
 0x21c   :  { %v279_v63 = vadd.f32 %v344_v62, %v316_v48  ;;  %v273_v0 = vpop.f32.mrb[3].mxu0 }
 0x21d   :  { %v274_v1 = vadd.f32 %v316_v48, %v273_v0 }
 0x21e   :  { %305 = vst.msk [vmem:[%s543_s5 + $0x18] sm:$0xff] %vm28_vm0, %v279_v63  ;;  %v350_v2 = vpop.f32.mrb[2].mxu1 }
 0x21f   :  { %304 = vst.msk [vmem:[%s543_s5 + $0x10] sm:$0xff] %vm28_vm0, %v274_v1  ;;  %v299_v3 = vadd.f32 %v350_v2, %v316_v48  ;;  %v293_v4 = vpop.f32.mrb[3].mxu1 }
 0x220   :  { %v294_v5 = vadd.f32 %v316_v48, %v293_v4 }
 0x221   :  { %309 = vst.msk [vmem:[%s543_s5 + $0x38] sm:$0xff] %vm28_vm0, %v299_v3 }
 0x222   :  { %308 = vst.msk [vmem:[%s543_s5 + $0x30] sm:$0xff] %vm28_vm0, %v294_v5 }

// kernel: _lambda_.123
= control target key start
LH: loop header
LB: loop body
LE: loop exit
PB: predicated region body
PF: predicated region fallthrough
CT: control target
= control target key end

     0   :  { %vm22_vm0 = vcmask 130048   ;;  %s326_s0 = inlined_call_operand.vmem [shape: f32[64,16], index: 0, kind: input, shape index: {}]   ;;  %s327_s1 = inlined_call_operand.vmem [shape: f32[1,16], index: 1, kind: input, shape index: {}]   ;;  %s328_s2 = inlined_call_operand.vmem [shape: f32[1,16], index: 2, kind: input, shape index: {}]   ;;  %s329_s3 = inlined_call_operand.vmem [shape: f32[64,16], index: 3, kind: output, shape index: {}]  }
   0x1   :  { %v14_v0 = vld [vmem:[%s326_s0] sm:$0xff]  ;;  %v16_v1 = vld [vmem:[%s326_s0 + $0x10] sm:$0xff]  ;;  %v15_v2 = vld [vmem:[%s326_s0 + $0x8] sm:$0xff] }
   0x2   :  { %v23_v3 = vsel %vm22_vm0, %v14_v0, 0.0  ;;  %v29_v4 = vsel %vm22_vm0, %v16_v1, 0.0  ;;  %v17_v5 = vld [vmem:[%s326_s0 + $0x18] sm:$0xff]  ;;  %v26_v6 = vsel %vm22_vm0, %v15_v2, 0.0  ;;  %v18_v8 = vld [vmem:[%s326_s0 + $0x20] sm:$0xff]  ;;  %v19_v9 = vld [vmem:[%s326_s0 + $0x28] sm:$0xff] }
   0x3   :  { %24 = vadd.xlane.f32.xlu0 %v23_v3  ;;  %30 = vadd.xlane.f32.xlu1 %v29_v4  ;;  %v32_v7 = vsel %vm22_vm0, %v17_v5, 0.0  ;;  %v35_v10 = vsel %vm22_vm0, %v18_v8, 0.0  ;;  %v38_v11 = vsel %vm22_vm0, %v19_v9, 0.0  ;;  %v20_v12 = vld [vmem:[%s326_s0 + $0x30] sm:$0xff]  ;;  %v21_v13 = vld [vmem:[%s326_s0 + $0x38] sm:$0xff] }
   0x4   :  { %v41_v14 = vsel %vm22_vm0, %v20_v12, 0.0  ;;  %v44_v15 = vsel %vm22_vm0, %v21_v13, 0.0 }
   0x7   :  { %27 = vadd.xlane.f32.xlu0 %v26_v6  ;;  %33 = vadd.xlane.f32.xlu1 %v32_v7 }
   0xb   :  { %36 = vadd.xlane.f32.xlu0 %v35_v10  ;;  %39 = vadd.xlane.f32.xlu1 %v38_v11 }
   0xf   :  { %42 = vadd.xlane.f32.xlu0 %v41_v14  ;;  %45 = vadd.xlane.f32.xlu1 %v44_v15 }
  0x90   :  { %v25_v16 = vpop.xlane.xlu0 %24  ;;  %v31_v17 = vpop.xlane.xlu1 %30 }
  0x91   :  { %v48_v18 = vmul.f32 0.0625, %v25_v16  ;;  %v50_v19 = vmul.f32 0.0625, %v31_v17  ;;  %v171_v17 = vld [vmem:[%s328_s2] ss:$0 sm:$0xff] }
  0x93   :  { %v240_v20 = vsub.f32 %v14_v0, %v48_v18  ;;  %v242_v21 = vsub.f32 %v16_v1, %v50_v19 }
  0x94   :  { %v28_v22 = vpop.xlane.xlu0 %27  ;;  %v34_v23 = vpop.xlane.xlu1 %33 }
  0x95   :  { %v49_v24 = vmul.f32 0.0625, %v28_v22  ;;  %v51_v25 = vmul.f32 0.0625, %v34_v23  ;;  %v64_v26 = vmul.f32 %v240_v20, %v240_v20  ;;  %v66_v27 = vmul.f32 %v242_v21, %v242_v21 }
  0x97   :  { %v248_v28 = vsub.f32 %v15_v2, %v49_v24  ;;  %v250_v29 = vsub.f32 %v17_v5, %v51_v25  ;;  %v72_v30 = vsel %vm22_vm0, %v64_v26, 0.0  ;;  %v78_v33 = vsel %vm22_vm0, %v66_v27, 0.0 }
  0x98   :  { %73 = vadd.xlane.f32.xlu0 %v72_v30  ;;  %v37_v31 = vpop.xlane.xlu0 %36  ;;  %v40_v32 = vpop.xlane.xlu1 %39 }
  0x99   :  { %v52_v34 = vmul.f32 0.0625, %v37_v31  ;;  %v53_v35 = vmul.f32 0.0625, %v40_v32  ;;  %v65_v36 = vmul.f32 %v248_v28, %v248_v28  ;;  %v67_v37 = vmul.f32 %v250_v29, %v250_v29 }
  0x9b   :  { %v258_v38 = vsub.f32 %v18_v8, %v52_v34  ;;  %v260_v39 = vsub.f32 %v19_v9, %v53_v35  ;;  %v75_v40 = vsel %vm22_vm0, %v65_v36, 0.0  ;;  %v81_v43 = vsel %vm22_vm0, %v67_v37, 0.0 }
  0x9c   :  { %79 = vadd.xlane.f32.xlu0 %v78_v33  ;;  %76 = vadd.xlane.f32.xlu1 %v75_v40  ;;  %v43_v41 = vpop.xlane.xlu0 %42  ;;  %v46_v42 = vpop.xlane.xlu1 %45 }
  0x9d   :  { %v54_v44 = vmul.f32 0.0625, %v43_v41  ;;  %v55_v45 = vmul.f32 0.0625, %v46_v42  ;;  %v68_v46 = vmul.f32 %v258_v38, %v258_v38  ;;  %v69_v47 = vmul.f32 %v260_v39, %v260_v39 }
  0x9f   :  { %v268_v48 = vsub.f32 %v20_v12, %v54_v44  ;;  %v270_v49 = vsub.f32 %v21_v13, %v55_v45  ;;  %v84_v50 = vsel %vm22_vm0, %v68_v46, 0.0  ;;  %v87_v51 = vsel %vm22_vm0, %v69_v47, 0.0  ;;  %v170_v12 = vld [vmem:[%s327_s1] ss:$0 sm:$0xff] }
  0xa0   :  { %82 = vadd.xlane.f32.xlu1 %v81_v43  ;;  %85 = vadd.xlane.f32.xlu0 %v84_v50 }
  0xa1   :  { %v70_v52 = vmul.f32 %v268_v48, %v268_v48  ;;  %v71_v53 = vmul.f32 %v270_v49, %v270_v49 }
  0xa3   :  { %v90_v54 = vsel %vm22_vm0, %v70_v52, 0.0  ;;  %v93_v55 = vsel %vm22_vm0, %v71_v53, 0.0 }
  0xa4   :  { %88 = vadd.xlane.f32.xlu1 %v87_v51  ;;  %91 = vadd.xlane.f32.xlu0 %v90_v54 }
  0xa8   :  { %94 = vadd.xlane.f32.xlu1 %v93_v55 }
 0x125   :  { %v74_v56 = vpop.xlane.xlu0 %73 }
 0x126   :  { %v96_v57 = vmul.f32 0.0625, %v74_v56 }
 0x128   :  { %v104_v58 = vadd.f32 1e-05, %v96_v57 }
 0x129   :  { %v77_v59 = vpop.xlane.xlu1 %76  ;;  %v80_v60 = vpop.xlane.xlu0 %79 }
 0x12a   :  { %172 = vrsqrt.f32 %v104_v58  ;;  %v97_v61 = vmul.f32 0.0625, %v77_v59  ;;  %v98_v62 = vmul.f32 0.0625, %v80_v60 }
 0x12c   :  { %v105_v63 = vadd.f32 1e-05, %v97_v61  ;;  %v106_v0 = vadd.f32 1e-05, %v98_v62 }
 0x12d   :  { %v83_v1 = vpop.xlane.xlu1 %82  ;;  %v86_v2 = vpop.xlane.xlu0 %85 }
 0x12e   :  { %174 = vrsqrt.f32 %v105_v63  ;;  %v99_v3 = vmul.f32 0.0625, %v83_v1  ;;  %v100_v4 = vmul.f32 0.0625, %v86_v2 }
 0x12f   :  { %176 = vrsqrt.f32 %v106_v0 }
 0x130   :  { %v107_v5 = vadd.f32 1e-05, %v99_v3  ;;  %v108_v6 = vadd.f32 1e-05, %v100_v4 }
 0x131   :  { %v89_v7 = vpop.xlane.xlu1 %88  ;;  %v92_v8 = vpop.xlane.xlu0 %91 }
 0x132   :  { %178 = vrsqrt.f32 %v107_v5  ;;  %v101_v9 = vmul.f32 0.0625, %v89_v7  ;;  %v102_v10 = vmul.f32 0.0625, %v92_v8 }
 0x133   :  { %180 = vrsqrt.f32 %v108_v6 }
 0x134   :  { %v173_v11 = vpop.eup %172  ;;  %v109_v13 = vadd.f32 1e-05, %v101_v9  ;;  %v110_v14 = vadd.f32 1e-05, %v102_v10 }
 0x135   :  { %v120_v15 = vmul.f32 %v173_v11, %v240_v20  ;;  %v95_v16 = vpop.xlane.xlu1 %94 }
 0x136   :  { %182 = vrsqrt.f32 %v109_v13  ;;  %v103_v18 = vmul.f32 0.0625, %v95_v16 }
 0x137   :  { %v135_v19 = vmul.f32 %v170_v12, %v120_v15  ;;  %184 = vrsqrt.f32 %v110_v14 }
 0x138   :  { %v175_v22 = vpop.eup %174  ;;  %v111_v23 = vadd.f32 1e-05, %v103_v18 }
 0x139   :  { %v177_v24 = vpop.eup %176  ;;  %v150_v25 = vadd.f32 %v171_v17, %v135_v19  ;;  %v121_v26 = vmul.f32 %v175_v22, %v248_v28 }
 0x13a   :  { %v122_v27 = vmul.f32 %v177_v24, %v242_v21  ;;  %186 = vrsqrt.f32 %v111_v23 }
 0x13b   :  { %158 = vst.msk [vmem:[%s329_s3] sm:$0xff] %vm22_vm0, %v150_v25  ;;  %v136_v20 = vmul.f32 %v170_v12, %v121_v26 }
 0x13c   :  { %v179_v30 = vpop.eup %178  ;;  %v137_v31 = vmul.f32 %v170_v12, %v122_v27 }
 0x13d   :  { %v181_v32 = vpop.eup %180  ;;  %v151_v33 = vadd.f32 %v171_v17, %v136_v20  ;;  %v123_v34 = vmul.f32 %v179_v30, %v250_v29 }
 0x13e   :  { %v152_v35 = vadd.f32 %v171_v17, %v137_v31  ;;  %v124_v36 = vmul.f32 %v181_v32, %v258_v38 }
 0x13f   :  { %159 = vst.msk [vmem:[%s329_s3 + $0x8] sm:$0xff] %vm22_vm0, %v151_v33  ;;  %v138_v21 = vmul.f32 %v170_v12, %v123_v34 }
 0x140   :  { %v183_v28 = vpop.eup %182  ;;  %160 = vst.msk [vmem:[%s329_s3 + $0x10] sm:$0xff] %vm22_vm0, %v152_v35  ;;  %v139_v37 = vmul.f32 %v170_v12, %v124_v36 }
 0x141   :  { %v185_v40 = vpop.eup %184  ;;  %v153_v41 = vadd.f32 %v171_v17, %v138_v21  ;;  %v125_v29 = vmul.f32 %v183_v28, %v260_v39 }
 0x142   :  { %v154_v42 = vadd.f32 %v171_v17, %v139_v37  ;;  %v126_v38 = vmul.f32 %v185_v40, %v268_v48 }
 0x143   :  { %161 = vst.msk [vmem:[%s329_s3 + $0x18] sm:$0xff] %vm22_vm0, %v153_v41  ;;  %v140_v43 = vmul.f32 %v170_v12, %v125_v29 }
 0x144   :  { %v187_v44 = vpop.eup %186  ;;  %162 = vst.msk [vmem:[%s329_s3 + $0x20] sm:$0xff] %vm22_vm0, %v154_v42  ;;  %v141_v45 = vmul.f32 %v170_v12, %v126_v38 }
 0x145   :  { %v155_v46 = vadd.f32 %v171_v17, %v140_v43  ;;  %v127_v47 = vmul.f32 %v187_v44, %v270_v49 }
 0x146   :  { %v156_v39 = vadd.f32 %v171_v17, %v141_v45 }
 0x147   :  { %163 = vst.msk [vmem:[%s329_s3 + $0x28] sm:$0xff] %vm22_vm0, %v155_v46  ;;  %v142_v48 = vmul.f32 %v170_v12, %v127_v47 }
 0x148   :  { %164 = vst.msk [vmem:[%s329_s3 + $0x30] sm:$0xff] %vm22_vm0, %v156_v39 }
 0x149   :  { %v157_v50 = vadd.f32 %v171_v17, %v142_v48 }
 0x14b   :  { %165 = vst.msk [vmem:[%s329_s3 + $0x38] sm:$0xff] %vm22_vm0, %v157_v50 }

// kernel: _lambda_.117
= control target key start
LH: loop header
LB: loop body
LE: loop exit
PB: predicated region body
PF: predicated region fallthrough
CT: control target
= control target key end

     0   :  { %vm21_vm0 = vcmask 130048   ;;  %v161_v7 = vmov 0.0|0.0   ;;  %vm162_vm1 = vmmov 0   ;;  %v163_v10 = vmov 0.0   ;;  %s219_s0 = inlined_call_operand.vmem [shape: f32[8,16], index: 0, kind: input, shape index: {}]   ;;  %s220_s3 = inlined_call_operand.vmem [shape: f32[16,16], index: 3, kind: input, shape index: {}]   ;;  %s221_s1 = inlined_call_operand.vmem [shape: f32[1,16], index: 1, kind: input, shape index: {}]   ;;  %s222_s2 = inlined_call_operand.vmem [shape: f32[1,16], index: 2, kind: input, shape index: {}, may-alias: {2,4}]   ;;  %s223_s4 = inlined_call_operand.vmem [shape: f32[1,16], index: 4, kind: input, shape index: {}, may-alias: {2,4}]   ;;  %s224_s5 = inlined_call_operand.vmem [shape: f32[8,16], index: 5, kind: output, shape index: {}]  }
   0x1   :  { %v20_v0 = vld [vmem:[%s219_s0] sm:$0xff]  ;;  %153 = vmatprep.subr.bf16.mxu0 %v161_v7  ;;  %v53_v9 = vld [vmem:[%s220_s3 + $0x8] sm:$0xff]  ;;  %150 = vmatprep.mubr.msk.f32.mxu0 %vm162_vm1, %v163_v10 }
   0x2   :  { %v22_v1 = vsel %vm21_vm0, %v20_v0, 0.0  ;;  %v52_v8 = vld [vmem:[%s220_s3] sm:$0xff] }
   0x3   :  { %23 = vadd.xlane.f32.xlu0 %v22_v1  ;;  %v154_v11 = vpack.c.bf16 %v53_v9, %v52_v8  ;;  %v139_v16 = vld [vmem:[%s221_s1] ss:$0 sm:$0xff] }
   0x4   :  { %v140_v18 = vld [vmem:[%s222_s2] ss:$0 sm:$0xff] }
   0x5   :  { %155 = vmatpush3.bf16.msra.mxu0 %v154_v11  ;;  %v141_v21 = vld [vmem:[%s223_s4] ss:$0 sm:$0xff] }
  0x90   :  { %v24_v2 = vpop.xlane.xlu0 %23 }
  0x91   :  { %v26_v3 = vmul.f32 0.0625, %v24_v2 }
  0x93   :  { %v27_v4 = vsub.f32 %v20_v0, %v26_v3 }
  0x95   :  { %v28_v5 = vmul.f32 %v27_v4, %v27_v4 }
  0x97   :  { %v29_v6 = vsel %vm21_vm0, %v28_v5, 0.0 }
  0x98   :  { %30 = vadd.xlane.f32.xlu0 %v29_v6 }
 0x125   :  { %v31_v12 = vpop.xlane.xlu0 %30 }
 0x126   :  { %v32_v13 = vmul.f32 0.0625, %v31_v12 }
 0x128   :  { %v33_v14 = vadd.f32 1e-05, %v32_v13 }
 0x12a   :  { %159 = vrsqrt.f32 %v33_v14 }
 0x134   :  { %v160_v15 = vpop.eup %159 }
 0x135   :  { %v35_v17 = vmul.f32 %v160_v15, %v27_v4 }
 0x137   :  { %v43_v19 = vmul.f32 %v139_v16, %v35_v17 }
 0x139   :  { %v51_v20 = vadd.f32 %v140_v18, %v43_v19 }
 0x13b   :  { %151 = vmatmul.mubr.msk.f32.vlgmr.msra.gmra.mrb[0].mxu0 %vm21_vm0, %v51_v20 }
 0x20e   :  { %v130_v22 = vpop.f32.mrb[0].mxu0 }
 0x20f   :  { %v131_v23 = vadd.f32 %v141_v21, %v130_v22  ;;  %v152_v24 = vpop.f32.mrb[1].mxu0 }
 0x211   :  { %134 = vst.msk [vmem:[%s224_s5] sm:$0xff] %vm21_vm0, %v131_v23 }

// kernel: _lambda_.119
= control target key start
LH: loop header
LB: loop body
LE: loop exit
PB: predicated region body
PF: predicated region fallthrough
CT: control target
= control target key end

     0   :  { %vm15_vm0 = vcmask 130048   ;;  %s90_s0 = inlined_call_operand.vmem [shape: f32[8,16], index: 0, kind: input, shape index: {}]   ;;  %s91_s1 = inlined_call_operand.vmem [shape: f32[1,16], index: 1, kind: input, shape index: {}]   ;;  %s92_s2 = inlined_call_operand.vmem [shape: f32[1,16], index: 2, kind: input, shape index: {}]   ;;  %s93_s3 = inlined_call_operand.vmem [shape: f32[8,16], index: 3, kind: output, shape index: {}]  }
   0x1   :  { %v14_v0 = vld [vmem:[%s90_s0] sm:$0xff] }
   0x2   :  { %v16_v1 = vsel %vm15_vm0, %v14_v0, 0.0  ;;  %v51_v11 = vld [vmem:[%s91_s1] ss:$0 sm:$0xff] }
   0x3   :  { %17 = vadd.xlane.f32.xlu0 %v16_v1  ;;  %v52_v13 = vld [vmem:[%s92_s2] ss:$0 sm:$0xff] }
  0x90   :  { %v18_v2 = vpop.xlane.xlu0 %17 }
  0x91   :  { %v20_v3 = vmul.f32 0.0625, %v18_v2 }
  0x93   :  { %v21_v4 = vsub.f32 %v14_v0, %v20_v3 }
  0x95   :  { %v22_v5 = vmul.f32 %v21_v4, %v21_v4 }
  0x97   :  { %v23_v6 = vsel %vm15_vm0, %v22_v5, 0.0 }
  0x98   :  { %24 = vadd.xlane.f32.xlu0 %v23_v6 }
 0x125   :  { %v25_v7 = vpop.xlane.xlu0 %24 }
 0x126   :  { %v26_v8 = vmul.f32 0.0625, %v25_v7 }
 0x128   :  { %v27_v9 = vadd.f32 1e-05, %v26_v8 }
 0x12a   :  { %53 = vrsqrt.f32 %v27_v9 }
 0x134   :  { %v54_v10 = vpop.eup %53 }
 0x135   :  { %v29_v12 = vmul.f32 %v54_v10, %v21_v4 }
 0x137   :  { %v37_v14 = vmul.f32 %v51_v11, %v29_v12 }
 0x139   :  { %v45_v15 = vadd.f32 %v52_v13, %v37_v14 }
 0x13b   :  { %46 = vst.msk [vmem:[%s93_s3] sm:$0xff] %vm15_vm0, %v45_v15 }

// kernel: _lambda_.118
= control target key start
LH: loop header
LB: loop body
LE: loop exit
PB: predicated region body
PF: predicated region fallthrough
CT: control target
= control target key end

     0   :  { %vm18_vm0 = vcmask 64512   ;;  %v143_v7 = vmov 0.0   ;;  %vm144_vm1 = vmmov 0   ;;  %vm123_vm2 = vcmask 130048   ;;  %s188_s0 = inlined_call_operand.vmem [shape: f32[8,8], index: 0, kind: input, shape index: {}]   ;;  %s189_s3 = inlined_call_operand.vmem [shape: f32[8,16], index: 3, kind: input, shape index: {}]   ;;  %s190_s1 = inlined_call_operand.vmem [shape: f32[1,8], index: 1, kind: input, shape index: {}]   ;;  %s191_s2 = inlined_call_operand.vmem [shape: f32[1,8], index: 2, kind: input, shape index: {}]   ;;  %s192_s4 = inlined_call_operand.vmem [shape: f32[8,16], index: 4, kind: output, shape index: {}]  }
   0x1   :  { %v17_v0 = vld [vmem:[%s188_s0] sm:$0xff]  ;;  %134 = vmatprep.subr.mxu0 %v143_v7  ;;  %136 = vmatprep.mubr.msk.f32.mxu0 %vm144_vm1, %v143_v7 }
   0x2   :  { %v19_v1 = vsel %vm18_vm0, %v17_v0, 0.0  ;;  %v49_v8 = vld [vmem:[%s189_s3] sm:$0xff] }
   0x3   :  { %20 = vadd.xlane.f32.xlu0 %v19_v1  ;;  %135 = vmatpush3.msra.mxu0 %v49_v8  ;;  %v129_v13 = vld [vmem:[%s190_s1] ss:$0 sm:$0xff] }
   0x4   :  { %v130_v15 = vld [vmem:[%s191_s2] ss:$0 sm:$0xff] }
  0x90   :  { %v21_v2 = vpop.xlane.xlu0 %20 }
  0x91   :  { %v23_v3 = vmul.f32 0.125, %v21_v2 }
  0x93   :  { %v24_v4 = vsub.f32 %v17_v0, %v23_v3 }
  0x95   :  { %v25_v5 = vmul.f32 %v24_v4, %v24_v4 }
  0x97   :  { %v26_v6 = vsel %vm18_vm0, %v25_v5, 0.0 }
  0x98   :  { %27 = vadd.xlane.f32.xlu0 %v26_v6 }
 0x125   :  { %v28_v9 = vpop.xlane.xlu0 %27 }
 0x126   :  { %v29_v10 = vmul.f32 0.125, %v28_v9 }
 0x128   :  { %v30_v11 = vadd.f32 1e-05, %v29_v10 }
 0x12a   :  { %141 = vrsqrt.f32 %v30_v11 }
 0x134   :  { %v142_v12 = vpop.eup %141 }
 0x135   :  { %v32_v14 = vmul.f32 %v142_v12, %v24_v4 }
 0x137   :  { %v40_v16 = vmul.f32 %v129_v13, %v32_v14 }
 0x139   :  { %v48_v17 = vadd.f32 %v130_v15, %v40_v16 }
 0x13b   :  { %137 = vmatmul.mubr.msk.f32.vlgmr.msra.gmra.mrb[0].mxu0 %vm18_vm0, %v48_v17 }
 0x20e   :  { %v119_v18 = vpop.f32.mrb[0].mxu0 }
 0x20f   :  { %124 = vst.msk [vmem:[%s192_s4] sm:$0xff] %vm123_vm2, %v119_v18  ;;  %v138_v19 = vpop.f32.mrb[1].mxu0 }

// kernel: _lambda_.124
= control target key start
LH: loop header
LB: loop body
LE: loop exit
PB: predicated region body
PF: predicated region fallthrough
CT: control target
= control target key end

     0   :  { %v133_v0 = vmov 0.0|0.0   ;;  %vm134_vm0 = vmmov 0   ;;  %v135_v4 = vmov 0.0   ;;  %vm26_vm1 = vcmask 261120   ;;  %s177_s1 = inlined_call_operand.vmem [shape: f32[32,14], index: 1, kind: input, shape index: {}]   ;;  %s178_s0 = inlined_call_operand.vmem [shape: f32[8,32], index: 0, kind: input, shape index: {}]   ;;  %s179_s2 = inlined_call_operand.vmem [shape: f32[1,14], index: 2, kind: input, shape index: {}]   ;;  %s180_s3 = inlined_call_operand.vmem [shape: f32[8,14], index: 3, kind: output, shape index: {}]  }
   0x1   :  { %124 = vmatprep.subr.bf16.mxu0 %v133_v0  ;;  %v15_v1 = vld [vmem:[%s177_s1] sm:$0xff]  ;;  %v16_v2 = vld [vmem:[%s177_s1 + $0x8] sm:$0xff]  ;;  %v17_v3 = vld [vmem:[%s177_s1 + $0x10] sm:$0xff]  ;;  %121 = vmatprep.mubr.msk.f32.mxu0 %vm134_vm0, %v135_v4  ;;  %vm100_vm2 = vcmask 113664  }
   0x2   :  { %v125_v5 = vpack.c.bf16 %v16_v2, %v15_v1  ;;  %v18_v6 = vld [vmem:[%s177_s1 + $0x18] sm:$0xff]  ;;  %v14_v8 = vld [vmem:[%s178_s0] sm:$0xff] }
   0x3   :  { %v128_v7 = vpack.c.bf16 %v18_v6, %v17_v3  ;;  %v106_v9 = vld [vmem:[%s179_s2] ss:$0 sm:$0xff] }
   0x4   :  { %126 = vmatpush3.bf16.msra.mxu0 %v125_v5 }
   0x5   :  { %127 = vmatprep.subr.bf16.mxu0 %v133_v0 }
   0x8   :  { %129 = vmatpush3.bf16.msra.mxu0 %v128_v7 }
   0xb   :  { %122 = vmatmul.mubr.msk.f32.vlgmr.msra.gmra.mrb[0].mxu0 %vm26_vm1, %v14_v8 }
  0xde   :  { %v96_v10 = vpop.f32.mrb[0].mxu0 }
  0xdf   :  { %v97_v11 = vadd.f32 %v106_v9, %v96_v10  ;;  %v123_v12 = vpop.f32.mrb[1].mxu0 }
  0xe1   :  { %101 = vst.msk [vmem:[%s180_s3] sm:$0xff] %vm100_vm2, %v97_v11 }

// kernel: _lambda_.134
= control target key start
LH: loop header
LB: loop body
LE: loop exit
PB: predicated region body
PF: predicated region fallthrough
CT: control target
= control target key end

     0   :  { %vm21_vm0 = vcmask 64512   ;;  %v154_v7 = vmov 0.0   ;;  %vm155_vm1 = vmmov 0   ;;  %vm133_vm2 = vcmask 261120   ;;  %s207_s0 = inlined_call_operand.vmem [shape: f32[8,8], index: 0, kind: input, shape index: {}]   ;;  %s208_s3 = inlined_call_operand.vmem [shape: f32[8,32], index: 3, kind: input, shape index: {}]   ;;  %s209_s1 = inlined_call_operand.vmem [shape: f32[1,8], index: 1, kind: input, shape index: {}]   ;;  %s210_s2 = inlined_call_operand.vmem [shape: f32[1,8], index: 2, kind: input, shape index: {}]   ;;  %s211_s4 = inlined_call_operand.vmem [shape: f32[1,32], index: 4, kind: input, shape index: {}]   ;;  %s212_s5 = inlined_call_operand.vmem [shape: f32[8,32], index: 5, kind: output, shape index: {}]  }
   0x1   :  { %v20_v0 = vld [vmem:[%s207_s0] sm:$0xff]  ;;  %145 = vmatprep.subr.mxu0 %v154_v7  ;;  %147 = vmatprep.mubr.msk.f32.mxu0 %vm155_vm1, %v154_v7 }
   0x2   :  { %v22_v1 = vsel %vm21_vm0, %v20_v0, 0.0  ;;  %v52_v8 = vld [vmem:[%s208_s3] sm:$0xff] }
   0x3   :  { %23 = vadd.xlane.f32.xlu0 %v22_v1  ;;  %146 = vmatpush3.msra.mxu0 %v52_v8  ;;  %v139_v13 = vld [vmem:[%s209_s1] ss:$0 sm:$0xff] }
   0x4   :  { %v140_v15 = vld [vmem:[%s210_s2] ss:$0 sm:$0xff] }
   0x5   :  { %v141_v18 = vld [vmem:[%s211_s4] ss:$0 sm:$0xff] }
  0x90   :  { %v24_v2 = vpop.xlane.xlu0 %23 }
  0x91   :  { %v26_v3 = vmul.f32 0.125, %v24_v2 }
  0x93   :  { %v27_v4 = vsub.f32 %v20_v0, %v26_v3 }
  0x95   :  { %v28_v5 = vmul.f32 %v27_v4, %v27_v4 }
  0x97   :  { %v29_v6 = vsel %vm21_vm0, %v28_v5, 0.0 }
  0x98   :  { %30 = vadd.xlane.f32.xlu0 %v29_v6 }
 0x125   :  { %v31_v9 = vpop.xlane.xlu0 %30 }
 0x126   :  { %v32_v10 = vmul.f32 0.125, %v31_v9 }
 0x128   :  { %v33_v11 = vadd.f32 1e-05, %v32_v10 }
 0x12a   :  { %152 = vrsqrt.f32 %v33_v11 }
 0x134   :  { %v153_v12 = vpop.eup %152 }
 0x135   :  { %v35_v14 = vmul.f32 %v153_v12, %v27_v4 }
 0x137   :  { %v43_v16 = vmul.f32 %v139_v13, %v35_v14 }
 0x139   :  { %v51_v17 = vadd.f32 %v140_v15, %v43_v16 }
 0x13b   :  { %148 = vmatmul.mubr.msk.f32.vlgmr.msra.gmra.mrb[0].mxu0 %vm21_vm0, %v51_v17 }
 0x20e   :  { %v129_v19 = vpop.f32.mrb[0].mxu0 }
 0x20f   :  { %v130_v20 = vadd.f32 %v141_v18, %v129_v19  ;;  %v149_v21 = vpop.f32.mrb[1].mxu0 }
 0x211   :  { %134 = vst.msk [vmem:[%s212_s5] sm:$0xff] %vm133_vm2, %v130_v20 }

// kernel: _lambda_.135
= control target key start
LH: loop header
LB: loop body
LE: loop exit
PB: predicated region body
PF: predicated region fallthrough
CT: control target
= control target key end

     0   :  { %vm24_vm0 = vcmask 261120   ;;  %v260_v38 = vmov 0.0   ;;  %s391_s0 = inlined_call_operand.vmem [shape: f32[32,32], index: 0, kind: input, shape index: {}]   ;;  %s392_s3 = inlined_call_operand.vmem [shape: f32[32,160], index: 3, kind: input, shape index: {}]   ;;  %s393_s1 = inlined_call_operand.vmem [shape: f32[1,32], index: 1, kind: input, shape index: {}]   ;;  %s394_s2 = inlined_call_operand.vmem [shape: f32[1,32], index: 2, kind: input, shape index: {}]   ;;  %s395_s4 = inlined_call_operand.vmem [shape: f32[1,160], index: 4, kind: input, shape index: {}]   ;;  %s396_s5 = inlined_call_operand.vmem [shape: f32[32,160], index: 5, kind: output, shape index: {}]  }
   0x1   :  { %v20_v0 = vld [vmem:[%s391_s0] sm:$0xff]  ;;  %v21_v1 = vld [vmem:[%s391_s0 + $0x8] sm:$0xff]  ;;  %v22_v2 = vld [vmem:[%s391_s0 + $0x10] sm:$0xff]  ;;  %196 = vmatprep.mubr.f32.mxu0 %v260_v38  ;;  %208 = vmatprep.mubr.f32.mxu1 %v260_v38 }
   0x2   :  { %v25_v3 = vsel %vm24_vm0, %v20_v0, 0.0  ;;  %v28_v4 = vsel %vm24_vm0, %v21_v1, 0.0  ;;  %v23_v5 = vld [vmem:[%s391_s0 + $0x18] sm:$0xff]  ;;  %v31_v6 = vsel %vm24_vm0, %v22_v2, 0.0  ;;  %v101_v28 = vld [vmem:[%s392_s3 + $0x8] sm:$0xff]  ;;  %v100_v31 = vld [vmem:[%s392_s3] sm:$0xff] }
   0x3   :  { %26 = vadd.xlane.f32.xlu0 %v25_v3  ;;  %29 = vadd.xlane.f32.xlu1 %v28_v4  ;;  %v34_v7 = vsel %vm24_vm0, %v23_v5, 0.0  ;;  %v103_v29 = vld [vmem:[%s392_s3 + $0x18] sm:$0xff]  ;;  %v102_v32 = vld [vmem:[%s392_s3 + $0x10] sm:$0xff]  ;;  %v105_v33 = vld [vmem:[%s392_s3 + $0x28] sm:$0xff] }
   0x4   :  { %v239_v30 = vpack.c.bf16 %v103_v29, %v101_v28  ;;  %v241_v34 = vpack.c.bf16 %v102_v32, %v100_v31  ;;  %v107_v35 = vld [vmem:[%s392_s3 + $0x38] sm:$0xff]  ;;  %v104_v36 = vld [vmem:[%s392_s3 + $0x20] sm:$0xff]  ;;  %v106_v37 = vld [vmem:[%s392_s3 + $0x30] sm:$0xff] }
   0x5   :  { %v243_v39 = vpack.c.bf16 %v107_v35, %v105_v33  ;;  %v245_v40 = vpack.c.bf16 %v106_v37, %v104_v36  ;;  %v233_v54 = vld [vmem:[%s393_s1] ss:$0 sm:$0xff] }
   0x6   :  { %240 = vmatprep.subr.bf16.mxu0 %v239_v30  ;;  %247 = vmatprep.subr.bf16.mxu1 %v239_v30  ;;  %v234_v56 = vld [vmem:[%s394_s2] ss:$0 sm:$0xff] }
   0x7   :  { %32 = vadd.xlane.f32.xlu0 %v31_v6  ;;  %35 = vadd.xlane.f32.xlu1 %v34_v7  ;;  %v110_v7 = vlaneseq }
   0x8   :  { %242 = vmatpush1.bf16.msra.mxu0 %v241_v34  ;;  %249 = vmatpush1.bf16.msra.mxu1 %v241_v34 }
   0x9   :  { %244 = vmatprep.subr.bf16.mxu0 %v243_v39  ;;  %248 = vmatprep.subr.bf16.mxu1 %v243_v39 }
   0xc   :  { %246 = vmatpush1.bf16.msra.mxu0 %v245_v40  ;;  %250 = vmatpush1.bf16.msra.mxu1 %v245_v40 }
  0x90   :  { %v27_v8 = vpop.xlane.xlu0 %26  ;;  %v30_v9 = vpop.xlane.xlu1 %29 }
  0x91   :  { %v38_v10 = vmul.f32 0.03125, %v27_v8  ;;  %v39_v11 = vmul.f32 0.03125, %v30_v9  ;;  %v111_v8 = vshrl.u32 %v110_v7, 7 }
  0x93   :  { %v307_v12 = vsub.f32 %v20_v0, %v38_v10  ;;  %v309_v13 = vsub.f32 %v21_v1, %v39_v11  ;;  %v112_v9 = vsub.s32 0, %v111_v8  ;;  %v108_v10 = vld [vmem:[%s395_s4] sm:$0x3]  ;;  %v116_v11 = vsub.s32 1, %v111_v8 }
  0x94   :  { %v33_v14 = vpop.xlane.xlu0 %32  ;;  %v36_v15 = vpop.xlane.xlu1 %35 }
  0x95   :  { %v40_v16 = vmul.f32 0.03125, %v33_v14  ;;  %v41_v17 = vmul.f32 0.03125, %v36_v15  ;;  %v46_v18 = vmul.f32 %v307_v12, %v307_v12  ;;  %v47_v19 = vmul.f32 %v309_v13, %v309_v13 }
  0x97   :  { %v44_v20 = vsub.f32 %v22_v2, %v40_v16  ;;  %v315_v21 = vsub.f32 %v23_v5, %v41_v17  ;;  %v50_v22 = vsel %vm24_vm0, %v46_v18, 0.0  ;;  %v53_v23 = vsel %vm24_vm0, %v47_v19, 0.0 }
  0x98   :  { %51 = vadd.xlane.f32.xlu0 %v50_v22 }
  0x99   :  { %v48_v24 = vmul.f32 %v44_v20, %v44_v20  ;;  %v49_v25 = vmul.f32 %v315_v21, %v315_v21 }
  0x9b   :  { %v56_v26 = vsel %vm24_vm0, %v48_v24, 0.0  ;;  %v59_v27 = vsel %vm24_vm0, %v49_v25, 0.0 }
  0x9c   :  { %54 = vadd.xlane.f32.xlu0 %v53_v23  ;;  %57 = vadd.xlane.f32.xlu1 %v56_v26 }
  0xa0   :  { %60 = vadd.xlane.f32.xlu1 %v59_v27 }
 0x125   :  { %v52_v41 = vpop.xlane.xlu0 %51 }
 0x126   :  { %v62_v42 = vmul.f32 0.03125, %v52_v41 }
 0x128   :  { %v66_v43 = vadd.f32 1e-05, %v62_v42 }
 0x129   :  { %v58_v44 = vpop.xlane.xlu1 %57  ;;  %v55_v45 = vpop.xlane.xlu0 %54 }
 0x12a   :  { %252 = vrsqrt.f32 %v66_v43  ;;  %v64_v46 = vmul.f32 0.03125, %v58_v44  ;;  %v63_v47 = vmul.f32 0.03125, %v55_v45 }
 0x12c   :  { %v68_v48 = vadd.f32 1e-05, %v64_v46  ;;  %v67_v49 = vadd.f32 1e-05, %v63_v47 }
 0x12d   :  { %v61_v50 = vpop.xlane.xlu1 %60 }
 0x12e   :  { %254 = vrsqrt.f32 %v68_v48  ;;  %v65_v51 = vmul.f32 0.03125, %v61_v50 }
 0x12f   :  { %256 = vrsqrt.f32 %v67_v49 }
 0x130   :  { %v69_v52 = vadd.f32 1e-05, %v65_v51 }
 0x132   :  { %258 = vrsqrt.f32 %v69_v52 }
 0x134   :  { %v253_v53 = vpop.eup %252 }
 0x135   :  { %v74_v55 = vmul.f32 %v253_v53, %v307_v12  ;;  %v113_v12 = vrot.slane %v108_v10, %v112_v9 }
 0x137   :  { %v85_v57 = vmul.f32 %v233_v54, %v74_v55 }
 0x138   :  { %v255_v58 = vpop.eup %254 }
 0x139   :  { %v257_v59 = vpop.eup %256  ;;  %v96_v60 = vadd.f32 %v234_v56, %v85_v57  ;;  %v76_v61 = vmul.f32 %v255_v58, %v44_v20 }
 0x13a   :  { %v75_v62 = vmul.f32 %v257_v59, %v309_v13  ;;  %v117_v13 = vrot.slane %v108_v10, %v116_v11 }
 0x13b   :  { %235 = vmatmul.mubr.msk.f32.vlgmr.msra.gmra.mrb[0].mxu0 %vm24_vm0, %v96_v60  ;;  %v87_v63 = vmul.f32 %v233_v54, %v76_v61 }
 0x13c   :  { %v259_v0 = vpop.eup %258  ;;  %202 = vmatprep.mubr.f32.mxu0 %v260_v38  ;;  %v86_v1 = vmul.f32 %v233_v54, %v75_v62 }
 0x13d   :  { %v98_v2 = vadd.f32 %v234_v56, %v87_v63  ;;  %v77_v3 = vmul.f32 %v259_v0, %v315_v21 }
 0x13e   :  { %v97_v4 = vadd.f32 %v234_v56, %v86_v1 }
 0x13f   :  { %237 = vmatmul.mubr.msk.f32.vlgmr.msra.gmra.mrb[0].mxu1 %vm24_vm0, %v98_v2  ;;  %v88_v5 = vmul.f32 %v233_v54, %v77_v3 }
 0x140   :  { %236 = vmatmul.mubr.msk.f32.gmra.mrb[2].mxu0 %vm24_vm0, %v97_v4  ;;  %214 = vmatprep.mubr.f32.mxu1 %v260_v38 }
 0x141   :  { %v99_v6 = vadd.f32 %v234_v56, %v88_v5 }
 0x143   :  { %238 = vmatmul.mubr.msk.f32.gmra.mrb[2].mxu1 %vm24_vm0, %v99_v6 }
 0x20e   :  { %v198_v14 = vpop.f32.mrb[0].mxu0 }
 0x20f   :  { %v199_v15 = vadd.f32 %v198_v14, %v113_v12  ;;  %v200_v16 = vpop.f32.mrb[1].mxu0 }
 0x210   :  { %v201_v17 = vadd.f32 %v200_v16, %v117_v13 }
 0x211   :  { %221 = vst [vmem:[%s396_s5] sm:$0xff] %v199_v15 }
 0x212   :  { %222 = vst.msk [vmem:[%s396_s5 + $0x8] sm:$0xff] %vm24_vm0, %v201_v17  ;;  %v210_v18 = vpop.f32.mrb[0].mxu1 }
 0x213   :  { %v204_v19 = vpop.f32.mrb[2].mxu0  ;;  %v211_v20 = vadd.f32 %v210_v18, %v113_v12  ;;  %v212_v21 = vpop.f32.mrb[1].mxu1 }
 0x214   :  { %v205_v22 = vadd.f32 %v204_v19, %v113_v12  ;;  %v206_v23 = vpop.f32.mrb[3].mxu0  ;;  %v213_v24 = vadd.f32 %v212_v21, %v117_v13 }
 0x215   :  { %225 = vst [vmem:[%s396_s5 + $0x20] sm:$0xff] %v211_v20  ;;  %v207_v25 = vadd.f32 %v206_v23, %v117_v13 }
 0x216   :  { %223 = vst [vmem:[%s396_s5 + $0x10] sm:$0xff] %v205_v22  ;;  %226 = vst.msk [vmem:[%s396_s5 + $0x28] sm:$0xff] %vm24_vm0, %v213_v24  ;;  %v216_v26 = vpop.f32.mrb[2].mxu1 }
 0x217   :  { %224 = vst.msk [vmem:[%s396_s5 + $0x18] sm:$0xff] %vm24_vm0, %v207_v25  ;;  %v217_v27 = vadd.f32 %v216_v26, %v113_v12  ;;  %v218_v28 = vpop.f32.mrb[3].mxu1 }
 0x218   :  { %v219_v29 = vadd.f32 %v218_v28, %v117_v13 }
 0x219   :  { %227 = vst [vmem:[%s396_s5 + $0x30] sm:$0xff] %v217_v27 }
 0x21a   :  { %228 = vst.msk [vmem:[%s396_s5 + $0x38] sm:$0xff] %vm24_vm0, %v219_v29 }

// kernel: _lambda_.138
= control target key start
LH: loop header
LB: loop body
LE: loop exit
PB: predicated region body
PF: predicated region fallthrough
CT: control target
= control target key end

     0   :  { %vm29_vm0 = vcmask 261120   ;;  %s241_s1 = inlined_call_operand.vmem [shape: f32[32,32], index: 1, kind: input, shape index: {}]   ;;  %s242_s0 = inlined_call_operand.vmem [shape: f32[32,32], index: 0, kind: input, shape index: {}]   ;;  %s243_s2 = inlined_call_operand.vmem [shape: f32[1,32], index: 2, kind: input, shape index: {}]   ;;  %s244_s3 = inlined_call_operand.vmem [shape: f32[32,32], index: 3, kind: output, shape index: {}]  }
   0x1   :  { %v18_v0 = vld [vmem:[%s241_s1] sm:$0xff]  ;;  %v19_v1 = vld [vmem:[%s241_s1 + $0x8] sm:$0xff]  ;;  %v20_v2 = vld [vmem:[%s241_s1 + $0x10] sm:$0xff] }
   0x2   :  { %v162_v3 = vpack.c.bf16 %v19_v1, %v18_v0  ;;  %v21_v4 = vld [vmem:[%s241_s1 + $0x18] sm:$0xff]  ;;  %v14_v5 = vld [vmem:[%s242_s0] sm:$0xff]  ;;  %v16_v6 = vld [vmem:[%s242_s0 + $0x10] sm:$0xff] }
   0x3   :  { %v166_v7 = vpack.c.bf16 %v21_v4, %v20_v2  ;;  %156 = vmatprep.mubr.msk.f32.mxu0 %vm29_vm0, %v14_v5  ;;  %159 = vmatprep.mubr.msk.f32.mxu1 %vm29_vm0, %v16_v6  ;;  %v15_v8 = vld [vmem:[%s242_s0 + $0x8] sm:$0xff]  ;;  %v17_v9 = vld [vmem:[%s242_s0 + $0x18] sm:$0xff]  ;;  %v135_v10 = vld [vmem:[%s243_s2] ss:$0 sm:$0xff] }
   0x4   :  { %163 = vmatprep.subr.bf16.mxu0 %v162_v3  ;;  %170 = vmatprep.subr.bf16.mxu1 %v162_v3 }
   0x5   :  { %165 = vmatpush3.bf16.msra.mxu0 %v162_v3  ;;  %172 = vmatpush3.bf16.msra.mxu1 %v162_v3 }
   0x6   :  { %167 = vmatprep.subr.bf16.mxu0 %v166_v7  ;;  %171 = vmatprep.subr.bf16.mxu1 %v166_v7 }
   0x9   :  { %169 = vmatpush3.bf16.msra.mxu0 %v166_v7  ;;  %173 = vmatpush3.bf16.msra.mxu1 %v166_v7 }
   0xc   :  { %157 = vmatmul.mubr.msk.f32.vlgmr.msra.gmra.mrb[0].mxu0 %vm29_vm0, %v15_v8  ;;  %160 = vmatmul.mubr.msk.f32.vlgmr.msra.gmra.mrb[0].mxu1 %vm29_vm0, %v17_v9 }
  0xdf   :  { %v158_v11 = vpop.f32.mrb[0].mxu0  ;;  %v161_v12 = vpop.f32.mrb[0].mxu1 }
  0xe0   :  { %v114_v13 = vadd.f32 %v158_v11, %v135_v10  ;;  %v124_v14 = vadd.f32 %v161_v12, %v135_v10  ;;  %v108_v15 = vpop.f32.mrb[1].mxu0  ;;  %v118_v16 = vpop.f32.mrb[1].mxu1 }
  0xe1   :  { %v109_v17 = vadd.f32 %v135_v10, %v108_v15  ;;  %v119_v18 = vadd.f32 %v135_v10, %v118_v16 }
  0xe2   :  { %128 = vst.msk [vmem:[%s244_s3 + $0x8] sm:$0xff] %vm29_vm0, %v114_v13  ;;  %130 = vst.msk [vmem:[%s244_s3 + $0x18] sm:$0xff] %vm29_vm0, %v124_v14 }
  0xe3   :  { %127 = vst.msk [vmem:[%s244_s3] sm:$0xff] %vm29_vm0, %v109_v17  ;;  %129 = vst.msk [vmem:[%s244_s3 + $0x10] sm:$0xff] %vm29_vm0, %v119_v18 }

// kernel: _lambda_.136
= control target key start
LH: loop header
LB: loop body
LE: loop exit
PB: predicated region body
PF: predicated region fallthrough
CT: control target
= control target key end

     0   :  { %vm21_vm0 = vcmask 261120   ;;  %v172_v7 = vmov 0.0|0.0   ;;  %vm173_vm1 = vmmov 0   ;;  %v174_v11 = vmov 0.0   ;;  %s236_s0 = inlined_call_operand.vmem [shape: f32[8,32], index: 0, kind: input, shape index: {}]   ;;  %s237_s3 = inlined_call_operand.vmem [shape: f32[32,32], index: 3, kind: input, shape index: {}]   ;;  %s238_s1 = inlined_call_operand.vmem [shape: f32[1,32], index: 1, kind: input, shape index: {}]   ;;  %s239_s2 = inlined_call_operand.vmem [shape: f32[1,32], index: 2, kind: input, shape index: {}, may-alias: {2,4}]   ;;  %s240_s4 = inlined_call_operand.vmem [shape: f32[1,32], index: 4, kind: input, shape index: {}, may-alias: {2,4}]   ;;  %s241_s5 = inlined_call_operand.vmem [shape: f32[8,32], index: 5, kind: output, shape index: {}]  }
   0x1   :  { %v20_v0 = vld [vmem:[%s236_s0] sm:$0xff]  ;;  %161 = vmatprep.subr.bf16.mxu0 %v172_v7  ;;  %v53_v9 = vld [vmem:[%s237_s3 + $0x8] sm:$0xff]  ;;  %v54_v10 = vld [vmem:[%s237_s3 + $0x10] sm:$0xff]  ;;  %158 = vmatprep.mubr.msk.f32.mxu0 %vm173_vm1, %v174_v11 }
   0x2   :  { %v22_v1 = vsel %vm21_vm0, %v20_v0, 0.0  ;;  %v52_v8 = vld [vmem:[%s237_s3] sm:$0xff]  ;;  %v55_v13 = vld [vmem:[%s237_s3 + $0x18] sm:$0xff] }
   0x3   :  { %23 = vadd.xlane.f32.xlu0 %v22_v1  ;;  %v162_v12 = vpack.c.bf16 %v53_v9, %v52_v8  ;;  %v165_v14 = vpack.c.bf16 %v55_v13, %v54_v10  ;;  %v141_v19 = vld [vmem:[%s238_s1] ss:$0 sm:$0xff] }
   0x4   :  { %v142_v21 = vld [vmem:[%s239_s2] ss:$0 sm:$0xff] }
   0x5   :  { %163 = vmatpush3.bf16.msra.mxu0 %v162_v12  ;;  %v143_v24 = vld [vmem:[%s240_s4] ss:$0 sm:$0xff] }
   0x6   :  { %164 = vmatprep.subr.bf16.mxu0 %v172_v7 }
   0x9   :  { %166 = vmatpush3.bf16.msra.mxu0 %v165_v14 }
  0x90   :  { %v24_v2 = vpop.xlane.xlu0 %23 }
  0x91   :  { %v26_v3 = vmul.f32 0.03125, %v24_v2 }
  0x93   :  { %v27_v4 = vsub.f32 %v20_v0, %v26_v3 }
  0x95   :  { %v28_v5 = vmul.f32 %v27_v4, %v27_v4 }
  0x97   :  { %v29_v6 = vsel %vm21_vm0, %v28_v5, 0.0 }
  0x98   :  { %30 = vadd.xlane.f32.xlu0 %v29_v6 }
 0x125   :  { %v31_v15 = vpop.xlane.xlu0 %30 }
 0x126   :  { %v32_v16 = vmul.f32 0.03125, %v31_v15 }
 0x128   :  { %v33_v17 = vadd.f32 1e-05, %v32_v16 }
 0x12a   :  { %170 = vrsqrt.f32 %v33_v17 }
 0x134   :  { %v171_v18 = vpop.eup %170 }
 0x135   :  { %v35_v20 = vmul.f32 %v171_v18, %v27_v4 }
 0x137   :  { %v43_v22 = vmul.f32 %v141_v19, %v35_v20 }
 0x139   :  { %v51_v23 = vadd.f32 %v142_v21, %v43_v22 }
 0x13b   :  { %159 = vmatmul.mubr.msk.f32.vlgmr.msra.gmra.mrb[0].mxu0 %vm21_vm0, %v51_v23 }
 0x20e   :  { %v132_v25 = vpop.f32.mrb[0].mxu0 }
 0x20f   :  { %v133_v26 = vadd.f32 %v143_v24, %v132_v25  ;;  %v160_v27 = vpop.f32.mrb[1].mxu0 }
 0x211   :  { %136 = vst.msk [vmem:[%s241_s5] sm:$0xff] %vm21_vm0, %v133_v26 }

// kernel: _lambda_.139
= control target key start
LH: loop header
LB: loop body
LE: loop exit
PB: predicated region body
PF: predicated region fallthrough
CT: control target
= control target key end

     0   :  { %vm24_vm0 = vcmask 261120   ;;  %s352_s0 = inlined_call_operand.vmem [shape: f32[32,32], index: 0, kind: input, shape index: {}]   ;;  %s353_s3 = inlined_call_operand.vmem [shape: f32[32,128], index: 3, kind: input, shape index: {}]   ;;  %s354_s1 = inlined_call_operand.vmem [shape: f32[1,32], index: 1, kind: input, shape index: {}]   ;;  %s355_s2 = inlined_call_operand.vmem [shape: f32[1,32], index: 2, kind: input, shape index: {}]   ;;  %s356_s4 = inlined_call_operand.vmem [shape: f32[1,128], index: 4, kind: input, shape index: {}]   ;;  %s357_s5 = inlined_call_operand.vmem [shape: f32[32,128], index: 5, kind: output, shape index: {}]  }
   0x1   :  { %v20_v0 = vld [vmem:[%s352_s0] sm:$0xff]  ;;  %v21_v1 = vld [vmem:[%s352_s0 + $0x8] sm:$0xff]  ;;  %v22_v2 = vld [vmem:[%s352_s0 + $0x10] sm:$0xff] }
   0x2   :  { %v25_v3 = vsel %vm24_vm0, %v20_v0, 0.0  ;;  %v28_v4 = vsel %vm24_vm0, %v21_v1, 0.0  ;;  %v23_v5 = vld [vmem:[%s352_s0 + $0x18] sm:$0xff]  ;;  %v31_v6 = vsel %vm24_vm0, %v22_v2, 0.0  ;;  %v100_v28 = vld [vmem:[%s353_s3] sm:$0xff]  ;;  %v101_v29 = vld [vmem:[%s353_s3 + $0x8] sm:$0xff] }
   0x3   :  { %26 = vadd.xlane.f32.xlu0 %v25_v3  ;;  %29 = vadd.xlane.f32.xlu1 %v28_v4  ;;  %v34_v7 = vsel %vm24_vm0, %v23_v5, 0.0  ;;  %v102_v30 = vld [vmem:[%s353_s3 + $0x10] sm:$0xff]  ;;  %v245_v31 = vpack.c.bf16 %v101_v29, %v100_v28  ;;  %v103_v32 = vld [vmem:[%s353_s3 + $0x18] sm:$0xff]  ;;  %v216_v47 = vld [vmem:[%s354_s1] ss:$0 sm:$0xff] }
   0x4   :  { %v249_v33 = vpack.c.bf16 %v103_v32, %v102_v30  ;;  %v217_v49 = vld [vmem:[%s355_s2] ss:$0 sm:$0xff] }
   0x5   :  { %246 = vmatprep.subr.bf16.mxu0 %v245_v31  ;;  %253 = vmatprep.subr.bf16.mxu1 %v245_v31 }
   0x6   :  { %248 = vmatpush3.bf16.msra.mxu0 %v245_v31  ;;  %255 = vmatpush3.bf16.msra.mxu1 %v245_v31 }
   0x7   :  { %32 = vadd.xlane.f32.xlu0 %v31_v6  ;;  %35 = vadd.xlane.f32.xlu1 %v34_v7 }
   0x8   :  { %250 = vmatprep.subr.bf16.mxu0 %v249_v33  ;;  %254 = vmatprep.subr.bf16.mxu1 %v249_v33 }
   0xa   :  { %252 = vmatpush3.bf16.msra.mxu0 %v249_v33  ;;  %256 = vmatpush3.bf16.msra.mxu1 %v249_v33 }
  0x90   :  { %v27_v8 = vpop.xlane.xlu0 %26  ;;  %v30_v9 = vpop.xlane.xlu1 %29 }
  0x91   :  { %v38_v10 = vmul.f32 0.03125, %v27_v8  ;;  %v39_v11 = vmul.f32 0.03125, %v30_v9 }
  0x93   :  { %v42_v12 = vsub.f32 %v20_v0, %v38_v10  ;;  %v43_v13 = vsub.f32 %v21_v1, %v39_v11  ;;  %v218_v0 = vld [vmem:[%s356_s4] ss:$0 sm:$0xff] }
  0x94   :  { %v33_v14 = vpop.xlane.xlu0 %32  ;;  %v36_v15 = vpop.xlane.xlu1 %35 }
  0x95   :  { %v40_v16 = vmul.f32 0.03125, %v33_v14  ;;  %v41_v17 = vmul.f32 0.03125, %v36_v15  ;;  %v46_v18 = vmul.f32 %v42_v12, %v42_v12  ;;  %v47_v19 = vmul.f32 %v43_v13, %v43_v13 }
  0x97   :  { %v44_v20 = vsub.f32 %v22_v2, %v40_v16  ;;  %v45_v21 = vsub.f32 %v23_v5, %v41_v17  ;;  %v50_v22 = vsel %vm24_vm0, %v46_v18, 0.0  ;;  %v53_v23 = vsel %vm24_vm0, %v47_v19, 0.0 }
  0x98   :  { %51 = vadd.xlane.f32.xlu0 %v50_v22 }
  0x99   :  { %v48_v24 = vmul.f32 %v44_v20, %v44_v20  ;;  %v49_v25 = vmul.f32 %v45_v21, %v45_v21 }
  0x9b   :  { %v56_v26 = vsel %vm24_vm0, %v48_v24, 0.0  ;;  %v59_v27 = vsel %vm24_vm0, %v49_v25, 0.0 }
  0x9c   :  { %54 = vadd.xlane.f32.xlu0 %v53_v23  ;;  %57 = vadd.xlane.f32.xlu1 %v56_v26 }
  0xa0   :  { %60 = vadd.xlane.f32.xlu1 %v59_v27 }
 0x125   :  { %v52_v34 = vpop.xlane.xlu0 %51 }
 0x126   :  { %v62_v35 = vmul.f32 0.03125, %v52_v34 }
 0x128   :  { %v66_v36 = vadd.f32 1e-05, %v62_v35 }
 0x129   :  { %v58_v37 = vpop.xlane.xlu1 %57  ;;  %v55_v38 = vpop.xlane.xlu0 %54 }
 0x12a   :  { %257 = vrsqrt.f32 %v66_v36  ;;  %v64_v39 = vmul.f32 0.03125, %v58_v37  ;;  %v63_v40 = vmul.f32 0.03125, %v55_v38 }
 0x12c   :  { %v68_v41 = vadd.f32 1e-05, %v64_v39  ;;  %v67_v42 = vadd.f32 1e-05, %v63_v40 }
 0x12d   :  { %v61_v43 = vpop.xlane.xlu1 %60 }
 0x12e   :  { %259 = vrsqrt.f32 %v68_v41  ;;  %v65_v44 = vmul.f32 0.03125, %v61_v43 }
 0x12f   :  { %261 = vrsqrt.f32 %v67_v42 }
 0x130   :  { %v69_v45 = vadd.f32 1e-05, %v65_v44 }
 0x132   :  { %263 = vrsqrt.f32 %v69_v45 }
 0x134   :  { %v258_v46 = vpop.eup %257 }
 0x135   :  { %v74_v48 = vmul.f32 %v258_v46, %v42_v12 }
 0x137   :  { %v85_v50 = vmul.f32 %v216_v47, %v74_v48 }
 0x138   :  { %v260_v51 = vpop.eup %259 }
 0x139   :  { %v262_v52 = vpop.eup %261  ;;  %v96_v53 = vadd.f32 %v217_v49, %v85_v50  ;;  %v76_v54 = vmul.f32 %v260_v51, %v44_v20 }
 0x13a   :  { %v75_v55 = vmul.f32 %v262_v52, %v43_v13 }
 0x13b   :  { %239 = vmatprep.mubr.msk.f32.mxu0 %vm24_vm0, %v96_v53  ;;  %v87_v56 = vmul.f32 %v216_v47, %v76_v54 }
 0x13c   :  { %v264_v57 = vpop.eup %263  ;;  %v86_v58 = vmul.f32 %v216_v47, %v75_v55 }
 0x13d   :  { %v98_v59 = vadd.f32 %v217_v49, %v87_v56  ;;  %v77_v60 = vmul.f32 %v264_v57, %v45_v21 }
 0x13e   :  { %v97_v61 = vadd.f32 %v217_v49, %v86_v58 }
 0x13f   :  { %242 = vmatprep.mubr.msk.f32.mxu1 %vm24_vm0, %v98_v59  ;;  %v88_v62 = vmul.f32 %v216_v47, %v77_v60 }
 0x140   :  { %240 = vmatmul.mubr.msk.f32.vlgmr.msra.gmra.mrb[0].mxu0 %vm24_vm0, %v97_v61 }
 0x141   :  { %v99_v63 = vadd.f32 %v217_v49, %v88_v62 }
 0x143   :  { %243 = vmatmul.mubr.msk.f32.vlgmr.msra.gmra.mrb[0].mxu1 %vm24_vm0, %v99_v63 }
 0x213   :  { %v241_v1 = vpop.f32.mrb[0].mxu0 }
 0x214   :  { %v195_v2 = vadd.f32 %v241_v1, %v218_v0  ;;  %v189_v3 = vpop.f32.mrb[1].mxu0 }
 0x215   :  { %v190_v4 = vadd.f32 %v218_v0, %v189_v3 }
 0x216   :  { %209 = vst [vmem:[%s357_s5 + $0x8] sm:$0xff] %v195_v2  ;;  %v244_v5 = vpop.f32.mrb[0].mxu1 }
 0x217   :  { %208 = vst [vmem:[%s357_s5] sm:$0xff] %v190_v4  ;;  %v205_v6 = vadd.f32 %v244_v5, %v218_v0  ;;  %v199_v7 = vpop.f32.mrb[1].mxu1 }
 0x218   :  { %v200_v8 = vadd.f32 %v218_v0, %v199_v7 }
 0x219   :  { %211 = vst [vmem:[%s357_s5 + $0x18] sm:$0xff] %v205_v6 }
 0x21a   :  { %210 = vst [vmem:[%s357_s5 + $0x10] sm:$0xff] %v200_v8 }

// kernel: _lambda_.142
= control target key start
LH: loop header
LB: loop body
LE: loop exit
PB: predicated region body
PF: predicated region fallthrough
CT: control target
= control target key end

     0   :  { %vm126_vm0 = vcmask 261120   ;;  %s337_s1 = inlined_call_operand.vmem [shape: f32[128,32], index: 1, kind: input, shape index: {}]   ;;  %s338_s0 = inlined_call_operand.vmem [shape: f32[32,128], index: 0, kind: input, shape index: {}]   ;;  %s339_s2 = inlined_call_operand.vmem [shape: f32[1,32], index: 2, kind: input, shape index: {}]   ;;  %s340_s3 = inlined_call_operand.vmem [shape: f32[32,32], index: 3, kind: output, shape index: {}]  }
   0x1   :  { %v18_v0 = vld [vmem:[%s337_s1] sm:$0xff]  ;;  %v19_v1 = vld [vmem:[%s337_s1 + $0x8] sm:$0xff]  ;;  %v20_v2 = vld [vmem:[%s337_s1 + $0x10] sm:$0xff] }
   0x2   :  { %v194_v3 = vpack.c.bf16 %v19_v1, %v18_v0  ;;  %v21_v4 = vld [vmem:[%s337_s1 + $0x18] sm:$0xff]  ;;  %v22_v6 = vld [vmem:[%s337_s1 + $0x20] sm:$0xff]  ;;  %v23_v7 = vld [vmem:[%s337_s1 + $0x28] sm:$0xff] }
   0x3   :  { %v198_v5 = vpack.c.bf16 %v21_v4, %v20_v2  ;;  %v202_v8 = vpack.c.bf16 %v23_v7, %v22_v6  ;;  %v14_v9 = vld [vmem:[%s338_s0] sm:$0xff]  ;;  %v16_v10 = vld [vmem:[%s338_s0 + $0x10] sm:$0xff]  ;;  %v25_v12 = vld [vmem:[%s337_s1 + $0x38] sm:$0xff] }
   0x4   :  { %195 = vmatprep.subr.bf16.mxu0 %v194_v3  ;;  %226 = vmatprep.subr.bf16.mxu1 %v194_v3  ;;  %v24_v11 = vld [vmem:[%s337_s1 + $0x30] sm:$0xff]  ;;  %v26_v14 = vld [vmem:[%s337_s1 + $0x40] sm:$0xff]  ;;  %v27_v15 = vld [vmem:[%s337_s1 + $0x48] sm:$0xff] }
   0x5   :  { %197 = vmatpush3.bf16.msra.mxu0 %v194_v3  ;;  %234 = vmatpush3.bf16.msra.mxu1 %v194_v3  ;;  %v206_v13 = vpack.c.bf16 %v25_v12, %v24_v11  ;;  %v210_v16 = vpack.c.bf16 %v27_v15, %v26_v14  ;;  %v28_v17 = vld [vmem:[%s337_s1 + $0x50] sm:$0xff]  ;;  %v29_v18 = vld [vmem:[%s337_s1 + $0x58] sm:$0xff]  ;;  %v30_v20 = vld [vmem:[%s337_s1 + $0x60] sm:$0xff] }
   0x6   :  { %199 = vmatprep.subr.bf16.mxu0 %v198_v5  ;;  %227 = vmatprep.subr.bf16.mxu1 %v198_v5  ;;  %v214_v19 = vpack.c.bf16 %v29_v18, %v28_v17  ;;  %v31_v21 = vld [vmem:[%s337_s1 + $0x68] sm:$0xff]  ;;  %v32_v23 = vld [vmem:[%s337_s1 + $0x70] sm:$0xff]  ;;  %v33_v24 = vld [vmem:[%s337_s1 + $0x78] sm:$0xff] }
   0x7   :  { %188 = vmatprep.mubr.f32.mxu0 %v14_v9  ;;  %191 = vmatprep.mubr.f32.mxu1 %v16_v10  ;;  %v218_v22 = vpack.c.bf16 %v31_v21, %v30_v20  ;;  %v222_v25 = vpack.c.bf16 %v33_v24, %v32_v23  ;;  %v15_v26 = vld [vmem:[%s338_s0 + $0x8] sm:$0xff]  ;;  %v17_v27 = vld [vmem:[%s338_s0 + $0x18] sm:$0xff]  ;;  %v135_v28 = vld [vmem:[%s339_s2] ss:$0 sm:$0xff] }
   0x9   :  { %201 = vmatpush3.bf16.msra.mxu0 %v198_v5  ;;  %235 = vmatpush3.bf16.msra.mxu1 %v198_v5 }
   0xa   :  { %203 = vmatprep.subr.bf16.mxu0 %v202_v8  ;;  %228 = vmatprep.subr.bf16.mxu1 %v202_v8 }
   0xd   :  { %205 = vmatpush3.bf16.msra.mxu0 %v202_v8  ;;  %236 = vmatpush3.bf16.msra.mxu1 %v202_v8 }
   0xe   :  { %207 = vmatprep.subr.bf16.mxu0 %v206_v13  ;;  %229 = vmatprep.subr.bf16.mxu1 %v206_v13 }
  0x11   :  { %209 = vmatpush3.bf16.msra.mxu0 %v206_v13  ;;  %237 = vmatpush3.bf16.msra.mxu1 %v206_v13 }
  0x12   :  { %211 = vmatprep.subr.bf16.mxu0 %v210_v16  ;;  %230 = vmatprep.subr.bf16.mxu1 %v210_v16 }
  0x15   :  { %213 = vmatpush3.bf16.msra.mxu0 %v210_v16  ;;  %238 = vmatpush3.bf16.msra.mxu1 %v210_v16 }
  0x16   :  { %215 = vmatprep.subr.bf16.mxu0 %v214_v19  ;;  %231 = vmatprep.subr.bf16.mxu1 %v214_v19 }
  0x19   :  { %217 = vmatpush3.bf16.msra.mxu0 %v214_v19  ;;  %239 = vmatpush3.bf16.msra.mxu1 %v214_v19 }
  0x1a   :  { %219 = vmatprep.subr.bf16.mxu0 %v218_v22  ;;  %232 = vmatprep.subr.bf16.mxu1 %v218_v22 }
  0x1d   :  { %221 = vmatpush3.bf16.msra.mxu0 %v218_v22  ;;  %240 = vmatpush3.bf16.msra.mxu1 %v218_v22 }
  0x1e   :  { %223 = vmatprep.subr.bf16.mxu0 %v222_v25  ;;  %233 = vmatprep.subr.bf16.mxu1 %v222_v25 }
  0x21   :  { %225 = vmatpush3.bf16.msra.mxu0 %v222_v25  ;;  %241 = vmatpush3.bf16.msra.mxu1 %v222_v25 }
  0x24   :  { %189 = vmatmul.mubr.f32.vlgmr.msra.gmra.mrb[0].mxu0 %v15_v26  ;;  %192 = vmatmul.mubr.f32.vlgmr.msra.gmra.mrb[0].mxu1 %v17_v27 }
  0xf7   :  { %v190_v29 = vpop.f32.mrb[0].mxu0  ;;  %v193_v30 = vpop.f32.mrb[0].mxu1 }
  0xf8   :  { %v113_v31 = vadd.f32 %v190_v29, %v135_v28  ;;  %v123_v32 = vadd.f32 %v193_v30, %v135_v28  ;;  %v107_v33 = vpop.f32.mrb[1].mxu0  ;;  %v117_v34 = vpop.f32.mrb[1].mxu1 }
  0xf9   :  { %v108_v35 = vadd.f32 %v135_v28, %v107_v33  ;;  %v118_v36 = vadd.f32 %v135_v28, %v117_v34 }
  0xfa   :  { %128 = vst.msk [vmem:[%s340_s3 + $0x8] sm:$0xff] %vm126_vm0, %v113_v31  ;;  %130 = vst.msk [vmem:[%s340_s3 + $0x18] sm:$0xff] %vm126_vm0, %v123_v32 }
  0xfb   :  { %127 = vst.msk [vmem:[%s340_s3] sm:$0xff] %vm126_vm0, %v108_v35  ;;  %129 = vst.msk [vmem:[%s340_s3 + $0x10] sm:$0xff] %vm126_vm0, %v118_v36 }

// kernel: _lambda_.143
= control target key start
LH: loop header
LB: loop body
LE: loop exit
PB: predicated region body
PF: predicated region fallthrough
CT: control target
= control target key end

     0   :  { %vm24_vm0 = vcmask 261120   ;;  %vm208_vm1 = vcmask 64512   ;;  %s353_s0 = inlined_call_operand.vmem [shape: f32[32,32], index: 0, kind: input, shape index: {}]   ;;  %s354_s3 = inlined_call_operand.vmem [shape: f32[32,8], index: 3, kind: input, shape index: {}]   ;;  %s355_s1 = inlined_call_operand.vmem [shape: f32[1,32], index: 1, kind: input, shape index: {}]   ;;  %s356_s2 = inlined_call_operand.vmem [shape: f32[1,32], index: 2, kind: input, shape index: {}]   ;;  %s357_s4 = inlined_call_operand.vmem [shape: f32[1,8], index: 4, kind: input, shape index: {}]   ;;  %s358_s5 = inlined_call_operand.vmem [shape: f32[32,8], index: 5, kind: output, shape index: {}]  }
   0x1   :  { %v20_v0 = vld [vmem:[%s353_s0] sm:$0xff]  ;;  %v21_v1 = vld [vmem:[%s353_s0 + $0x8] sm:$0xff]  ;;  %v22_v2 = vld [vmem:[%s353_s0 + $0x10] sm:$0xff] }
   0x2   :  { %v25_v3 = vsel %vm24_vm0, %v20_v0, 0.0  ;;  %v28_v4 = vsel %vm24_vm0, %v21_v1, 0.0  ;;  %v23_v5 = vld [vmem:[%s353_s0 + $0x18] sm:$0xff]  ;;  %v31_v6 = vsel %vm24_vm0, %v22_v2, 0.0  ;;  %v100_v28 = vld [vmem:[%s354_s3] sm:$0xff]  ;;  %v101_v29 = vld [vmem:[%s354_s3 + $0x8] sm:$0xff] }
   0x3   :  { %26 = vadd.xlane.f32.xlu0 %v25_v3  ;;  %29 = vadd.xlane.f32.xlu1 %v28_v4  ;;  %v34_v7 = vsel %vm24_vm0, %v23_v5, 0.0  ;;  %v102_v30 = vld [vmem:[%s354_s3 + $0x10] sm:$0xff]  ;;  %v246_v31 = vpack.c.bf16 %v101_v29, %v100_v28  ;;  %v103_v32 = vld [vmem:[%s354_s3 + $0x18] sm:$0xff]  ;;  %v217_v47 = vld [vmem:[%s355_s1] ss:$0 sm:$0xff] }
   0x4   :  { %v250_v33 = vpack.c.bf16 %v103_v32, %v102_v30  ;;  %v218_v49 = vld [vmem:[%s356_s2] ss:$0 sm:$0xff] }
   0x5   :  { %247 = vmatprep.subr.bf16.mxu0 %v246_v31  ;;  %254 = vmatprep.subr.bf16.mxu1 %v246_v31 }
   0x6   :  { %249 = vmatpush3.bf16.msra.mxu0 %v246_v31  ;;  %256 = vmatpush3.bf16.msra.mxu1 %v246_v31 }
   0x7   :  { %32 = vadd.xlane.f32.xlu0 %v31_v6  ;;  %35 = vadd.xlane.f32.xlu1 %v34_v7 }
   0x8   :  { %251 = vmatprep.subr.bf16.mxu0 %v250_v33  ;;  %255 = vmatprep.subr.bf16.mxu1 %v250_v33 }
   0xa   :  { %253 = vmatpush3.bf16.msra.mxu0 %v250_v33  ;;  %257 = vmatpush3.bf16.msra.mxu1 %v250_v33 }
  0x90   :  { %v27_v8 = vpop.xlane.xlu0 %26  ;;  %v30_v9 = vpop.xlane.xlu1 %29 }
  0x91   :  { %v38_v10 = vmul.f32 0.03125, %v27_v8  ;;  %v39_v11 = vmul.f32 0.03125, %v30_v9 }
  0x93   :  { %v42_v12 = vsub.f32 %v20_v0, %v38_v10  ;;  %v43_v13 = vsub.f32 %v21_v1, %v39_v11  ;;  %v219_v0 = vld [vmem:[%s357_s4] ss:$0 sm:$0xff] }
  0x94   :  { %v33_v14 = vpop.xlane.xlu0 %32  ;;  %v36_v15 = vpop.xlane.xlu1 %35 }
  0x95   :  { %v40_v16 = vmul.f32 0.03125, %v33_v14  ;;  %v41_v17 = vmul.f32 0.03125, %v36_v15  ;;  %v46_v18 = vmul.f32 %v42_v12, %v42_v12  ;;  %v47_v19 = vmul.f32 %v43_v13, %v43_v13 }
  0x97   :  { %v44_v20 = vsub.f32 %v22_v2, %v40_v16  ;;  %v45_v21 = vsub.f32 %v23_v5, %v41_v17  ;;  %v50_v22 = vsel %vm24_vm0, %v46_v18, 0.0  ;;  %v53_v23 = vsel %vm24_vm0, %v47_v19, 0.0 }
  0x98   :  { %51 = vadd.xlane.f32.xlu0 %v50_v22 }
  0x99   :  { %v48_v24 = vmul.f32 %v44_v20, %v44_v20  ;;  %v49_v25 = vmul.f32 %v45_v21, %v45_v21 }
  0x9b   :  { %v56_v26 = vsel %vm24_vm0, %v48_v24, 0.0  ;;  %v59_v27 = vsel %vm24_vm0, %v49_v25, 0.0 }
  0x9c   :  { %54 = vadd.xlane.f32.xlu0 %v53_v23  ;;  %57 = vadd.xlane.f32.xlu1 %v56_v26 }
  0xa0   :  { %60 = vadd.xlane.f32.xlu1 %v59_v27 }
 0x125   :  { %v52_v34 = vpop.xlane.xlu0 %51 }
 0x126   :  { %v62_v35 = vmul.f32 0.03125, %v52_v34 }
 0x128   :  { %v66_v36 = vadd.f32 1e-05, %v62_v35 }
 0x129   :  { %v58_v37 = vpop.xlane.xlu1 %57  ;;  %v55_v38 = vpop.xlane.xlu0 %54 }
 0x12a   :  { %258 = vrsqrt.f32 %v66_v36  ;;  %v64_v39 = vmul.f32 0.03125, %v58_v37  ;;  %v63_v40 = vmul.f32 0.03125, %v55_v38 }
 0x12c   :  { %v68_v41 = vadd.f32 1e-05, %v64_v39  ;;  %v67_v42 = vadd.f32 1e-05, %v63_v40 }
 0x12d   :  { %v61_v43 = vpop.xlane.xlu1 %60 }
 0x12e   :  { %260 = vrsqrt.f32 %v68_v41  ;;  %v65_v44 = vmul.f32 0.03125, %v61_v43 }
 0x12f   :  { %262 = vrsqrt.f32 %v67_v42 }
 0x130   :  { %v69_v45 = vadd.f32 1e-05, %v65_v44 }
 0x132   :  { %264 = vrsqrt.f32 %v69_v45 }
 0x134   :  { %v259_v46 = vpop.eup %258 }
 0x135   :  { %v74_v48 = vmul.f32 %v259_v46, %v42_v12 }
 0x137   :  { %v85_v50 = vmul.f32 %v217_v47, %v74_v48 }
 0x138   :  { %v261_v51 = vpop.eup %260 }
 0x139   :  { %v263_v52 = vpop.eup %262  ;;  %v96_v53 = vadd.f32 %v218_v49, %v85_v50  ;;  %v76_v54 = vmul.f32 %v261_v51, %v44_v20 }
 0x13a   :  { %v75_v55 = vmul.f32 %v263_v52, %v43_v13 }
 0x13b   :  { %240 = vmatprep.mubr.msk.f32.mxu0 %vm24_vm0, %v96_v53  ;;  %v87_v56 = vmul.f32 %v217_v47, %v76_v54 }
 0x13c   :  { %v265_v57 = vpop.eup %264  ;;  %v86_v58 = vmul.f32 %v217_v47, %v75_v55 }
 0x13d   :  { %v98_v59 = vadd.f32 %v218_v49, %v87_v56  ;;  %v77_v60 = vmul.f32 %v265_v57, %v45_v21 }
 0x13e   :  { %v97_v61 = vadd.f32 %v218_v49, %v86_v58 }
 0x13f   :  { %243 = vmatprep.mubr.msk.f32.mxu1 %vm24_vm0, %v98_v59  ;;  %v88_v62 = vmul.f32 %v217_v47, %v77_v60 }
 0x140   :  { %241 = vmatmul.mubr.msk.f32.vlgmr.msra.gmra.mrb[0].mxu0 %vm24_vm0, %v97_v61 }
 0x141   :  { %v99_v63 = vadd.f32 %v218_v49, %v88_v62 }
 0x143   :  { %244 = vmatmul.mubr.msk.f32.vlgmr.msra.gmra.mrb[0].mxu1 %vm24_vm0, %v99_v63 }
 0x213   :  { %v242_v1 = vpop.f32.mrb[0].mxu0 }
 0x214   :  { %v195_v2 = vadd.f32 %v242_v1, %v219_v0  ;;  %v189_v3 = vpop.f32.mrb[1].mxu0 }
 0x215   :  { %v190_v4 = vadd.f32 %v219_v0, %v189_v3 }
 0x216   :  { %210 = vst.msk [vmem:[%s358_s5 + $0x8] sm:$0xff] %vm208_vm1, %v195_v2  ;;  %v245_v5 = vpop.f32.mrb[0].mxu1 }
 0x217   :  { %209 = vst.msk [vmem:[%s358_s5] sm:$0xff] %vm208_vm1, %v190_v4  ;;  %v205_v6 = vadd.f32 %v245_v5, %v219_v0  ;;  %v199_v7 = vpop.f32.mrb[1].mxu1 }
 0x218   :  { %v200_v8 = vadd.f32 %v219_v0, %v199_v7 }
 0x219   :  { %212 = vst.msk [vmem:[%s358_s5 + $0x18] sm:$0xff] %vm208_vm1, %v205_v6 }
 0x21a   :  { %211 = vst.msk [vmem:[%s358_s5 + $0x10] sm:$0xff] %vm208_vm1, %v200_v8 }

// kernel: _lambda_.155
= control target key start
LH: loop header
LB: loop body
LE: loop exit
PB: predicated region body
PF: predicated region fallthrough
CT: control target
= control target key end

     0   :  { %vm21_vm0 = vcmask 261120   ;;  %v173_v7 = vmov 0.0|0.0   ;;  %vm174_vm1 = vmmov 0   ;;  %v175_v11 = vmov 0.0   ;;  %s236_s0 = inlined_call_operand.vmem [shape: f32[8,32], index: 0, kind: input, shape index: {}]   ;;  %s237_s3 = inlined_call_operand.vmem [shape: f32[32,16], index: 3, kind: input, shape index: {}]   ;;  %s238_s1 = inlined_call_operand.vmem [shape: f32[1,32], index: 1, kind: input, shape index: {}]   ;;  %s239_s2 = inlined_call_operand.vmem [shape: f32[1,32], index: 2, kind: input, shape index: {}]   ;;  %s240_s4 = inlined_call_operand.vmem [shape: f32[1,16], index: 4, kind: input, shape index: {}]   ;;  %s241_s5 = inlined_call_operand.vmem [shape: f32[8,16], index: 5, kind: output, shape index: {}]  }
   0x1   :  { %v20_v0 = vld [vmem:[%s236_s0] sm:$0xff]  ;;  %162 = vmatprep.subr.bf16.mxu0 %v173_v7  ;;  %v53_v9 = vld [vmem:[%s237_s3 + $0x8] sm:$0xff]  ;;  %v54_v10 = vld [vmem:[%s237_s3 + $0x10] sm:$0xff]  ;;  %159 = vmatprep.mubr.msk.f32.mxu0 %vm174_vm1, %v175_v11  ;;  %vm136_vm2 = vcmask 130048  }
   0x2   :  { %v22_v1 = vsel %vm21_vm0, %v20_v0, 0.0  ;;  %v52_v8 = vld [vmem:[%s237_s3] sm:$0xff]  ;;  %v55_v13 = vld [vmem:[%s237_s3 + $0x18] sm:$0xff] }
   0x3   :  { %23 = vadd.xlane.f32.xlu0 %v22_v1  ;;  %v163_v12 = vpack.c.bf16 %v53_v9, %v52_v8  ;;  %v166_v14 = vpack.c.bf16 %v55_v13, %v54_v10  ;;  %v142_v19 = vld [vmem:[%s238_s1] ss:$0 sm:$0xff] }
   0x4   :  { %v143_v21 = vld [vmem:[%s239_s2] ss:$0 sm:$0xff] }
   0x5   :  { %164 = vmatpush3.bf16.msra.mxu0 %v163_v12  ;;  %v144_v24 = vld [vmem:[%s240_s4] ss:$0 sm:$0xff] }
   0x6   :  { %165 = vmatprep.subr.bf16.mxu0 %v173_v7 }
   0x9   :  { %167 = vmatpush3.bf16.msra.mxu0 %v166_v14 }
  0x90   :  { %v24_v2 = vpop.xlane.xlu0 %23 }
  0x91   :  { %v26_v3 = vmul.f32 0.03125, %v24_v2 }
  0x93   :  { %v27_v4 = vsub.f32 %v20_v0, %v26_v3 }
  0x95   :  { %v28_v5 = vmul.f32 %v27_v4, %v27_v4 }
  0x97   :  { %v29_v6 = vsel %vm21_vm0, %v28_v5, 0.0 }
  0x98   :  { %30 = vadd.xlane.f32.xlu0 %v29_v6 }
 0x125   :  { %v31_v15 = vpop.xlane.xlu0 %30 }
 0x126   :  { %v32_v16 = vmul.f32 0.03125, %v31_v15 }
 0x128   :  { %v33_v17 = vadd.f32 1e-05, %v32_v16 }
 0x12a   :  { %171 = vrsqrt.f32 %v33_v17 }
 0x134   :  { %v172_v18 = vpop.eup %171 }
 0x135   :  { %v35_v20 = vmul.f32 %v172_v18, %v27_v4 }
 0x137   :  { %v43_v22 = vmul.f32 %v142_v19, %v35_v20 }
 0x139   :  { %v51_v23 = vadd.f32 %v143_v21, %v43_v22 }
 0x13b   :  { %160 = vmatmul.mubr.msk.f32.vlgmr.msra.gmra.mrb[0].mxu0 %vm21_vm0, %v51_v23 }
 0x20e   :  { %v132_v25 = vpop.f32.mrb[0].mxu0 }
 0x20f   :  { %v133_v26 = vadd.f32 %v144_v24, %v132_v25  ;;  %v161_v27 = vpop.f32.mrb[1].mxu0 }
 0x211   :  { %137 = vst.msk [vmem:[%s241_s5] sm:$0xff] %vm136_vm2, %v133_v26 }

// kernel: _lambda_.180
= control target key start
LH: loop header
LB: loop body
LE: loop exit
PB: predicated region body
PF: predicated region fallthrough
CT: control target
= control target key end

     0   :  { %vm21_vm0 = vcmask 64512   ;;  %v153_v7 = vmov 0.0   ;;  %vm154_vm1 = vmmov 0   ;;  %s206_s0 = inlined_call_operand.vmem [shape: f32[8,8], index: 0, kind: input, shape index: {}]   ;;  %s207_s3 = inlined_call_operand.vmem [shape: f32[8,128], index: 3, kind: input, shape index: {}]   ;;  %s208_s1 = inlined_call_operand.vmem [shape: f32[1,8], index: 1, kind: input, shape index: {}]   ;;  %s209_s2 = inlined_call_operand.vmem [shape: f32[1,8], index: 2, kind: input, shape index: {}]   ;;  %s210_s4 = inlined_call_operand.vmem [shape: f32[1,128], index: 4, kind: input, shape index: {}]   ;;  %s211_s5 = inlined_call_operand.vmem [shape: f32[8,128], index: 5, kind: output, shape index: {}]  }
   0x1   :  { %v20_v0 = vld [vmem:[%s206_s0] sm:$0xff]  ;;  %144 = vmatprep.subr.mxu0 %v153_v7  ;;  %146 = vmatprep.mubr.msk.f32.mxu0 %vm154_vm1, %v153_v7 }
   0x2   :  { %v22_v1 = vsel %vm21_vm0, %v20_v0, 0.0  ;;  %v52_v8 = vld [vmem:[%s207_s3] sm:$0xff] }
   0x3   :  { %23 = vadd.xlane.f32.xlu0 %v22_v1  ;;  %145 = vmatpush3.msra.mxu0 %v52_v8  ;;  %v138_v13 = vld [vmem:[%s208_s1] ss:$0 sm:$0xff] }
   0x4   :  { %v139_v15 = vld [vmem:[%s209_s2] ss:$0 sm:$0xff] }
   0x5   :  { %v140_v18 = vld [vmem:[%s210_s4] ss:$0 sm:$0xff] }
  0x90   :  { %v24_v2 = vpop.xlane.xlu0 %23 }
  0x91   :  { %v26_v3 = vmul.f32 0.125, %v24_v2 }
  0x93   :  { %v27_v4 = vsub.f32 %v20_v0, %v26_v3 }
  0x95   :  { %v28_v5 = vmul.f32 %v27_v4, %v27_v4 }
  0x97   :  { %v29_v6 = vsel %vm21_vm0, %v28_v5, 0.0 }
  0x98   :  { %30 = vadd.xlane.f32.xlu0 %v29_v6 }
 0x125   :  { %v31_v9 = vpop.xlane.xlu0 %30 }
 0x126   :  { %v32_v10 = vmul.f32 0.125, %v31_v9 }
 0x128   :  { %v33_v11 = vadd.f32 1e-05, %v32_v10 }
 0x12a   :  { %151 = vrsqrt.f32 %v33_v11 }
 0x134   :  { %v152_v12 = vpop.eup %151 }
 0x135   :  { %v35_v14 = vmul.f32 %v152_v12, %v27_v4 }
 0x137   :  { %v43_v16 = vmul.f32 %v138_v13, %v35_v14 }
 0x139   :  { %v51_v17 = vadd.f32 %v139_v15, %v43_v16 }
 0x13b   :  { %147 = vmatmul.mubr.msk.f32.vlgmr.msra.gmra.mrb[0].mxu0 %vm21_vm0, %v51_v17 }
 0x20e   :  { %v129_v19 = vpop.f32.mrb[0].mxu0 }
 0x20f   :  { %v130_v20 = vadd.f32 %v140_v18, %v129_v19  ;;  %v148_v21 = vpop.f32.mrb[1].mxu0 }
 0x211   :  { %133 = vst [vmem:[%s211_s5] sm:$0xff] %v130_v20 }

// kernel: _lambda_.179
= control target key start
LH: loop header
LB: loop body
LE: loop exit
PB: predicated region body
PF: predicated region fallthrough
CT: control target
= control target key end

     0   :  { %vm21_vm0 = vcmask 261120   ;;  %v172_v7 = vmov 0.0|0.0   ;;  %vm173_vm1 = vmmov 0   ;;  %v174_v11 = vmov 0.0   ;;  %s235_s0 = inlined_call_operand.vmem [shape: f32[8,32], index: 0, kind: input, shape index: {}]   ;;  %s236_s3 = inlined_call_operand.vmem [shape: f32[32,128], index: 3, kind: input, shape index: {}]   ;;  %s237_s1 = inlined_call_operand.vmem [shape: f32[1,32], index: 1, kind: input, shape index: {}]   ;;  %s238_s2 = inlined_call_operand.vmem [shape: f32[1,32], index: 2, kind: input, shape index: {}]   ;;  %s239_s4 = inlined_call_operand.vmem [shape: f32[1,128], index: 4, kind: input, shape index: {}]   ;;  %s240_s5 = inlined_call_operand.vmem [shape: f32[8,128], index: 5, kind: output, shape index: {}]  }
   0x1   :  { %v20_v0 = vld [vmem:[%s235_s0] sm:$0xff]  ;;  %161 = vmatprep.subr.bf16.mxu0 %v172_v7  ;;  %v53_v9 = vld [vmem:[%s236_s3 + $0x8] sm:$0xff]  ;;  %v54_v10 = vld [vmem:[%s236_s3 + $0x10] sm:$0xff]  ;;  %158 = vmatprep.mubr.msk.f32.mxu0 %vm173_vm1, %v174_v11 }
   0x2   :  { %v22_v1 = vsel %vm21_vm0, %v20_v0, 0.0  ;;  %v52_v8 = vld [vmem:[%s236_s3] sm:$0xff]  ;;  %v55_v13 = vld [vmem:[%s236_s3 + $0x18] sm:$0xff] }
   0x3   :  { %23 = vadd.xlane.f32.xlu0 %v22_v1  ;;  %v162_v12 = vpack.c.bf16 %v53_v9, %v52_v8  ;;  %v165_v14 = vpack.c.bf16 %v55_v13, %v54_v10  ;;  %v141_v19 = vld [vmem:[%s237_s1] ss:$0 sm:$0xff] }
   0x4   :  { %v142_v21 = vld [vmem:[%s238_s2] ss:$0 sm:$0xff] }
   0x5   :  { %163 = vmatpush3.bf16.msra.mxu0 %v162_v12  ;;  %v143_v24 = vld [vmem:[%s239_s4] ss:$0 sm:$0xff] }
   0x6   :  { %164 = vmatprep.subr.bf16.mxu0 %v172_v7 }
   0x9   :  { %166 = vmatpush3.bf16.msra.mxu0 %v165_v14 }
  0x90   :  { %v24_v2 = vpop.xlane.xlu0 %23 }
  0x91   :  { %v26_v3 = vmul.f32 0.03125, %v24_v2 }
  0x93   :  { %v27_v4 = vsub.f32 %v20_v0, %v26_v3 }
  0x95   :  { %v28_v5 = vmul.f32 %v27_v4, %v27_v4 }
  0x97   :  { %v29_v6 = vsel %vm21_vm0, %v28_v5, 0.0 }
  0x98   :  { %30 = vadd.xlane.f32.xlu0 %v29_v6 }
 0x125   :  { %v31_v15 = vpop.xlane.xlu0 %30 }
 0x126   :  { %v32_v16 = vmul.f32 0.03125, %v31_v15 }
 0x128   :  { %v33_v17 = vadd.f32 1e-05, %v32_v16 }
 0x12a   :  { %170 = vrsqrt.f32 %v33_v17 }
 0x134   :  { %v171_v18 = vpop.eup %170 }
 0x135   :  { %v35_v20 = vmul.f32 %v171_v18, %v27_v4 }
 0x137   :  { %v43_v22 = vmul.f32 %v141_v19, %v35_v20 }
 0x139   :  { %v51_v23 = vadd.f32 %v142_v21, %v43_v22 }
 0x13b   :  { %159 = vmatmul.mubr.msk.f32.vlgmr.msra.gmra.mrb[0].mxu0 %vm21_vm0, %v51_v23 }
 0x20e   :  { %v132_v25 = vpop.f32.mrb[0].mxu0 }
 0x20f   :  { %v133_v26 = vadd.f32 %v143_v24, %v132_v25  ;;  %v160_v27 = vpop.f32.mrb[1].mxu0 }
 0x211   :  { %136 = vst [vmem:[%s240_s5] sm:$0xff] %v133_v26 }

// kernel: _lambda_.181
= control target key start
LH: loop header
LB: loop body
LE: loop exit
PB: predicated region body
PF: predicated region fallthrough
CT: control target
= control target key end

     0   :  { %v193_v0 = vmov 0.0|0.0   ;;  %vm194_vm0 = vmmov 0   ;;  %v195_v4 = vmov 0.0   ;;  %s273_s1 = inlined_call_operand.vmem [shape: f32[128,128], index: 1, kind: input, shape index: {}]   ;;  %s274_s0 = inlined_call_operand.vmem [shape: f32[8,128], index: 0, kind: input, shape index: {}]   ;;  %s275_s2 = inlined_call_operand.vmem [shape: f32[1,128], index: 2, kind: input, shape index: {}]   ;;  %s276_s3 = inlined_call_operand.vmem [shape: f32[8,128], index: 3, kind: output, shape index: {}]  }
   0x1   :  { %166 = vmatprep.subr.bf16.mxu0 %v193_v0  ;;  %v15_v1 = vld [vmem:[%s273_s1] sm:$0xff]  ;;  %v16_v2 = vld [vmem:[%s273_s1 + $0x8] sm:$0xff]  ;;  %v17_v3 = vld [vmem:[%s273_s1 + $0x10] sm:$0xff]  ;;  %163 = vmatprep.mubr.msk.f32.mxu0 %vm194_vm0, %v195_v4 }
   0x2   :  { %v167_v5 = vpack.c.bf16 %v16_v2, %v15_v1  ;;  %v18_v6 = vld [vmem:[%s273_s1 + $0x18] sm:$0xff]  ;;  %v19_v8 = vld [vmem:[%s273_s1 + $0x20] sm:$0xff]  ;;  %v20_v9 = vld [vmem:[%s273_s1 + $0x28] sm:$0xff] }
   0x3   :  { %v170_v7 = vpack.c.bf16 %v18_v6, %v17_v3  ;;  %v173_v10 = vpack.c.bf16 %v20_v9, %v19_v8  ;;  %v21_v11 = vld [vmem:[%s273_s1 + $0x30] sm:$0xff]  ;;  %v22_v12 = vld [vmem:[%s273_s1 + $0x38] sm:$0xff]  ;;  %v23_v14 = vld [vmem:[%s273_s1 + $0x40] sm:$0xff] }
   0x4   :  { %168 = vmatpush3.bf16.msra.mxu0 %v167_v5  ;;  %v176_v13 = vpack.c.bf16 %v22_v12, %v21_v11  ;;  %v24_v15 = vld [vmem:[%s273_s1 + $0x48] sm:$0xff]  ;;  %v25_v17 = vld [vmem:[%s273_s1 + $0x50] sm:$0xff]  ;;  %v26_v18 = vld [vmem:[%s273_s1 + $0x58] sm:$0xff] }
   0x5   :  { %169 = vmatprep.subr.bf16.mxu0 %v193_v0  ;;  %v179_v16 = vpack.c.bf16 %v24_v15, %v23_v14  ;;  %v182_v19 = vpack.c.bf16 %v26_v18, %v25_v17  ;;  %v27_v20 = vld [vmem:[%s273_s1 + $0x60] sm:$0xff]  ;;  %v28_v21 = vld [vmem:[%s273_s1 + $0x68] sm:$0xff]  ;;  %v29_v23 = vld [vmem:[%s273_s1 + $0x70] sm:$0xff] }
   0x6   :  { %v185_v22 = vpack.c.bf16 %v28_v21, %v27_v20  ;;  %v30_v24 = vld [vmem:[%s273_s1 + $0x78] sm:$0xff]  ;;  %v14_v26 = vld [vmem:[%s274_s0] sm:$0xff] }
   0x7   :  { %v188_v25 = vpack.c.bf16 %v30_v24, %v29_v23  ;;  %v113_v27 = vld [vmem:[%s275_s2] ss:$0 sm:$0xff] }
   0x8   :  { %171 = vmatpush3.bf16.msra.mxu0 %v170_v7 }
   0x9   :  { %172 = vmatprep.subr.bf16.mxu0 %v193_v0 }
   0xc   :  { %174 = vmatpush3.bf16.msra.mxu0 %v173_v10 }
   0xd   :  { %175 = vmatprep.subr.bf16.mxu0 %v193_v0 }
  0x10   :  { %177 = vmatpush3.bf16.msra.mxu0 %v176_v13 }
  0x11   :  { %178 = vmatprep.subr.bf16.mxu0 %v193_v0 }
  0x14   :  { %180 = vmatpush3.bf16.msra.mxu0 %v179_v16 }
  0x15   :  { %181 = vmatprep.subr.bf16.mxu0 %v193_v0 }
  0x18   :  { %183 = vmatpush3.bf16.msra.mxu0 %v182_v19 }
  0x19   :  { %184 = vmatprep.subr.bf16.mxu0 %v193_v0 }
  0x1c   :  { %186 = vmatpush3.bf16.msra.mxu0 %v185_v22 }
  0x1d   :  { %187 = vmatprep.subr.bf16.mxu0 %v193_v0 }
  0x20   :  { %189 = vmatpush3.bf16.msra.mxu0 %v188_v25 }
  0x23   :  { %164 = vmatmul.mubr.f32.vlgmr.msra.gmra.mrb[0].mxu0 %v14_v26 }
  0xf6   :  { %v104_v28 = vpop.f32.mrb[0].mxu0 }
  0xf7   :  { %v105_v29 = vadd.f32 %v113_v27, %v104_v28  ;;  %v165_v30 = vpop.f32.mrb[1].mxu0 }
  0xf9   :  { %108 = vst [vmem:[%s276_s3] sm:$0xff] %v105_v29 }

// kernel: _lambda_.185
= control target key start
LH: loop header
LB: loop body
LE: loop exit
PB: predicated region body
PF: predicated region fallthrough
CT: control target
= control target key end

     0   :  { %v194_v0 = vmov 0.0|0.0   ;;  %vm195_vm0 = vmmov 0   ;;  %v196_v4 = vmov 0.0   ;;  %vm108_vm1 = vcmask 162816   ;;  %s274_s1 = inlined_call_operand.vmem [shape: f32[128,20], index: 1, kind: input, shape index: {}]   ;;  %s275_s0 = inlined_call_operand.vmem [shape: f32[8,128], index: 0, kind: input, shape index: {}]   ;;  %s276_s2 = inlined_call_operand.vmem [shape: f32[1,20], index: 2, kind: input, shape index: {}]   ;;  %s277_s3 = inlined_call_operand.vmem [shape: f32[8,20], index: 3, kind: output, shape index: {}]  }
   0x1   :  { %167 = vmatprep.subr.bf16.mxu0 %v194_v0  ;;  %v15_v1 = vld [vmem:[%s274_s1] sm:$0xff]  ;;  %v16_v2 = vld [vmem:[%s274_s1 + $0x8] sm:$0xff]  ;;  %v17_v3 = vld [vmem:[%s274_s1 + $0x10] sm:$0xff]  ;;  %164 = vmatprep.mubr.msk.f32.mxu0 %vm195_vm0, %v196_v4 }
   0x2   :  { %v168_v5 = vpack.c.bf16 %v16_v2, %v15_v1  ;;  %v18_v6 = vld [vmem:[%s274_s1 + $0x18] sm:$0xff]  ;;  %v19_v8 = vld [vmem:[%s274_s1 + $0x20] sm:$0xff]  ;;  %v20_v9 = vld [vmem:[%s274_s1 + $0x28] sm:$0xff] }
   0x3   :  { %v171_v7 = vpack.c.bf16 %v18_v6, %v17_v3  ;;  %v174_v10 = vpack.c.bf16 %v20_v9, %v19_v8  ;;  %v21_v11 = vld [vmem:[%s274_s1 + $0x30] sm:$0xff]  ;;  %v22_v12 = vld [vmem:[%s274_s1 + $0x38] sm:$0xff]  ;;  %v23_v14 = vld [vmem:[%s274_s1 + $0x40] sm:$0xff] }
   0x4   :  { %169 = vmatpush3.bf16.msra.mxu0 %v168_v5  ;;  %v177_v13 = vpack.c.bf16 %v22_v12, %v21_v11  ;;  %v24_v15 = vld [vmem:[%s274_s1 + $0x48] sm:$0xff]  ;;  %v25_v17 = vld [vmem:[%s274_s1 + $0x50] sm:$0xff]  ;;  %v26_v18 = vld [vmem:[%s274_s1 + $0x58] sm:$0xff] }
   0x5   :  { %170 = vmatprep.subr.bf16.mxu0 %v194_v0  ;;  %v180_v16 = vpack.c.bf16 %v24_v15, %v23_v14  ;;  %v183_v19 = vpack.c.bf16 %v26_v18, %v25_v17  ;;  %v27_v20 = vld [vmem:[%s274_s1 + $0x60] sm:$0xff]  ;;  %v28_v21 = vld [vmem:[%s274_s1 + $0x68] sm:$0xff]  ;;  %v29_v23 = vld [vmem:[%s274_s1 + $0x70] sm:$0xff] }
   0x6   :  { %v186_v22 = vpack.c.bf16 %v28_v21, %v27_v20  ;;  %v30_v24 = vld [vmem:[%s274_s1 + $0x78] sm:$0xff]  ;;  %v14_v26 = vld [vmem:[%s275_s0] sm:$0xff] }
   0x7   :  { %v189_v25 = vpack.c.bf16 %v30_v24, %v29_v23  ;;  %v114_v27 = vld [vmem:[%s276_s2] ss:$0 sm:$0xff] }
   0x8   :  { %172 = vmatpush3.bf16.msra.mxu0 %v171_v7 }
   0x9   :  { %173 = vmatprep.subr.bf16.mxu0 %v194_v0 }
   0xc   :  { %175 = vmatpush3.bf16.msra.mxu0 %v174_v10 }
   0xd   :  { %176 = vmatprep.subr.bf16.mxu0 %v194_v0 }
  0x10   :  { %178 = vmatpush3.bf16.msra.mxu0 %v177_v13 }
  0x11   :  { %179 = vmatprep.subr.bf16.mxu0 %v194_v0 }
  0x14   :  { %181 = vmatpush3.bf16.msra.mxu0 %v180_v16 }
  0x15   :  { %182 = vmatprep.subr.bf16.mxu0 %v194_v0 }
  0x18   :  { %184 = vmatpush3.bf16.msra.mxu0 %v183_v19 }
  0x19   :  { %185 = vmatprep.subr.bf16.mxu0 %v194_v0 }
  0x1c   :  { %187 = vmatpush3.bf16.msra.mxu0 %v186_v22 }
  0x1d   :  { %188 = vmatprep.subr.bf16.mxu0 %v194_v0 }
  0x20   :  { %190 = vmatpush3.bf16.msra.mxu0 %v189_v25 }
  0x23   :  { %165 = vmatmul.mubr.f32.vlgmr.msra.gmra.mrb[0].mxu0 %v14_v26 }
  0xf6   :  { %v104_v28 = vpop.f32.mrb[0].mxu0 }
  0xf7   :  { %v105_v29 = vadd.f32 %v114_v27, %v104_v28  ;;  %v166_v30 = vpop.f32.mrb[1].mxu0 }
  0xf9   :  { %109 = vst.msk [vmem:[%s277_s3] sm:$0xff] %vm108_vm1, %v105_v29 }

// kernel: _lambda_.125
= control target key start
LH: loop header
LB: loop body
LE: loop exit
PB: predicated region body
PF: predicated region fallthrough
CT: control target
= control target key end

     0   :  { %vm21_vm0 = vcmask 130048   ;;  %v161_v7 = vmov 0.0|0.0   ;;  %vm162_vm1 = vmmov 0   ;;  %v163_v10 = vmov 0.0   ;;  %s218_s0 = inlined_call_operand.vmem [shape: f32[8,16], index: 0, kind: input, shape index: {}]   ;;  %s219_s3 = inlined_call_operand.vmem [shape: f32[16,128], index: 3, kind: input, shape index: {}]   ;;  %s220_s1 = inlined_call_operand.vmem [shape: f32[1,16], index: 1, kind: input, shape index: {}]   ;;  %s221_s2 = inlined_call_operand.vmem [shape: f32[1,16], index: 2, kind: input, shape index: {}]   ;;  %s222_s4 = inlined_call_operand.vmem [shape: f32[1,128], index: 4, kind: input, shape index: {}]   ;;  %s223_s5 = inlined_call_operand.vmem [shape: f32[8,128], index: 5, kind: output, shape index: {}]  }
   0x1   :  { %v20_v0 = vld [vmem:[%s218_s0] sm:$0xff]  ;;  %153 = vmatprep.subr.bf16.mxu0 %v161_v7  ;;  %v53_v9 = vld [vmem:[%s219_s3 + $0x8] sm:$0xff]  ;;  %150 = vmatprep.mubr.msk.f32.mxu0 %vm162_vm1, %v163_v10 }
   0x2   :  { %v22_v1 = vsel %vm21_vm0, %v20_v0, 0.0  ;;  %v52_v8 = vld [vmem:[%s219_s3] sm:$0xff] }
   0x3   :  { %23 = vadd.xlane.f32.xlu0 %v22_v1  ;;  %v154_v11 = vpack.c.bf16 %v53_v9, %v52_v8  ;;  %v139_v16 = vld [vmem:[%s220_s1] ss:$0 sm:$0xff] }
   0x4   :  { %v140_v18 = vld [vmem:[%s221_s2] ss:$0 sm:$0xff] }
   0x5   :  { %155 = vmatpush3.bf16.msra.mxu0 %v154_v11  ;;  %v141_v21 = vld [vmem:[%s222_s4] ss:$0 sm:$0xff] }
  0x90   :  { %v24_v2 = vpop.xlane.xlu0 %23 }
  0x91   :  { %v26_v3 = vmul.f32 0.0625, %v24_v2 }
  0x93   :  { %v27_v4 = vsub.f32 %v20_v0, %v26_v3 }
  0x95   :  { %v28_v5 = vmul.f32 %v27_v4, %v27_v4 }
  0x97   :  { %v29_v6 = vsel %vm21_vm0, %v28_v5, 0.0 }
  0x98   :  { %30 = vadd.xlane.f32.xlu0 %v29_v6 }
 0x125   :  { %v31_v12 = vpop.xlane.xlu0 %30 }
 0x126   :  { %v32_v13 = vmul.f32 0.0625, %v31_v12 }
 0x128   :  { %v33_v14 = vadd.f32 1e-05, %v32_v13 }
 0x12a   :  { %159 = vrsqrt.f32 %v33_v14 }
 0x134   :  { %v160_v15 = vpop.eup %159 }
 0x135   :  { %v35_v17 = vmul.f32 %v160_v15, %v27_v4 }
 0x137   :  { %v43_v19 = vmul.f32 %v139_v16, %v35_v17 }
 0x139   :  { %v51_v20 = vadd.f32 %v140_v18, %v43_v19 }
 0x13b   :  { %151 = vmatmul.mubr.msk.f32.vlgmr.msra.gmra.mrb[0].mxu0 %vm21_vm0, %v51_v20 }
 0x20e   :  { %v130_v22 = vpop.f32.mrb[0].mxu0 }
 0x20f   :  { %v131_v23 = vadd.f32 %v141_v21, %v130_v22  ;;  %v152_v24 = vpop.f32.mrb[1].mxu0 }
 0x211   :  { %134 = vst [vmem:[%s223_s5] sm:$0xff] %v131_v23 }

</bundles_post_ra>
